<compile_context>
chip_gen: v6e
topology: v6e:2x2x1
jax: 0.10.0
libtpu: 0.0.40
codegen_flags: <defaults>
</compile_context>

<pallas_src>
import functools

import jax
import jax.numpy as jnp
from jax import lax
from jax.experimental import pallas as pl
from jax.experimental.pallas import tpu as pltpu


def _interleave0(a, b):
    """c[2i, ...] = a[i, ...], c[2i+1, ...] = b[i, ...] (interleave along axis 0)."""
    s = a.shape
    ex = (s[0], 1) + s[1:]
    tg = (s[0], 2) + s[1:]
    fl = (2 * s[0],) + s[1:]
    aa = jnp.broadcast_to(a.reshape(ex), tg).reshape(fl)
    bb = jnp.broadcast_to(b.reshape(ex), tg).reshape(fl)
    sel = lax.broadcasted_iota(jnp.int32, fl, 0) % 2
    return jnp.where(sel == 0, aa, bb)


def _unet_up_kernel(x_ref, skip_ref, w_up_ref, b_up_ref, w_conv_ref, b_conv_ref,
                    o_ref, x0p_ref, cat_ref, col_up_ref, col_cv_ref, *,
                    D, H, W, Cin, Cout):
    """Fused ConvTranspose3d(4,2,1) -> concat(skip) -> Conv3d(3,1,1)+ReLU for one batch elem."""
    C2 = 2 * Cout
    D2, H2, W2 = 2 * D, 2 * H, 2 * W
    HW = H * W
    S2 = H2 * W2
    taps2 = [(rd, rh, rw) for rd in range(2) for rh in range(2) for rw in range(2)]

    # ---- stage the zero-padded deconv input in VMEM (no jnp.pad / HBM copy) ----
    x0p_ref[...] = jnp.zeros((D + 2, H + 2, W + 2, Cin), jnp.float32)
    x0p_ref[1:1 + D, 1:1 + H, 1:1 + W, :] = x_ref[0]

    # ---- stage the padded concat buffer: zero border = conv padding; skip copied
    #      next to the (to-be-written) deconv channels = fused torch.cat ----
    cat_ref[...] = jnp.zeros((D2 + 2, H2 + 2, W2 + 2, C2), jnp.float32)
    cat_ref[1:1 + D2, 1:1 + H2, 1:1 + W2, Cout:C2] = skip_ref[0]

    # hoisted bias broadcasts (kept out of the depth loops)
    b_up = jnp.broadcast_to(b_up_ref[...], (HW, Cout))
    b_cv = jnp.broadcast_to(b_conv_ref[...], (S2, Cout))

    # ---- stage 1: ConvTranspose3d(k=4, s=2, p=1) via parity decomposition ----
    # Output voxel 2j+p sees only 2 input taps per axis -> 8 sub-taps of the 4^3 kernel
    # applied to the original (undilated) input, one im2col + K=8*Cin matmul per parity.
    def up_body(jd, carry):
        for pd in range(2):                        # output depth parity (static)
            slabs_h = []
            for ph in range(2):                    # output height parity
                accs_w = []
                for pw in range(2):                # output width parity
                    for t, (rd, rh, rw) in enumerate(taps2):
                        win = x0p_ref[jd + pd + rd,
                                      ph + rh:ph + rh + H,
                                      pw + rw:pw + rw + W, :]
                        col_up_ref[:, t * Cin:(t + 1) * Cin] = win.reshape(HW, Cin)
                    acc = jnp.dot(col_up_ref[...], w_up_ref[pd, ph, pw],
                                  preferred_element_type=jnp.float32) + b_up
                    accs_w.append(acc)             # (HW, Cout), rows = h*W + w
                # interleave width parity: rows -> h*(2W) + (2w + pw)
                t_ph = _interleave0(accs_w[0], accs_w[1]).reshape(H, W2, Cout)
                slabs_h.append(t_ph)
            # interleave height parity: rows -> (2h + ph)
            slab = _interleave0(slabs_h[0], slabs_h[1])            # (H2, W2, Cout)
            cat_ref[1 + 2 * jd + pd, 1:1 + H2, 1:1 + W2, 0:Cout] = slab
        return carry

    lax.fori_loop(0, D, up_body, 0)

    # ---- stage 2: Conv3d(k=3, s=1, p=1) over the fused concat, + bias + ReLU ----
    def conv_body(od, carry):
        t = 0
        for kd in range(3):
            for kh in range(3):
                for kw in range(3):
                    win = cat_ref[od + kd, kh:kh + H2, kw:kw + W2, :]
                    col_cv_ref[:, t * C2:(t + 1) * C2] = win.reshape(S2, C2)
                    t += 1
        acc = jnp.dot(col_cv_ref[...], w_conv_ref[...],
                      preferred_element_type=jnp.float32) + b_cv
        acc = jnp.maximum(acc, 0.0)
        o_ref[0, od] = acc.reshape(H2, W2, Cout)
        return carry

    lax.fori_loop(0, D2, conv_body, 0)


def unet_up_forward(inputs0_ncdhw, skip_ncdhw, params):
    """unetUp.forward(inputs0, skip) with is_deconv=True, n_concat=2 (fused Pallas kernel)."""
    x0 = jnp.transpose(inputs0_ncdhw, (0, 2, 3, 4, 1)).astype(jnp.float32)   # NDHWC
    skip = jnp.transpose(skip_ncdhw, (0, 2, 3, 4, 1)).astype(jnp.float32)    # NDHWC

    N, D, H, W, Cin = x0.shape
    Cout = params["b_up"].shape[0]
    C2 = 2 * Cout
    D2, H2, W2 = 2 * D, 2 * H, 2 * W

    # --- ConvTranspose3d weight (Cin, Cout, 4,4,4) -> 8 parity sub-kernels, flattened
    #     for im2col.  For output parity p and tap r the kernel index is k = 3 - p - 2r.
    kidx = jnp.array([[3, 1], [2, 0]], dtype=jnp.int32)                      # [parity, tap] -> k
    wt = jnp.transpose(params["w_up"].astype(jnp.float32), (2, 3, 4, 0, 1))  # (kD,kH,kW,Cin,Cout)
    wt = wt[kidx]                      # (pd, rd, kH, kW, Cin, Cout)
    wt = wt[:, :, kidx]                # (pd, rd, ph, rh, kW, Cin, Cout)
    wt = wt[:, :, :, :, kidx]          # (pd, rd, ph, rh, pw, rw, Cin, Cout)
    w_up_par = jnp.transpose(wt, (0, 2, 4, 1, 3, 5, 6, 7)).reshape(2, 2, 2, 8 * Cin, Cout)

    # --- Conv3d weight (Cout, 2*Cout, 3,3,3) -> (27*2*Cout, Cout), matching im2col order ---
    w_conv_r = jnp.transpose(params["w_conv"].astype(jnp.float32),
                             (2, 3, 4, 1, 0)).reshape(27 * C2, Cout)

    b_up2 = params["b_up"].reshape(1, Cout).astype(jnp.float32)
    b_conv2 = params["b_conv"].reshape(1, Cout).astype(jnp.float32)

    kernel = functools.partial(_unet_up_kernel, D=D, H=H, W=W, Cin=Cin, Cout=Cout)

    out_ndhwc = pl.pallas_call(
        kernel,
        out_shape=jax.ShapeDtypeStruct((N, D2, H2, W2, Cout), jnp.float32),
        grid=(N,),
        in_specs=[
            pl.BlockSpec((1, D, H, W, Cin), lambda n: (n, 0, 0, 0, 0)),
            pl.BlockSpec((1, D2, H2, W2, Cout), lambda n: (n, 0, 0, 0, 0)),
            pl.BlockSpec((2, 2, 2, 8 * Cin, Cout), lambda n: (0, 0, 0, 0, 0)),
            pl.BlockSpec((1, Cout), lambda n: (0, 0)),
            pl.BlockSpec((27 * C2, Cout), lambda n: (0, 0)),
            pl.BlockSpec((1, Cout), lambda n: (0, 0)),
        ],
        out_specs=pl.BlockSpec((1, D2, H2, W2, Cout), lambda n: (n, 0, 0, 0, 0)),
        scratch_shapes=[
            pltpu.VMEM((D + 2, H + 2, W + 2, Cin), jnp.float32),        # padded deconv input
            pltpu.VMEM((D2 + 2, H2 + 2, W2 + 2, C2), jnp.float32),      # padded [up | skip] concat
            pltpu.VMEM((H * W, 8 * Cin), jnp.float32),                  # deconv im2col buffer
            pltpu.VMEM((H2 * W2, 27 * C2), jnp.float32),                # conv im2col buffer
        ],
        compiler_params=pltpu.CompilerParams(
            dimension_semantics=("parallel",),
            vmem_limit_bytes=32 * 1024 * 1024,
        ),
    )(x0, skip, w_up_par, b_up2, w_conv_r, b_conv2)

    # NDHWC -> NCDHW only at the module boundary (channels stay on the lane axis in-kernel).
    return jnp.transpose(out_ndhwc, (0, 4, 1, 2, 3))


def unet_up_reference(inputs0_ncdhw, skip_ncdhw, params):
    """Pure-JAX (XLA conv) reference for correctness checking."""
    x0 = jnp.transpose(inputs0_ncdhw, (0, 2, 3, 4, 1))
    skip = jnp.transpose(skip_ncdhw, (0, 2, 3, 4, 1))
    dn = ("NDHWC", "DHWIO", "NDHWC")

    w_up_eq = jnp.transpose(jnp.flip(params["w_up"], axis=(2, 3, 4)), (2, 3, 4, 0, 1))
    up = lax.conv_general_dilated(x0, w_up_eq, window_strides=(1, 1, 1),
                                  padding=((2, 2),) * 3, lhs_dilation=(2, 2, 2),
                                  dimension_numbers=dn) + params["b_up"]
    cat = jnp.concatenate([up, skip], axis=-1)
    w_c_eq = jnp.transpose(params["w_conv"], (2, 3, 4, 1, 0))
    out = lax.conv_general_dilated(cat, w_c_eq, window_strides=(1, 1, 1),
                                   padding=((1, 1),) * 3,
                                   dimension_numbers=dn) + params["b_conv"]
    out = jnp.maximum(out, 0.0)
    return jnp.transpose(out, (0, 4, 1, 2, 3))


if __name__ == "__main__":
    # module config (SMALL, but with realistic-ish channel counts so the matmul K is large)
    in_size, out_size = 16, 8
    N, D, H, W = 2, 4, 4, 4

    key = jax.random.PRNGKey(0)
    k_x0, k_skip, k_wu, k_bu, k_wc, k_bc = jax.random.split(key, 6)

    # inputs (PyTorch NCDHW convention)
    inputs0 = jax.random.normal(k_x0, (N, in_size, D, H, W), jnp.float32)
    skip = jax.random.normal(k_skip, (N, out_size, 2 * D, 2 * H, 2 * W), jnp.float32)

    # deterministic parameters, PyTorch-native layouts
    params = {
        # ConvTranspose3d(in_size, out_size, 4, 2, 1): weight (Cin, Cout, 4, 4, 4)
        "w_up": 0.1 * jax.random.normal(k_wu, (in_size, out_size, 4, 4, 4), jnp.float32),
        "b_up": 0.1 * jax.random.normal(k_bu, (out_size,), jnp.float32),
        # Conv3d(2*out_size, out_size, 3, 1, 1): weight (Cout, 2*Cout, 3, 3, 3)
        "w_conv": 0.1 * jax.random.normal(k_wc, (out_size, 2 * out_size, 3, 3, 3), jnp.float32),
        "b_conv": 0.1 * jax.random.normal(k_bc, (out_size,), jnp.float32),
    }

    out = unet_up_forward(inputs0, skip, params)
    out = jax.block_until_ready(out)

    ref = unet_up_reference(inputs0, skip, params)
    ref = jax.block_until_ready(ref)

    assert out.shape == (N, out_size, 2 * D, 2 * H, 2 * W), out.shape
    assert jnp.allclose(out, ref, atol=5e-4, rtol=5e-4), float(jnp.max(jnp.abs(out - ref)))

    print("KERNEL_OK")
</pallas_src>

<mosaic_0001>
module attributes {stable_mosaic.version = 11 : i64} {
  func.func @_unet_up_kernel(%arg0: i32, %arg1: memref<1x4x4x4x16xf32, #tpu.memory_space<vmem>>, %arg2: memref<1x8x8x8x8xf32, #tpu.memory_space<vmem>>, %arg3: memref<2x2x2x128x8xf32, #tpu.memory_space<vmem>>, %arg4: memref<1x8xf32, #tpu.memory_space<vmem>>, %arg5: memref<432x8xf32, #tpu.memory_space<vmem>>, %arg6: memref<1x8xf32, #tpu.memory_space<vmem>>, %arg7: memref<1x8x8x8x8xf32, #tpu.memory_space<vmem>>, %arg8: memref<6x6x6x16xf32, #tpu.memory_space<vmem>>, %arg9: memref<10x10x10x16xf32, #tpu.memory_space<vmem>>, %arg10: memref<16x128xf32, #tpu.memory_space<vmem>>, %arg11: memref<64x432xf32, #tpu.memory_space<vmem>>) attributes {dimension_semantics = [#tpu.dimension_semantics<parallel>], iteration_bounds = array<i64: 2>, scalar_prefetch = 0 : i64, scratch_operands = 4 : i64, tpu.core_type = #tpu.core_type<tc>, window_params = [{transform_indices = @transform_0, window_bounds = array<i64: 1, 4, 4, 4, 16>}, {transform_indices = @transform_1, window_bounds = array<i64: 1, 8, 8, 8, 8>}, {pipeline_mode = #tpu.pipeline_mode<synchronous>, transform_indices = @transform_2, window_bounds = array<i64: 2, 2, 2, 128, 8>}, {pipeline_mode = #tpu.pipeline_mode<synchronous>, transform_indices = @transform_3, window_bounds = array<i64: 1, 8>}, {pipeline_mode = #tpu.pipeline_mode<synchronous>, transform_indices = @transform_4, window_bounds = array<i64: 432, 8>}, {pipeline_mode = #tpu.pipeline_mode<synchronous>, transform_indices = @transform_5, window_bounds = array<i64: 1, 8>}, {transform_indices = @transform_6, window_bounds = array<i64: 1, 8, 8, 8, 8>}]} {
    %cst = arith.constant 0.000000e+00 : f32
    %0 = vector.broadcast %cst : f32 to vector<6x6x6x16xf32>
    %c0 = arith.constant 0 : index
    %c0_0 = arith.constant 0 : index
    %c0_1 = arith.constant 0 : index
    %c0_2 = arith.constant 0 : index
    %1 = vector.load %arg8[%c0, %c0_0, %c0_1, %c0_2] : memref<6x6x6x16xf32, #tpu.memory_space<vmem>>, vector<6x6x6x16xf32>
    tpu.vector_store %arg8[%c0, %c0_0, %c0_1, %c0_2], %0 {strides = array<i32>} : memref<6x6x6x16xf32, #tpu.memory_space<vmem>>, vector<6x6x6x16xf32>,
    %c0_3 = arith.constant 0 : index
    %c0_4 = arith.constant 0 : index
    %c0_5 = arith.constant 0 : index
    %c0_6 = arith.constant 0 : index
    %c0_7 = arith.constant 0 : index
    %2 = vector.load %arg1[%c0_3, %c0_4, %c0_5, %c0_6, %c0_7] : memref<1x4x4x4x16xf32, #tpu.memory_space<vmem>>, vector<1x4x4x4x16xf32>
    %3 = vector.shape_cast %2 : vector<1x4x4x4x16xf32> to vector<4x4x4x16xf32>
    %c1 = arith.constant 1 : index
    %c1_8 = arith.constant 1 : index
    %c1_9 = arith.constant 1 : index
    %c0_10 = arith.constant 0 : index
    %4 = vector.load %arg8[%c1, %c1_8, %c1_9, %c0_10] : memref<6x6x6x16xf32, #tpu.memory_space<vmem>>, vector<4x4x4x16xf32>
    tpu.vector_store %arg8[%c1, %c1_8, %c1_9, %c0_10], %3 {strides = array<i32>} : memref<6x6x6x16xf32, #tpu.memory_space<vmem>>, vector<4x4x4x16xf32>,
    %cst_11 = arith.constant 0.000000e+00 : f32
    %5 = vector.broadcast %cst_11 : f32 to vector<10x10x10x16xf32>
    %c0_12 = arith.constant 0 : index
    %c0_13 = arith.constant 0 : index
    %c0_14 = arith.constant 0 : index
    %c0_15 = arith.constant 0 : index
    %6 = vector.load %arg9[%c0_12, %c0_13, %c0_14, %c0_15] : memref<10x10x10x16xf32, #tpu.memory_space<vmem>>, vector<10x10x10x16xf32>
    tpu.vector_store %arg9[%c0_12, %c0_13, %c0_14, %c0_15], %5 {strides = array<i32>} : memref<10x10x10x16xf32, #tpu.memory_space<vmem>>, vector<10x10x10x16xf32>,
    %c0_16 = arith.constant 0 : index
    %c0_17 = arith.constant 0 : index
    %c0_18 = arith.constant 0 : index
    %c0_19 = arith.constant 0 : index
    %c0_20 = arith.constant 0 : index
    %7 = vector.load %arg2[%c0_16, %c0_17, %c0_18, %c0_19, %c0_20] : memref<1x8x8x8x8xf32, #tpu.memory_space<vmem>>, vector<1x8x8x8x8xf32>
    %8 = vector.shape_cast %7 : vector<1x8x8x8x8xf32> to vector<8x8x8x8xf32>
    %c1_21 = arith.constant 1 : index
    %c1_22 = arith.constant 1 : index
    %c1_23 = arith.constant 1 : index
    %c8 = arith.constant 8 : index
    %9 = vector.load %arg9[%c1_21, %c1_22, %c1_23, %c8] : memref<10x10x10x16xf32, #tpu.memory_space<vmem>>, vector<8x8x8x8xf32>
    tpu.vector_store %arg9[%c1_21, %c1_22, %c1_23, %c8], %8 {strides = array<i32>} : memref<10x10x10x16xf32, #tpu.memory_space<vmem>>, vector<8x8x8x8xf32>,
    %c0_24 = arith.constant 0 : index
    %c0_25 = arith.constant 0 : index
    %10 = vector.load %arg4[%c0_24, %c0_25] : memref<1x8xf32, #tpu.memory_space<vmem>>, vector<1x8xf32>
    %11 = vector.shape_cast %10 : vector<1x8xf32> to vector<1x8xf32>
    %12 = vector.broadcast %11 : vector<1x8xf32> to vector<16x8xf32>
    %c0_26 = arith.constant 0 : index
    %c0_27 = arith.constant 0 : index
    %13 = vector.load %arg6[%c0_26, %c0_27] : memref<1x8xf32, #tpu.memory_space<vmem>>, vector<1x8xf32>
    %14 = vector.shape_cast %13 : vector<1x8xf32> to vector<1x8xf32>
    %15 = vector.broadcast %14 : vector<1x8xf32> to vector<64x8xf32>
    %c0_i32 = arith.constant 0 : i32
    %c4_i32 = arith.constant 4 : i32
    %16 = arith.addi %c0_i32, %c4_i32 : i32
    %c1_i32 = arith.constant 1 : i32
    scf.for %arg12 = %c0_i32 to %16 step %c1_i32  : i32 {
      %c0_i32_32 = arith.constant 0 : i32
      %18 = arith.addi %arg12, %c0_i32_32 : i32
      %c0_i32_33 = arith.constant 0 : i32
      %19 = arith.addi %18, %c0_i32_33 : i32
      %20 = arith.index_cast %19 : i32 to index
      %c0_34 = arith.constant 0 : index
      %c0_35 = arith.constant 0 : index
      %c0_36 = arith.constant 0 : index
      %21 = vector.load %arg8[%20, %c0_34, %c0_35, %c0_36] : memref<6x6x6x16xf32, #tpu.memory_space<vmem>>, vector<1x4x4x16xf32>
      %22 = vector.shape_cast %21 : vector<1x4x4x16xf32> to vector<4x4x16xf32>
      %23 = vector.shape_cast %22 : vector<4x4x16xf32> to vector<16x16xf32>
      %c0_37 = arith.constant 0 : index
      %c0_38 = arith.constant 0 : index
      %24 = vector.load %arg10[%c0_37, %c0_38] : memref<16x128xf32, #tpu.memory_space<vmem>>, vector<16x16xf32>
      tpu.vector_store %arg10[%c0_37, %c0_38], %23 {strides = array<i32>} : memref<16x128xf32, #tpu.memory_space<vmem>>, vector<16x16xf32>,
      %c0_i32_39 = arith.constant 0 : i32
      %25 = arith.addi %arg12, %c0_i32_39 : i32
      %c0_i32_40 = arith.constant 0 : i32
      %26 = arith.addi %25, %c0_i32_40 : i32
      %27 = arith.index_cast %26 : i32 to index
      %c0_41 = arith.constant 0 : index
      %c1_42 = arith.constant 1 : index
      %c0_43 = arith.constant 0 : index
      %28 = vector.load %arg8[%27, %c0_41, %c1_42, %c0_43] : memref<6x6x6x16xf32, #tpu.memory_space<vmem>>, vector<1x4x4x16xf32>
      %29 = vector.shape_cast %28 : vector<1x4x4x16xf32> to vector<4x4x16xf32>
      %30 = vector.shape_cast %29 : vector<4x4x16xf32> to vector<16x16xf32>
      %c0_44 = arith.constant 0 : index
      %c16 = arith.constant 16 : index
      %31 = vector.load %arg10[%c0_44, %c16] : memref<16x128xf32, #tpu.memory_space<vmem>>, vector<16x16xf32>
      tpu.vector_store %arg10[%c0_44, %c16], %30 {strides = array<i32>} : memref<16x128xf32, #tpu.memory_space<vmem>>, vector<16x16xf32>,
      %c0_i32_45 = arith.constant 0 : i32
      %32 = arith.addi %arg12, %c0_i32_45 : i32
      %c0_i32_46 = arith.constant 0 : i32
      %33 = arith.addi %32, %c0_i32_46 : i32
      %34 = arith.index_cast %33 : i32 to index
      %c1_47 = arith.constant 1 : index
      %c0_48 = arith.constant 0 : index
      %c0_49 = arith.constant 0 : index
      %35 = vector.load %arg8[%34, %c1_47, %c0_48, %c0_49] : memref<6x6x6x16xf32, #tpu.memory_space<vmem>>, vector<1x4x4x16xf32>
      %36 = vector.shape_cast %35 : vector<1x4x4x16xf32> to vector<4x4x16xf32>
      %37 = vector.shape_cast %36 : vector<4x4x16xf32> to vector<16x16xf32>
      %c0_50 = arith.constant 0 : index
      %c32 = arith.constant 32 : index
      %38 = vector.load %arg10[%c0_50, %c32] : memref<16x128xf32, #tpu.memory_space<vmem>>, vector<16x16xf32>
      tpu.vector_store %arg10[%c0_50, %c32], %37 {strides = array<i32>} : memref<16x128xf32, #tpu.memory_space<vmem>>, vector<16x16xf32>,
      %c0_i32_51 = arith.constant 0 : i32
      %39 = arith.addi %arg12, %c0_i32_51 : i32
      %c0_i32_52 = arith.constant 0 : i32
      %40 = arith.addi %39, %c0_i32_52 : i32
      %41 = arith.index_cast %40 : i32 to index
      %c1_53 = arith.constant 1 : index
      %c1_54 = arith.constant 1 : index
      %c0_55 = arith.constant 0 : index
      %42 = vector.load %arg8[%41, %c1_53, %c1_54, %c0_55] : memref<6x6x6x16xf32, #tpu.memory_space<vmem>>, vector<1x4x4x16xf32>
      %43 = vector.shape_cast %42 : vector<1x4x4x16xf32> to vector<4x4x16xf32>
      %44 = vector.shape_cast %43 : vector<4x4x16xf32> to vector<16x16xf32>
      %c0_56 = arith.constant 0 : index
      %c48 = arith.constant 48 : index
      %45 = vector.load %arg10[%c0_56, %c48] : memref<16x128xf32, #tpu.memory_space<vmem>>, vector<16x16xf32>
      tpu.vector_store %arg10[%c0_56, %c48], %44 {strides = array<i32>} : memref<16x128xf32, #tpu.memory_space<vmem>>, vector<16x16xf32>,
      %c0_i32_57 = arith.constant 0 : i32
      %46 = arith.addi %arg12, %c0_i32_57 : i32
      %c1_i32_58 = arith.constant 1 : i32
      %47 = arith.addi %46, %c1_i32_58 : i32
      %48 = arith.index_cast %47 : i32 to index
      %c0_59 = arith.constant 0 : index
      %c0_60 = arith.constant 0 : index
      %c0_61 = arith.constant 0 : index
      %49 = vector.load %arg8[%48, %c0_59, %c0_60, %c0_61] : memref<6x6x6x16xf32, #tpu.memory_space<vmem>>, vector<1x4x4x16xf32>
      %50 = vector.shape_cast %49 : vector<1x4x4x16xf32> to vector<4x4x16xf32>
      %51 = vector.shape_cast %50 : vector<4x4x16xf32> to vector<16x16xf32>
      %c0_62 = arith.constant 0 : index
      %c64 = arith.constant 64 : index
      %52 = vector.load %arg10[%c0_62, %c64] : memref<16x128xf32, #tpu.memory_space<vmem>>, vector<16x16xf32>
      tpu.vector_store %arg10[%c0_62, %c64], %51 {strides = array<i32>} : memref<16x128xf32, #tpu.memory_space<vmem>>, vector<16x16xf32>,
      %c0_i32_63 = arith.constant 0 : i32
      %53 = arith.addi %arg12, %c0_i32_63 : i32
      %c1_i32_64 = arith.constant 1 : i32
      %54 = arith.addi %53, %c1_i32_64 : i32
      %55 = arith.index_cast %54 : i32 to index
      %c0_65 = arith.constant 0 : index
      %c1_66 = arith.constant 1 : index
      %c0_67 = arith.constant 0 : index
      %56 = vector.load %arg8[%55, %c0_65, %c1_66, %c0_67] : memref<6x6x6x16xf32, #tpu.memory_space<vmem>>, vector<1x4x4x16xf32>
      %57 = vector.shape_cast %56 : vector<1x4x4x16xf32> to vector<4x4x16xf32>
      %58 = vector.shape_cast %57 : vector<4x4x16xf32> to vector<16x16xf32>
      %c0_68 = arith.constant 0 : index
      %c80 = arith.constant 80 : index
      %59 = vector.load %arg10[%c0_68, %c80] : memref<16x128xf32, #tpu.memory_space<vmem>>, vector<16x16xf32>
      tpu.vector_store %arg10[%c0_68, %c80], %58 {strides = array<i32>} : memref<16x128xf32, #tpu.memory_space<vmem>>, vector<16x16xf32>,
      %c0_i32_69 = arith.constant 0 : i32
      %60 = arith.addi %arg12, %c0_i32_69 : i32
      %c1_i32_70 = arith.constant 1 : i32
      %61 = arith.addi %60, %c1_i32_70 : i32
      %62 = arith.index_cast %61 : i32 to index
      %c1_71 = arith.constant 1 : index
      %c0_72 = arith.constant 0 : index
      %c0_73 = arith.constant 0 : index
      %63 = vector.load %arg8[%62, %c1_71, %c0_72, %c0_73] : memref<6x6x6x16xf32, #tpu.memory_space<vmem>>, vector<1x4x4x16xf32>
      %64 = vector.shape_cast %63 : vector<1x4x4x16xf32> to vector<4x4x16xf32>
      %65 = vector.shape_cast %64 : vector<4x4x16xf32> to vector<16x16xf32>
      %c0_74 = arith.constant 0 : index
      %c96 = arith.constant 96 : index
      %66 = vector.load %arg10[%c0_74, %c96] : memref<16x128xf32, #tpu.memory_space<vmem>>, vector<16x16xf32>
      tpu.vector_store %arg10[%c0_74, %c96], %65 {strides = array<i32>} : memref<16x128xf32, #tpu.memory_space<vmem>>, vector<16x16xf32>,
      %c0_i32_75 = arith.constant 0 : i32
      %67 = arith.addi %arg12, %c0_i32_75 : i32
      %c1_i32_76 = arith.constant 1 : i32
      %68 = arith.addi %67, %c1_i32_76 : i32
      %69 = arith.index_cast %68 : i32 to index
      %c1_77 = arith.constant 1 : index
      %c1_78 = arith.constant 1 : index
      %c0_79 = arith.constant 0 : index
      %70 = vector.load %arg8[%69, %c1_77, %c1_78, %c0_79] : memref<6x6x6x16xf32, #tpu.memory_space<vmem>>, vector<1x4x4x16xf32>
      %71 = vector.shape_cast %70 : vector<1x4x4x16xf32> to vector<4x4x16xf32>
      %72 = vector.shape_cast %71 : vector<4x4x16xf32> to vector<16x16xf32>
      %c0_80 = arith.constant 0 : index
      %c112 = arith.constant 112 : index
      %73 = vector.load %arg10[%c0_80, %c112] : memref<16x128xf32, #tpu.memory_space<vmem>>, vector<16x16xf32>
      tpu.vector_store %arg10[%c0_80, %c112], %72 {strides = array<i32>} : memref<16x128xf32, #tpu.memory_space<vmem>>, vector<16x16xf32>,
      %c0_81 = arith.constant 0 : index
      %c0_82 = arith.constant 0 : index
      %74 = vector.load %arg10[%c0_81, %c0_82] : memref<16x128xf32, #tpu.memory_space<vmem>>, vector<16x128xf32>
      %c0_83 = arith.constant 0 : index
      %c0_84 = arith.constant 0 : index
      %c0_85 = arith.constant 0 : index
      %c0_86 = arith.constant 0 : index
      %c0_87 = arith.constant 0 : index
      %75 = vector.load %arg3[%c0_83, %c0_84, %c0_85, %c0_86, %c0_87] : memref<2x2x2x128x8xf32, #tpu.memory_space<vmem>>, vector<1x1x1x128x8xf32>
      %76 = vector.shape_cast %75 : vector<1x1x1x128x8xf32> to vector<128x8xf32>
      %cst_88 = arith.constant dense<0.000000e+00> : vector<16x8xf32>
      %77 = tpu.matmul %74, %76, %cst_88 {dimension_numbers = #tpu.dot_dimension_numbers<[1], [0], [0], [1], [0, 0, 1, 1], [], []>} : vector<16x128xf32>, vector<128x8xf32>, vector<16x8xf32> -> vector<16x8xf32>
      %78 = arith.addf %77, %12 : vector<16x8xf32>
      %c0_i32_89 = arith.constant 0 : i32
      %79 = arith.addi %arg12, %c0_i32_89 : i32
      %c0_i32_90 = arith.constant 0 : i32
      %80 = arith.addi %79, %c0_i32_90 : i32
      %81 = arith.index_cast %80 : i32 to index
      %c0_91 = arith.constant 0 : index
      %c1_92 = arith.constant 1 : index
      %c0_93 = arith.constant 0 : index
      %82 = vector.load %arg8[%81, %c0_91, %c1_92, %c0_93] : memref<6x6x6x16xf32, #tpu.memory_space<vmem>>, vector<1x4x4x16xf32>
      %83 = vector.shape_cast %82 : vector<1x4x4x16xf32> to vector<4x4x16xf32>
      %84 = vector.shape_cast %83 : vector<4x4x16xf32> to vector<16x16xf32>
      %c0_94 = arith.constant 0 : index
      %c0_95 = arith.constant 0 : index
      %85 = vector.load %arg10[%c0_94, %c0_95] : memref<16x128xf32, #tpu.memory_space<vmem>>, vector<16x16xf32>
      tpu.vector_store %arg10[%c0_94, %c0_95], %84 {strides = array<i32>} : memref<16x128xf32, #tpu.memory_space<vmem>>, vector<16x16xf32>,
      %c0_i32_96 = arith.constant 0 : i32
      %86 = arith.addi %arg12, %c0_i32_96 : i32
      %c0_i32_97 = arith.constant 0 : i32
      %87 = arith.addi %86, %c0_i32_97 : i32
      %88 = arith.index_cast %87 : i32 to index
      %c0_98 = arith.constant 0 : index
      %c2 = arith.constant 2 : index
      %c0_99 = arith.constant 0 : index
      %89 = vector.load %arg8[%88, %c0_98, %c2, %c0_99] : memref<6x6x6x16xf32, #tpu.memory_space<vmem>>, vector<1x4x4x16xf32>
      %90 = vector.shape_cast %89 : vector<1x4x4x16xf32> to vector<4x4x16xf32>
      %91 = vector.shape_cast %90 : vector<4x4x16xf32> to vector<16x16xf32>
      %c0_100 = arith.constant 0 : index
      %c16_101 = arith.constant 16 : index
      %92 = vector.load %arg10[%c0_100, %c16_101] : memref<16x128xf32, #tpu.memory_space<vmem>>, vector<16x16xf32>
      tpu.vector_store %arg10[%c0_100, %c16_101], %91 {strides = array<i32>} : memref<16x128xf32, #tpu.memory_space<vmem>>, vector<16x16xf32>,
      %c0_i32_102 = arith.constant 0 : i32
      %93 = arith.addi %arg12, %c0_i32_102 : i32
      %c0_i32_103 = arith.constant 0 : i32
      %94 = arith.addi %93, %c0_i32_103 : i32
      %95 = arith.index_cast %94 : i32 to index
      %c1_104 = arith.constant 1 : index
      %c1_105 = arith.constant 1 : index
      %c0_106 = arith.constant 0 : index
      %96 = vector.load %arg8[%95, %c1_104, %c1_105, %c0_106] : memref<6x6x6x16xf32, #tpu.memory_space<vmem>>, vector<1x4x4x16xf32>
      %97 = vector.shape_cast %96 : vector<1x4x4x16xf32> to vector<4x4x16xf32>
      %98 = vector.shape_cast %97 : vector<4x4x16xf32> to vector<16x16xf32>
      %c0_107 = arith.constant 0 : index
      %c32_108 = arith.constant 32 : index
      %99 = vector.load %arg10[%c0_107, %c32_108] : memref<16x128xf32, #tpu.memory_space<vmem>>, vector<16x16xf32>
      tpu.vector_store %arg10[%c0_107, %c32_108], %98 {strides = array<i32>} : memref<16x128xf32, #tpu.memory_space<vmem>>, vector<16x16xf32>,
      %c0_i32_109 = arith.constant 0 : i32
      %100 = arith.addi %arg12, %c0_i32_109 : i32
      %c0_i32_110 = arith.constant 0 : i32
      %101 = arith.addi %100, %c0_i32_110 : i32
      %102 = arith.index_cast %101 : i32 to index
      %c1_111 = arith.constant 1 : index
      %c2_112 = arith.constant 2 : index
      %c0_113 = arith.constant 0 : index
      %103 = vector.load %arg8[%102, %c1_111, %c2_112, %c0_113] : memref<6x6x6x16xf32, #tpu.memory_space<vmem>>, vector<1x4x4x16xf32>
      %104 = vector.shape_cast %103 : vector<1x4x4x16xf32> to vector<4x4x16xf32>
      %105 = vector.shape_cast %104 : vector<4x4x16xf32> to vector<16x16xf32>
      %c0_114 = arith.constant 0 : index
      %c48_115 = arith.constant 48 : index
      %106 = vector.load %arg10[%c0_114, %c48_115] : memref<16x128xf32, #tpu.memory_space<vmem>>, vector<16x16xf32>
      tpu.vector_store %arg10[%c0_114, %c48_115], %105 {strides = array<i32>} : memref<16x128xf32, #tpu.memory_space<vmem>>, vector<16x16xf32>,
      %c0_i32_116 = arith.constant 0 : i32
      %107 = arith.addi %arg12, %c0_i32_116 : i32
      %c1_i32_117 = arith.constant 1 : i32
      %108 = arith.addi %107, %c1_i32_117 : i32
      %109 = arith.index_cast %108 : i32 to index
      %c0_118 = arith.constant 0 : index
      %c1_119 = arith.constant 1 : index
      %c0_120 = arith.constant 0 : index
      %110 = vector.load %arg8[%109, %c0_118, %c1_119, %c0_120] : memref<6x6x6x16xf32, #tpu.memory_space<vmem>>, vector<1x4x4x16xf32>
      %111 = vector.shape_cast %110 : vector<1x4x4x16xf32> to vector<4x4x16xf32>
      %112 = vector.shape_cast %111 : vector<4x4x16xf32> to vector<16x16xf32>
      %c0_121 = arith.constant 0 : index
      %c64_122 = arith.constant 64 : index
      %113 = vector.load %arg10[%c0_121, %c64_122] : memref<16x128xf32, #tpu.memory_space<vmem>>, vector<16x16xf32>
      tpu.vector_store %arg10[%c0_121, %c64_122], %112 {strides = array<i32>} : memref<16x128xf32, #tpu.memory_space<vmem>>, vector<16x16xf32>,
      %c0_i32_123 = arith.constant 0 : i32
      %114 = arith.addi %arg12, %c0_i32_123 : i32
      %c1_i32_124 = arith.constant 1 : i32
      %115 = arith.addi %114, %c1_i32_124 : i32
      %116 = arith.index_cast %115 : i32 to index
      %c0_125 = arith.constant 0 : index
      %c2_126 = arith.constant 2 : index
      %c0_127 = arith.constant 0 : index
      %117 = vector.load %arg8[%116, %c0_125, %c2_126, %c0_127] : memref<6x6x6x16xf32, #tpu.memory_space<vmem>>, vector<1x4x4x16xf32>
      %118 = vector.shape_cast %117 : vector<1x4x4x16xf32> to vector<4x4x16xf32>
      %119 = vector.shape_cast %118 : vector<4x4x16xf32> to vector<16x16xf32>
      %c0_128 = arith.constant 0 : index
      %c80_129 = arith.constant 80 : index
      %120 = vector.load %arg10[%c0_128, %c80_129] : memref<16x128xf32, #tpu.memory_space<vmem>>, vector<16x16xf32>
      tpu.vector_store %arg10[%c0_128, %c80_129], %119 {strides = array<i32>} : memref<16x128xf32, #tpu.memory_space<vmem>>, vector<16x16xf32>,
      %c0_i32_130 = arith.constant 0 : i32
      %121 = arith.addi %arg12, %c0_i32_130 : i32
      %c1_i32_131 = arith.constant 1 : i32
      %122 = arith.addi %121, %c1_i32_131 : i32
      %123 = arith.index_cast %122 : i32 to index
      %c1_132 = arith.constant 1 : index
      %c1_133 = arith.constant 1 : index
      %c0_134 = arith.constant 0 : index
      %124 = vector.load %arg8[%123, %c1_132, %c1_133, %c0_134] : memref<6x6x6x16xf32, #tpu.memory_space<vmem>>, vector<1x4x4x16xf32>
      %125 = vector.shape_cast %124 : vector<1x4x4x16xf32> to vector<4x4x16xf32>
      %126 = vector.shape_cast %125 : vector<4x4x16xf32> to vector<16x16xf32>
      %c0_135 = arith.constant 0 : index
      %c96_136 = arith.constant 96 : index
      %127 = vector.load %arg10[%c0_135, %c96_136] : memref<16x128xf32, #tpu.memory_space<vmem>>, vector<16x16xf32>
      tpu.vector_store %arg10[%c0_135, %c96_136], %126 {strides = array<i32>} : memref<16x128xf32, #tpu.memory_space<vmem>>, vector<16x16xf32>,
      %c0_i32_137 = arith.constant 0 : i32
      %128 = arith.addi %arg12, %c0_i32_137 : i32
      %c1_i32_138 = arith.constant 1 : i32
      %129 = arith.addi %128, %c1_i32_138 : i32
      %130 = arith.index_cast %129 : i32 to index
      %c1_139 = arith.constant 1 : index
      %c2_140 = arith.constant 2 : index
      %c0_141 = arith.constant 0 : index
      %131 = vector.load %arg8[%130, %c1_139, %c2_140, %c0_141] : memref<6x6x6x16xf32, #tpu.memory_space<vmem>>, vector<1x4x4x16xf32>
      %132 = vector.shape_cast %131 : vector<1x4x4x16xf32> to vector<4x4x16xf32>
      %133 = vector.shape_cast %132 : vector<4x4x16xf32> to vector<16x16xf32>
      %c0_142 = arith.constant 0 : index
      %c112_143 = arith.constant 112 : index
      %134 = vector.load %arg10[%c0_142, %c112_143] : memref<16x128xf32, #tpu.memory_space<vmem>>, vector<16x16xf32>
      tpu.vector_store %arg10[%c0_142, %c112_143], %133 {strides = array<i32>} : memref<16x128xf32, #tpu.memory_space<vmem>>, vector<16x16xf32>,
      %c0_144 = arith.constant 0 : index
      %c0_145 = arith.constant 0 : index
      %135 = vector.load %arg10[%c0_144, %c0_145] : memref<16x128xf32, #tpu.memory_space<vmem>>, vector<16x128xf32>
      %c0_146 = arith.constant 0 : index
      %c0_147 = arith.constant 0 : index
      %c1_148 = arith.constant 1 : index
      %c0_149 = arith.constant 0 : index
      %c0_150 = arith.constant 0 : index
      %136 = vector.load %arg3[%c0_146, %c0_147, %c1_148, %c0_149, %c0_150] : memref<2x2x2x128x8xf32, #tpu.memory_space<vmem>>, vector<1x1x1x128x8xf32>
      %137 = vector.shape_cast %136 : vector<1x1x1x128x8xf32> to vector<128x8xf32>
      %cst_151 = arith.constant dense<0.000000e+00> : vector<16x8xf32>
      %138 = tpu.matmul %135, %137, %cst_151 {dimension_numbers = #tpu.dot_dimension_numbers<[1], [0], [0], [1], [0, 0, 1, 1], [], []>} : vector<16x128xf32>, vector<128x8xf32>, vector<16x8xf32> -> vector<16x8xf32>
      %139 = arith.addf %138, %12 : vector<16x8xf32>
      %140 = vector.shape_cast %78 : vector<16x8xf32> to vector<16x1x8xf32>
      %141 = vector.shape_cast %140 : vector<16x1x8xf32> to vector<16x1x8xf32>
      %142 = vector.broadcast %141 : vector<16x1x8xf32> to vector<16x2x8xf32>
      %143 = vector.shape_cast %142 : vector<16x2x8xf32> to vector<32x8xf32>
      %144 = vector.shape_cast %139 : vector<16x8xf32> to vector<16x1x8xf32>
      %145 = vector.shape_cast %144 : vector<16x1x8xf32> to vector<16x1x8xf32>
      %146 = vector.broadcast %145 : vector<16x1x8xf32> to vector<16x2x8xf32>
      %147 = vector.shape_cast %146 : vector<16x2x8xf32> to vector<32x8xf32>
      %148 = tpu.iota {dimensions = array<i32: 0>} : vector<32x8xi32>
      %c2_i32 = arith.constant 2 : i32
      %c0_i32_152 = arith.constant 0 : i32
      %149 = arith.cmpi eq, %c2_i32, %c0_i32_152 : i32
      %c1_i32_153 = arith.constant 1 : i32
      %150 = arith.select %149, %c1_i32_153, %c2_i32 : i32
      %151 = vector.broadcast %150 : i32 to vector<32x8xi32>
      %152 = arith.remsi %148, %151 : vector<32x8xi32>
      %c0_i32_154 = arith.constant 0 : i32
      %153 = vector.broadcast %c0_i32_154 : i32 to vector<32x8xi32>
      %154 = arith.cmpi ne, %152, %153 : vector<32x8xi32>
      %c0_i32_155 = arith.constant 0 : i32
      %155 = vector.broadcast %c0_i32_155 : i32 to vector<32x8xi32>
      %156 = arith.cmpi slt, %152, %155 : vector<32x8xi32>
      %c0_i32_156 = arith.constant 0 : i32
      %157 = arith.cmpi slt, %150, %c0_i32_156 : i32
      %158 = vector.broadcast %157 : i1 to vector<32x8xi1>
      %159 = vector.broadcast %158 : vector<32x8xi1> to vector<32x8xi1>
      %160 = arith.xori %156, %159 : vector<32x8xi1>
      %161 = arith.andi %160, %154 : vector<32x8xi1>
      %162 = vector.broadcast %150 : i32 to vector<32x8xi32>
      %163 = arith.addi %152, %162 : vector<32x8xi32>
      %164 = arith.select %161, %163, %152 : vector<32x8xi1>, vector<32x8xi32>
      %c0_i32_157 = arith.constant 0 : i32
      %165 = vector.broadcast %c0_i32_157 : i32 to vector<32x8xi32>
      %166 = arith.cmpi eq, %164, %165 : vector<32x8xi32>
      %167 = arith.select %166, %143, %147 : vector<32x8xi1>, vector<32x8xf32>
      %168 = vector.shape_cast %167 : vector<32x8xf32> to vector<4x8x8xf32>
      %c0_i32_158 = arith.constant 0 : i32
      %169 = arith.addi %arg12, %c0_i32_158 : i32
      %c0_i32_159 = arith.constant 0 : i32
      %170 = arith.addi %169, %c0_i32_159 : i32
      %171 = arith.index_cast %170 : i32 to index
      %c1_160 = arith.constant 1 : index
      %c0_161 = arith.constant 0 : index
      %c0_162 = arith.constant 0 : index
      %172 = vector.load %arg8[%171, %c1_160, %c0_161, %c0_162] : memref<6x6x6x16xf32, #tpu.memory_space<vmem>>, vector<1x4x4x16xf32>
      %173 = vector.shape_cast %172 : vector<1x4x4x16xf32> to vector<4x4x16xf32>
      %174 = vector.shape_cast %173 : vector<4x4x16xf32> to vector<16x16xf32>
      %c0_163 = arith.constant 0 : index
      %c0_164 = arith.constant 0 : index
      %175 = vector.load %arg10[%c0_163, %c0_164] : memref<16x128xf32, #tpu.memory_space<vmem>>, vector<16x16xf32>
      tpu.vector_store %arg10[%c0_163, %c0_164], %174 {strides = array<i32>} : memref<16x128xf32, #tpu.memory_space<vmem>>, vector<16x16xf32>,
      %c0_i32_165 = arith.constant 0 : i32
      %176 = arith.addi %arg12, %c0_i32_165 : i32
      %c0_i32_166 = arith.constant 0 : i32
      %177 = arith.addi %176, %c0_i32_166 : i32
      %178 = arith.index_cast %177 : i32 to index
      %c1_167 = arith.constant 1 : index
      %c1_168 = arith.constant 1 : index
      %c0_169 = arith.constant 0 : index
      %179 = vector.load %arg8[%178, %c1_167, %c1_168, %c0_169] : memref<6x6x6x16xf32, #tpu.memory_space<vmem>>, vector<1x4x4x16xf32>
      %180 = vector.shape_cast %179 : vector<1x4x4x16xf32> to vector<4x4x16xf32>
      %181 = vector.shape_cast %180 : vector<4x4x16xf32> to vector<16x16xf32>
      %c0_170 = arith.constant 0 : index
      %c16_171 = arith.constant 16 : index
      %182 = vector.load %arg10[%c0_170, %c16_171] : memref<16x128xf32, #tpu.memory_space<vmem>>, vector<16x16xf32>
      tpu.vector_store %arg10[%c0_170, %c16_171], %181 {strides = array<i32>} : memref<16x128xf32, #tpu.memory_space<vmem>>, vector<16x16xf32>,
      %c0_i32_172 = arith.constant 0 : i32
      %183 = arith.addi %arg12, %c0_i32_172 : i32
      %c0_i32_173 = arith.constant 0 : i32
      %184 = arith.addi %183, %c0_i32_173 : i32
      %185 = arith.index_cast %184 : i32 to index
      %c2_174 = arith.constant 2 : index
      %c0_175 = arith.constant 0 : index
      %c0_176 = arith.constant 0 : index
      %186 = vector.load %arg8[%185, %c2_174, %c0_175, %c0_176] : memref<6x6x6x16xf32, #tpu.memory_space<vmem>>, vector<1x4x4x16xf32>
      %187 = vector.shape_cast %186 : vector<1x4x4x16xf32> to vector<4x4x16xf32>
      %188 = vector.shape_cast %187 : vector<4x4x16xf32> to vector<16x16xf32>
      %c0_177 = arith.constant 0 : index
      %c32_178 = arith.constant 32 : index
      %189 = vector.load %arg10[%c0_177, %c32_178] : memref<16x128xf32, #tpu.memory_space<vmem>>, vector<16x16xf32>
      tpu.vector_store %arg10[%c0_177, %c32_178], %188 {strides = array<i32>} : memref<16x128xf32, #tpu.memory_space<vmem>>, vector<16x16xf32>,
      %c0_i32_179 = arith.constant 0 : i32
      %190 = arith.addi %arg12, %c0_i32_179 : i32
      %c0_i32_180 = arith.constant 0 : i32
      %191 = arith.addi %190, %c0_i32_180 : i32
      %192 = arith.index_cast %191 : i32 to index
      %c2_181 = arith.constant 2 : index
      %c1_182 = arith.constant 1 : index
      %c0_183 = arith.constant 0 : index
      %193 = vector.load %arg8[%192, %c2_181, %c1_182, %c0_183] : memref<6x6x6x16xf32, #tpu.memory_space<vmem>>, vector<1x4x4x16xf32>
      %194 = vector.shape_cast %193 : vector<1x4x4x16xf32> to vector<4x4x16xf32>
      %195 = vector.shape_cast %194 : vector<4x4x16xf32> to vector<16x16xf32>
      %c0_184 = arith.constant 0 : index
      %c48_185 = arith.constant 48 : index
      %196 = vector.load %arg10[%c0_184, %c48_185] : memref<16x128xf32, #tpu.memory_space<vmem>>, vector<16x16xf32>
      tpu.vector_store %arg10[%c0_184, %c48_185], %195 {strides = array<i32>} : memref<16x128xf32, #tpu.memory_space<vmem>>, vector<16x16xf32>,
      %c0_i32_186 = arith.constant 0 : i32
      %197 = arith.addi %arg12, %c0_i32_186 : i32
      %c1_i32_187 = arith.constant 1 : i32
      %198 = arith.addi %197, %c1_i32_187 : i32
      %199 = arith.index_cast %198 : i32 to index
      %c1_188 = arith.constant 1 : index
      %c0_189 = arith.constant 0 : index
      %c0_190 = arith.constant 0 : index
      %200 = vector.load %arg8[%199, %c1_188, %c0_189, %c0_190] : memref<6x6x6x16xf32, #tpu.memory_space<vmem>>, vector<1x4x4x16xf32>
      %201 = vector.shape_cast %200 : vector<1x4x4x16xf32> to vector<4x4x16xf32>
      %202 = vector.shape_cast %201 : vector<4x4x16xf32> to vector<16x16xf32>
      %c0_191 = arith.constant 0 : index
      %c64_192 = arith.constant 64 : index
      %203 = vector.load %arg10[%c0_191, %c64_192] : memref<16x128xf32, #tpu.memory_space<vmem>>, vector<16x16xf32>
      tpu.vector_store %arg10[%c0_191, %c64_192], %202 {strides = array<i32>} : memref<16x128xf32, #tpu.memory_space<vmem>>, vector<16x16xf32>,
      %c0_i32_193 = arith.constant 0 : i32
      %204 = arith.addi %arg12, %c0_i32_193 : i32
      %c1_i32_194 = arith.constant 1 : i32
      %205 = arith.addi %204, %c1_i32_194 : i32
      %206 = arith.index_cast %205 : i32 to index
      %c1_195 = arith.constant 1 : index
      %c1_196 = arith.constant 1 : index
      %c0_197 = arith.constant 0 : index
      %207 = vector.load %arg8[%206, %c1_195, %c1_196, %c0_197] : memref<6x6x6x16xf32, #tpu.memory_space<vmem>>, vector<1x4x4x16xf32>
      %208 = vector.shape_cast %207 : vector<1x4x4x16xf32> to vector<4x4x16xf32>
      %209 = vector.shape_cast %208 : vector<4x4x16xf32> to vector<16x16xf32>
      %c0_198 = arith.constant 0 : index
      %c80_199 = arith.constant 80 : index
      %210 = vector.load %arg10[%c0_198, %c80_199] : memref<16x128xf32, #tpu.memory_space<vmem>>, vector<16x16xf32>
      tpu.vector_store %arg10[%c0_198, %c80_199], %209 {strides = array<i32>} : memref<16x128xf32, #tpu.memory_space<vmem>>, vector<16x16xf32>,
      %c0_i32_200 = arith.constant 0 : i32
      %211 = arith.addi %arg12, %c0_i32_200 : i32
      %c1_i32_201 = arith.constant 1 : i32
      %212 = arith.addi %211, %c1_i32_201 : i32
      %213 = arith.index_cast %212 : i32 to index
      %c2_202 = arith.constant 2 : index
      %c0_203 = arith.constant 0 : index
      %c0_204 = arith.constant 0 : index
      %214 = vector.load %arg8[%213, %c2_202, %c0_203, %c0_204] : memref<6x6x6x16xf32, #tpu.memory_space<vmem>>, vector<1x4x4x16xf32>
      %215 = vector.shape_cast %214 : vector<1x4x4x16xf32> to vector<4x4x16xf32>
      %216 = vector.shape_cast %215 : vector<4x4x16xf32> to vector<16x16xf32>
      %c0_205 = arith.constant 0 : index
      %c96_206 = arith.constant 96 : index
      %217 = vector.load %arg10[%c0_205, %c96_206] : memref<16x128xf32, #tpu.memory_space<vmem>>, vector<16x16xf32>
      tpu.vector_store %arg10[%c0_205, %c96_206], %216 {strides = array<i32>} : memref<16x128xf32, #tpu.memory_space<vmem>>, vector<16x16xf32>,
      %c0_i32_207 = arith.constant 0 : i32
      %218 = arith.addi %arg12, %c0_i32_207 : i32
      %c1_i32_208 = arith.constant 1 : i32
      %219 = arith.addi %218, %c1_i32_208 : i32
      %220 = arith.index_cast %219 : i32 to index
      %c2_209 = arith.constant 2 : index
      %c1_210 = arith.constant 1 : index
      %c0_211 = arith.constant 0 : index
      %221 = vector.load %arg8[%220, %c2_209, %c1_210, %c0_211] : memref<6x6x6x16xf32, #tpu.memory_space<vmem>>, vector<1x4x4x16xf32>
      %222 = vector.shape_cast %221 : vector<1x4x4x16xf32> to vector<4x4x16xf32>
      %223 = vector.shape_cast %222 : vector<4x4x16xf32> to vector<16x16xf32>
      %c0_212 = arith.constant 0 : index
      %c112_213 = arith.constant 112 : index
      %224 = vector.load %arg10[%c0_212, %c112_213] : memref<16x128xf32, #tpu.memory_space<vmem>>, vector<16x16xf32>
      tpu.vector_store %arg10[%c0_212, %c112_213], %223 {strides = array<i32>} : memref<16x128xf32, #tpu.memory_space<vmem>>, vector<16x16xf32>,
      %c0_214 = arith.constant 0 : index
      %c0_215 = arith.constant 0 : index
      %225 = vector.load %arg10[%c0_214, %c0_215] : memref<16x128xf32, #tpu.memory_space<vmem>>, vector<16x128xf32>
      %c0_216 = arith.constant 0 : index
      %c1_217 = arith.constant 1 : index
      %c0_218 = arith.constant 0 : index
      %c0_219 = arith.constant 0 : index
      %c0_220 = arith.constant 0 : index
      %226 = vector.load %arg3[%c0_216, %c1_217, %c0_218, %c0_219, %c0_220] : memref<2x2x2x128x8xf32, #tpu.memory_space<vmem>>, vector<1x1x1x128x8xf32>
      %227 = vector.shape_cast %226 : vector<1x1x1x128x8xf32> to vector<128x8xf32>
      %cst_221 = arith.constant dense<0.000000e+00> : vector<16x8xf32>
      %228 = tpu.matmul %225, %227, %cst_221 {dimension_numbers = #tpu.dot_dimension_numbers<[1], [0], [0], [1], [0, 0, 1, 1], [], []>} : vector<16x128xf32>, vector<128x8xf32>, vector<16x8xf32> -> vector<16x8xf32>
      %229 = arith.addf %228, %12 : vector<16x8xf32>
      %c0_i32_222 = arith.constant 0 : i32
      %230 = arith.addi %arg12, %c0_i32_222 : i32
      %c0_i32_223 = arith.constant 0 : i32
      %231 = arith.addi %230, %c0_i32_223 : i32
      %232 = arith.index_cast %231 : i32 to index
      %c1_224 = arith.constant 1 : index
      %c1_225 = arith.constant 1 : index
      %c0_226 = arith.constant 0 : index
      %233 = vector.load %arg8[%232, %c1_224, %c1_225, %c0_226] : memref<6x6x6x16xf32, #tpu.memory_space<vmem>>, vector<1x4x4x16xf32>
      %234 = vector.shape_cast %233 : vector<1x4x4x16xf32> to vector<4x4x16xf32>
      %235 = vector.shape_cast %234 : vector<4x4x16xf32> to vector<16x16xf32>
      %c0_227 = arith.constant 0 : index
      %c0_228 = arith.constant 0 : index
      %236 = vector.load %arg10[%c0_227, %c0_228] : memref<16x128xf32, #tpu.memory_space<vmem>>, vector<16x16xf32>
      tpu.vector_store %arg10[%c0_227, %c0_228], %235 {strides = array<i32>} : memref<16x128xf32, #tpu.memory_space<vmem>>, vector<16x16xf32>,
      %c0_i32_229 = arith.constant 0 : i32
      %237 = arith.addi %arg12, %c0_i32_229 : i32
      %c0_i32_230 = arith.constant 0 : i32
      %238 = arith.addi %237, %c0_i32_230 : i32
      %239 = arith.index_cast %238 : i32 to index
      %c1_231 = arith.constant 1 : index
      %c2_232 = arith.constant 2 : index
      %c0_233 = arith.constant 0 : index
      %240 = vector.load %arg8[%239, %c1_231, %c2_232, %c0_233] : memref<6x6x6x16xf32, #tpu.memory_space<vmem>>, vector<1x4x4x16xf32>
      %241 = vector.shape_cast %240 : vector<1x4x4x16xf32> to vector<4x4x16xf32>
      %242 = vector.shape_cast %241 : vector<4x4x16xf32> to vector<16x16xf32>
      %c0_234 = arith.constant 0 : index
      %c16_235 = arith.constant 16 : index
      %243 = vector.load %arg10[%c0_234, %c16_235] : memref<16x128xf32, #tpu.memory_space<vmem>>, vector<16x16xf32>
      tpu.vector_store %arg10[%c0_234, %c16_235], %242 {strides = array<i32>} : memref<16x128xf32, #tpu.memory_space<vmem>>, vector<16x16xf32>,
      %c0_i32_236 = arith.constant 0 : i32
      %244 = arith.addi %arg12, %c0_i32_236 : i32
      %c0_i32_237 = arith.constant 0 : i32
      %245 = arith.addi %244, %c0_i32_237 : i32
      %246 = arith.index_cast %245 : i32 to index
      %c2_238 = arith.constant 2 : index
      %c1_239 = arith.constant 1 : index
      %c0_240 = arith.constant 0 : index
      %247 = vector.load %arg8[%246, %c2_238, %c1_239, %c0_240] : memref<6x6x6x16xf32, #tpu.memory_space<vmem>>, vector<1x4x4x16xf32>
      %248 = vector.shape_cast %247 : vector<1x4x4x16xf32> to vector<4x4x16xf32>
      %249 = vector.shape_cast %248 : vector<4x4x16xf32> to vector<16x16xf32>
      %c0_241 = arith.constant 0 : index
      %c32_242 = arith.constant 32 : index
      %250 = vector.load %arg10[%c0_241, %c32_242] : memref<16x128xf32, #tpu.memory_space<vmem>>, vector<16x16xf32>
      tpu.vector_store %arg10[%c0_241, %c32_242], %249 {strides = array<i32>} : memref<16x128xf32, #tpu.memory_space<vmem>>, vector<16x16xf32>,
      %c0_i32_243 = arith.constant 0 : i32
      %251 = arith.addi %arg12, %c0_i32_243 : i32
      %c0_i32_244 = arith.constant 0 : i32
      %252 = arith.addi %251, %c0_i32_244 : i32
      %253 = arith.index_cast %252 : i32 to index
      %c2_245 = arith.constant 2 : index
      %c2_246 = arith.constant 2 : index
      %c0_247 = arith.constant 0 : index
      %254 = vector.load %arg8[%253, %c2_245, %c2_246, %c0_247] : memref<6x6x6x16xf32, #tpu.memory_space<vmem>>, vector<1x4x4x16xf32>
      %255 = vector.shape_cast %254 : vector<1x4x4x16xf32> to vector<4x4x16xf32>
      %256 = vector.shape_cast %255 : vector<4x4x16xf32> to vector<16x16xf32>
      %c0_248 = arith.constant 0 : index
      %c48_249 = arith.constant 48 : index
      %257 = vector.load %arg10[%c0_248, %c48_249] : memref<16x128xf32, #tpu.memory_space<vmem>>, vector<16x16xf32>
      tpu.vector_store %arg10[%c0_248, %c48_249], %256 {strides = array<i32>} : memref<16x128xf32, #tpu.memory_space<vmem>>, vector<16x16xf32>,
      %c0_i32_250 = arith.constant 0 : i32
      %258 = arith.addi %arg12, %c0_i32_250 : i32
      %c1_i32_251 = arith.constant 1 : i32
      %259 = arith.addi %258, %c1_i32_251 : i32
      %260 = arith.index_cast %259 : i32 to index
      %c1_252 = arith.constant 1 : index
      %c1_253 = arith.constant 1 : index
      %c0_254 = arith.constant 0 : index
      %261 = vector.load %arg8[%260, %c1_252, %c1_253, %c0_254] : memref<6x6x6x16xf32, #tpu.memory_space<vmem>>, vector<1x4x4x16xf32>
      %262 = vector.shape_cast %261 : vector<1x4x4x16xf32> to vector<4x4x16xf32>
      %263 = vector.shape_cast %262 : vector<4x4x16xf32> to vector<16x16xf32>
      %c0_255 = arith.constant 0 : index
      %c64_256 = arith.constant 64 : index
      %264 = vector.load %arg10[%c0_255, %c64_256] : memref<16x128xf32, #tpu.memory_space<vmem>>, vector<16x16xf32>
      tpu.vector_store %arg10[%c0_255, %c64_256], %263 {strides = array<i32>} : memref<16x128xf32, #tpu.memory_space<vmem>>, vector<16x16xf32>,
      %c0_i32_257 = arith.constant 0 : i32
      %265 = arith.addi %arg12, %c0_i32_257 : i32
      %c1_i32_258 = arith.constant 1 : i32
      %266 = arith.addi %265, %c1_i32_258 : i32
      %267 = arith.index_cast %266 : i32 to index
      %c1_259 = arith.constant 1 : index
      %c2_260 = arith.constant 2 : index
      %c0_261 = arith.constant 0 : index
      %268 = vector.load %arg8[%267, %c1_259, %c2_260, %c0_261] : memref<6x6x6x16xf32, #tpu.memory_space<vmem>>, vector<1x4x4x16xf32>
      %269 = vector.shape_cast %268 : vector<1x4x4x16xf32> to vector<4x4x16xf32>
      %270 = vector.shape_cast %269 : vector<4x4x16xf32> to vector<16x16xf32>
      %c0_262 = arith.constant 0 : index
      %c80_263 = arith.constant 80 : index
      %271 = vector.load %arg10[%c0_262, %c80_263] : memref<16x128xf32, #tpu.memory_space<vmem>>, vector<16x16xf32>
      tpu.vector_store %arg10[%c0_262, %c80_263], %270 {strides = array<i32>} : memref<16x128xf32, #tpu.memory_space<vmem>>, vector<16x16xf32>,
      %c0_i32_264 = arith.constant 0 : i32
      %272 = arith.addi %arg12, %c0_i32_264 : i32
      %c1_i32_265 = arith.constant 1 : i32
      %273 = arith.addi %272, %c1_i32_265 : i32
      %274 = arith.index_cast %273 : i32 to index
      %c2_266 = arith.constant 2 : index
      %c1_267 = arith.constant 1 : index
      %c0_268 = arith.constant 0 : index
      %275 = vector.load %arg8[%274, %c2_266, %c1_267, %c0_268] : memref<6x6x6x16xf32, #tpu.memory_space<vmem>>, vector<1x4x4x16xf32>
      %276 = vector.shape_cast %275 : vector<1x4x4x16xf32> to vector<4x4x16xf32>
      %277 = vector.shape_cast %276 : vector<4x4x16xf32> to vector<16x16xf32>
      %c0_269 = arith.constant 0 : index
      %c96_270 = arith.constant 96 : index
      %278 = vector.load %arg10[%c0_269, %c96_270] : memref<16x128xf32, #tpu.memory_space<vmem>>, vector<16x16xf32>
      tpu.vector_store %arg10[%c0_269, %c96_270], %277 {strides = array<i32>} : memref<16x128xf32, #tpu.memory_space<vmem>>, vector<16x16xf32>,
      %c0_i32_271 = arith.constant 0 : i32
      %279 = arith.addi %arg12, %c0_i32_271 : i32
      %c1_i32_272 = arith.constant 1 : i32
      %280 = arith.addi %279, %c1_i32_272 : i32
      %281 = arith.index_cast %280 : i32 to index
      %c2_273 = arith.constant 2 : index
      %c2_274 = arith.constant 2 : index
      %c0_275 = arith.constant 0 : index
      %282 = vector.load %arg8[%281, %c2_273, %c2_274, %c0_275] : memref<6x6x6x16xf32, #tpu.memory_space<vmem>>, vector<1x4x4x16xf32>
      %283 = vector.shape_cast %282 : vector<1x4x4x16xf32> to vector<4x4x16xf32>
      %284 = vector.shape_cast %283 : vector<4x4x16xf32> to vector<16x16xf32>
      %c0_276 = arith.constant 0 : index
      %c112_277 = arith.constant 112 : index
      %285 = vector.load %arg10[%c0_276, %c112_277] : memref<16x128xf32, #tpu.memory_space<vmem>>, vector<16x16xf32>
      tpu.vector_store %arg10[%c0_276, %c112_277], %284 {strides = array<i32>} : memref<16x128xf32, #tpu.memory_space<vmem>>, vector<16x16xf32>,
      %c0_278 = arith.constant 0 : index
      %c0_279 = arith.constant 0 : index
      %286 = vector.load %arg10[%c0_278, %c0_279] : memref<16x128xf32, #tpu.memory_space<vmem>>, vector<16x128xf32>
      %c0_280 = arith.constant 0 : index
      %c1_281 = arith.constant 1 : index
      %c1_282 = arith.constant 1 : index
      %c0_283 = arith.constant 0 : index
      %c0_284 = arith.constant 0 : index
      %287 = vector.load %arg3[%c0_280, %c1_281, %c1_282, %c0_283, %c0_284] : memref<2x2x2x128x8xf32, #tpu.memory_space<vmem>>, vector<1x1x1x128x8xf32>
      %288 = vector.shape_cast %287 : vector<1x1x1x128x8xf32> to vector<128x8xf32>
      %cst_285 = arith.constant dense<0.000000e+00> : vector<16x8xf32>
      %289 = tpu.matmul %286, %288, %cst_285 {dimension_numbers = #tpu.dot_dimension_numbers<[1], [0], [0], [1], [0, 0, 1, 1], [], []>} : vector<16x128xf32>, vector<128x8xf32>, vector<16x8xf32> -> vector<16x8xf32>
      %290 = arith.addf %289, %12 : vector<16x8xf32>
      %291 = vector.shape_cast %229 : vector<16x8xf32> to vector<16x1x8xf32>
      %292 = vector.shape_cast %291 : vector<16x1x8xf32> to vector<16x1x8xf32>
      %293 = vector.broadcast %292 : vector<16x1x8xf32> to vector<16x2x8xf32>
      %294 = vector.shape_cast %293 : vector<16x2x8xf32> to vector<32x8xf32>
      %295 = vector.shape_cast %290 : vector<16x8xf32> to vector<16x1x8xf32>
      %296 = vector.shape_cast %295 : vector<16x1x8xf32> to vector<16x1x8xf32>
      %297 = vector.broadcast %296 : vector<16x1x8xf32> to vector<16x2x8xf32>
      %298 = vector.shape_cast %297 : vector<16x2x8xf32> to vector<32x8xf32>
      %299 = tpu.iota {dimensions = array<i32: 0>} : vector<32x8xi32>
      %c2_i32_286 = arith.constant 2 : i32
      %c0_i32_287 = arith.constant 0 : i32
      %300 = arith.cmpi eq, %c2_i32_286, %c0_i32_287 : i32
      %c1_i32_288 = arith.constant 1 : i32
      %301 = arith.select %300, %c1_i32_288, %c2_i32_286 : i32
      %302 = vector.broadcast %301 : i32 to vector<32x8xi32>
      %303 = arith.remsi %299, %302 : vector<32x8xi32>
      %c0_i32_289 = arith.constant 0 : i32
      %304 = vector.broadcast %c0_i32_289 : i32 to vector<32x8xi32>
      %305 = arith.cmpi ne, %303, %304 : vector<32x8xi32>
      %c0_i32_290 = arith.constant 0 : i32
      %306 = vector.broadcast %c0_i32_290 : i32 to vector<32x8xi32>
      %307 = arith.cmpi slt, %303, %306 : vector<32x8xi32>
      %c0_i32_291 = arith.constant 0 : i32
      %308 = arith.cmpi slt, %301, %c0_i32_291 : i32
      %309 = vector.broadcast %308 : i1 to vector<32x8xi1>
      %310 = vector.broadcast %309 : vector<32x8xi1> to vector<32x8xi1>
      %311 = arith.xori %307, %310 : vector<32x8xi1>
      %312 = arith.andi %311, %305 : vector<32x8xi1>
      %313 = vector.broadcast %301 : i32 to vector<32x8xi32>
      %314 = arith.addi %303, %313 : vector<32x8xi32>
      %315 = arith.select %312, %314, %303 : vector<32x8xi1>, vector<32x8xi32>
      %c0_i32_292 = arith.constant 0 : i32
      %316 = vector.broadcast %c0_i32_292 : i32 to vector<32x8xi32>
      %317 = arith.cmpi eq, %315, %316 : vector<32x8xi32>
      %318 = arith.select %317, %294, %298 : vector<32x8xi1>, vector<32x8xf32>
      %319 = vector.shape_cast %318 : vector<32x8xf32> to vector<4x8x8xf32>
      %320 = vector.shape_cast %168 : vector<4x8x8xf32> to vector<4x1x8x8xf32>
      %321 = vector.shape_cast %320 : vector<4x1x8x8xf32> to vector<4x1x8x8xf32>
      %322 = vector.broadcast %321 : vector<4x1x8x8xf32> to vector<4x2x8x8xf32>
      %323 = vector.shape_cast %322 : vector<4x2x8x8xf32> to vector<8x8x8xf32>
      %324 = vector.shape_cast %319 : vector<4x8x8xf32> to vector<4x1x8x8xf32>
      %325 = vector.shape_cast %324 : vector<4x1x8x8xf32> to vector<4x1x8x8xf32>
      %326 = vector.broadcast %325 : vector<4x1x8x8xf32> to vector<4x2x8x8xf32>
      %327 = vector.shape_cast %326 : vector<4x2x8x8xf32> to vector<8x8x8xf32>
      %328 = tpu.iota {dimensions = array<i32: 0>} : vector<8x8x8xi32>
      %c2_i32_293 = arith.constant 2 : i32
      %c0_i32_294 = arith.constant 0 : i32
      %329 = arith.cmpi eq, %c2_i32_293, %c0_i32_294 : i32
      %c1_i32_295 = arith.constant 1 : i32
      %330 = arith.select %329, %c1_i32_295, %c2_i32_293 : i32
      %331 = vector.broadcast %330 : i32 to vector<8x8x8xi32>
      %332 = arith.remsi %328, %331 : vector<8x8x8xi32>
      %c0_i32_296 = arith.constant 0 : i32
      %333 = vector.broadcast %c0_i32_296 : i32 to vector<8x8x8xi32>
      %334 = arith.cmpi ne, %332, %333 : vector<8x8x8xi32>
      %c0_i32_297 = arith.constant 0 : i32
      %335 = vector.broadcast %c0_i32_297 : i32 to vector<8x8x8xi32>
      %336 = arith.cmpi slt, %332, %335 : vector<8x8x8xi32>
      %c0_i32_298 = arith.constant 0 : i32
      %337 = arith.cmpi slt, %330, %c0_i32_298 : i32
      %338 = vector.broadcast %337 : i1 to vector<8x8x8xi1>
      %339 = vector.broadcast %338 : vector<8x8x8xi1> to vector<8x8x8xi1>
      %340 = arith.xori %336, %339 : vector<8x8x8xi1>
      %341 = arith.andi %340, %334 : vector<8x8x8xi1>
      %342 = vector.broadcast %330 : i32 to vector<8x8x8xi32>
      %343 = arith.addi %332, %342 : vector<8x8x8xi32>
      %344 = arith.select %341, %343, %332 : vector<8x8x8xi1>, vector<8x8x8xi32>
      %c0_i32_299 = arith.constant 0 : i32
      %345 = vector.broadcast %c0_i32_299 : i32 to vector<8x8x8xi32>
      %346 = arith.cmpi eq, %344, %345 : vector<8x8x8xi32>
      %347 = arith.select %346, %323, %327 : vector<8x8x8xi1>, vector<8x8x8xf32>
      %c2_i32_300 = arith.constant 2 : i32
      %348 = arith.muli %c2_i32_300, %arg12 : i32
      %c1_i32_301 = arith.constant 1 : i32
      %349 = arith.addi %c1_i32_301, %348 : i32
      %c0_i32_302 = arith.constant 0 : i32
      %350 = arith.addi %349, %c0_i32_302 : i32
      %351 = arith.index_cast %350 : i32 to index
      %c1_303 = arith.constant 1 : index
      %c1_304 = arith.constant 1 : index
      %c0_305 = arith.constant 0 : index
      %352 = vector.load %arg9[%351, %c1_303, %c1_304, %c0_305] : memref<10x10x10x16xf32, #tpu.memory_space<vmem>>, vector<1x8x8x8xf32>
      %353 = vector.shape_cast %352 : vector<1x8x8x8xf32> to vector<8x8x8xf32>
      %354 = vector.shape_cast %347 : vector<8x8x8xf32> to vector<1x8x8x8xf32>
      tpu.vector_store %arg9[%351, %c1_303, %c1_304, %c0_305], %354 {strides = array<i32>} : memref<10x10x10x16xf32, #tpu.memory_space<vmem>>, vector<1x8x8x8xf32>,
      %c1_i32_306 = arith.constant 1 : i32
      %355 = arith.addi %arg12, %c1_i32_306 : i32
      %c0_i32_307 = arith.constant 0 : i32
      %356 = arith.addi %355, %c0_i32_307 : i32
      %357 = arith.index_cast %356 : i32 to index
      %c0_308 = arith.constant 0 : index
      %c0_309 = arith.constant 0 : index
      %c0_310 = arith.constant 0 : index
      %358 = vector.load %arg8[%357, %c0_308, %c0_309, %c0_310] : memref<6x6x6x16xf32, #tpu.memory_space<vmem>>, vector<1x4x4x16xf32>
      %359 = vector.shape_cast %358 : vector<1x4x4x16xf32> to vector<4x4x16xf32>
      %360 = vector.shape_cast %359 : vector<4x4x16xf32> to vector<16x16xf32>
      %c0_311 = arith.constant 0 : index
      %c0_312 = arith.constant 0 : index
      %361 = vector.load %arg10[%c0_311, %c0_312] : memref<16x128xf32, #tpu.memory_space<vmem>>, vector<16x16xf32>
      tpu.vector_store %arg10[%c0_311, %c0_312], %360 {strides = array<i32>} : memref<16x128xf32, #tpu.memory_space<vmem>>, vector<16x16xf32>,
      %c1_i32_313 = arith.constant 1 : i32
      %362 = arith.addi %arg12, %c1_i32_313 : i32
      %c0_i32_314 = arith.constant 0 : i32
      %363 = arith.addi %362, %c0_i32_314 : i32
      %364 = arith.index_cast %363 : i32 to index
      %c0_315 = arith.constant 0 : index
      %c1_316 = arith.constant 1 : index
      %c0_317 = arith.constant 0 : index
      %365 = vector.load %arg8[%364, %c0_315, %c1_316, %c0_317] : memref<6x6x6x16xf32, #tpu.memory_space<vmem>>, vector<1x4x4x16xf32>
      %366 = vector.shape_cast %365 : vector<1x4x4x16xf32> to vector<4x4x16xf32>
      %367 = vector.shape_cast %366 : vector<4x4x16xf32> to vector<16x16xf32>
      %c0_318 = arith.constant 0 : index
      %c16_319 = arith.constant 16 : index
      %368 = vector.load %arg10[%c0_318, %c16_319] : memref<16x128xf32, #tpu.memory_space<vmem>>, vector<16x16xf32>
      tpu.vector_store %arg10[%c0_318, %c16_319], %367 {strides = array<i32>} : memref<16x128xf32, #tpu.memory_space<vmem>>, vector<16x16xf32>,
      %c1_i32_320 = arith.constant 1 : i32
      %369 = arith.addi %arg12, %c1_i32_320 : i32
      %c0_i32_321 = arith.constant 0 : i32
      %370 = arith.addi %369, %c0_i32_321 : i32
      %371 = arith.index_cast %370 : i32 to index
      %c1_322 = arith.constant 1 : index
      %c0_323 = arith.constant 0 : index
      %c0_324 = arith.constant 0 : index
      %372 = vector.load %arg8[%371, %c1_322, %c0_323, %c0_324] : memref<6x6x6x16xf32, #tpu.memory_space<vmem>>, vector<1x4x4x16xf32>
      %373 = vector.shape_cast %372 : vector<1x4x4x16xf32> to vector<4x4x16xf32>
      %374 = vector.shape_cast %373 : vector<4x4x16xf32> to vector<16x16xf32>
      %c0_325 = arith.constant 0 : index
      %c32_326 = arith.constant 32 : index
      %375 = vector.load %arg10[%c0_325, %c32_326] : memref<16x128xf32, #tpu.memory_space<vmem>>, vector<16x16xf32>
      tpu.vector_store %arg10[%c0_325, %c32_326], %374 {strides = array<i32>} : memref<16x128xf32, #tpu.memory_space<vmem>>, vector<16x16xf32>,
      %c1_i32_327 = arith.constant 1 : i32
      %376 = arith.addi %arg12, %c1_i32_327 : i32
      %c0_i32_328 = arith.constant 0 : i32
      %377 = arith.addi %376, %c0_i32_328 : i32
      %378 = arith.index_cast %377 : i32 to index
      %c1_329 = arith.constant 1 : index
      %c1_330 = arith.constant 1 : index
      %c0_331 = arith.constant 0 : index
      %379 = vector.load %arg8[%378, %c1_329, %c1_330, %c0_331] : memref<6x6x6x16xf32, #tpu.memory_space<vmem>>, vector<1x4x4x16xf32>
      %380 = vector.shape_cast %379 : vector<1x4x4x16xf32> to vector<4x4x16xf32>
      %381 = vector.shape_cast %380 : vector<4x4x16xf32> to vector<16x16xf32>
      %c0_332 = arith.constant 0 : index
      %c48_333 = arith.constant 48 : index
      %382 = vector.load %arg10[%c0_332, %c48_333] : memref<16x128xf32, #tpu.memory_space<vmem>>, vector<16x16xf32>
      tpu.vector_store %arg10[%c0_332, %c48_333], %381 {strides = array<i32>} : memref<16x128xf32, #tpu.memory_space<vmem>>, vector<16x16xf32>,
      %c1_i32_334 = arith.constant 1 : i32
      %383 = arith.addi %arg12, %c1_i32_334 : i32
      %c1_i32_335 = arith.constant 1 : i32
      %384 = arith.addi %383, %c1_i32_335 : i32
      %385 = arith.index_cast %384 : i32 to index
      %c0_336 = arith.constant 0 : index
      %c0_337 = arith.constant 0 : index
      %c0_338 = arith.constant 0 : index
      %386 = vector.load %arg8[%385, %c0_336, %c0_337, %c0_338] : memref<6x6x6x16xf32, #tpu.memory_space<vmem>>, vector<1x4x4x16xf32>
      %387 = vector.shape_cast %386 : vector<1x4x4x16xf32> to vector<4x4x16xf32>
      %388 = vector.shape_cast %387 : vector<4x4x16xf32> to vector<16x16xf32>
      %c0_339 = arith.constant 0 : index
      %c64_340 = arith.constant 64 : index
      %389 = vector.load %arg10[%c0_339, %c64_340] : memref<16x128xf32, #tpu.memory_space<vmem>>, vector<16x16xf32>
      tpu.vector_store %arg10[%c0_339, %c64_340], %388 {strides = array<i32>} : memref<16x128xf32, #tpu.memory_space<vmem>>, vector<16x16xf32>,
      %c1_i32_341 = arith.constant 1 : i32
      %390 = arith.addi %arg12, %c1_i32_341 : i32
      %c1_i32_342 = arith.constant 1 : i32
      %391 = arith.addi %390, %c1_i32_342 : i32
      %392 = arith.index_cast %391 : i32 to index
      %c0_343 = arith.constant 0 : index
      %c1_344 = arith.constant 1 : index
      %c0_345 = arith.constant 0 : index
      %393 = vector.load %arg8[%392, %c0_343, %c1_344, %c0_345] : memref<6x6x6x16xf32, #tpu.memory_space<vmem>>, vector<1x4x4x16xf32>
      %394 = vector.shape_cast %393 : vector<1x4x4x16xf32> to vector<4x4x16xf32>
      %395 = vector.shape_cast %394 : vector<4x4x16xf32> to vector<16x16xf32>
      %c0_346 = arith.constant 0 : index
      %c80_347 = arith.constant 80 : index
      %396 = vector.load %arg10[%c0_346, %c80_347] : memref<16x128xf32, #tpu.memory_space<vmem>>, vector<16x16xf32>
      tpu.vector_store %arg10[%c0_346, %c80_347], %395 {strides = array<i32>} : memref<16x128xf32, #tpu.memory_space<vmem>>, vector<16x16xf32>,
      %c1_i32_348 = arith.constant 1 : i32
      %397 = arith.addi %arg12, %c1_i32_348 : i32
      %c1_i32_349 = arith.constant 1 : i32
      %398 = arith.addi %397, %c1_i32_349 : i32
      %399 = arith.index_cast %398 : i32 to index
      %c1_350 = arith.constant 1 : index
      %c0_351 = arith.constant 0 : index
      %c0_352 = arith.constant 0 : index
      %400 = vector.load %arg8[%399, %c1_350, %c0_351, %c0_352] : memref<6x6x6x16xf32, #tpu.memory_space<vmem>>, vector<1x4x4x16xf32>
      %401 = vector.shape_cast %400 : vector<1x4x4x16xf32> to vector<4x4x16xf32>
      %402 = vector.shape_cast %401 : vector<4x4x16xf32> to vector<16x16xf32>
      %c0_353 = arith.constant 0 : index
      %c96_354 = arith.constant 96 : index
      %403 = vector.load %arg10[%c0_353, %c96_354] : memref<16x128xf32, #tpu.memory_space<vmem>>, vector<16x16xf32>
      tpu.vector_store %arg10[%c0_353, %c96_354], %402 {strides = array<i32>} : memref<16x128xf32, #tpu.memory_space<vmem>>, vector<16x16xf32>,
      %c1_i32_355 = arith.constant 1 : i32
      %404 = arith.addi %arg12, %c1_i32_355 : i32
      %c1_i32_356 = arith.constant 1 : i32
      %405 = arith.addi %404, %c1_i32_356 : i32
      %406 = arith.index_cast %405 : i32 to index
      %c1_357 = arith.constant 1 : index
      %c1_358 = arith.constant 1 : index
      %c0_359 = arith.constant 0 : index
      %407 = vector.load %arg8[%406, %c1_357, %c1_358, %c0_359] : memref<6x6x6x16xf32, #tpu.memory_space<vmem>>, vector<1x4x4x16xf32>
      %408 = vector.shape_cast %407 : vector<1x4x4x16xf32> to vector<4x4x16xf32>
      %409 = vector.shape_cast %408 : vector<4x4x16xf32> to vector<16x16xf32>
      %c0_360 = arith.constant 0 : index
      %c112_361 = arith.constant 112 : index
      %410 = vector.load %arg10[%c0_360, %c112_361] : memref<16x128xf32, #tpu.memory_space<vmem>>, vector<16x16xf32>
      tpu.vector_store %arg10[%c0_360, %c112_361], %409 {strides = array<i32>} : memref<16x128xf32, #tpu.memory_space<vmem>>, vector<16x16xf32>,
      %c0_362 = arith.constant 0 : index
      %c0_363 = arith.constant 0 : index
      %411 = vector.load %arg10[%c0_362, %c0_363] : memref<16x128xf32, #tpu.memory_space<vmem>>, vector<16x128xf32>
      %c1_364 = arith.constant 1 : index
      %c0_365 = arith.constant 0 : index
      %c0_366 = arith.constant 0 : index
      %c0_367 = arith.constant 0 : index
      %c0_368 = arith.constant 0 : index
      %412 = vector.load %arg3[%c1_364, %c0_365, %c0_366, %c0_367, %c0_368] : memref<2x2x2x128x8xf32, #tpu.memory_space<vmem>>, vector<1x1x1x128x8xf32>
      %413 = vector.shape_cast %412 : vector<1x1x1x128x8xf32> to vector<128x8xf32>
      %cst_369 = arith.constant dense<0.000000e+00> : vector<16x8xf32>
      %414 = tpu.matmul %411, %413, %cst_369 {dimension_numbers = #tpu.dot_dimension_numbers<[1], [0], [0], [1], [0, 0, 1, 1], [], []>} : vector<16x128xf32>, vector<128x8xf32>, vector<16x8xf32> -> vector<16x8xf32>
      %415 = arith.addf %414, %12 : vector<16x8xf32>
      %c1_i32_370 = arith.constant 1 : i32
      %416 = arith.addi %arg12, %c1_i32_370 : i32
      %c0_i32_371 = arith.constant 0 : i32
      %417 = arith.addi %416, %c0_i32_371 : i32
      %418 = arith.index_cast %417 : i32 to index
      %c0_372 = arith.constant 0 : index
      %c1_373 = arith.constant 1 : index
      %c0_374 = arith.constant 0 : index
      %419 = vector.load %arg8[%418, %c0_372, %c1_373, %c0_374] : memref<6x6x6x16xf32, #tpu.memory_space<vmem>>, vector<1x4x4x16xf32>
      %420 = vector.shape_cast %419 : vector<1x4x4x16xf32> to vector<4x4x16xf32>
      %421 = vector.shape_cast %420 : vector<4x4x16xf32> to vector<16x16xf32>
      %c0_375 = arith.constant 0 : index
      %c0_376 = arith.constant 0 : index
      %422 = vector.load %arg10[%c0_375, %c0_376] : memref<16x128xf32, #tpu.memory_space<vmem>>, vector<16x16xf32>
      tpu.vector_store %arg10[%c0_375, %c0_376], %421 {strides = array<i32>} : memref<16x128xf32, #tpu.memory_space<vmem>>, vector<16x16xf32>,
      %c1_i32_377 = arith.constant 1 : i32
      %423 = arith.addi %arg12, %c1_i32_377 : i32
      %c0_i32_378 = arith.constant 0 : i32
      %424 = arith.addi %423, %c0_i32_378 : i32
      %425 = arith.index_cast %424 : i32 to index
      %c0_379 = arith.constant 0 : index
      %c2_380 = arith.constant 2 : index
      %c0_381 = arith.constant 0 : index
      %426 = vector.load %arg8[%425, %c0_379, %c2_380, %c0_381] : memref<6x6x6x16xf32, #tpu.memory_space<vmem>>, vector<1x4x4x16xf32>
      %427 = vector.shape_cast %426 : vector<1x4x4x16xf32> to vector<4x4x16xf32>
      %428 = vector.shape_cast %427 : vector<4x4x16xf32> to vector<16x16xf32>
      %c0_382 = arith.constant 0 : index
      %c16_383 = arith.constant 16 : index
      %429 = vector.load %arg10[%c0_382, %c16_383] : memref<16x128xf32, #tpu.memory_space<vmem>>, vector<16x16xf32>
      tpu.vector_store %arg10[%c0_382, %c16_383], %428 {strides = array<i32>} : memref<16x128xf32, #tpu.memory_space<vmem>>, vector<16x16xf32>,
      %c1_i32_384 = arith.constant 1 : i32
      %430 = arith.addi %arg12, %c1_i32_384 : i32
      %c0_i32_385 = arith.constant 0 : i32
      %431 = arith.addi %430, %c0_i32_385 : i32
      %432 = arith.index_cast %431 : i32 to index
      %c1_386 = arith.constant 1 : index
      %c1_387 = arith.constant 1 : index
      %c0_388 = arith.constant 0 : index
      %433 = vector.load %arg8[%432, %c1_386, %c1_387, %c0_388] : memref<6x6x6x16xf32, #tpu.memory_space<vmem>>, vector<1x4x4x16xf32>
      %434 = vector.shape_cast %433 : vector<1x4x4x16xf32> to vector<4x4x16xf32>
      %435 = vector.shape_cast %434 : vector<4x4x16xf32> to vector<16x16xf32>
      %c0_389 = arith.constant 0 : index
      %c32_390 = arith.constant 32 : index
      %436 = vector.load %arg10[%c0_389, %c32_390] : memref<16x128xf32, #tpu.memory_space<vmem>>, vector<16x16xf32>
      tpu.vector_store %arg10[%c0_389, %c32_390], %435 {strides = array<i32>} : memref<16x128xf32, #tpu.memory_space<vmem>>, vector<16x16xf32>,
      %c1_i32_391 = arith.constant 1 : i32
      %437 = arith.addi %arg12, %c1_i32_391 : i32
      %c0_i32_392 = arith.constant 0 : i32
      %438 = arith.addi %437, %c0_i32_392 : i32
      %439 = arith.index_cast %438 : i32 to index
      %c1_393 = arith.constant 1 : index
      %c2_394 = arith.constant 2 : index
      %c0_395 = arith.constant 0 : index
      %440 = vector.load %arg8[%439, %c1_393, %c2_394, %c0_395] : memref<6x6x6x16xf32, #tpu.memory_space<vmem>>, vector<1x4x4x16xf32>
      %441 = vector.shape_cast %440 : vector<1x4x4x16xf32> to vector<4x4x16xf32>
      %442 = vector.shape_cast %441 : vector<4x4x16xf32> to vector<16x16xf32>
      %c0_396 = arith.constant 0 : index
      %c48_397 = arith.constant 48 : index
      %443 = vector.load %arg10[%c0_396, %c48_397] : memref<16x128xf32, #tpu.memory_space<vmem>>, vector<16x16xf32>
      tpu.vector_store %arg10[%c0_396, %c48_397], %442 {strides = array<i32>} : memref<16x128xf32, #tpu.memory_space<vmem>>, vector<16x16xf32>,
      %c1_i32_398 = arith.constant 1 : i32
      %444 = arith.addi %arg12, %c1_i32_398 : i32
      %c1_i32_399 = arith.constant 1 : i32
      %445 = arith.addi %444, %c1_i32_399 : i32
      %446 = arith.index_cast %445 : i32 to index
      %c0_400 = arith.constant 0 : index
      %c1_401 = arith.constant 1 : index
      %c0_402 = arith.constant 0 : index
      %447 = vector.load %arg8[%446, %c0_400, %c1_401, %c0_402] : memref<6x6x6x16xf32, #tpu.memory_space<vmem>>, vector<1x4x4x16xf32>
      %448 = vector.shape_cast %447 : vector<1x4x4x16xf32> to vector<4x4x16xf32>
      %449 = vector.shape_cast %448 : vector<4x4x16xf32> to vector<16x16xf32>
      %c0_403 = arith.constant 0 : index
      %c64_404 = arith.constant 64 : index
      %450 = vector.load %arg10[%c0_403, %c64_404] : memref<16x128xf32, #tpu.memory_space<vmem>>, vector<16x16xf32>
      tpu.vector_store %arg10[%c0_403, %c64_404], %449 {strides = array<i32>} : memref<16x128xf32, #tpu.memory_space<vmem>>, vector<16x16xf32>,
      %c1_i32_405 = arith.constant 1 : i32
      %451 = arith.addi %arg12, %c1_i32_405 : i32
      %c1_i32_406 = arith.constant 1 : i32
      %452 = arith.addi %451, %c1_i32_406 : i32
      %453 = arith.index_cast %452 : i32 to index
      %c0_407 = arith.constant 0 : index
      %c2_408 = arith.constant 2 : index
      %c0_409 = arith.constant 0 : index
      %454 = vector.load %arg8[%453, %c0_407, %c2_408, %c0_409] : memref<6x6x6x16xf32, #tpu.memory_space<vmem>>, vector<1x4x4x16xf32>
      %455 = vector.shape_cast %454 : vector<1x4x4x16xf32> to vector<4x4x16xf32>
      %456 = vector.shape_cast %455 : vector<4x4x16xf32> to vector<16x16xf32>
      %c0_410 = arith.constant 0 : index
      %c80_411 = arith.constant 80 : index
      %457 = vector.load %arg10[%c0_410, %c80_411] : memref<16x128xf32, #tpu.memory_space<vmem>>, vector<16x16xf32>
      tpu.vector_store %arg10[%c0_410, %c80_411], %456 {strides = array<i32>} : memref<16x128xf32, #tpu.memory_space<vmem>>, vector<16x16xf32>,
      %c1_i32_412 = arith.constant 1 : i32
      %458 = arith.addi %arg12, %c1_i32_412 : i32
      %c1_i32_413 = arith.constant 1 : i32
      %459 = arith.addi %458, %c1_i32_413 : i32
      %460 = arith.index_cast %459 : i32 to index
      %c1_414 = arith.constant 1 : index
      %c1_415 = arith.constant 1 : index
      %c0_416 = arith.constant 0 : index
      %461 = vector.load %arg8[%460, %c1_414, %c1_415, %c0_416] : memref<6x6x6x16xf32, #tpu.memory_space<vmem>>, vector<1x4x4x16xf32>
      %462 = vector.shape_cast %461 : vector<1x4x4x16xf32> to vector<4x4x16xf32>
      %463 = vector.shape_cast %462 : vector<4x4x16xf32> to vector<16x16xf32>
      %c0_417 = arith.constant 0 : index
      %c96_418 = arith.constant 96 : index
      %464 = vector.load %arg10[%c0_417, %c96_418] : memref<16x128xf32, #tpu.memory_space<vmem>>, vector<16x16xf32>
      tpu.vector_store %arg10[%c0_417, %c96_418], %463 {strides = array<i32>} : memref<16x128xf32, #tpu.memory_space<vmem>>, vector<16x16xf32>,
      %c1_i32_419 = arith.constant 1 : i32
      %465 = arith.addi %arg12, %c1_i32_419 : i32
      %c1_i32_420 = arith.constant 1 : i32
      %466 = arith.addi %465, %c1_i32_420 : i32
      %467 = arith.index_cast %466 : i32 to index
      %c1_421 = arith.constant 1 : index
      %c2_422 = arith.constant 2 : index
      %c0_423 = arith.constant 0 : index
      %468 = vector.load %arg8[%467, %c1_421, %c2_422, %c0_423] : memref<6x6x6x16xf32, #tpu.memory_space<vmem>>, vector<1x4x4x16xf32>
      %469 = vector.shape_cast %468 : vector<1x4x4x16xf32> to vector<4x4x16xf32>
      %470 = vector.shape_cast %469 : vector<4x4x16xf32> to vector<16x16xf32>
      %c0_424 = arith.constant 0 : index
      %c112_425 = arith.constant 112 : index
      %471 = vector.load %arg10[%c0_424, %c112_425] : memref<16x128xf32, #tpu.memory_space<vmem>>, vector<16x16xf32>
      tpu.vector_store %arg10[%c0_424, %c112_425], %470 {strides = array<i32>} : memref<16x128xf32, #tpu.memory_space<vmem>>, vector<16x16xf32>,
      %c0_426 = arith.constant 0 : index
      %c0_427 = arith.constant 0 : index
      %472 = vector.load %arg10[%c0_426, %c0_427] : memref<16x128xf32, #tpu.memory_space<vmem>>, vector<16x128xf32>
      %c1_428 = arith.constant 1 : index
      %c0_429 = arith.constant 0 : index
      %c1_430 = arith.constant 1 : index
      %c0_431 = arith.constant 0 : index
      %c0_432 = arith.constant 0 : index
      %473 = vector.load %arg3[%c1_428, %c0_429, %c1_430, %c0_431, %c0_432] : memref<2x2x2x128x8xf32, #tpu.memory_space<vmem>>, vector<1x1x1x128x8xf32>
      %474 = vector.shape_cast %473 : vector<1x1x1x128x8xf32> to vector<128x8xf32>
      %cst_433 = arith.constant dense<0.000000e+00> : vector<16x8xf32>
      %475 = tpu.matmul %472, %474, %cst_433 {dimension_numbers = #tpu.dot_dimension_numbers<[1], [0], [0], [1], [0, 0, 1, 1], [], []>} : vector<16x128xf32>, vector<128x8xf32>, vector<16x8xf32> -> vector<16x8xf32>
      %476 = arith.addf %475, %12 : vector<16x8xf32>
      %477 = vector.shape_cast %415 : vector<16x8xf32> to vector<16x1x8xf32>
      %478 = vector.shape_cast %477 : vector<16x1x8xf32> to vector<16x1x8xf32>
      %479 = vector.broadcast %478 : vector<16x1x8xf32> to vector<16x2x8xf32>
      %480 = vector.shape_cast %479 : vector<16x2x8xf32> to vector<32x8xf32>
      %481 = vector.shape_cast %476 : vector<16x8xf32> to vector<16x1x8xf32>
      %482 = vector.shape_cast %481 : vector<16x1x8xf32> to vector<16x1x8xf32>
      %483 = vector.broadcast %482 : vector<16x1x8xf32> to vector<16x2x8xf32>
      %484 = vector.shape_cast %483 : vector<16x2x8xf32> to vector<32x8xf32>
      %485 = tpu.iota {dimensions = array<i32: 0>} : vector<32x8xi32>
      %c2_i32_434 = arith.constant 2 : i32
      %c0_i32_435 = arith.constant 0 : i32
      %486 = arith.cmpi eq, %c2_i32_434, %c0_i32_435 : i32
      %c1_i32_436 = arith.constant 1 : i32
      %487 = arith.select %486, %c1_i32_436, %c2_i32_434 : i32
      %488 = vector.broadcast %487 : i32 to vector<32x8xi32>
      %489 = arith.remsi %485, %488 : vector<32x8xi32>
      %c0_i32_437 = arith.constant 0 : i32
      %490 = vector.broadcast %c0_i32_437 : i32 to vector<32x8xi32>
      %491 = arith.cmpi ne, %489, %490 : vector<32x8xi32>
      %c0_i32_438 = arith.constant 0 : i32
      %492 = vector.broadcast %c0_i32_438 : i32 to vector<32x8xi32>
      %493 = arith.cmpi slt, %489, %492 : vector<32x8xi32>
      %c0_i32_439 = arith.constant 0 : i32
      %494 = arith.cmpi slt, %487, %c0_i32_439 : i32
      %495 = vector.broadcast %494 : i1 to vector<32x8xi1>
      %496 = vector.broadcast %495 : vector<32x8xi1> to vector<32x8xi1>
      %497 = arith.xori %493, %496 : vector<32x8xi1>
      %498 = arith.andi %497, %491 : vector<32x8xi1>
      %499 = vector.broadcast %487 : i32 to vector<32x8xi32>
      %500 = arith.addi %489, %499 : vector<32x8xi32>
      %501 = arith.select %498, %500, %489 : vector<32x8xi1>, vector<32x8xi32>
      %c0_i32_440 = arith.constant 0 : i32
      %502 = vector.broadcast %c0_i32_440 : i32 to vector<32x8xi32>
      %503 = arith.cmpi eq, %501, %502 : vector<32x8xi32>
      %504 = arith.select %503, %480, %484 : vector<32x8xi1>, vector<32x8xf32>
      %505 = vector.shape_cast %504 : vector<32x8xf32> to vector<4x8x8xf32>
      %c1_i32_441 = arith.constant 1 : i32
      %506 = arith.addi %arg12, %c1_i32_441 : i32
      %c0_i32_442 = arith.constant 0 : i32
      %507 = arith.addi %506, %c0_i32_442 : i32
      %508 = arith.index_cast %507 : i32 to index
      %c1_443 = arith.constant 1 : index
      %c0_444 = arith.constant 0 : index
      %c0_445 = arith.constant 0 : index
      %509 = vector.load %arg8[%508, %c1_443, %c0_444, %c0_445] : memref<6x6x6x16xf32, #tpu.memory_space<vmem>>, vector<1x4x4x16xf32>
      %510 = vector.shape_cast %509 : vector<1x4x4x16xf32> to vector<4x4x16xf32>
      %511 = vector.shape_cast %510 : vector<4x4x16xf32> to vector<16x16xf32>
      %c0_446 = arith.constant 0 : index
      %c0_447 = arith.constant 0 : index
      %512 = vector.load %arg10[%c0_446, %c0_447] : memref<16x128xf32, #tpu.memory_space<vmem>>, vector<16x16xf32>
      tpu.vector_store %arg10[%c0_446, %c0_447], %511 {strides = array<i32>} : memref<16x128xf32, #tpu.memory_space<vmem>>, vector<16x16xf32>,
      %c1_i32_448 = arith.constant 1 : i32
      %513 = arith.addi %arg12, %c1_i32_448 : i32
      %c0_i32_449 = arith.constant 0 : i32
      %514 = arith.addi %513, %c0_i32_449 : i32
      %515 = arith.index_cast %514 : i32 to index
      %c1_450 = arith.constant 1 : index
      %c1_451 = arith.constant 1 : index
      %c0_452 = arith.constant 0 : index
      %516 = vector.load %arg8[%515, %c1_450, %c1_451, %c0_452] : memref<6x6x6x16xf32, #tpu.memory_space<vmem>>, vector<1x4x4x16xf32>
      %517 = vector.shape_cast %516 : vector<1x4x4x16xf32> to vector<4x4x16xf32>
      %518 = vector.shape_cast %517 : vector<4x4x16xf32> to vector<16x16xf32>
      %c0_453 = arith.constant 0 : index
      %c16_454 = arith.constant 16 : index
      %519 = vector.load %arg10[%c0_453, %c16_454] : memref<16x128xf32, #tpu.memory_space<vmem>>, vector<16x16xf32>
      tpu.vector_store %arg10[%c0_453, %c16_454], %518 {strides = array<i32>} : memref<16x128xf32, #tpu.memory_space<vmem>>, vector<16x16xf32>,
      %c1_i32_455 = arith.constant 1 : i32
      %520 = arith.addi %arg12, %c1_i32_455 : i32
      %c0_i32_456 = arith.constant 0 : i32
      %521 = arith.addi %520, %c0_i32_456 : i32
      %522 = arith.index_cast %521 : i32 to index
      %c2_457 = arith.constant 2 : index
      %c0_458 = arith.constant 0 : index
      %c0_459 = arith.constant 0 : index
      %523 = vector.load %arg8[%522, %c2_457, %c0_458, %c0_459] : memref<6x6x6x16xf32, #tpu.memory_space<vmem>>, vector<1x4x4x16xf32>
      %524 = vector.shape_cast %523 : vector<1x4x4x16xf32> to vector<4x4x16xf32>
      %525 = vector.shape_cast %524 : vector<4x4x16xf32> to vector<16x16xf32>
      %c0_460 = arith.constant 0 : index
      %c32_461 = arith.constant 32 : index
      %526 = vector.load %arg10[%c0_460, %c32_461] : memref<16x128xf32, #tpu.memory_space<vmem>>, vector<16x16xf32>
      tpu.vector_store %arg10[%c0_460, %c32_461], %525 {strides = array<i32>} : memref<16x128xf32, #tpu.memory_space<vmem>>, vector<16x16xf32>,
      %c1_i32_462 = arith.constant 1 : i32
      %527 = arith.addi %arg12, %c1_i32_462 : i32
      %c0_i32_463 = arith.constant 0 : i32
      %528 = arith.addi %527, %c0_i32_463 : i32
      %529 = arith.index_cast %528 : i32 to index
      %c2_464 = arith.constant 2 : index
      %c1_465 = arith.constant 1 : index
      %c0_466 = arith.constant 0 : index
      %530 = vector.load %arg8[%529, %c2_464, %c1_465, %c0_466] : memref<6x6x6x16xf32, #tpu.memory_space<vmem>>, vector<1x4x4x16xf32>
      %531 = vector.shape_cast %530 : vector<1x4x4x16xf32> to vector<4x4x16xf32>
      %532 = vector.shape_cast %531 : vector<4x4x16xf32> to vector<16x16xf32>
      %c0_467 = arith.constant 0 : index
      %c48_468 = arith.constant 48 : index
      %533 = vector.load %arg10[%c0_467, %c48_468] : memref<16x128xf32, #tpu.memory_space<vmem>>, vector<16x16xf32>
      tpu.vector_store %arg10[%c0_467, %c48_468], %532 {strides = array<i32>} : memref<16x128xf32, #tpu.memory_space<vmem>>, vector<16x16xf32>,
      %c1_i32_469 = arith.constant 1 : i32
      %534 = arith.addi %arg12, %c1_i32_469 : i32
      %c1_i32_470 = arith.constant 1 : i32
      %535 = arith.addi %534, %c1_i32_470 : i32
      %536 = arith.index_cast %535 : i32 to index
      %c1_471 = arith.constant 1 : index
      %c0_472 = arith.constant 0 : index
      %c0_473 = arith.constant 0 : index
      %537 = vector.load %arg8[%536, %c1_471, %c0_472, %c0_473] : memref<6x6x6x16xf32, #tpu.memory_space<vmem>>, vector<1x4x4x16xf32>
      %538 = vector.shape_cast %537 : vector<1x4x4x16xf32> to vector<4x4x16xf32>
      %539 = vector.shape_cast %538 : vector<4x4x16xf32> to vector<16x16xf32>
      %c0_474 = arith.constant 0 : index
      %c64_475 = arith.constant 64 : index
      %540 = vector.load %arg10[%c0_474, %c64_475] : memref<16x128xf32, #tpu.memory_space<vmem>>, vector<16x16xf32>
      tpu.vector_store %arg10[%c0_474, %c64_475], %539 {strides = array<i32>} : memref<16x128xf32, #tpu.memory_space<vmem>>, vector<16x16xf32>,
      %c1_i32_476 = arith.constant 1 : i32
      %541 = arith.addi %arg12, %c1_i32_476 : i32
      %c1_i32_477 = arith.constant 1 : i32
      %542 = arith.addi %541, %c1_i32_477 : i32
      %543 = arith.index_cast %542 : i32 to index
      %c1_478 = arith.constant 1 : index
      %c1_479 = arith.constant 1 : index
      %c0_480 = arith.constant 0 : index
      %544 = vector.load %arg8[%543, %c1_478, %c1_479, %c0_480] : memref<6x6x6x16xf32, #tpu.memory_space<vmem>>, vector<1x4x4x16xf32>
      %545 = vector.shape_cast %544 : vector<1x4x4x16xf32> to vector<4x4x16xf32>
      %546 = vector.shape_cast %545 : vector<4x4x16xf32> to vector<16x16xf32>
      %c0_481 = arith.constant 0 : index
      %c80_482 = arith.constant 80 : index
      %547 = vector.load %arg10[%c0_481, %c80_482] : memref<16x128xf32, #tpu.memory_space<vmem>>, vector<16x16xf32>
      tpu.vector_store %arg10[%c0_481, %c80_482], %546 {strides = array<i32>} : memref<16x128xf32, #tpu.memory_space<vmem>>, vector<16x16xf32>,
      %c1_i32_483 = arith.constant 1 : i32
      %548 = arith.addi %arg12, %c1_i32_483 : i32
      %c1_i32_484 = arith.constant 1 : i32
      %549 = arith.addi %548, %c1_i32_484 : i32
      %550 = arith.index_cast %549 : i32 to index
      %c2_485 = arith.constant 2 : index
      %c0_486 = arith.constant 0 : index
      %c0_487 = arith.constant 0 : index
      %551 = vector.load %arg8[%550, %c2_485, %c0_486, %c0_487] : memref<6x6x6x16xf32, #tpu.memory_space<vmem>>, vector<1x4x4x16xf32>
      %552 = vector.shape_cast %551 : vector<1x4x4x16xf32> to vector<4x4x16xf32>
      %553 = vector.shape_cast %552 : vector<4x4x16xf32> to vector<16x16xf32>
      %c0_488 = arith.constant 0 : index
      %c96_489 = arith.constant 96 : index
      %554 = vector.load %arg10[%c0_488, %c96_489] : memref<16x128xf32, #tpu.memory_space<vmem>>, vector<16x16xf32>
      tpu.vector_store %arg10[%c0_488, %c96_489], %553 {strides = array<i32>} : memref<16x128xf32, #tpu.memory_space<vmem>>, vector<16x16xf32>,
      %c1_i32_490 = arith.constant 1 : i32
      %555 = arith.addi %arg12, %c1_i32_490 : i32
      %c1_i32_491 = arith.constant 1 : i32
      %556 = arith.addi %555, %c1_i32_491 : i32
      %557 = arith.index_cast %556 : i32 to index
      %c2_492 = arith.constant 2 : index
      %c1_493 = arith.constant 1 : index
      %c0_494 = arith.constant 0 : index
      %558 = vector.load %arg8[%557, %c2_492, %c1_493, %c0_494] : memref<6x6x6x16xf32, #tpu.memory_space<vmem>>, vector<1x4x4x16xf32>
      %559 = vector.shape_cast %558 : vector<1x4x4x16xf32> to vector<4x4x16xf32>
      %560 = vector.shape_cast %559 : vector<4x4x16xf32> to vector<16x16xf32>
      %c0_495 = arith.constant 0 : index
      %c112_496 = arith.constant 112 : index
      %561 = vector.load %arg10[%c0_495, %c112_496] : memref<16x128xf32, #tpu.memory_space<vmem>>, vector<16x16xf32>
      tpu.vector_store %arg10[%c0_495, %c112_496], %560 {strides = array<i32>} : memref<16x128xf32, #tpu.memory_space<vmem>>, vector<16x16xf32>,
      %c0_497 = arith.constant 0 : index
      %c0_498 = arith.constant 0 : index
      %562 = vector.load %arg10[%c0_497, %c0_498] : memref<16x128xf32, #tpu.memory_space<vmem>>, vector<16x128xf32>
      %c1_499 = arith.constant 1 : index
      %c1_500 = arith.constant 1 : index
      %c0_501 = arith.constant 0 : index
      %c0_502 = arith.constant 0 : index
      %c0_503 = arith.constant 0 : index
      %563 = vector.load %arg3[%c1_499, %c1_500, %c0_501, %c0_502, %c0_503] : memref<2x2x2x128x8xf32, #tpu.memory_space<vmem>>, vector<1x1x1x128x8xf32>
      %564 = vector.shape_cast %563 : vector<1x1x1x128x8xf32> to vector<128x8xf32>
      %cst_504 = arith.constant dense<0.000000e+00> : vector<16x8xf32>
      %565 = tpu.matmul %562, %564, %cst_504 {dimension_numbers = #tpu.dot_dimension_numbers<[1], [0], [0], [1], [0, 0, 1, 1], [], []>} : vector<16x128xf32>, vector<128x8xf32>, vector<16x8xf32> -> vector<16x8xf32>
      %566 = arith.addf %565, %12 : vector<16x8xf32>
      %c1_i32_505 = arith.constant 1 : i32
      %567 = arith.addi %arg12, %c1_i32_505 : i32
      %c0_i32_506 = arith.constant 0 : i32
      %568 = arith.addi %567, %c0_i32_506 : i32
      %569 = arith.index_cast %568 : i32 to index
      %c1_507 = arith.constant 1 : index
      %c1_508 = arith.constant 1 : index
      %c0_509 = arith.constant 0 : index
      %570 = vector.load %arg8[%569, %c1_507, %c1_508, %c0_509] : memref<6x6x6x16xf32, #tpu.memory_space<vmem>>, vector<1x4x4x16xf32>
      %571 = vector.shape_cast %570 : vector<1x4x4x16xf32> to vector<4x4x16xf32>
      %572 = vector.shape_cast %571 : vector<4x4x16xf32> to vector<16x16xf32>
      %c0_510 = arith.constant 0 : index
      %c0_511 = arith.constant 0 : index
      %573 = vector.load %arg10[%c0_510, %c0_511] : memref<16x128xf32, #tpu.memory_space<vmem>>, vector<16x16xf32>
      tpu.vector_store %arg10[%c0_510, %c0_511], %572 {strides = array<i32>} : memref<16x128xf32, #tpu.memory_space<vmem>>, vector<16x16xf32>,
      %c1_i32_512 = arith.constant 1 : i32
      %574 = arith.addi %arg12, %c1_i32_512 : i32
      %c0_i32_513 = arith.constant 0 : i32
      %575 = arith.addi %574, %c0_i32_513 : i32
      %576 = arith.index_cast %575 : i32 to index
      %c1_514 = arith.constant 1 : index
      %c2_515 = arith.constant 2 : index
      %c0_516 = arith.constant 0 : index
      %577 = vector.load %arg8[%576, %c1_514, %c2_515, %c0_516] : memref<6x6x6x16xf32, #tpu.memory_space<vmem>>, vector<1x4x4x16xf32>
      %578 = vector.shape_cast %577 : vector<1x4x4x16xf32> to vector<4x4x16xf32>
      %579 = vector.shape_cast %578 : vector<4x4x16xf32> to vector<16x16xf32>
      %c0_517 = arith.constant 0 : index
      %c16_518 = arith.constant 16 : index
      %580 = vector.load %arg10[%c0_517, %c16_518] : memref<16x128xf32, #tpu.memory_space<vmem>>, vector<16x16xf32>
      tpu.vector_store %arg10[%c0_517, %c16_518], %579 {strides = array<i32>} : memref<16x128xf32, #tpu.memory_space<vmem>>, vector<16x16xf32>,
      %c1_i32_519 = arith.constant 1 : i32
      %581 = arith.addi %arg12, %c1_i32_519 : i32
      %c0_i32_520 = arith.constant 0 : i32
      %582 = arith.addi %581, %c0_i32_520 : i32
      %583 = arith.index_cast %582 : i32 to index
      %c2_521 = arith.constant 2 : index
      %c1_522 = arith.constant 1 : index
      %c0_523 = arith.constant 0 : index
      %584 = vector.load %arg8[%583, %c2_521, %c1_522, %c0_523] : memref<6x6x6x16xf32, #tpu.memory_space<vmem>>, vector<1x4x4x16xf32>
      %585 = vector.shape_cast %584 : vector<1x4x4x16xf32> to vector<4x4x16xf32>
      %586 = vector.shape_cast %585 : vector<4x4x16xf32> to vector<16x16xf32>
      %c0_524 = arith.constant 0 : index
      %c32_525 = arith.constant 32 : index
      %587 = vector.load %arg10[%c0_524, %c32_525] : memref<16x128xf32, #tpu.memory_space<vmem>>, vector<16x16xf32>
      tpu.vector_store %arg10[%c0_524, %c32_525], %586 {strides = array<i32>} : memref<16x128xf32, #tpu.memory_space<vmem>>, vector<16x16xf32>,
      %c1_i32_526 = arith.constant 1 : i32
      %588 = arith.addi %arg12, %c1_i32_526 : i32
      %c0_i32_527 = arith.constant 0 : i32
      %589 = arith.addi %588, %c0_i32_527 : i32
      %590 = arith.index_cast %589 : i32 to index
      %c2_528 = arith.constant 2 : index
      %c2_529 = arith.constant 2 : index
      %c0_530 = arith.constant 0 : index
      %591 = vector.load %arg8[%590, %c2_528, %c2_529, %c0_530] : memref<6x6x6x16xf32, #tpu.memory_space<vmem>>, vector<1x4x4x16xf32>
      %592 = vector.shape_cast %591 : vector<1x4x4x16xf32> to vector<4x4x16xf32>
      %593 = vector.shape_cast %592 : vector<4x4x16xf32> to vector<16x16xf32>
      %c0_531 = arith.constant 0 : index
      %c48_532 = arith.constant 48 : index
      %594 = vector.load %arg10[%c0_531, %c48_532] : memref<16x128xf32, #tpu.memory_space<vmem>>, vector<16x16xf32>
      tpu.vector_store %arg10[%c0_531, %c48_532], %593 {strides = array<i32>} : memref<16x128xf32, #tpu.memory_space<vmem>>, vector<16x16xf32>,
      %c1_i32_533 = arith.constant 1 : i32
      %595 = arith.addi %arg12, %c1_i32_533 : i32
      %c1_i32_534 = arith.constant 1 : i32
      %596 = arith.addi %595, %c1_i32_534 : i32
      %597 = arith.index_cast %596 : i32 to index
      %c1_535 = arith.constant 1 : index
      %c1_536 = arith.constant 1 : index
      %c0_537 = arith.constant 0 : index
      %598 = vector.load %arg8[%597, %c1_535, %c1_536, %c0_537] : memref<6x6x6x16xf32, #tpu.memory_space<vmem>>, vector<1x4x4x16xf32>
      %599 = vector.shape_cast %598 : vector<1x4x4x16xf32> to vector<4x4x16xf32>
      %600 = vector.shape_cast %599 : vector<4x4x16xf32> to vector<16x16xf32>
      %c0_538 = arith.constant 0 : index
      %c64_539 = arith.constant 64 : index
      %601 = vector.load %arg10[%c0_538, %c64_539] : memref<16x128xf32, #tpu.memory_space<vmem>>, vector<16x16xf32>
      tpu.vector_store %arg10[%c0_538, %c64_539], %600 {strides = array<i32>} : memref<16x128xf32, #tpu.memory_space<vmem>>, vector<16x16xf32>,
      %c1_i32_540 = arith.constant 1 : i32
      %602 = arith.addi %arg12, %c1_i32_540 : i32
      %c1_i32_541 = arith.constant 1 : i32
      %603 = arith.addi %602, %c1_i32_541 : i32
      %604 = arith.index_cast %603 : i32 to index
      %c1_542 = arith.constant 1 : index
      %c2_543 = arith.constant 2 : index
      %c0_544 = arith.constant 0 : index
      %605 = vector.load %arg8[%604, %c1_542, %c2_543, %c0_544] : memref<6x6x6x16xf32, #tpu.memory_space<vmem>>, vector<1x4x4x16xf32>
      %606 = vector.shape_cast %605 : vector<1x4x4x16xf32> to vector<4x4x16xf32>
      %607 = vector.shape_cast %606 : vector<4x4x16xf32> to vector<16x16xf32>
      %c0_545 = arith.constant 0 : index
      %c80_546 = arith.constant 80 : index
      %608 = vector.load %arg10[%c0_545, %c80_546] : memref<16x128xf32, #tpu.memory_space<vmem>>, vector<16x16xf32>
      tpu.vector_store %arg10[%c0_545, %c80_546], %607 {strides = array<i32>} : memref<16x128xf32, #tpu.memory_space<vmem>>, vector<16x16xf32>,
      %c1_i32_547 = arith.constant 1 : i32
      %609 = arith.addi %arg12, %c1_i32_547 : i32
      %c1_i32_548 = arith.constant 1 : i32
      %610 = arith.addi %609, %c1_i32_548 : i32
      %611 = arith.index_cast %610 : i32 to index
      %c2_549 = arith.constant 2 : index
      %c1_550 = arith.constant 1 : index
      %c0_551 = arith.constant 0 : index
      %612 = vector.load %arg8[%611, %c2_549, %c1_550, %c0_551] : memref<6x6x6x16xf32, #tpu.memory_space<vmem>>, vector<1x4x4x16xf32>
      %613 = vector.shape_cast %612 : vector<1x4x4x16xf32> to vector<4x4x16xf32>
      %614 = vector.shape_cast %613 : vector<4x4x16xf32> to vector<16x16xf32>
      %c0_552 = arith.constant 0 : index
      %c96_553 = arith.constant 96 : index
      %615 = vector.load %arg10[%c0_552, %c96_553] : memref<16x128xf32, #tpu.memory_space<vmem>>, vector<16x16xf32>
      tpu.vector_store %arg10[%c0_552, %c96_553], %614 {strides = array<i32>} : memref<16x128xf32, #tpu.memory_space<vmem>>, vector<16x16xf32>,
      %c1_i32_554 = arith.constant 1 : i32
      %616 = arith.addi %arg12, %c1_i32_554 : i32
      %c1_i32_555 = arith.constant 1 : i32
      %617 = arith.addi %616, %c1_i32_555 : i32
      %618 = arith.index_cast %617 : i32 to index
      %c2_556 = arith.constant 2 : index
      %c2_557 = arith.constant 2 : index
      %c0_558 = arith.constant 0 : index
      %619 = vector.load %arg8[%618, %c2_556, %c2_557, %c0_558] : memref<6x6x6x16xf32, #tpu.memory_space<vmem>>, vector<1x4x4x16xf32>
      %620 = vector.shape_cast %619 : vector<1x4x4x16xf32> to vector<4x4x16xf32>
      %621 = vector.shape_cast %620 : vector<4x4x16xf32> to vector<16x16xf32>
      %c0_559 = arith.constant 0 : index
      %c112_560 = arith.constant 112 : index
      %622 = vector.load %arg10[%c0_559, %c112_560] : memref<16x128xf32, #tpu.memory_space<vmem>>, vector<16x16xf32>
      tpu.vector_store %arg10[%c0_559, %c112_560], %621 {strides = array<i32>} : memref<16x128xf32, #tpu.memory_space<vmem>>, vector<16x16xf32>,
      %c0_561 = arith.constant 0 : index
      %c0_562 = arith.constant 0 : index
      %623 = vector.load %arg10[%c0_561, %c0_562] : memref<16x128xf32, #tpu.memory_space<vmem>>, vector<16x128xf32>
      %c1_563 = arith.constant 1 : index
      %c1_564 = arith.constant 1 : index
      %c1_565 = arith.constant 1 : index
      %c0_566 = arith.constant 0 : index
      %c0_567 = arith.constant 0 : index
      %624 = vector.load %arg3[%c1_563, %c1_564, %c1_565, %c0_566, %c0_567] : memref<2x2x2x128x8xf32, #tpu.memory_space<vmem>>, vector<1x1x1x128x8xf32>
      %625 = vector.shape_cast %624 : vector<1x1x1x128x8xf32> to vector<128x8xf32>
      %cst_568 = arith.constant dense<0.000000e+00> : vector<16x8xf32>
      %626 = tpu.matmul %623, %625, %cst_568 {dimension_numbers = #tpu.dot_dimension_numbers<[1], [0], [0], [1], [0, 0, 1, 1], [], []>} : vector<16x128xf32>, vector<128x8xf32>, vector<16x8xf32> -> vector<16x8xf32>
      %627 = arith.addf %626, %12 : vector<16x8xf32>
      %628 = vector.shape_cast %566 : vector<16x8xf32> to vector<16x1x8xf32>
      %629 = vector.shape_cast %628 : vector<16x1x8xf32> to vector<16x1x8xf32>
      %630 = vector.broadcast %629 : vector<16x1x8xf32> to vector<16x2x8xf32>
      %631 = vector.shape_cast %630 : vector<16x2x8xf32> to vector<32x8xf32>
      %632 = vector.shape_cast %627 : vector<16x8xf32> to vector<16x1x8xf32>
      %633 = vector.shape_cast %632 : vector<16x1x8xf32> to vector<16x1x8xf32>
      %634 = vector.broadcast %633 : vector<16x1x8xf32> to vector<16x2x8xf32>
      %635 = vector.shape_cast %634 : vector<16x2x8xf32> to vector<32x8xf32>
      %636 = tpu.iota {dimensions = array<i32: 0>} : vector<32x8xi32>
      %c2_i32_569 = arith.constant 2 : i32
      %c0_i32_570 = arith.constant 0 : i32
      %637 = arith.cmpi eq, %c2_i32_569, %c0_i32_570 : i32
      %c1_i32_571 = arith.constant 1 : i32
      %638 = arith.select %637, %c1_i32_571, %c2_i32_569 : i32
      %639 = vector.broadcast %638 : i32 to vector<32x8xi32>
      %640 = arith.remsi %636, %639 : vector<32x8xi32>
      %c0_i32_572 = arith.constant 0 : i32
      %641 = vector.broadcast %c0_i32_572 : i32 to vector<32x8xi32>
      %642 = arith.cmpi ne, %640, %641 : vector<32x8xi32>
      %c0_i32_573 = arith.constant 0 : i32
      %643 = vector.broadcast %c0_i32_573 : i32 to vector<32x8xi32>
      %644 = arith.cmpi slt, %640, %643 : vector<32x8xi32>
      %c0_i32_574 = arith.constant 0 : i32
      %645 = arith.cmpi slt, %638, %c0_i32_574 : i32
      %646 = vector.broadcast %645 : i1 to vector<32x8xi1>
      %647 = vector.broadcast %646 : vector<32x8xi1> to vector<32x8xi1>
      %648 = arith.xori %644, %647 : vector<32x8xi1>
      %649 = arith.andi %648, %642 : vector<32x8xi1>
      %650 = vector.broadcast %638 : i32 to vector<32x8xi32>
      %651 = arith.addi %640, %650 : vector<32x8xi32>
      %652 = arith.select %649, %651, %640 : vector<32x8xi1>, vector<32x8xi32>
      %c0_i32_575 = arith.constant 0 : i32
      %653 = vector.broadcast %c0_i32_575 : i32 to vector<32x8xi32>
      %654 = arith.cmpi eq, %652, %653 : vector<32x8xi32>
      %655 = arith.select %654, %631, %635 : vector<32x8xi1>, vector<32x8xf32>
      %656 = vector.shape_cast %655 : vector<32x8xf32> to vector<4x8x8xf32>
      %657 = vector.shape_cast %505 : vector<4x8x8xf32> to vector<4x1x8x8xf32>
      %658 = vector.shape_cast %657 : vector<4x1x8x8xf32> to vector<4x1x8x8xf32>
      %659 = vector.broadcast %658 : vector<4x1x8x8xf32> to vector<4x2x8x8xf32>
      %660 = vector.shape_cast %659 : vector<4x2x8x8xf32> to vector<8x8x8xf32>
      %661 = vector.shape_cast %656 : vector<4x8x8xf32> to vector<4x1x8x8xf32>
      %662 = vector.shape_cast %661 : vector<4x1x8x8xf32> to vector<4x1x8x8xf32>
      %663 = vector.broadcast %662 : vector<4x1x8x8xf32> to vector<4x2x8x8xf32>
      %664 = vector.shape_cast %663 : vector<4x2x8x8xf32> to vector<8x8x8xf32>
      %665 = tpu.iota {dimensions = array<i32: 0>} : vector<8x8x8xi32>
      %c2_i32_576 = arith.constant 2 : i32
      %c0_i32_577 = arith.constant 0 : i32
      %666 = arith.cmpi eq, %c2_i32_576, %c0_i32_577 : i32
      %c1_i32_578 = arith.constant 1 : i32
      %667 = arith.select %666, %c1_i32_578, %c2_i32_576 : i32
      %668 = vector.broadcast %667 : i32 to vector<8x8x8xi32>
      %669 = arith.remsi %665, %668 : vector<8x8x8xi32>
      %c0_i32_579 = arith.constant 0 : i32
      %670 = vector.broadcast %c0_i32_579 : i32 to vector<8x8x8xi32>
      %671 = arith.cmpi ne, %669, %670 : vector<8x8x8xi32>
      %c0_i32_580 = arith.constant 0 : i32
      %672 = vector.broadcast %c0_i32_580 : i32 to vector<8x8x8xi32>
      %673 = arith.cmpi slt, %669, %672 : vector<8x8x8xi32>
      %c0_i32_581 = arith.constant 0 : i32
      %674 = arith.cmpi slt, %667, %c0_i32_581 : i32
      %675 = vector.broadcast %674 : i1 to vector<8x8x8xi1>
      %676 = vector.broadcast %675 : vector<8x8x8xi1> to vector<8x8x8xi1>
      %677 = arith.xori %673, %676 : vector<8x8x8xi1>
      %678 = arith.andi %677, %671 : vector<8x8x8xi1>
      %679 = vector.broadcast %667 : i32 to vector<8x8x8xi32>
      %680 = arith.addi %669, %679 : vector<8x8x8xi32>
      %681 = arith.select %678, %680, %669 : vector<8x8x8xi1>, vector<8x8x8xi32>
      %c0_i32_582 = arith.constant 0 : i32
      %682 = vector.broadcast %c0_i32_582 : i32 to vector<8x8x8xi32>
      %683 = arith.cmpi eq, %681, %682 : vector<8x8x8xi32>
      %684 = arith.select %683, %660, %664 : vector<8x8x8xi1>, vector<8x8x8xf32>
      %c2_i32_583 = arith.constant 2 : i32
      %685 = arith.muli %c2_i32_583, %arg12 : i32
      %c1_i32_584 = arith.constant 1 : i32
      %686 = arith.addi %c1_i32_584, %685 : i32
      %c1_i32_585 = arith.constant 1 : i32
      %687 = arith.addi %686, %c1_i32_585 : i32
      %688 = arith.index_cast %687 : i32 to index
      %c1_586 = arith.constant 1 : index
      %c1_587 = arith.constant 1 : index
      %c0_588 = arith.constant 0 : index
      %689 = vector.load %arg9[%688, %c1_586, %c1_587, %c0_588] : memref<10x10x10x16xf32, #tpu.memory_space<vmem>>, vector<1x8x8x8xf32>
      %690 = vector.shape_cast %689 : vector<1x8x8x8xf32> to vector<8x8x8xf32>
      %691 = vector.shape_cast %684 : vector<8x8x8xf32> to vector<1x8x8x8xf32>
      tpu.vector_store %arg9[%688, %c1_586, %c1_587, %c0_588], %691 {strides = array<i32>} : memref<10x10x10x16xf32, #tpu.memory_space<vmem>>, vector<1x8x8x8xf32>,
    }
    %c4_i32_28 = arith.constant 4 : i32
    %c0_i32_29 = arith.constant 0 : i32
    %c8_i32 = arith.constant 8 : i32
    %17 = arith.addi %c0_i32_29, %c8_i32 : i32
    %c1_i32_30 = arith.constant 1 : i32
    scf.for %arg12 = %c0_i32_29 to %17 step %c1_i32_30  : i32 {
      %c0_i32_32 = arith.constant 0 : i32
      %18 = arith.addi %arg12, %c0_i32_32 : i32
      %19 = arith.index_cast %18 : i32 to index
      %c0_33 = arith.constant 0 : index
      %c0_34 = arith.constant 0 : index
      %c0_35 = arith.constant 0 : index
      %20 = vector.load %arg9[%19, %c0_33, %c0_34, %c0_35] : memref<10x10x10x16xf32, #tpu.memory_space<vmem>>, vector<1x8x8x16xf32>
      %21 = vector.shape_cast %20 : vector<1x8x8x16xf32> to vector<8x8x16xf32>
      %22 = vector.shape_cast %21 : vector<8x8x16xf32> to vector<64x16xf32>
      %c0_36 = arith.constant 0 : index
      %c0_37 = arith.constant 0 : index
      %23 = vector.load %arg11[%c0_36, %c0_37] : memref<64x432xf32, #tpu.memory_space<vmem>>, vector<64x16xf32>
      tpu.vector_store %arg11[%c0_36, %c0_37], %22 {strides = array<i32>} : memref<64x432xf32, #tpu.memory_space<vmem>>, vector<64x16xf32>,
      %c0_i32_38 = arith.constant 0 : i32
      %24 = arith.addi %arg12, %c0_i32_38 : i32
      %25 = arith.index_cast %24 : i32 to index
      %c0_39 = arith.constant 0 : index
      %c1_40 = arith.constant 1 : index
      %c0_41 = arith.constant 0 : index
      %26 = vector.load %arg9[%25, %c0_39, %c1_40, %c0_41] : memref<10x10x10x16xf32, #tpu.memory_space<vmem>>, vector<1x8x8x16xf32>
      %27 = vector.shape_cast %26 : vector<1x8x8x16xf32> to vector<8x8x16xf32>
      %28 = vector.shape_cast %27 : vector<8x8x16xf32> to vector<64x16xf32>
      %c0_42 = arith.constant 0 : index
      %c16 = arith.constant 16 : index
      %29 = vector.load %arg11[%c0_42, %c16] : memref<64x432xf32, #tpu.memory_space<vmem>>, vector<64x16xf32>
      tpu.vector_store %arg11[%c0_42, %c16], %28 {strides = array<i32>} : memref<64x432xf32, #tpu.memory_space<vmem>>, vector<64x16xf32>,
      %c0_i32_43 = arith.constant 0 : i32
      %30 = arith.addi %arg12, %c0_i32_43 : i32
      %31 = arith.index_cast %30 : i32 to index
      %c0_44 = arith.constant 0 : index
      %c2 = arith.constant 2 : index
      %c0_45 = arith.constant 0 : index
      %32 = vector.load %arg9[%31, %c0_44, %c2, %c0_45] : memref<10x10x10x16xf32, #tpu.memory_space<vmem>>, vector<1x8x8x16xf32>
      %33 = vector.shape_cast %32 : vector<1x8x8x16xf32> to vector<8x8x16xf32>
      %34 = vector.shape_cast %33 : vector<8x8x16xf32> to vector<64x16xf32>
      %c0_46 = arith.constant 0 : index
      %c32 = arith.constant 32 : index
      %35 = vector.load %arg11[%c0_46, %c32] : memref<64x432xf32, #tpu.memory_space<vmem>>, vector<64x16xf32>
      tpu.vector_store %arg11[%c0_46, %c32], %34 {strides = array<i32>} : memref<64x432xf32, #tpu.memory_space<vmem>>, vector<64x16xf32>,
      %c0_i32_47 = arith.constant 0 : i32
      %36 = arith.addi %arg12, %c0_i32_47 : i32
      %37 = arith.index_cast %36 : i32 to index
      %c1_48 = arith.constant 1 : index
      %c0_49 = arith.constant 0 : index
      %c0_50 = arith.constant 0 : index
      %38 = vector.load %arg9[%37, %c1_48, %c0_49, %c0_50] : memref<10x10x10x16xf32, #tpu.memory_space<vmem>>, vector<1x8x8x16xf32>
      %39 = vector.shape_cast %38 : vector<1x8x8x16xf32> to vector<8x8x16xf32>
      %40 = vector.shape_cast %39 : vector<8x8x16xf32> to vector<64x16xf32>
      %c0_51 = arith.constant 0 : index
      %c48 = arith.constant 48 : index
      %41 = vector.load %arg11[%c0_51, %c48] : memref<64x432xf32, #tpu.memory_space<vmem>>, vector<64x16xf32>
      tpu.vector_store %arg11[%c0_51, %c48], %40 {strides = array<i32>} : memref<64x432xf32, #tpu.memory_space<vmem>>, vector<64x16xf32>,
      %c0_i32_52 = arith.constant 0 : i32
      %42 = arith.addi %arg12, %c0_i32_52 : i32
      %43 = arith.index_cast %42 : i32 to index
      %c1_53 = arith.constant 1 : index
      %c1_54 = arith.constant 1 : index
      %c0_55 = arith.constant 0 : index
      %44 = vector.load %arg9[%43, %c1_53, %c1_54, %c0_55] : memref<10x10x10x16xf32, #tpu.memory_space<vmem>>, vector<1x8x8x16xf32>
      %45 = vector.shape_cast %44 : vector<1x8x8x16xf32> to vector<8x8x16xf32>
      %46 = vector.shape_cast %45 : vector<8x8x16xf32> to vector<64x16xf32>
      %c0_56 = arith.constant 0 : index
      %c64 = arith.constant 64 : index
      %47 = vector.load %arg11[%c0_56, %c64] : memref<64x432xf32, #tpu.memory_space<vmem>>, vector<64x16xf32>
      tpu.vector_store %arg11[%c0_56, %c64], %46 {strides = array<i32>} : memref<64x432xf32, #tpu.memory_space<vmem>>, vector<64x16xf32>,
      %c0_i32_57 = arith.constant 0 : i32
      %48 = arith.addi %arg12, %c0_i32_57 : i32
      %49 = arith.index_cast %48 : i32 to index
      %c1_58 = arith.constant 1 : index
      %c2_59 = arith.constant 2 : index
      %c0_60 = arith.constant 0 : index
      %50 = vector.load %arg9[%49, %c1_58, %c2_59, %c0_60] : memref<10x10x10x16xf32, #tpu.memory_space<vmem>>, vector<1x8x8x16xf32>
      %51 = vector.shape_cast %50 : vector<1x8x8x16xf32> to vector<8x8x16xf32>
      %52 = vector.shape_cast %51 : vector<8x8x16xf32> to vector<64x16xf32>
      %c0_61 = arith.constant 0 : index
      %c80 = arith.constant 80 : index
      %53 = vector.load %arg11[%c0_61, %c80] : memref<64x432xf32, #tpu.memory_space<vmem>>, vector<64x16xf32>
      tpu.vector_store %arg11[%c0_61, %c80], %52 {strides = array<i32>} : memref<64x432xf32, #tpu.memory_space<vmem>>, vector<64x16xf32>,
      %c0_i32_62 = arith.constant 0 : i32
      %54 = arith.addi %arg12, %c0_i32_62 : i32
      %55 = arith.index_cast %54 : i32 to index
      %c2_63 = arith.constant 2 : index
      %c0_64 = arith.constant 0 : index
      %c0_65 = arith.constant 0 : index
      %56 = vector.load %arg9[%55, %c2_63, %c0_64, %c0_65] : memref<10x10x10x16xf32, #tpu.memory_space<vmem>>, vector<1x8x8x16xf32>
      %57 = vector.shape_cast %56 : vector<1x8x8x16xf32> to vector<8x8x16xf32>
      %58 = vector.shape_cast %57 : vector<8x8x16xf32> to vector<64x16xf32>
      %c0_66 = arith.constant 0 : index
      %c96 = arith.constant 96 : index
      %59 = vector.load %arg11[%c0_66, %c96] : memref<64x432xf32, #tpu.memory_space<vmem>>, vector<64x16xf32>
      tpu.vector_store %arg11[%c0_66, %c96], %58 {strides = array<i32>} : memref<64x432xf32, #tpu.memory_space<vmem>>, vector<64x16xf32>,
      %c0_i32_67 = arith.constant 0 : i32
      %60 = arith.addi %arg12, %c0_i32_67 : i32
      %61 = arith.index_cast %60 : i32 to index
      %c2_68 = arith.constant 2 : index
      %c1_69 = arith.constant 1 : index
      %c0_70 = arith.constant 0 : index
      %62 = vector.load %arg9[%61, %c2_68, %c1_69, %c0_70] : memref<10x10x10x16xf32, #tpu.memory_space<vmem>>, vector<1x8x8x16xf32>
      %63 = vector.shape_cast %62 : vector<1x8x8x16xf32> to vector<8x8x16xf32>
      %64 = vector.shape_cast %63 : vector<8x8x16xf32> to vector<64x16xf32>
      %c0_71 = arith.constant 0 : index
      %c112 = arith.constant 112 : index
      %65 = vector.load %arg11[%c0_71, %c112] : memref<64x432xf32, #tpu.memory_space<vmem>>, vector<64x16xf32>
      tpu.vector_store %arg11[%c0_71, %c112], %64 {strides = array<i32>} : memref<64x432xf32, #tpu.memory_space<vmem>>, vector<64x16xf32>,
      %c0_i32_72 = arith.constant 0 : i32
      %66 = arith.addi %arg12, %c0_i32_72 : i32
      %67 = arith.index_cast %66 : i32 to index
      %c2_73 = arith.constant 2 : index
      %c2_74 = arith.constant 2 : index
      %c0_75 = arith.constant 0 : index
      %68 = vector.load %arg9[%67, %c2_73, %c2_74, %c0_75] : memref<10x10x10x16xf32, #tpu.memory_space<vmem>>, vector<1x8x8x16xf32>
      %69 = vector.shape_cast %68 : vector<1x8x8x16xf32> to vector<8x8x16xf32>
      %70 = vector.shape_cast %69 : vector<8x8x16xf32> to vector<64x16xf32>
      %c0_76 = arith.constant 0 : index
      %c128 = arith.constant 128 : index
      %71 = vector.load %arg11[%c0_76, %c128] : memref<64x432xf32, #tpu.memory_space<vmem>>, vector<64x16xf32>
      tpu.vector_store %arg11[%c0_76, %c128], %70 {strides = array<i32>} : memref<64x432xf32, #tpu.memory_space<vmem>>, vector<64x16xf32>,
      %c1_i32_77 = arith.constant 1 : i32
      %72 = arith.addi %arg12, %c1_i32_77 : i32
      %73 = arith.index_cast %72 : i32 to index
      %c0_78 = arith.constant 0 : index
      %c0_79 = arith.constant 0 : index
      %c0_80 = arith.constant 0 : index
      %74 = vector.load %arg9[%73, %c0_78, %c0_79, %c0_80] : memref<10x10x10x16xf32, #tpu.memory_space<vmem>>, vector<1x8x8x16xf32>
      %75 = vector.shape_cast %74 : vector<1x8x8x16xf32> to vector<8x8x16xf32>
      %76 = vector.shape_cast %75 : vector<8x8x16xf32> to vector<64x16xf32>
      %c0_81 = arith.constant 0 : index
      %c144 = arith.constant 144 : index
      %77 = vector.load %arg11[%c0_81, %c144] : memref<64x432xf32, #tpu.memory_space<vmem>>, vector<64x16xf32>
      tpu.vector_store %arg11[%c0_81, %c144], %76 {strides = array<i32>} : memref<64x432xf32, #tpu.memory_space<vmem>>, vector<64x16xf32>,
      %c1_i32_82 = arith.constant 1 : i32
      %78 = arith.addi %arg12, %c1_i32_82 : i32
      %79 = arith.index_cast %78 : i32 to index
      %c0_83 = arith.constant 0 : index
      %c1_84 = arith.constant 1 : index
      %c0_85 = arith.constant 0 : index
      %80 = vector.load %arg9[%79, %c0_83, %c1_84, %c0_85] : memref<10x10x10x16xf32, #tpu.memory_space<vmem>>, vector<1x8x8x16xf32>
      %81 = vector.shape_cast %80 : vector<1x8x8x16xf32> to vector<8x8x16xf32>
      %82 = vector.shape_cast %81 : vector<8x8x16xf32> to vector<64x16xf32>
      %c0_86 = arith.constant 0 : index
      %c160 = arith.constant 160 : index
      %83 = vector.load %arg11[%c0_86, %c160] : memref<64x432xf32, #tpu.memory_space<vmem>>, vector<64x16xf32>
      tpu.vector_store %arg11[%c0_86, %c160], %82 {strides = array<i32>} : memref<64x432xf32, #tpu.memory_space<vmem>>, vector<64x16xf32>,
      %c1_i32_87 = arith.constant 1 : i32
      %84 = arith.addi %arg12, %c1_i32_87 : i32
      %85 = arith.index_cast %84 : i32 to index
      %c0_88 = arith.constant 0 : index
      %c2_89 = arith.constant 2 : index
      %c0_90 = arith.constant 0 : index
      %86 = vector.load %arg9[%85, %c0_88, %c2_89, %c0_90] : memref<10x10x10x16xf32, #tpu.memory_space<vmem>>, vector<1x8x8x16xf32>
      %87 = vector.shape_cast %86 : vector<1x8x8x16xf32> to vector<8x8x16xf32>
      %88 = vector.shape_cast %87 : vector<8x8x16xf32> to vector<64x16xf32>
      %c0_91 = arith.constant 0 : index
      %c176 = arith.constant 176 : index
      %89 = vector.load %arg11[%c0_91, %c176] : memref<64x432xf32, #tpu.memory_space<vmem>>, vector<64x16xf32>
      tpu.vector_store %arg11[%c0_91, %c176], %88 {strides = array<i32>} : memref<64x432xf32, #tpu.memory_space<vmem>>, vector<64x16xf32>,
      %c1_i32_92 = arith.constant 1 : i32
      %90 = arith.addi %arg12, %c1_i32_92 : i32
      %91 = arith.index_cast %90 : i32 to index
      %c1_93 = arith.constant 1 : index
      %c0_94 = arith.constant 0 : index
      %c0_95 = arith.constant 0 : index
      %92 = vector.load %arg9[%91, %c1_93, %c0_94, %c0_95] : memref<10x10x10x16xf32, #tpu.memory_space<vmem>>, vector<1x8x8x16xf32>
      %93 = vector.shape_cast %92 : vector<1x8x8x16xf32> to vector<8x8x16xf32>
      %94 = vector.shape_cast %93 : vector<8x8x16xf32> to vector<64x16xf32>
      %c0_96 = arith.constant 0 : index
      %c192 = arith.constant 192 : index
      %95 = vector.load %arg11[%c0_96, %c192] : memref<64x432xf32, #tpu.memory_space<vmem>>, vector<64x16xf32>
      tpu.vector_store %arg11[%c0_96, %c192], %94 {strides = array<i32>} : memref<64x432xf32, #tpu.memory_space<vmem>>, vector<64x16xf32>,
      %c1_i32_97 = arith.constant 1 : i32
      %96 = arith.addi %arg12, %c1_i32_97 : i32
      %97 = arith.index_cast %96 : i32 to index
      %c1_98 = arith.constant 1 : index
      %c1_99 = arith.constant 1 : index
      %c0_100 = arith.constant 0 : index
      %98 = vector.load %arg9[%97, %c1_98, %c1_99, %c0_100] : memref<10x10x10x16xf32, #tpu.memory_space<vmem>>, vector<1x8x8x16xf32>
      %99 = vector.shape_cast %98 : vector<1x8x8x16xf32> to vector<8x8x16xf32>
      %100 = vector.shape_cast %99 : vector<8x8x16xf32> to vector<64x16xf32>
      %c0_101 = arith.constant 0 : index
      %c208 = arith.constant 208 : index
      %101 = vector.load %arg11[%c0_101, %c208] : memref<64x432xf32, #tpu.memory_space<vmem>>, vector<64x16xf32>
      tpu.vector_store %arg11[%c0_101, %c208], %100 {strides = array<i32>} : memref<64x432xf32, #tpu.memory_space<vmem>>, vector<64x16xf32>,
      %c1_i32_102 = arith.constant 1 : i32
      %102 = arith.addi %arg12, %c1_i32_102 : i32
      %103 = arith.index_cast %102 : i32 to index
      %c1_103 = arith.constant 1 : index
      %c2_104 = arith.constant 2 : index
      %c0_105 = arith.constant 0 : index
      %104 = vector.load %arg9[%103, %c1_103, %c2_104, %c0_105] : memref<10x10x10x16xf32, #tpu.memory_space<vmem>>, vector<1x8x8x16xf32>
      %105 = vector.shape_cast %104 : vector<1x8x8x16xf32> to vector<8x8x16xf32>
      %106 = vector.shape_cast %105 : vector<8x8x16xf32> to vector<64x16xf32>
      %c0_106 = arith.constant 0 : index
      %c224 = arith.constant 224 : index
      %107 = vector.load %arg11[%c0_106, %c224] : memref<64x432xf32, #tpu.memory_space<vmem>>, vector<64x16xf32>
      tpu.vector_store %arg11[%c0_106, %c224], %106 {strides = array<i32>} : memref<64x432xf32, #tpu.memory_space<vmem>>, vector<64x16xf32>,
      %c1_i32_107 = arith.constant 1 : i32
      %108 = arith.addi %arg12, %c1_i32_107 : i32
      %109 = arith.index_cast %108 : i32 to index
      %c2_108 = arith.constant 2 : index
      %c0_109 = arith.constant 0 : index
      %c0_110 = arith.constant 0 : index
      %110 = vector.load %arg9[%109, %c2_108, %c0_109, %c0_110] : memref<10x10x10x16xf32, #tpu.memory_space<vmem>>, vector<1x8x8x16xf32>
      %111 = vector.shape_cast %110 : vector<1x8x8x16xf32> to vector<8x8x16xf32>
      %112 = vector.shape_cast %111 : vector<8x8x16xf32> to vector<64x16xf32>
      %c0_111 = arith.constant 0 : index
      %c240 = arith.constant 240 : index
      %113 = vector.load %arg11[%c0_111, %c240] : memref<64x432xf32, #tpu.memory_space<vmem>>, vector<64x16xf32>
      tpu.vector_store %arg11[%c0_111, %c240], %112 {strides = array<i32>} : memref<64x432xf32, #tpu.memory_space<vmem>>, vector<64x16xf32>,
      %c1_i32_112 = arith.constant 1 : i32
      %114 = arith.addi %arg12, %c1_i32_112 : i32
      %115 = arith.index_cast %114 : i32 to index
      %c2_113 = arith.constant 2 : index
      %c1_114 = arith.constant 1 : index
      %c0_115 = arith.constant 0 : index
      %116 = vector.load %arg9[%115, %c2_113, %c1_114, %c0_115] : memref<10x10x10x16xf32, #tpu.memory_space<vmem>>, vector<1x8x8x16xf32>
      %117 = vector.shape_cast %116 : vector<1x8x8x16xf32> to vector<8x8x16xf32>
      %118 = vector.shape_cast %117 : vector<8x8x16xf32> to vector<64x16xf32>
      %c0_116 = arith.constant 0 : index
      %c256 = arith.constant 256 : index
      %119 = vector.load %arg11[%c0_116, %c256] : memref<64x432xf32, #tpu.memory_space<vmem>>, vector<64x16xf32>
      tpu.vector_store %arg11[%c0_116, %c256], %118 {strides = array<i32>} : memref<64x432xf32, #tpu.memory_space<vmem>>, vector<64x16xf32>,
      %c1_i32_117 = arith.constant 1 : i32
      %120 = arith.addi %arg12, %c1_i32_117 : i32
      %121 = arith.index_cast %120 : i32 to index
      %c2_118 = arith.constant 2 : index
      %c2_119 = arith.constant 2 : index
      %c0_120 = arith.constant 0 : index
      %122 = vector.load %arg9[%121, %c2_118, %c2_119, %c0_120] : memref<10x10x10x16xf32, #tpu.memory_space<vmem>>, vector<1x8x8x16xf32>
      %123 = vector.shape_cast %122 : vector<1x8x8x16xf32> to vector<8x8x16xf32>
      %124 = vector.shape_cast %123 : vector<8x8x16xf32> to vector<64x16xf32>
      %c0_121 = arith.constant 0 : index
      %c272 = arith.constant 272 : index
      %125 = vector.load %arg11[%c0_121, %c272] : memref<64x432xf32, #tpu.memory_space<vmem>>, vector<64x16xf32>
      tpu.vector_store %arg11[%c0_121, %c272], %124 {strides = array<i32>} : memref<64x432xf32, #tpu.memory_space<vmem>>, vector<64x16xf32>,
      %c2_i32 = arith.constant 2 : i32
      %126 = arith.addi %arg12, %c2_i32 : i32
      %127 = arith.index_cast %126 : i32 to index
      %c0_122 = arith.constant 0 : index
      %c0_123 = arith.constant 0 : index
      %c0_124 = arith.constant 0 : index
      %128 = vector.load %arg9[%127, %c0_122, %c0_123, %c0_124] : memref<10x10x10x16xf32, #tpu.memory_space<vmem>>, vector<1x8x8x16xf32>
      %129 = vector.shape_cast %128 : vector<1x8x8x16xf32> to vector<8x8x16xf32>
      %130 = vector.shape_cast %129 : vector<8x8x16xf32> to vector<64x16xf32>
      %c0_125 = arith.constant 0 : index
      %c288 = arith.constant 288 : index
      %131 = vector.load %arg11[%c0_125, %c288] : memref<64x432xf32, #tpu.memory_space<vmem>>, vector<64x16xf32>
      tpu.vector_store %arg11[%c0_125, %c288], %130 {strides = array<i32>} : memref<64x432xf32, #tpu.memory_space<vmem>>, vector<64x16xf32>,
      %c2_i32_126 = arith.constant 2 : i32
      %132 = arith.addi %arg12, %c2_i32_126 : i32
      %133 = arith.index_cast %132 : i32 to index
      %c0_127 = arith.constant 0 : index
      %c1_128 = arith.constant 1 : index
      %c0_129 = arith.constant 0 : index
      %134 = vector.load %arg9[%133, %c0_127, %c1_128, %c0_129] : memref<10x10x10x16xf32, #tpu.memory_space<vmem>>, vector<1x8x8x16xf32>
      %135 = vector.shape_cast %134 : vector<1x8x8x16xf32> to vector<8x8x16xf32>
      %136 = vector.shape_cast %135 : vector<8x8x16xf32> to vector<64x16xf32>
      %c0_130 = arith.constant 0 : index
      %c304 = arith.constant 304 : index
      %137 = vector.load %arg11[%c0_130, %c304] : memref<64x432xf32, #tpu.memory_space<vmem>>, vector<64x16xf32>
      tpu.vector_store %arg11[%c0_130, %c304], %136 {strides = array<i32>} : memref<64x432xf32, #tpu.memory_space<vmem>>, vector<64x16xf32>,
      %c2_i32_131 = arith.constant 2 : i32
      %138 = arith.addi %arg12, %c2_i32_131 : i32
      %139 = arith.index_cast %138 : i32 to index
      %c0_132 = arith.constant 0 : index
      %c2_133 = arith.constant 2 : index
      %c0_134 = arith.constant 0 : index
      %140 = vector.load %arg9[%139, %c0_132, %c2_133, %c0_134] : memref<10x10x10x16xf32, #tpu.memory_space<vmem>>, vector<1x8x8x16xf32>
      %141 = vector.shape_cast %140 : vector<1x8x8x16xf32> to vector<8x8x16xf32>
      %142 = vector.shape_cast %141 : vector<8x8x16xf32> to vector<64x16xf32>
      %c0_135 = arith.constant 0 : index
      %c320 = arith.constant 320 : index
      %143 = vector.load %arg11[%c0_135, %c320] : memref<64x432xf32, #tpu.memory_space<vmem>>, vector<64x16xf32>
      tpu.vector_store %arg11[%c0_135, %c320], %142 {strides = array<i32>} : memref<64x432xf32, #tpu.memory_space<vmem>>, vector<64x16xf32>,
      %c2_i32_136 = arith.constant 2 : i32
      %144 = arith.addi %arg12, %c2_i32_136 : i32
      %145 = arith.index_cast %144 : i32 to index
      %c1_137 = arith.constant 1 : index
      %c0_138 = arith.constant 0 : index
      %c0_139 = arith.constant 0 : index
      %146 = vector.load %arg9[%145, %c1_137, %c0_138, %c0_139] : memref<10x10x10x16xf32, #tpu.memory_space<vmem>>, vector<1x8x8x16xf32>
      %147 = vector.shape_cast %146 : vector<1x8x8x16xf32> to vector<8x8x16xf32>
      %148 = vector.shape_cast %147 : vector<8x8x16xf32> to vector<64x16xf32>
      %c0_140 = arith.constant 0 : index
      %c336 = arith.constant 336 : index
      %149 = vector.load %arg11[%c0_140, %c336] : memref<64x432xf32, #tpu.memory_space<vmem>>, vector<64x16xf32>
      tpu.vector_store %arg11[%c0_140, %c336], %148 {strides = array<i32>} : memref<64x432xf32, #tpu.memory_space<vmem>>, vector<64x16xf32>,
      %c2_i32_141 = arith.constant 2 : i32
      %150 = arith.addi %arg12, %c2_i32_141 : i32
      %151 = arith.index_cast %150 : i32 to index
      %c1_142 = arith.constant 1 : index
      %c1_143 = arith.constant 1 : index
      %c0_144 = arith.constant 0 : index
      %152 = vector.load %arg9[%151, %c1_142, %c1_143, %c0_144] : memref<10x10x10x16xf32, #tpu.memory_space<vmem>>, vector<1x8x8x16xf32>
      %153 = vector.shape_cast %152 : vector<1x8x8x16xf32> to vector<8x8x16xf32>
      %154 = vector.shape_cast %153 : vector<8x8x16xf32> to vector<64x16xf32>
      %c0_145 = arith.constant 0 : index
      %c352 = arith.constant 352 : index
      %155 = vector.load %arg11[%c0_145, %c352] : memref<64x432xf32, #tpu.memory_space<vmem>>, vector<64x16xf32>
      tpu.vector_store %arg11[%c0_145, %c352], %154 {strides = array<i32>} : memref<64x432xf32, #tpu.memory_space<vmem>>, vector<64x16xf32>,
      %c2_i32_146 = arith.constant 2 : i32
      %156 = arith.addi %arg12, %c2_i32_146 : i32
      %157 = arith.index_cast %156 : i32 to index
      %c1_147 = arith.constant 1 : index
      %c2_148 = arith.constant 2 : index
      %c0_149 = arith.constant 0 : index
      %158 = vector.load %arg9[%157, %c1_147, %c2_148, %c0_149] : memref<10x10x10x16xf32, #tpu.memory_space<vmem>>, vector<1x8x8x16xf32>
      %159 = vector.shape_cast %158 : vector<1x8x8x16xf32> to vector<8x8x16xf32>
      %160 = vector.shape_cast %159 : vector<8x8x16xf32> to vector<64x16xf32>
      %c0_150 = arith.constant 0 : index
      %c368 = arith.constant 368 : index
      %161 = vector.load %arg11[%c0_150, %c368] : memref<64x432xf32, #tpu.memory_space<vmem>>, vector<64x16xf32>
      tpu.vector_store %arg11[%c0_150, %c368], %160 {strides = array<i32>} : memref<64x432xf32, #tpu.memory_space<vmem>>, vector<64x16xf32>,
      %c2_i32_151 = arith.constant 2 : i32
      %162 = arith.addi %arg12, %c2_i32_151 : i32
      %163 = arith.index_cast %162 : i32 to index
      %c2_152 = arith.constant 2 : index
      %c0_153 = arith.constant 0 : index
      %c0_154 = arith.constant 0 : index
      %164 = vector.load %arg9[%163, %c2_152, %c0_153, %c0_154] : memref<10x10x10x16xf32, #tpu.memory_space<vmem>>, vector<1x8x8x16xf32>
      %165 = vector.shape_cast %164 : vector<1x8x8x16xf32> to vector<8x8x16xf32>
      %166 = vector.shape_cast %165 : vector<8x8x16xf32> to vector<64x16xf32>
      %c0_155 = arith.constant 0 : index
      %c384 = arith.constant 384 : index
      %167 = vector.load %arg11[%c0_155, %c384] : memref<64x432xf32, #tpu.memory_space<vmem>>, vector<64x16xf32>
      tpu.vector_store %arg11[%c0_155, %c384], %166 {strides = array<i32>} : memref<64x432xf32, #tpu.memory_space<vmem>>, vector<64x16xf32>,
      %c2_i32_156 = arith.constant 2 : i32
      %168 = arith.addi %arg12, %c2_i32_156 : i32
      %169 = arith.index_cast %168 : i32 to index
      %c2_157 = arith.constant 2 : index
      %c1_158 = arith.constant 1 : index
      %c0_159 = arith.constant 0 : index
      %170 = vector.load %arg9[%169, %c2_157, %c1_158, %c0_159] : memref<10x10x10x16xf32, #tpu.memory_space<vmem>>, vector<1x8x8x16xf32>
      %171 = vector.shape_cast %170 : vector<1x8x8x16xf32> to vector<8x8x16xf32>
      %172 = vector.shape_cast %171 : vector<8x8x16xf32> to vector<64x16xf32>
      %c0_160 = arith.constant 0 : index
      %c400 = arith.constant 400 : index
      %173 = vector.load %arg11[%c0_160, %c400] : memref<64x432xf32, #tpu.memory_space<vmem>>, vector<64x16xf32>
      tpu.vector_store %arg11[%c0_160, %c400], %172 {strides = array<i32>} : memref<64x432xf32, #tpu.memory_space<vmem>>, vector<64x16xf32>,
      %c2_i32_161 = arith.constant 2 : i32
      %174 = arith.addi %arg12, %c2_i32_161 : i32
      %175 = arith.index_cast %174 : i32 to index
      %c2_162 = arith.constant 2 : index
      %c2_163 = arith.constant 2 : index
      %c0_164 = arith.constant 0 : index
      %176 = vector.load %arg9[%175, %c2_162, %c2_163, %c0_164] : memref<10x10x10x16xf32, #tpu.memory_space<vmem>>, vector<1x8x8x16xf32>
      %177 = vector.shape_cast %176 : vector<1x8x8x16xf32> to vector<8x8x16xf32>
      %178 = vector.shape_cast %177 : vector<8x8x16xf32> to vector<64x16xf32>
      %c0_165 = arith.constant 0 : index
      %c416 = arith.constant 416 : index
      %179 = vector.load %arg11[%c0_165, %c416] : memref<64x432xf32, #tpu.memory_space<vmem>>, vector<64x16xf32>
      tpu.vector_store %arg11[%c0_165, %c416], %178 {strides = array<i32>} : memref<64x432xf32, #tpu.memory_space<vmem>>, vector<64x16xf32>,
      %c0_166 = arith.constant 0 : index
      %c0_167 = arith.constant 0 : index
      %180 = vector.load %arg11[%c0_166, %c0_167] : memref<64x432xf32, #tpu.memory_space<vmem>>, vector<64x432xf32>
      %c0_168 = arith.constant 0 : index
      %c0_169 = arith.constant 0 : index
      %181 = vector.load %arg5[%c0_168, %c0_169] : memref<432x8xf32, #tpu.memory_space<vmem>>, vector<432x8xf32>
      %cst_170 = arith.constant dense<0.000000e+00> : vector<64x8xf32>
      %182 = tpu.matmul %180, %181, %cst_170 {dimension_numbers = #tpu.dot_dimension_numbers<[1], [0], [0], [1], [0, 0, 1, 1], [], []>} : vector<64x432xf32>, vector<432x8xf32>, vector<64x8xf32> -> vector<64x8xf32>
      %183 = arith.addf %182, %15 : vector<64x8xf32>
      %cst_171 = arith.constant 0.000000e+00 : f32
      %184 = vector.broadcast %cst_171 : f32 to vector<64x8xf32>
      %185 = arith.maximumf %183, %184 : vector<64x8xf32>
      %186 = vector.shape_cast %185 : vector<64x8xf32> to vector<8x8x8xf32>
      %c0_172 = arith.constant 0 : index
      %187 = arith.index_cast %arg12 : i32 to index
      %c0_173 = arith.constant 0 : index
      %c0_174 = arith.constant 0 : index
      %c0_175 = arith.constant 0 : index
      %188 = vector.load %arg7[%c0_172, %187, %c0_173, %c0_174, %c0_175] : memref<1x8x8x8x8xf32, #tpu.memory_space<vmem>>, vector<1x1x8x8x8xf32>
      %189 = vector.shape_cast %188 : vector<1x1x8x8x8xf32> to vector<8x8x8xf32>
      %190 = vector.shape_cast %186 : vector<8x8x8xf32> to vector<1x1x8x8x8xf32>
      tpu.vector_store %arg7[%c0_172, %187, %c0_173, %c0_174, %c0_175], %190 {strides = array<i32>} : memref<1x8x8x8x8xf32, #tpu.memory_space<vmem>>, vector<1x1x8x8x8xf32>,
    }
    %c8_i32_31 = arith.constant 8 : i32
    return
  }
  func.func @transform_0(%arg0: i32) -> (i32, i32, i32, i32, i32) {
    %c0_i32 = arith.constant 0 : i32
    %c0_i32_0 = arith.constant 0 : i32
    %c0_i32_1 = arith.constant 0 : i32
    %c0_i32_2 = arith.constant 0 : i32
    %c0_i32_3 = arith.constant 0 : i32
    return %arg0, %c0_i32, %c0_i32_0, %c0_i32_1, %c0_i32_2 : i32, i32, i32, i32, i32
  }
  func.func @transform_1(%arg0: i32) -> (i32, i32, i32, i32, i32) {
    %c0_i32 = arith.constant 0 : i32
    %c0_i32_0 = arith.constant 0 : i32
    %c0_i32_1 = arith.constant 0 : i32
    %c0_i32_2 = arith.constant 0 : i32
    %c0_i32_3 = arith.constant 0 : i32
    return %arg0, %c0_i32, %c0_i32_0, %c0_i32_1, %c0_i32_2 : i32, i32, i32, i32, i32
  }
  func.func @transform_2(%arg0: i32) -> (i32, i32, i32, i32, i32) {
    %c0_i32 = arith.constant 0 : i32
    %c0_i32_0 = arith.constant 0 : i32
    %c0_i32_1 = arith.constant 0 : i32
    %c0_i32_2 = arith.constant 0 : i32
    %c0_i32_3 = arith.constant 0 : i32
    %c0_i32_4 = arith.constant 0 : i32
    return %c0_i32, %c0_i32_0, %c0_i32_1, %c0_i32_2, %c0_i32_3 : i32, i32, i32, i32, i32
  }
  func.func @transform_3(%arg0: i32) -> (i32, i32) {
    %c0_i32 = arith.constant 0 : i32
    %c0_i32_0 = arith.constant 0 : i32
    %c0_i32_1 = arith.constant 0 : i32
    return %c0_i32, %c0_i32_0 : i32, i32
  }
  func.func @transform_4(%arg0: i32) -> (i32, i32) {
    %c0_i32 = arith.constant 0 : i32
    %c0_i32_0 = arith.constant 0 : i32
    %c0_i32_1 = arith.constant 0 : i32
    return %c0_i32, %c0_i32_0 : i32, i32
  }
  func.func @transform_5(%arg0: i32) -> (i32, i32) {
    %c0_i32 = arith.constant 0 : i32
    %c0_i32_0 = arith.constant 0 : i32
    %c0_i32_1 = arith.constant 0 : i32
    return %c0_i32, %c0_i32_0 : i32, i32
  }
  func.func @transform_6(%arg0: i32) -> (i32, i32, i32, i32, i32) {
    %c0_i32 = arith.constant 0 : i32
    %c0_i32_0 = arith.constant 0 : i32
    %c0_i32_1 = arith.constant 0 : i32
    %c0_i32_2 = arith.constant 0 : i32
    %c0_i32_3 = arith.constant 0 : i32
    return %arg0, %c0_i32, %c0_i32_0, %c0_i32_1, %c0_i32_2 : i32, i32, i32, i32, i32
  }
}

</mosaic_0001>

<bundles_post_ra>
// kernel: tpu_custom_call.1
= control target key start
LH: loop header
LB: loop body
LE: loop exit
PB: predicated region body
PF: predicated region fallthrough
CT: control target
= control target key end

     0   :  { %11 = vsyncpa [#allocation7], 0  ;;  %s11007_s0 = inlined_call_operand.vmem [shape: f32[2,4,4,4,16], index: 0, kind: input, shape index: {}]   ;;  %s11008_s1 = inlined_call_operand.vmem [shape: f32[2,8,8,8,8], index: 1, kind: input, shape index: {}]   ;;  %s11009_s2 = inlined_call_operand.vmem [shape: f32[2,2,2,128,8], index: 2, kind: input, shape index: {}]   ;;  %s11010_s3 = inlined_call_operand.vmem [shape: f32[1,8], index: 3, kind: input, shape index: {}]   ;;  %s11011_s4 = inlined_call_operand.vmem [shape: f32[432,8], index: 4, kind: input, shape index: {}]   ;;  %s11012_s5 = inlined_call_operand.vmem [shape: f32[1,8], index: 5, kind: input, shape index: {}]   ;;  %s11013_s6 = inlined_call_operand.hbm [shape: f32[2,8,8,8,8], index: 6, kind: output, shape index: {}]  }
   0x1   :  { %13 = vsyncpa [#allocation7 + $0x1], 0  ;;  %s7960_s21 = smov 0   ;;  %s7962_s22 = smov 0  }
   0x2   :  { %s7964_s23 = smov 0   ;;  %s7966_s24 = smov 0  }
   0x3 LB: > { %s7981_s25 = sadd.s32 4294967295, %s7894_s24   ;;  %s6551_s26 = sadd.s32 4294967294, %s7894_s24   ;;  %s7894_s24 = sphi %s7966_s24, %s11051_s24   ;;  %s7890_s23 = sphi %s7964_s23, %s11050_s23   ;;  %s7886_s22 = sphi %s7962_s22, %s11049_s22   ;;  %s7882_s21 = sphi %s7960_s21, %s11048_s21  }
   0x4   : > { %s7985_s27 = sadd.s32 1, %s7894_s24   ;;  %s162_s28 = sadd.s32 1, %s7890_s23 }
   0x5   : > { %s159_s29 = ssub.s32 %s7894_s24, %s7985_s27  ;;  %p172_p0 = scmp.ne.s32.totalorder %s7890_s23, %s7886_s22 }
   0x6   : > { %p160_p1 = scmp.eq.s32.totalorder %s159_s29, 0  ;;  %p173_p2 = scmp.eq.s32.totalorder %s7981_s25, 1 }
   0x7   : > { %p178_p3 = scmp.ne.s32.totalorder %s7886_s22, %s7882_s21  ;;  %p179_p4 = scmp.eq.s32.totalorder %s6551_s26, 1 }
   0x8   : > { %s7996_s30 = scalar_select %p160_p1, %s7890_s23, %s162_s28  }
   0x9   : > { %p7998_p5 = por %p173_p2, %p172_p0  ;;  %p8002_p6 = por %p179_p4, %p178_p3 }
   0xa   : > { %p6554_p7 = scmp.ge.s32.totalorder %s7894_s24, 1  ;;  %p225_p8 = scmp.lt.s32.totalorder %s7894_s24, 3 }
   0xc   : > { %p226_p9 = pnand %p6554_p7, %p225_p8 }
   0xd   : > { %p260_p10 = scmp.lt.s32.totalorder (!%p226_p9), %s7981_s25, 1  ;;  %s11014_s18 = smov (!%p226_p9), 8  }
   0xe   : > { %229 = sbr.rel (%p226_p9) target bundleno = 1561 (0x619), region = 44  ;;  %s11015_s19 = sand.u32 (!%p226_p9), 1, %s7886_s22  }
   0xf   : > { %s8632_s20 = sshll.u32 (!%p226_p9), %s11015_s19, 9 }
  0x13   : > { %vm270_vm0 = vcmask 128000   ;;  %vm341_vm1 = vcmask 130048   ;;  %v7904_v0 = vmov 0.0   ;;  %vm343_vm2 = vcmask 123904   ;;  %s8284_s9 = scalar_select %p260_p10, %s7981_s25, 1 }
  0x14   : > { %271 = vst.msk [vmem:[#allocation2] sm:$0x3f] %vm270_vm0, %v7904_v0  ;;  %272 = vst.msk [vmem:[#allocation2 + $0x8] sm:$0x3f] %vm270_vm0, %v7904_v0  ;;  %vm324_vm3 = vcmask 125952   ;;  %vm864_vm4 = vcmask 130112  }
  0x15   : > { %273 = vst.msk [vmem:[#allocation2 + $0x10] sm:$0x3f] %vm270_vm0, %v7904_v0  ;;  %274 = vst.msk [vmem:[#allocation2 + $0x18] sm:$0x3f] %vm270_vm0, %v7904_v0  ;;  %s7141_s10 = sshll.u32 %s8284_s9, 9  ;;  %s7140_s11 = sshll.u32 %s8284_s9, 6 }
  0x16   : > { %275 = vst.msk [vmem:[#allocation2 + $0x20] sm:$0x3f] %vm270_vm0, %v7904_v0  ;;  %276 = vst.msk [vmem:[#allocation2 + $0x28] sm:$0x3f] %vm270_vm0, %v7904_v0  ;;  %s8491_s14 = scalar_lea.vmem %s11008_s1, %s7141_s10  ;;  %s264_s17 = scalar_lea.vmem %s11007_s0, %s7140_s11 }
  0x17   : > { %277 = vst.msk [vmem:[#allocation2 + $0x30] sm:$0x3f] %vm270_vm0, %v7904_v0  ;;  %278 = vst.msk [vmem:[#allocation2 + $0x38] sm:$0x3f] %vm270_vm0, %v7904_v0  ;;  %v545_v1 = vld [vmem:[%s8491_s14 + $0x10] sm:$0xff]  ;;  %v543_v18 = vld [vmem:[%s8491_s14] sm:$0xff] }
  0x18   : > { %279 = vst.msk [vmem:[#allocation2 + $0x40] sm:$0x3f] %vm270_vm0, %v7904_v0  ;;  %280 = vst.msk [vmem:[#allocation2 + $0x48] sm:$0x3f] %vm270_vm0, %v7904_v0  ;;  %v307_v2 = vld [vmem:[%s264_s17] sm:$0xf]  ;;  %675 = vrot.lane.b32.xlu1 %v545_v1, %s11014_s18  ;;  %671 = vrot.lane.b32.xlu0 %v543_v18, %s11014_s18 }
  0x19   : > { %281 = vst.msk [vmem:[#allocation2 + $0x50] sm:$0x3f] %vm270_vm0, %v7904_v0  ;;  %282 = vst.msk [vmem:[#allocation2 + $0x58] sm:$0x3f] %vm270_vm0, %v7904_v0  ;;  %v308_v3 = vld [vmem:[%s264_s17 + $0x4] sm:$0xf] }
  0x1a   : > { %283 = vst.msk [vmem:[#allocation2 + $0x60] sm:$0x3f] %vm270_vm0, %v7904_v0  ;;  %284 = vst.msk [vmem:[#allocation2 + $0x68] sm:$0x3f] %vm270_vm0, %v7904_v0  ;;  %v309_v4 = vld [vmem:[%s264_s17 + $0x8] sm:$0xf] }
  0x1b   : > { %285 = vst.msk [vmem:[#allocation2 + $0x70] sm:$0x3f] %vm270_vm0, %v7904_v0  ;;  %286 = vst.msk [vmem:[#allocation2 + $0x78] sm:$0x3f] %vm270_vm0, %v7904_v0  ;;  %v310_v5 = vld [vmem:[%s264_s17 + $0xc] sm:$0xf] }
  0x1c   : > { %287 = vst.msk [vmem:[#allocation2 + $0x80] sm:$0x3f] %vm270_vm0, %v7904_v0  ;;  %288 = vst.msk [vmem:[#allocation2 + $0x88] sm:$0x3f] %vm270_vm0, %v7904_v0  ;;  %v311_v6 = vld [vmem:[%s264_s17 + $0x10] sm:$0xf] }
  0x1d   : > { %289 = vst.msk [vmem:[#allocation2 + $0x90] sm:$0x3f] %vm270_vm0, %v7904_v0  ;;  %290 = vst.msk [vmem:[#allocation2 + $0x98] sm:$0x3f] %vm270_vm0, %v7904_v0  ;;  %v312_v7 = vld [vmem:[%s264_s17 + $0x14] sm:$0xf] }
  0x1e   : > { %291 = vst.msk [vmem:[#allocation2 + $0xa0] sm:$0x3f] %vm270_vm0, %v7904_v0  ;;  %292 = vst.msk [vmem:[#allocation2 + $0xa8] sm:$0x3f] %vm270_vm0, %v7904_v0  ;;  %v313_v8 = vld [vmem:[%s264_s17 + $0x18] sm:$0xf] }
  0x1f   : > { %293 = vst.msk [vmem:[#allocation2 + $0xb0] sm:$0x3f] %vm270_vm0, %v7904_v0  ;;  %294 = vst.msk [vmem:[#allocation2 + $0xb8] sm:$0x3f] %vm270_vm0, %v7904_v0  ;;  %v314_v9 = vld [vmem:[%s264_s17 + $0x1c] sm:$0xf] }
  0x20   : > { %295 = vst.msk [vmem:[#allocation2 + $0xc0] sm:$0x3f] %vm270_vm0, %v7904_v0  ;;  %296 = vst.msk [vmem:[#allocation2 + $0xc8] sm:$0x3f] %vm270_vm0, %v7904_v0  ;;  %v315_v10 = vld [vmem:[%s264_s17 + $0x20] sm:$0xf] }
  0x21   : > { %297 = vst.msk [vmem:[#allocation2 + $0xd0] sm:$0x3f] %vm270_vm0, %v7904_v0  ;;  %298 = vst.msk [vmem:[#allocation2 + $0xd8] sm:$0x3f] %vm270_vm0, %v7904_v0  ;;  %v316_v11 = vld [vmem:[%s264_s17 + $0x24] sm:$0xf] }
  0x22   : > { %299 = vst.msk [vmem:[#allocation2 + $0xe0] sm:$0x3f] %vm270_vm0, %v7904_v0  ;;  %300 = vst.msk [vmem:[#allocation2 + $0xe8] sm:$0x3f] %vm270_vm0, %v7904_v0  ;;  %v317_v12 = vld [vmem:[%s264_s17 + $0x28] sm:$0xf] }
  0x23   : > { %301 = vst.msk [vmem:[#allocation2 + $0xf0] sm:$0x3f] %vm270_vm0, %v7904_v0  ;;  %302 = vst.msk [vmem:[#allocation2 + $0xf8] sm:$0x3f] %vm270_vm0, %v7904_v0  ;;  %v318_v13 = vld [vmem:[%s264_s17 + $0x2c] sm:$0xf] }
  0x24   : > { %303 = vst.msk [vmem:[#allocation2 + $0x100] sm:$0x3f] %vm270_vm0, %v7904_v0  ;;  %304 = vst.msk [vmem:[#allocation2 + $0x108] sm:$0x3f] %vm270_vm0, %v7904_v0  ;;  %v319_v14 = vld [vmem:[%s264_s17 + $0x30] sm:$0xf] }
  0x25   : > { %305 = vst.msk [vmem:[#allocation2 + $0x110] sm:$0x3f] %vm270_vm0, %v7904_v0  ;;  %306 = vst.msk [vmem:[#allocation2 + $0x118] sm:$0x3f] %vm270_vm0, %v7904_v0  ;;  %v320_v15 = vld [vmem:[%s264_s17 + $0x34] sm:$0xf] }
  0x26   : > { %369 = vst.msk [vmem:[#allocation3 + $0xd0] sm:$0xff] %vm341_vm1, %v7904_v0  ;;  %342 = vst.msk [vmem:[#allocation3] sm:$0xff] %vm341_vm1, %v7904_v0  ;;  %v321_v16 = vld [vmem:[%s264_s17 + $0x38] sm:$0xf]  ;;  %v322_v17 = vld [vmem:[%s264_s17 + $0x3c] sm:$0xf] }
  0x27   : > { %345 = vst.msk [vmem:[#allocation3 + $0x10] sm:$0xff] %vm341_vm1, %v7904_v0  ;;  %347 = vst.msk [vmem:[#allocation3 + $0x20] sm:$0xff] %vm341_vm1, %v7904_v0  ;;  %v546_v19 = vld [vmem:[%s8491_s14 + $0x18] sm:$0xff]  ;;  %v544_v20 = vld [vmem:[%s8491_s14 + $0x8] sm:$0xff]  ;;  %s8720_s11 = smov 0  }
  0x28   : > { %349 = vst.msk [vmem:[#allocation3 + $0x30] sm:$0xff] %vm341_vm1, %v7904_v0  ;;  %351 = vst.msk [vmem:[#allocation3 + $0x40] sm:$0xff] %vm341_vm1, %v7904_v0  ;;  %677 = vrot.lane.b32.xlu1 %v546_v19, %s11014_s18  ;;  %v548_v21 = vld [vmem:[%s8491_s14 + $0x28] sm:$0xff]  ;;  %673 = vrot.lane.b32.xlu0 %v544_v20, %s11014_s18  ;;  %v547_v22 = vld [vmem:[%s8491_s14 + $0x20] sm:$0xff] }
  0x29   : > { %353 = vst.msk [vmem:[#allocation3 + $0x50] sm:$0xff] %vm341_vm1, %v7904_v0  ;;  %355 = vst.msk [vmem:[#allocation3 + $0x60] sm:$0xff] %vm341_vm1, %v7904_v0  ;;  %v550_v23 = vld [vmem:[%s8491_s14 + $0x38] sm:$0xff]  ;;  %v549_v24 = vld [vmem:[%s8491_s14 + $0x30] sm:$0xff] }
  0x2a   : > { %357 = vst.msk [vmem:[#allocation3 + $0x70] sm:$0xff] %vm341_vm1, %v7904_v0  ;;  %359 = vst.msk [vmem:[#allocation3 + $0x80] sm:$0xff] %vm341_vm1, %v7904_v0  ;;  %v552_v25 = vld [vmem:[%s8491_s14 + $0x48] sm:$0xff]  ;;  %v551_v26 = vld [vmem:[%s8491_s14 + $0x40] sm:$0xff] }
  0x2b   : > { %361 = vst.msk [vmem:[#allocation3 + $0x90] sm:$0xff] %vm341_vm1, %v7904_v0  ;;  %363 = vst.msk [vmem:[#allocation3 + $0xa0] sm:$0xff] %vm341_vm1, %v7904_v0  ;;  %v554_v27 = vld [vmem:[%s8491_s14 + $0x58] sm:$0xff]  ;;  %v553_v28 = vld [vmem:[%s8491_s14 + $0x50] sm:$0xff] }
  0x2c   : > { %365 = vst.msk [vmem:[#allocation3 + $0xb0] sm:$0xff] %vm341_vm1, %v7904_v0  ;;  %367 = vst.msk [vmem:[#allocation3 + $0xc0] sm:$0xff] %vm341_vm1, %v7904_v0  ;;  %681 = vrot.lane.b32.xlu1 %v548_v21, %s11014_s18  ;;  %679 = vrot.lane.b32.xlu0 %v547_v22, %s11014_s18  ;;  %v556_v29 = vld [vmem:[%s8491_s14 + $0x68] sm:$0xff]  ;;  %v555_v30 = vld [vmem:[%s8491_s14 + $0x60] sm:$0xff] }
  0x2d   : > { %371 = vst.msk [vmem:[#allocation3 + $0xe0] sm:$0xff] %vm341_vm1, %v7904_v0  ;;  %373 = vst.msk [vmem:[#allocation3 + $0xf0] sm:$0xff] %vm341_vm1, %v7904_v0  ;;  %v558_v31 = vld [vmem:[%s8491_s14 + $0x78] sm:$0xff]  ;;  %v557_v32 = vld [vmem:[%s8491_s14 + $0x70] sm:$0xff] }
  0x2e   : > { %375 = vst.msk [vmem:[#allocation3 + $0x100] sm:$0xff] %vm341_vm1, %v7904_v0  ;;  %377 = vst.msk [vmem:[#allocation3 + $0x110] sm:$0xff] %vm341_vm1, %v7904_v0  ;;  %v560_v33 = vld [vmem:[%s8491_s14 + $0x88] sm:$0xff]  ;;  %v559_v34 = vld [vmem:[%s8491_s14 + $0x80] sm:$0xff] }
  0x2f   : > { %379 = vst.msk [vmem:[#allocation3 + $0x120] sm:$0xff] %vm341_vm1, %v7904_v0  ;;  %381 = vst.msk [vmem:[#allocation3 + $0x130] sm:$0xff] %vm341_vm1, %v7904_v0  ;;  %v562_v35 = vld [vmem:[%s8491_s14 + $0x98] sm:$0xff]  ;;  %v561_v36 = vld [vmem:[%s8491_s14 + $0x90] sm:$0xff] }
  0x30   : > { %383 = vst.msk [vmem:[#allocation3 + $0x140] sm:$0xff] %vm341_vm1, %v7904_v0  ;;  %385 = vst.msk [vmem:[#allocation3 + $0x150] sm:$0xff] %vm341_vm1, %v7904_v0  ;;  %685 = vrot.lane.b32.xlu1 %v550_v23, %s11014_s18  ;;  %683 = vrot.lane.b32.xlu0 %v549_v24, %s11014_s18  ;;  %v564_v37 = vld [vmem:[%s8491_s14 + $0xa8] sm:$0xff]  ;;  %v563_v38 = vld [vmem:[%s8491_s14 + $0xa0] sm:$0xff] }
  0x31   : > { %387 = vst.msk [vmem:[#allocation3 + $0x160] sm:$0xff] %vm341_vm1, %v7904_v0  ;;  %389 = vst.msk [vmem:[#allocation3 + $0x170] sm:$0xff] %vm341_vm1, %v7904_v0  ;;  %v566_v39 = vld [vmem:[%s8491_s14 + $0xb8] sm:$0xff]  ;;  %v565_v40 = vld [vmem:[%s8491_s14 + $0xb0] sm:$0xff] }
  0x32   : > { %391 = vst.msk [vmem:[#allocation3 + $0x180] sm:$0xff] %vm341_vm1, %v7904_v0  ;;  %393 = vst.msk [vmem:[#allocation3 + $0x190] sm:$0xff] %vm341_vm1, %v7904_v0  ;;  %v568_v41 = vld [vmem:[%s8491_s14 + $0xc8] sm:$0xff]  ;;  %v567_v42 = vld [vmem:[%s8491_s14 + $0xc0] sm:$0xff] }
  0x33   : > { %395 = vst.msk [vmem:[#allocation3 + $0x1a0] sm:$0xff] %vm341_vm1, %v7904_v0  ;;  %397 = vst.msk [vmem:[#allocation3 + $0x1b0] sm:$0xff] %vm341_vm1, %v7904_v0  ;;  %v570_v43 = vld [vmem:[%s8491_s14 + $0xd8] sm:$0xff]  ;;  %v569_v44 = vld [vmem:[%s8491_s14 + $0xd0] sm:$0xff] }
  0x34   : > { %399 = vst.msk [vmem:[#allocation3 + $0x1c0] sm:$0xff] %vm341_vm1, %v7904_v0  ;;  %401 = vst.msk [vmem:[#allocation3 + $0x1d0] sm:$0xff] %vm341_vm1, %v7904_v0  ;;  %689 = vrot.lane.b32.xlu1 %v552_v25, %s11014_s18  ;;  %687 = vrot.lane.b32.xlu0 %v551_v26, %s11014_s18  ;;  %v572_v45 = vld [vmem:[%s8491_s14 + $0xe8] sm:$0xff]  ;;  %v571_v46 = vld [vmem:[%s8491_s14 + $0xe0] sm:$0xff] }
  0x35   : > { %403 = vst.msk [vmem:[#allocation3 + $0x1e0] sm:$0xff] %vm341_vm1, %v7904_v0  ;;  %405 = vst.msk [vmem:[#allocation3 + $0x1f0] sm:$0xff] %vm341_vm1, %v7904_v0  ;;  %v574_v47 = vld [vmem:[%s8491_s14 + $0xf8] sm:$0xff]  ;;  %v573_v48 = vld [vmem:[%s8491_s14 + $0xf0] sm:$0xff] }
  0x36   : > { %407 = vst.msk [vmem:[#allocation3 + $0x200] sm:$0xff] %vm341_vm1, %v7904_v0  ;;  %409 = vst.msk [vmem:[#allocation3 + $0x210] sm:$0xff] %vm341_vm1, %v7904_v0  ;;  %v576_v49 = vld [vmem:[%s8491_s14 + $0x108] sm:$0xff]  ;;  %v575_v50 = vld [vmem:[%s8491_s14 + $0x100] sm:$0xff] }
  0x37   : > { %411 = vst.msk [vmem:[#allocation3 + $0x220] sm:$0xff] %vm341_vm1, %v7904_v0  ;;  %413 = vst.msk [vmem:[#allocation3 + $0x230] sm:$0xff] %vm341_vm1, %v7904_v0  ;;  %v578_v51 = vld [vmem:[%s8491_s14 + $0x118] sm:$0xff]  ;;  %v577_v52 = vld [vmem:[%s8491_s14 + $0x110] sm:$0xff] }
  0x38   : > { %415 = vst.msk [vmem:[#allocation3 + $0x240] sm:$0xff] %vm341_vm1, %v7904_v0  ;;  %417 = vst.msk [vmem:[#allocation3 + $0x250] sm:$0xff] %vm341_vm1, %v7904_v0  ;;  %693 = vrot.lane.b32.xlu1 %v554_v27, %s11014_s18  ;;  %691 = vrot.lane.b32.xlu0 %v553_v28, %s11014_s18  ;;  %v580_v53 = vld [vmem:[%s8491_s14 + $0x128] sm:$0xff]  ;;  %v579_v54 = vld [vmem:[%s8491_s14 + $0x120] sm:$0xff] }
  0x39   : > { %419 = vst.msk [vmem:[#allocation3 + $0x260] sm:$0xff] %vm341_vm1, %v7904_v0  ;;  %421 = vst.msk [vmem:[#allocation3 + $0x270] sm:$0xff] %vm341_vm1, %v7904_v0  ;;  %v582_v55 = vld [vmem:[%s8491_s14 + $0x138] sm:$0xff]  ;;  %v581_v56 = vld [vmem:[%s8491_s14 + $0x130] sm:$0xff] }
  0x3a   : > { %423 = vst.msk [vmem:[#allocation3 + $0x280] sm:$0xff] %vm341_vm1, %v7904_v0  ;;  %425 = vst.msk [vmem:[#allocation3 + $0x290] sm:$0xff] %vm341_vm1, %v7904_v0  ;;  %v584_v57 = vld [vmem:[%s8491_s14 + $0x148] sm:$0xff]  ;;  %v583_v58 = vld [vmem:[%s8491_s14 + $0x140] sm:$0xff] }
  0x3b   : > { %427 = vst.msk [vmem:[#allocation3 + $0x2a0] sm:$0xff] %vm341_vm1, %v7904_v0  ;;  %429 = vst.msk [vmem:[#allocation3 + $0x2b0] sm:$0xff] %vm341_vm1, %v7904_v0  ;;  %v586_v59 = vld [vmem:[%s8491_s14 + $0x158] sm:$0xff]  ;;  %v585_v60 = vld [vmem:[%s8491_s14 + $0x150] sm:$0xff] }
  0x3c   : > { %431 = vst.msk [vmem:[#allocation3 + $0x2c0] sm:$0xff] %vm341_vm1, %v7904_v0  ;;  %433 = vst.msk [vmem:[#allocation3 + $0x2d0] sm:$0xff] %vm341_vm1, %v7904_v0  ;;  %697 = vrot.lane.b32.xlu1 %v556_v29, %s11014_s18  ;;  %695 = vrot.lane.b32.xlu0 %v555_v30, %s11014_s18  ;;  %v588_v61 = vld [vmem:[%s8491_s14 + $0x168] sm:$0xff]  ;;  %v587_v62 = vld [vmem:[%s8491_s14 + $0x160] sm:$0xff] }
  0x3d   : > { %435 = vst.msk [vmem:[#allocation3 + $0x2e0] sm:$0xff] %vm341_vm1, %v7904_v0  ;;  %437 = vst.msk [vmem:[#allocation3 + $0x2f0] sm:$0xff] %vm341_vm1, %v7904_v0  ;;  %v590_v63 = vld [vmem:[%s8491_s14 + $0x178] sm:$0xff]  ;;  %v592_v1 = vld [vmem:[%s8491_s14 + $0x188] sm:$0xff] }
  0x3e   : > { %439 = vst.msk [vmem:[#allocation3 + $0x300] sm:$0xff] %vm341_vm1, %v7904_v0  ;;  %441 = vst.msk [vmem:[#allocation3 + $0x310] sm:$0xff] %vm341_vm1, %v7904_v0  ;;  %v603_v19 = vld [vmem:[%s8491_s14 + $0x1e0] sm:$0xff]  ;;  %v606_v21 = vld [vmem:[%s8491_s14 + $0x1f8] sm:$0xff] }
  0x3f   : > { %443 = vst.msk [vmem:[#allocation3 + $0x320] sm:$0xff] %vm341_vm1, %v7904_v0  ;;  %445 = vst.msk [vmem:[#allocation3 + $0x330] sm:$0xff] %vm341_vm1, %v7904_v0  ;;  %v605_v23 = vld [vmem:[%s8491_s14 + $0x1f0] sm:$0xff] }
  0x40   : > { %447 = vst.msk [vmem:[#allocation3 + $0x340] sm:$0xff] %vm341_vm1, %v7904_v0  ;;  %449 = vst.msk [vmem:[#allocation3 + $0x350] sm:$0xff] %vm341_vm1, %v7904_v0  ;;  %701 = vrot.lane.b32.xlu1 %v558_v31, %s11014_s18  ;;  %699 = vrot.lane.b32.xlu0 %v557_v32, %s11014_s18 }
  0x41   : > { %451 = vst.msk [vmem:[#allocation3 + $0x360] sm:$0xff] %vm341_vm1, %v7904_v0  ;;  %453 = vst.msk [vmem:[#allocation3 + $0x370] sm:$0xff] %vm341_vm1, %v7904_v0 }
  0x42   : > { %455 = vst.msk [vmem:[#allocation3 + $0x380] sm:$0xff] %vm341_vm1, %v7904_v0  ;;  %457 = vst.msk [vmem:[#allocation3 + $0x390] sm:$0xff] %vm341_vm1, %v7904_v0 }
  0x43   : > { %459 = vst.msk [vmem:[#allocation3 + $0x3a0] sm:$0xff] %vm341_vm1, %v7904_v0  ;;  %461 = vst.msk [vmem:[#allocation3 + $0x3b0] sm:$0xff] %vm341_vm1, %v7904_v0 }
  0x44   : > { %463 = vst.msk [vmem:[#allocation3 + $0x3c0] sm:$0xff] %vm341_vm1, %v7904_v0  ;;  %465 = vst.msk [vmem:[#allocation3 + $0x3d0] sm:$0xff] %vm341_vm1, %v7904_v0  ;;  %705 = vrot.lane.b32.xlu1 %v560_v33, %s11014_s18  ;;  %703 = vrot.lane.b32.xlu0 %v559_v34, %s11014_s18 }
  0x45   : > { %467 = vst.msk [vmem:[#allocation3 + $0x3e0] sm:$0xff] %vm341_vm1, %v7904_v0  ;;  %469 = vst.msk [vmem:[#allocation3 + $0x3f0] sm:$0xff] %vm341_vm1, %v7904_v0 }
  0x46   : > { %471 = vst.msk [vmem:[#allocation3 + $0x400] sm:$0xff] %vm341_vm1, %v7904_v0  ;;  %473 = vst.msk [vmem:[#allocation3 + $0x410] sm:$0xff] %vm341_vm1, %v7904_v0 }
  0x47   : > { %475 = vst.msk [vmem:[#allocation3 + $0x420] sm:$0xff] %vm341_vm1, %v7904_v0  ;;  %477 = vst.msk [vmem:[#allocation3 + $0x430] sm:$0xff] %vm341_vm1, %v7904_v0 }
  0x48   : > { %479 = vst.msk [vmem:[#allocation3 + $0x440] sm:$0xff] %vm341_vm1, %v7904_v0  ;;  %481 = vst.msk [vmem:[#allocation3 + $0x450] sm:$0xff] %vm341_vm1, %v7904_v0  ;;  %709 = vrot.lane.b32.xlu1 %v562_v35, %s11014_s18  ;;  %707 = vrot.lane.b32.xlu0 %v561_v36, %s11014_s18 }
  0x49   : > { %483 = vst.msk [vmem:[#allocation3 + $0x460] sm:$0xff] %vm341_vm1, %v7904_v0  ;;  %485 = vst.msk [vmem:[#allocation3 + $0x470] sm:$0xff] %vm341_vm1, %v7904_v0 }
  0x4a   : > { %487 = vst.msk [vmem:[#allocation3 + $0x480] sm:$0xff] %vm341_vm1, %v7904_v0  ;;  %489 = vst.msk [vmem:[#allocation3 + $0x490] sm:$0xff] %vm341_vm1, %v7904_v0 }
  0x4b   : > { %491 = vst.msk [vmem:[#allocation3 + $0x4a0] sm:$0xff] %vm341_vm1, %v7904_v0  ;;  %493 = vst.msk [vmem:[#allocation3 + $0x4b0] sm:$0xff] %vm341_vm1, %v7904_v0 }
  0x4c   : > { %495 = vst.msk [vmem:[#allocation3 + $0x4c0] sm:$0xff] %vm341_vm1, %v7904_v0  ;;  %497 = vst.msk [vmem:[#allocation3 + $0x4d0] sm:$0xff] %vm341_vm1, %v7904_v0  ;;  %713 = vrot.lane.b32.xlu1 %v564_v37, %s11014_s18  ;;  %711 = vrot.lane.b32.xlu0 %v563_v38, %s11014_s18 }
  0x4d   : > { %499 = vst.msk [vmem:[#allocation3 + $0x4e0] sm:$0xff] %vm341_vm1, %v7904_v0  ;;  %501 = vst.msk [vmem:[#allocation3 + $0x4f0] sm:$0xff] %vm341_vm1, %v7904_v0 }
  0x4e   : > { %503 = vst.msk [vmem:[#allocation3 + $0x500] sm:$0xff] %vm341_vm1, %v7904_v0  ;;  %505 = vst.msk [vmem:[#allocation3 + $0x510] sm:$0xff] %vm341_vm1, %v7904_v0 }
  0x4f   : > { %507 = vst.msk [vmem:[#allocation3 + $0x520] sm:$0xff] %vm341_vm1, %v7904_v0  ;;  %509 = vst.msk [vmem:[#allocation3 + $0x530] sm:$0xff] %vm341_vm1, %v7904_v0 }
  0x50   : > { %511 = vst.msk [vmem:[#allocation3 + $0x540] sm:$0xff] %vm341_vm1, %v7904_v0  ;;  %513 = vst.msk [vmem:[#allocation3 + $0x550] sm:$0xff] %vm341_vm1, %v7904_v0  ;;  %717 = vrot.lane.b32.xlu1 %v566_v39, %s11014_s18  ;;  %715 = vrot.lane.b32.xlu0 %v565_v40, %s11014_s18 }
  0x51   : > { %515 = vst.msk [vmem:[#allocation3 + $0x560] sm:$0xff] %vm341_vm1, %v7904_v0  ;;  %517 = vst.msk [vmem:[#allocation3 + $0x570] sm:$0xff] %vm341_vm1, %v7904_v0 }
  0x52   : > { %519 = vst.msk [vmem:[#allocation3 + $0x580] sm:$0xff] %vm341_vm1, %v7904_v0  ;;  %521 = vst.msk [vmem:[#allocation3 + $0x590] sm:$0xff] %vm341_vm1, %v7904_v0 }
  0x53   : > { %523 = vst.msk [vmem:[#allocation3 + $0x5a0] sm:$0xff] %vm341_vm1, %v7904_v0  ;;  %525 = vst.msk [vmem:[#allocation3 + $0x5b0] sm:$0xff] %vm341_vm1, %v7904_v0 }
  0x54   : > { %527 = vst.msk [vmem:[#allocation3 + $0x5c0] sm:$0xff] %vm341_vm1, %v7904_v0  ;;  %529 = vst.msk [vmem:[#allocation3 + $0x5d0] sm:$0xff] %vm341_vm1, %v7904_v0  ;;  %721 = vrot.lane.b32.xlu1 %v568_v41, %s11014_s18  ;;  %719 = vrot.lane.b32.xlu0 %v567_v42, %s11014_s18 }
  0x55   : > { %531 = vst.msk [vmem:[#allocation3 + $0x5e0] sm:$0xff] %vm341_vm1, %v7904_v0  ;;  %533 = vst.msk [vmem:[#allocation3 + $0x5f0] sm:$0xff] %vm341_vm1, %v7904_v0 }
  0x56   : > { %535 = vst.msk [vmem:[#allocation3 + $0x600] sm:$0xff] %vm341_vm1, %v7904_v0  ;;  %537 = vst.msk [vmem:[#allocation3 + $0x610] sm:$0xff] %vm341_vm1, %v7904_v0 }
  0x57   : > { %539 = vst.msk [vmem:[#allocation3 + $0x620] sm:$0xff] %vm341_vm1, %v7904_v0  ;;  %541 = vst.msk [vmem:[#allocation3 + $0x630] sm:$0xff] %vm341_vm1, %v7904_v0 }
  0x58   : > { %370 = vst.msk [vmem:[#allocation3 + $0xd8] sm:$0x3] %vm343_vm2, %v7904_v0  ;;  %344 = vst.msk [vmem:[#allocation3 + $0x8] sm:$0x3] %vm343_vm2, %v7904_v0  ;;  %725 = vrot.lane.b32.xlu1 %v570_v43, %s11014_s18  ;;  %723 = vrot.lane.b32.xlu0 %v569_v44, %s11014_s18 }
  0x59   : > { %346 = vst.msk [vmem:[#allocation3 + $0x18] sm:$0x3] %vm343_vm2, %v7904_v0  ;;  %348 = vst.msk [vmem:[#allocation3 + $0x28] sm:$0x3] %vm343_vm2, %v7904_v0 }
  0x5a   : > { %350 = vst.msk [vmem:[#allocation3 + $0x38] sm:$0x3] %vm343_vm2, %v7904_v0  ;;  %352 = vst.msk [vmem:[#allocation3 + $0x48] sm:$0x3] %vm343_vm2, %v7904_v0 }
  0x5b   : > { %354 = vst.msk [vmem:[#allocation3 + $0x58] sm:$0x3] %vm343_vm2, %v7904_v0  ;;  %356 = vst.msk [vmem:[#allocation3 + $0x68] sm:$0x3] %vm343_vm2, %v7904_v0 }
  0x5c   : > { %358 = vst.msk [vmem:[#allocation3 + $0x78] sm:$0x3] %vm343_vm2, %v7904_v0  ;;  %360 = vst.msk [vmem:[#allocation3 + $0x88] sm:$0x3] %vm343_vm2, %v7904_v0  ;;  %729 = vrot.lane.b32.xlu1 %v572_v45, %s11014_s18  ;;  %727 = vrot.lane.b32.xlu0 %v571_v46, %s11014_s18 }
  0x5d   : > { %362 = vst.msk [vmem:[#allocation3 + $0x98] sm:$0x3] %vm343_vm2, %v7904_v0  ;;  %364 = vst.msk [vmem:[#allocation3 + $0xa8] sm:$0x3] %vm343_vm2, %v7904_v0 }
  0x5e   : > { %366 = vst.msk [vmem:[#allocation3 + $0xb8] sm:$0x3] %vm343_vm2, %v7904_v0  ;;  %368 = vst.msk [vmem:[#allocation3 + $0xc8] sm:$0x3] %vm343_vm2, %v7904_v0 }
  0x5f   : > { %372 = vst.msk [vmem:[#allocation3 + $0xe8] sm:$0x3] %vm343_vm2, %v7904_v0  ;;  %374 = vst.msk [vmem:[#allocation3 + $0xf8] sm:$0x3] %vm343_vm2, %v7904_v0 }
  0x60   : > { %376 = vst.msk [vmem:[#allocation3 + $0x108] sm:$0x3] %vm343_vm2, %v7904_v0  ;;  %378 = vst.msk [vmem:[#allocation3 + $0x118] sm:$0x3] %vm343_vm2, %v7904_v0  ;;  %733 = vrot.lane.b32.xlu1 %v574_v47, %s11014_s18  ;;  %731 = vrot.lane.b32.xlu0 %v573_v48, %s11014_s18 }
  0x61   : > { %380 = vst.msk [vmem:[#allocation3 + $0x128] sm:$0x3] %vm343_vm2, %v7904_v0  ;;  %382 = vst.msk [vmem:[#allocation3 + $0x138] sm:$0x3] %vm343_vm2, %v7904_v0 }
  0x62   : > { %384 = vst.msk [vmem:[#allocation3 + $0x148] sm:$0x3] %vm343_vm2, %v7904_v0  ;;  %386 = vst.msk [vmem:[#allocation3 + $0x158] sm:$0x3] %vm343_vm2, %v7904_v0 }
  0x63   : > { %388 = vst.msk [vmem:[#allocation3 + $0x168] sm:$0x3] %vm343_vm2, %v7904_v0  ;;  %390 = vst.msk [vmem:[#allocation3 + $0x178] sm:$0x3] %vm343_vm2, %v7904_v0 }
  0x64   : > { %392 = vst.msk [vmem:[#allocation3 + $0x188] sm:$0x3] %vm343_vm2, %v7904_v0  ;;  %394 = vst.msk [vmem:[#allocation3 + $0x198] sm:$0x3] %vm343_vm2, %v7904_v0  ;;  %737 = vrot.lane.b32.xlu1 %v576_v49, %s11014_s18  ;;  %735 = vrot.lane.b32.xlu0 %v575_v50, %s11014_s18 }
  0x65   : > { %396 = vst.msk [vmem:[#allocation3 + $0x1a8] sm:$0x3] %vm343_vm2, %v7904_v0  ;;  %398 = vst.msk [vmem:[#allocation3 + $0x1b8] sm:$0x3] %vm343_vm2, %v7904_v0 }
  0x66   : > { %400 = vst.msk [vmem:[#allocation3 + $0x1c8] sm:$0x3] %vm343_vm2, %v7904_v0  ;;  %402 = vst.msk [vmem:[#allocation3 + $0x1d8] sm:$0x3] %vm343_vm2, %v7904_v0 }
  0x67   : > { %404 = vst.msk [vmem:[#allocation3 + $0x1e8] sm:$0x3] %vm343_vm2, %v7904_v0  ;;  %406 = vst.msk [vmem:[#allocation3 + $0x1f8] sm:$0x3] %vm343_vm2, %v7904_v0 }
  0x68   : > { %408 = vst.msk [vmem:[#allocation3 + $0x208] sm:$0x3] %vm343_vm2, %v7904_v0  ;;  %410 = vst.msk [vmem:[#allocation3 + $0x218] sm:$0x3] %vm343_vm2, %v7904_v0  ;;  %741 = vrot.lane.b32.xlu1 %v578_v51, %s11014_s18  ;;  %739 = vrot.lane.b32.xlu0 %v577_v52, %s11014_s18 }
  0x69   : > { %412 = vst.msk [vmem:[#allocation3 + $0x228] sm:$0x3] %vm343_vm2, %v7904_v0  ;;  %414 = vst.msk [vmem:[#allocation3 + $0x238] sm:$0x3] %vm343_vm2, %v7904_v0 }
  0x6a   : > { %416 = vst.msk [vmem:[#allocation3 + $0x248] sm:$0x3] %vm343_vm2, %v7904_v0  ;;  %418 = vst.msk [vmem:[#allocation3 + $0x258] sm:$0x3] %vm343_vm2, %v7904_v0 }
  0x6b   : > { %420 = vst.msk [vmem:[#allocation3 + $0x268] sm:$0x3] %vm343_vm2, %v7904_v0  ;;  %422 = vst.msk [vmem:[#allocation3 + $0x278] sm:$0x3] %vm343_vm2, %v7904_v0 }
  0x6c   : > { %424 = vst.msk [vmem:[#allocation3 + $0x288] sm:$0x3] %vm343_vm2, %v7904_v0  ;;  %426 = vst.msk [vmem:[#allocation3 + $0x298] sm:$0x3] %vm343_vm2, %v7904_v0  ;;  %745 = vrot.lane.b32.xlu1 %v580_v53, %s11014_s18  ;;  %743 = vrot.lane.b32.xlu0 %v579_v54, %s11014_s18 }
  0x6d   : > { %428 = vst.msk [vmem:[#allocation3 + $0x2a8] sm:$0x3] %vm343_vm2, %v7904_v0  ;;  %430 = vst.msk [vmem:[#allocation3 + $0x2b8] sm:$0x3] %vm343_vm2, %v7904_v0 }
  0x6e   : > { %432 = vst.msk [vmem:[#allocation3 + $0x2c8] sm:$0x3] %vm343_vm2, %v7904_v0  ;;  %434 = vst.msk [vmem:[#allocation3 + $0x2d8] sm:$0x3] %vm343_vm2, %v7904_v0 }
  0x6f   : > { %436 = vst.msk [vmem:[#allocation3 + $0x2e8] sm:$0x3] %vm343_vm2, %v7904_v0  ;;  %438 = vst.msk [vmem:[#allocation3 + $0x2f8] sm:$0x3] %vm343_vm2, %v7904_v0 }
  0x70   : > { %440 = vst.msk [vmem:[#allocation3 + $0x308] sm:$0x3] %vm343_vm2, %v7904_v0  ;;  %442 = vst.msk [vmem:[#allocation3 + $0x318] sm:$0x3] %vm343_vm2, %v7904_v0  ;;  %749 = vrot.lane.b32.xlu1 %v582_v55, %s11014_s18  ;;  %747 = vrot.lane.b32.xlu0 %v581_v56, %s11014_s18 }
  0x71   : > { %444 = vst.msk [vmem:[#allocation3 + $0x328] sm:$0x3] %vm343_vm2, %v7904_v0  ;;  %446 = vst.msk [vmem:[#allocation3 + $0x338] sm:$0x3] %vm343_vm2, %v7904_v0 }
  0x72   : > { %448 = vst.msk [vmem:[#allocation3 + $0x348] sm:$0x3] %vm343_vm2, %v7904_v0  ;;  %450 = vst.msk [vmem:[#allocation3 + $0x358] sm:$0x3] %vm343_vm2, %v7904_v0 }
  0x73   : > { %452 = vst.msk [vmem:[#allocation3 + $0x368] sm:$0x3] %vm343_vm2, %v7904_v0  ;;  %454 = vst.msk [vmem:[#allocation3 + $0x378] sm:$0x3] %vm343_vm2, %v7904_v0 }
  0x74   : > { %456 = vst.msk [vmem:[#allocation3 + $0x388] sm:$0x3] %vm343_vm2, %v7904_v0  ;;  %458 = vst.msk [vmem:[#allocation3 + $0x398] sm:$0x3] %vm343_vm2, %v7904_v0  ;;  %753 = vrot.lane.b32.xlu1 %v584_v57, %s11014_s18  ;;  %751 = vrot.lane.b32.xlu0 %v583_v58, %s11014_s18 }
  0x75   : > { %460 = vst.msk [vmem:[#allocation3 + $0x3a8] sm:$0x3] %vm343_vm2, %v7904_v0  ;;  %462 = vst.msk [vmem:[#allocation3 + $0x3b8] sm:$0x3] %vm343_vm2, %v7904_v0 }
  0x76   : > { %464 = vst.msk [vmem:[#allocation3 + $0x3c8] sm:$0x3] %vm343_vm2, %v7904_v0  ;;  %466 = vst.msk [vmem:[#allocation3 + $0x3d8] sm:$0x3] %vm343_vm2, %v7904_v0 }
  0x77   : > { %468 = vst.msk [vmem:[#allocation3 + $0x3e8] sm:$0x3] %vm343_vm2, %v7904_v0  ;;  %470 = vst.msk [vmem:[#allocation3 + $0x3f8] sm:$0x3] %vm343_vm2, %v7904_v0 }
  0x78   : > { %472 = vst.msk [vmem:[#allocation3 + $0x408] sm:$0x3] %vm343_vm2, %v7904_v0  ;;  %474 = vst.msk [vmem:[#allocation3 + $0x418] sm:$0x3] %vm343_vm2, %v7904_v0  ;;  %757 = vrot.lane.b32.xlu1 %v586_v59, %s11014_s18  ;;  %755 = vrot.lane.b32.xlu0 %v585_v60, %s11014_s18 }
  0x79   : > { %476 = vst.msk [vmem:[#allocation3 + $0x428] sm:$0x3] %vm343_vm2, %v7904_v0  ;;  %478 = vst.msk [vmem:[#allocation3 + $0x438] sm:$0x3] %vm343_vm2, %v7904_v0 }
  0x7a   : > { %480 = vst.msk [vmem:[#allocation3 + $0x448] sm:$0x3] %vm343_vm2, %v7904_v0  ;;  %482 = vst.msk [vmem:[#allocation3 + $0x458] sm:$0x3] %vm343_vm2, %v7904_v0 }
  0x7b   : > { %484 = vst.msk [vmem:[#allocation3 + $0x468] sm:$0x3] %vm343_vm2, %v7904_v0  ;;  %486 = vst.msk [vmem:[#allocation3 + $0x478] sm:$0x3] %vm343_vm2, %v7904_v0 }
  0x7c   : > { %488 = vst.msk [vmem:[#allocation3 + $0x488] sm:$0x3] %vm343_vm2, %v7904_v0  ;;  %490 = vst.msk [vmem:[#allocation3 + $0x498] sm:$0x3] %vm343_vm2, %v7904_v0  ;;  %761 = vrot.lane.b32.xlu1 %v588_v61, %s11014_s18  ;;  %759 = vrot.lane.b32.xlu0 %v587_v62, %s11014_s18 }
  0x7d   : > { %492 = vst.msk [vmem:[#allocation3 + $0x4a8] sm:$0x3] %vm343_vm2, %v7904_v0  ;;  %494 = vst.msk [vmem:[#allocation3 + $0x4b8] sm:$0x3] %vm343_vm2, %v7904_v0 }
  0x7e   : > { %496 = vst.msk [vmem:[#allocation3 + $0x4c8] sm:$0x3] %vm343_vm2, %v7904_v0  ;;  %498 = vst.msk [vmem:[#allocation3 + $0x4d8] sm:$0x3] %vm343_vm2, %v7904_v0 }
  0x7f   : > { %500 = vst.msk [vmem:[#allocation3 + $0x4e8] sm:$0x3] %vm343_vm2, %v7904_v0  ;;  %502 = vst.msk [vmem:[#allocation3 + $0x4f8] sm:$0x3] %vm343_vm2, %v7904_v0 }
  0x80   : > { %504 = vst.msk [vmem:[#allocation3 + $0x508] sm:$0x3] %vm343_vm2, %v7904_v0  ;;  %506 = vst.msk [vmem:[#allocation3 + $0x518] sm:$0x3] %vm343_vm2, %v7904_v0  ;;  %765 = vrot.lane.b32.xlu1 %v590_v63, %s11014_s18 }
  0x81   : > { %508 = vst.msk [vmem:[#allocation3 + $0x528] sm:$0x3] %vm343_vm2, %v7904_v0  ;;  %510 = vst.msk [vmem:[#allocation3 + $0x538] sm:$0x3] %vm343_vm2, %v7904_v0 }
  0x82   : > { %512 = vst.msk [vmem:[#allocation3 + $0x548] sm:$0x3] %vm343_vm2, %v7904_v0  ;;  %514 = vst.msk [vmem:[#allocation3 + $0x558] sm:$0x3] %vm343_vm2, %v7904_v0 }
  0x83   : > { %516 = vst.msk [vmem:[#allocation3 + $0x568] sm:$0x3] %vm343_vm2, %v7904_v0  ;;  %518 = vst.msk [vmem:[#allocation3 + $0x578] sm:$0x3] %vm343_vm2, %v7904_v0 }
  0x84   : > { %520 = vst.msk [vmem:[#allocation3 + $0x588] sm:$0x3] %vm343_vm2, %v7904_v0  ;;  %522 = vst.msk [vmem:[#allocation3 + $0x598] sm:$0x3] %vm343_vm2, %v7904_v0  ;;  %769 = vrot.lane.b32.xlu1 %v592_v1, %s11014_s18 }
  0x85   : > { %524 = vst.msk [vmem:[#allocation3 + $0x5a8] sm:$0x3] %vm343_vm2, %v7904_v0  ;;  %526 = vst.msk [vmem:[#allocation3 + $0x5b8] sm:$0x3] %vm343_vm2, %v7904_v0 }
  0x86   : > { %528 = vst.msk [vmem:[#allocation3 + $0x5c8] sm:$0x3] %vm343_vm2, %v7904_v0  ;;  %530 = vst.msk [vmem:[#allocation3 + $0x5d8] sm:$0x3] %vm343_vm2, %v7904_v0 }
  0x87   : > { %532 = vst.msk [vmem:[#allocation3 + $0x5e8] sm:$0x3] %vm343_vm2, %v7904_v0  ;;  %534 = vst.msk [vmem:[#allocation3 + $0x5f8] sm:$0x3] %vm343_vm2, %v7904_v0 }
  0x88   : > { %536 = vst.msk [vmem:[#allocation3 + $0x608] sm:$0x3] %vm343_vm2, %v7904_v0  ;;  %538 = vst.msk [vmem:[#allocation3 + $0x618] sm:$0x3] %vm343_vm2, %v7904_v0 }
  0x89   : > { %540 = vst.msk [vmem:[#allocation3 + $0x628] sm:$0x3] %vm343_vm2, %v7904_v0  ;;  %542 = vst.msk [vmem:[#allocation3 + $0x638] sm:$0x3] %vm343_vm2, %v7904_v0  ;;  %v589_v0 = vld [vmem:[%s8491_s14 + $0x170] sm:$0xff] }
  0x8a   : > { %325 = vst.msk [vmem:[#allocation2 + $0x39] sm:$0xf] %vm324_vm3, %v307_v2  ;;  %326 = vst.msk [vmem:[#allocation2 + $0x41] sm:$0xf] %vm324_vm3, %v308_v3  ;;  %763 = vrot.lane.b32.xlu0 %v589_v0, %s11014_s18  ;;  %v591_v2 = vld [vmem:[%s8491_s14 + $0x180] sm:$0xff]  ;;  %v594_v3 = vld [vmem:[%s8491_s14 + $0x198] sm:$0xff] }
  0x8b   : > { %327 = vst.msk [vmem:[#allocation2 + $0x49] sm:$0xf] %vm324_vm3, %v309_v4  ;;  %328 = vst.msk [vmem:[#allocation2 + $0x51] sm:$0xf] %vm324_vm3, %v310_v5  ;;  %773 = vrot.lane.b32.xlu1 %v594_v3, %s11014_s18  ;;  %v593_v4 = vld [vmem:[%s8491_s14 + $0x190] sm:$0xff]  ;;  %v596_v5 = vld [vmem:[%s8491_s14 + $0x1a8] sm:$0xff] }
  0x8c   : > { %329 = vst.msk [vmem:[#allocation2 + $0x69] sm:$0xf] %vm324_vm3, %v311_v6  ;;  %330 = vst.msk [vmem:[#allocation2 + $0x71] sm:$0xf] %vm324_vm3, %v312_v7  ;;  %v595_v6 = vld [vmem:[%s8491_s14 + $0x1a0] sm:$0xff]  ;;  %v598_v7 = vld [vmem:[%s8491_s14 + $0x1b8] sm:$0xff] }
  0x8d   : > { %331 = vst.msk [vmem:[#allocation2 + $0x79] sm:$0xf] %vm324_vm3, %v313_v8  ;;  %332 = vst.msk [vmem:[#allocation2 + $0x81] sm:$0xf] %vm324_vm3, %v314_v9  ;;  %v597_v8 = vld [vmem:[%s8491_s14 + $0x1b0] sm:$0xff]  ;;  %v600_v9 = vld [vmem:[%s8491_s14 + $0x1c8] sm:$0xff] }
  0x8e   : > { %333 = vst.msk [vmem:[#allocation2 + $0x99] sm:$0xf] %vm324_vm3, %v315_v10  ;;  %334 = vst.msk [vmem:[#allocation2 + $0xa1] sm:$0xf] %vm324_vm3, %v316_v11  ;;  %767 = vrot.lane.b32.xlu0 %v591_v2, %s11014_s18  ;;  %v599_v10 = vld [vmem:[%s8491_s14 + $0x1c0] sm:$0xff]  ;;  %v676_v11 = vpop.permute.xlu1 %675 }
  0x8f   : > { %335 = vst.msk [vmem:[#allocation2 + $0xa9] sm:$0xf] %vm324_vm3, %v317_v12  ;;  %336 = vst.msk [vmem:[#allocation2 + $0xb1] sm:$0xf] %vm324_vm3, %v318_v13  ;;  %777 = vrot.lane.b32.xlu1 %v596_v5, %s11014_s18  ;;  %v602_v12 = vld [vmem:[%s8491_s14 + $0x1d8] sm:$0xff] }
  0x90   : > { %337 = vst.msk [vmem:[#allocation2 + $0xc9] sm:$0xf] %vm324_vm3, %v319_v14  ;;  %338 = vst.msk [vmem:[#allocation2 + $0xd1] sm:$0xf] %vm324_vm3, %v320_v15  ;;  %v8637_v13 = vld [vmem:[%s11010_s3] ss:$0 sm:$0xff] }
  0x91   : > { %339 = vst.msk [vmem:[#allocation2 + $0xd9] sm:$0xf] %vm324_vm3, %v321_v16  ;;  %340 = vst.msk [vmem:[#allocation2 + $0xe1] sm:$0xf] %vm324_vm3, %v322_v17  ;;  %v8642_v14 = vld [vmem:[%s11012_s5] ss:$0 sm:$0xff]  ;;  %v672_v16 = vpop.permute.xlu0 %671 }
  0x92   : > { %771 = vrot.lane.b32.xlu0 %v593_v4, %s11014_s18  ;;  %867 = vst.msk [vmem:[#allocation3 + $0xd1] sm:$0xff] %vm864_vm4, %v676_v11  ;;  %v601_v15 = vld [vmem:[%s8491_s14 + $0x1d0] sm:$0xff]  ;;  %v604_v17 = vld [vmem:[%s8491_s14 + $0x1e8] sm:$0xff]  ;;  %865 = vst.msk [vmem:[#allocation3 + $0xb1] sm:$0xff] %vm864_vm4, %v672_v16 }
  0x93   : > { %781 = vrot.lane.b32.xlu1 %v598_v7, %s11014_s18 }
  0x96   : > { %775 = vrot.lane.b32.xlu0 %v595_v6, %s11014_s18 }
  0x97   : > { %785 = vrot.lane.b32.xlu1 %v600_v9, %s11014_s18 }
  0x9a   : > { %779 = vrot.lane.b32.xlu0 %v597_v8, %s11014_s18  ;;  %v678_v18 = vpop.permute.xlu1 %677  ;;  %v674_v20 = vpop.permute.xlu0 %673 }
  0x9b   : > { %789 = vrot.lane.b32.xlu1 %v602_v12, %s11014_s18  ;;  %868 = vst.msk [vmem:[#allocation3 + $0xe1] sm:$0xff] %vm864_vm4, %v678_v18  ;;  %866 = vst.msk [vmem:[#allocation3 + $0xc1] sm:$0xff] %vm864_vm4, %v674_v20 }
  0x9e   : > { %783 = vrot.lane.b32.xlu0 %v599_v10, %s11014_s18  ;;  %v682_v22 = vpop.permute.xlu1 %681  ;;  %v680_v24 = vpop.permute.xlu0 %679 }
  0x9f   : > { %793 = vrot.lane.b32.xlu1 %v604_v17, %s11014_s18  ;;  %870 = vst.msk [vmem:[#allocation3 + $0x101] sm:$0xff] %vm864_vm4, %v682_v22  ;;  %869 = vst.msk [vmem:[#allocation3 + $0xf1] sm:$0xff] %vm864_vm4, %v680_v24 }
  0xa2   : > { %787 = vrot.lane.b32.xlu0 %v601_v15, %s11014_s18  ;;  %v686_v25 = vpop.permute.xlu1 %685  ;;  %v684_v26 = vpop.permute.xlu0 %683 }
  0xa3   : > { %797 = vrot.lane.b32.xlu1 %v606_v21, %s11014_s18  ;;  %872 = vst.msk [vmem:[#allocation3 + $0x121] sm:$0xff] %vm864_vm4, %v686_v25  ;;  %871 = vst.msk [vmem:[#allocation3 + $0x111] sm:$0xff] %vm864_vm4, %v684_v26 }
  0xa6   : > { %791 = vrot.lane.b32.xlu0 %v603_v19, %s11014_s18  ;;  %v690_v27 = vpop.permute.xlu1 %689  ;;  %v688_v28 = vpop.permute.xlu0 %687 }
  0xa7   : > { %874 = vst.msk [vmem:[#allocation3 + $0x161] sm:$0xff] %vm864_vm4, %v690_v27  ;;  %873 = vst.msk [vmem:[#allocation3 + $0x151] sm:$0xff] %vm864_vm4, %v688_v28 }
  0xaa   : > { %795 = vrot.lane.b32.xlu0 %v605_v23, %s11014_s18  ;;  %v694_v29 = vpop.permute.xlu1 %693  ;;  %v692_v30 = vpop.permute.xlu0 %691 }
  0xab   : > { %876 = vst.msk [vmem:[#allocation3 + $0x181] sm:$0xff] %vm864_vm4, %v694_v29  ;;  %875 = vst.msk [vmem:[#allocation3 + $0x171] sm:$0xff] %vm864_vm4, %v692_v30 }
  0xae   : > { %v698_v31 = vpop.permute.xlu1 %697  ;;  %v696_v32 = vpop.permute.xlu0 %695 }
  0xaf   : > { %878 = vst.msk [vmem:[#allocation3 + $0x1a1] sm:$0xff] %vm864_vm4, %v698_v31  ;;  %877 = vst.msk [vmem:[#allocation3 + $0x191] sm:$0xff] %vm864_vm4, %v696_v32 }
  0xb2   : > { %v702_v33 = vpop.permute.xlu1 %701  ;;  %v700_v34 = vpop.permute.xlu0 %699 }
  0xb3   : > { %880 = vst.msk [vmem:[#allocation3 + $0x1c1] sm:$0xff] %vm864_vm4, %v702_v33  ;;  %879 = vst.msk [vmem:[#allocation3 + $0x1b1] sm:$0xff] %vm864_vm4, %v700_v34 }
  0xb6   : > { %v706_v35 = vpop.permute.xlu1 %705  ;;  %v704_v36 = vpop.permute.xlu0 %703 }
  0xb7   : > { %882 = vst.msk [vmem:[#allocation3 + $0x201] sm:$0xff] %vm864_vm4, %v706_v35  ;;  %881 = vst.msk [vmem:[#allocation3 + $0x1f1] sm:$0xff] %vm864_vm4, %v704_v36 }
  0xba   : > { %v710_v37 = vpop.permute.xlu1 %709  ;;  %v708_v38 = vpop.permute.xlu0 %707 }
  0xbb   : > { %884 = vst.msk [vmem:[#allocation3 + $0x221] sm:$0xff] %vm864_vm4, %v710_v37  ;;  %883 = vst.msk [vmem:[#allocation3 + $0x211] sm:$0xff] %vm864_vm4, %v708_v38 }
  0xbe   : > { %v714_v39 = vpop.permute.xlu1 %713  ;;  %v712_v40 = vpop.permute.xlu0 %711 }
  0xbf   : > { %886 = vst.msk [vmem:[#allocation3 + $0x241] sm:$0xff] %vm864_vm4, %v714_v39  ;;  %885 = vst.msk [vmem:[#allocation3 + $0x231] sm:$0xff] %vm864_vm4, %v712_v40 }
  0xc2   : > { %v718_v41 = vpop.permute.xlu1 %717  ;;  %v716_v42 = vpop.permute.xlu0 %715 }
  0xc3   : > { %888 = vst.msk [vmem:[#allocation3 + $0x261] sm:$0xff] %vm864_vm4, %v718_v41  ;;  %887 = vst.msk [vmem:[#allocation3 + $0x251] sm:$0xff] %vm864_vm4, %v716_v42 }
  0xc6   : > { %v722_v43 = vpop.permute.xlu1 %721  ;;  %v720_v44 = vpop.permute.xlu0 %719 }
  0xc7   : > { %890 = vst.msk [vmem:[#allocation3 + $0x2a1] sm:$0xff] %vm864_vm4, %v722_v43  ;;  %889 = vst.msk [vmem:[#allocation3 + $0x291] sm:$0xff] %vm864_vm4, %v720_v44 }
  0xca   : > { %v726_v45 = vpop.permute.xlu1 %725  ;;  %v724_v46 = vpop.permute.xlu0 %723 }
  0xcb   : > { %892 = vst.msk [vmem:[#allocation3 + $0x2c1] sm:$0xff] %vm864_vm4, %v726_v45  ;;  %891 = vst.msk [vmem:[#allocation3 + $0x2b1] sm:$0xff] %vm864_vm4, %v724_v46 }
  0xce   : > { %v730_v47 = vpop.permute.xlu1 %729  ;;  %v728_v48 = vpop.permute.xlu0 %727 }
  0xcf   : > { %894 = vst.msk [vmem:[#allocation3 + $0x2e1] sm:$0xff] %vm864_vm4, %v730_v47  ;;  %893 = vst.msk [vmem:[#allocation3 + $0x2d1] sm:$0xff] %vm864_vm4, %v728_v48 }
  0xd2   : > { %v734_v49 = vpop.permute.xlu1 %733  ;;  %v732_v50 = vpop.permute.xlu0 %731 }
  0xd3   : > { %896 = vst.msk [vmem:[#allocation3 + $0x301] sm:$0xff] %vm864_vm4, %v734_v49  ;;  %895 = vst.msk [vmem:[#allocation3 + $0x2f1] sm:$0xff] %vm864_vm4, %v732_v50 }
  0xd6   : > { %v738_v51 = vpop.permute.xlu1 %737  ;;  %v736_v52 = vpop.permute.xlu0 %735 }
  0xd7   : > { %898 = vst.msk [vmem:[#allocation3 + $0x341] sm:$0xff] %vm864_vm4, %v738_v51  ;;  %897 = vst.msk [vmem:[#allocation3 + $0x331] sm:$0xff] %vm864_vm4, %v736_v52 }
  0xda   : > { %v742_v53 = vpop.permute.xlu1 %741  ;;  %v740_v54 = vpop.permute.xlu0 %739 }
  0xdb   : > { %900 = vst.msk [vmem:[#allocation3 + $0x361] sm:$0xff] %vm864_vm4, %v742_v53  ;;  %899 = vst.msk [vmem:[#allocation3 + $0x351] sm:$0xff] %vm864_vm4, %v740_v54 }
  0xde   : > { %v746_v55 = vpop.permute.xlu1 %745  ;;  %v744_v56 = vpop.permute.xlu0 %743 }
  0xdf   : > { %902 = vst.msk [vmem:[#allocation3 + $0x381] sm:$0xff] %vm864_vm4, %v746_v55  ;;  %901 = vst.msk [vmem:[#allocation3 + $0x371] sm:$0xff] %vm864_vm4, %v744_v56 }
  0xe2   : > { %v750_v57 = vpop.permute.xlu1 %749  ;;  %v748_v58 = vpop.permute.xlu0 %747 }
  0xe3   : > { %904 = vst.msk [vmem:[#allocation3 + $0x3a1] sm:$0xff] %vm864_vm4, %v750_v57  ;;  %903 = vst.msk [vmem:[#allocation3 + $0x391] sm:$0xff] %vm864_vm4, %v748_v58 }
  0xe6   : > { %v754_v59 = vpop.permute.xlu1 %753  ;;  %v752_v60 = vpop.permute.xlu0 %751 }
  0xe7   : > { %906 = vst.msk [vmem:[#allocation3 + $0x3e1] sm:$0xff] %vm864_vm4, %v754_v59  ;;  %905 = vst.msk [vmem:[#allocation3 + $0x3d1] sm:$0xff] %vm864_vm4, %v752_v60 }
  0xea   : > { %v758_v61 = vpop.permute.xlu1 %757  ;;  %v756_v62 = vpop.permute.xlu0 %755 }
  0xeb   : > { %908 = vst.msk [vmem:[#allocation3 + $0x401] sm:$0xff] %vm864_vm4, %v758_v61  ;;  %907 = vst.msk [vmem:[#allocation3 + $0x3f1] sm:$0xff] %vm864_vm4, %v756_v62 }
  0xee   : > { %v762_v63 = vpop.permute.xlu1 %761  ;;  %v760_v0 = vpop.permute.xlu0 %759 }
  0xef   : > { %910 = vst.msk [vmem:[#allocation3 + $0x421] sm:$0xff] %vm864_vm4, %v762_v63  ;;  %909 = vst.msk [vmem:[#allocation3 + $0x411] sm:$0xff] %vm864_vm4, %v760_v0 }
  0xf2   : > { %v766_v1 = vpop.permute.xlu1 %765 }
  0xf3   : > { %912 = vst.msk [vmem:[#allocation3 + $0x441] sm:$0xff] %vm864_vm4, %v766_v1 }
  0xf6   : > { %v770_v3 = vpop.permute.xlu1 %769 }
  0xf7   : > { %914 = vst.msk [vmem:[#allocation3 + $0x481] sm:$0xff] %vm864_vm4, %v770_v3 }
  0xfc   : > { %v764_v2 = vpop.permute.xlu0 %763 }
  0xfd   : > { %911 = vst.msk [vmem:[#allocation3 + $0x431] sm:$0xff] %vm864_vm4, %v764_v2  ;;  %v774_v5 = vpop.permute.xlu1 %773 }
  0xfe   : > { %916 = vst.msk [vmem:[#allocation3 + $0x4a1] sm:$0xff] %vm864_vm4, %v774_v5 }
 0x100   : > { %v768_v4 = vpop.permute.xlu0 %767 }
 0x101   : > { %913 = vst.msk [vmem:[#allocation3 + $0x471] sm:$0xff] %vm864_vm4, %v768_v4  ;;  %v778_v7 = vpop.permute.xlu1 %777 }
 0x102   : > { %918 = vst.msk [vmem:[#allocation3 + $0x4c1] sm:$0xff] %vm864_vm4, %v778_v7 }
 0x104   : > { %v772_v6 = vpop.permute.xlu0 %771 }
 0x105   : > { %915 = vst.msk [vmem:[#allocation3 + $0x491] sm:$0xff] %vm864_vm4, %v772_v6  ;;  %v782_v9 = vpop.permute.xlu1 %781 }
 0x106   : > { %920 = vst.msk [vmem:[#allocation3 + $0x4e1] sm:$0xff] %vm864_vm4, %v782_v9 }
 0x108   : > { %v776_v8 = vpop.permute.xlu0 %775 }
 0x109   : > { %917 = vst.msk [vmem:[#allocation3 + $0x4b1] sm:$0xff] %vm864_vm4, %v776_v8  ;;  %v786_v11 = vpop.permute.xlu1 %785 }
 0x10a   : > { %922 = vst.msk [vmem:[#allocation3 + $0x521] sm:$0xff] %vm864_vm4, %v786_v11 }
 0x10c   : > { %v780_v10 = vpop.permute.xlu0 %779 }
 0x10d   : > { %919 = vst.msk [vmem:[#allocation3 + $0x4d1] sm:$0xff] %vm864_vm4, %v780_v10  ;;  %v790_v15 = vpop.permute.xlu1 %789 }
 0x10e   : > { %924 = vst.msk [vmem:[#allocation3 + $0x541] sm:$0xff] %vm864_vm4, %v790_v15 }
 0x110   : > { %v784_v12 = vpop.permute.xlu0 %783 }
 0x111   : > { %921 = vst.msk [vmem:[#allocation3 + $0x511] sm:$0xff] %vm864_vm4, %v784_v12  ;;  %v794_v17 = vpop.permute.xlu1 %793 }
 0x112   : > { %926 = vst.msk [vmem:[#allocation3 + $0x561] sm:$0xff] %vm864_vm4, %v794_v17 }
 0x114   : > { %v788_v16 = vpop.permute.xlu0 %787 }
 0x115   : > { %923 = vst.msk [vmem:[#allocation3 + $0x531] sm:$0xff] %vm864_vm4, %v788_v16  ;;  %v798_v19 = vpop.permute.xlu1 %797 }
 0x116   : > { %928 = vst.msk [vmem:[#allocation3 + $0x581] sm:$0xff] %vm864_vm4, %v798_v19 }
 0x118   : > { %v792_v18 = vpop.permute.xlu0 %791 }
 0x119   : > { %925 = vst.msk [vmem:[#allocation3 + $0x551] sm:$0xff] %vm864_vm4, %v792_v18 }
 0x11c   : > { %v796_v20 = vpop.permute.xlu0 %795 }
 0x11d   : > { %927 = vst.msk [vmem:[#allocation3 + $0x571] sm:$0xff] %vm864_vm4, %v796_v20 }
 0x11e LB: >> { %v1122_v21 = vld [vmem:[%s11009_s2 + $0x78] sm:$0xff]  ;;  %v1121_v22 = vld [vmem:[%s11009_s2 + $0x70] sm:$0xff]  ;;  %s949_s16 = smul.u32 48, %s7898_s11  ;;  %v1120_v23 = vld [vmem:[%s11009_s2 + $0x68] sm:$0xff]  ;;  %s11020_s17 = smov 32   ;;  %vm981_vm5 = vcmask 261248   ;;  %s7898_s11 = sphi %s8720_s11, %s948_s11  }
 0x11f   : >> { %7343 = vmatprep.subr.mxu0 %v1122_v21  ;;  %v1119_v24 = vld [vmem:[%s11009_s2 + $0x60] sm:$0xff]  ;;  %v1118_v25 = vld [vmem:[%s11009_s2 + $0x58] sm:$0xff]  ;;  %v1117_v28 = vld [vmem:[%s11009_s2 + $0x50] sm:$0xff]  ;;  %s11016_s26 = smov 48   ;;  %s7909_s9 = smov 64   ;;  %vm1002_vm6 = vcmask 392448  }
 0x120   : >> { %7344 = vmatpush3.msra.mxu0 %v1122_v21  ;;  %s8741_s13 = scalar_lea.vmem [#allocation2], %s949_s16  ;;  %s11018_s16 = smov 16   ;;  %v1116_v35 = vld [vmem:[%s11009_s2 + $0x48] sm:$0xff]  ;;  %v1115_v2 = vld [vmem:[%s11009_s2 + $0x40] sm:$0xff]  ;;  %v1114_v3 = vld [vmem:[%s11009_s2 + $0x38] sm:$0xff]  ;;  %vm1021_vm7 = vcmask 523648  }
 0x121   : >> { %7345 = vmatprep.subr.mxu0 %v1121_v22  ;;  %v7698_v26 = vld [vmem:[%s8741_s13 + $0x8] ss:$8 sps:$4 sm:$0xff]   ;;  %v7700_v29 = vld [vmem:[%s8741_s13 + $0x18] ss:$8 sps:$4 sm:$0xff]   ;;  %s7910_s12 = smov 80   ;;  %s7911_s14 = smov 96  }
 0x122   : >> { %7346 = vmatpush3.msra.mxu0 %v1121_v22  ;;  %v7699_v27 = vld [vmem:[%s8741_s13 + $0x1] ss:$8 sps:$4 sm:$0xff]   ;;  %996 = vrot.lane.b32.xlu1 %v7698_v26, %s11020_s17  ;;  %v7701_v30 = vld [vmem:[%s8741_s13 + $0x11] ss:$8 sps:$4 sm:$0xff]   ;;  %s7912_s15 = smov 112   ;;  %s11030_s18 = smov 48  }
 0x123   : >> { %7347 = vmatprep.subr.mxu0 %v1120_v23  ;;  %975 = vrot.lane.b32.xlu0 %v7699_v27, %s11018_s16  ;;  %v7702_v31 = vld [vmem:[%s8741_s13 + $0x19] ss:$8 sps:$4 sm:$0xff]   ;;  %v7703_v32 = vld [vmem:[%s8741_s13 + $0x9] ss:$8 sps:$4 sm:$0xff]   ;;  %s11031_s10 = smov 16   ;;  %vm1043_vm8 = vcmask 654848  }
 0x124   : >> { %7348 = vmatpush3.msra.mxu0 %v1120_v23  ;;  %v7704_v33 = vld [vmem:[%s8741_s13 + $0x40] ss:$8 sps:$4 sm:$0xff]   ;;  %v7705_v34 = vld [vmem:[%s8741_s13 + $0x30] ss:$8 sps:$4 sm:$0xff]   ;;  %vm1062_vm9 = vcmask 786048   ;;  %vm1083_vm10 = vcmask 917248  }
 0x125   : >> { %7349 = vmatprep.subr.mxu0 %v1119_v24  ;;  %v7706_v36 = vld [vmem:[%s8741_s13 + $0x41] ss:$8 sps:$4 sm:$0xff]   ;;  %v7707_v37 = vld [vmem:[%s8741_s13 + $0x31] ss:$8 sps:$4 sm:$0xff]   ;;  %vm1102_vm11 = vcmask 1048448   ;;  %s11032_s29 = smov 32  }
 0x126   : >> { %7350 = vmatpush3.msra.mxu0 %v1119_v24  ;;  %998 = vrot.lane.b32.xlu1 %v7700_v29, %s11020_s17  ;;  %v7708_v38 = vld [vmem:[%s8741_s13 + $0x48] ss:$8 sps:$4 sm:$0xff]   ;;  %v7709_v39 = vld [vmem:[%s8741_s13 + $0x38] ss:$8 sps:$4 sm:$0xff]   ;;  %vm2926_vm13 = vcmask 64512  }
 0x127   : >> { %7351 = vmatprep.subr.mxu0 %v1118_v25  ;;  %977 = vrot.lane.b32.xlu0 %v7701_v30, %s11018_s16  ;;  %v7710_v40 = vld [vmem:[%s8741_s13 + $0x49] ss:$8 sps:$4 sm:$0xff]   ;;  %v7711_v41 = vld [vmem:[%s8741_s13 + $0x39] ss:$8 sps:$4 sm:$0xff]  }
 0x128   : >> { %7352 = vmatpush3.msra.mxu0 %v1118_v25  ;;  %v7712_v42 = vld [vmem:[%s8741_s13 + $0x12] ss:$8 sps:$4 sm:$0xff]   ;;  %v7713_v43 = vld [vmem:[%s8741_s13 + $0x2] ss:$8 sps:$4 sm:$0xff]  }
 0x129   : >> { %7353 = vmatprep.subr.mxu0 %v1117_v28  ;;  %v7714_v44 = vld [vmem:[%s8741_s13 + $0x19] ss:$8 sps:$4 sm:$0xff]   ;;  %v7715_v45 = vld [vmem:[%s8741_s13 + $0x9] ss:$8 sps:$4 sm:$0xff]  }
 0x12a   : >> { %7354 = vmatpush3.msra.mxu0 %v1117_v28  ;;  %1017 = vrot.lane.b32.xlu1 %v7702_v31, %s11016_s26  ;;  %v7716_v46 = vld [vmem:[%s8741_s13 + $0x1a] ss:$8 sps:$4 sm:$0xff]   ;;  %v7717_v47 = vld [vmem:[%s8741_s13 + $0xa] ss:$8 sps:$4 sm:$0xff]  }
 0x12b   : >> { %1015 = vrot.lane.b32.xlu0 %v7703_v32, %s11016_s26  ;;  %7355 = vmatprep.subr.mxu0 %v1116_v35  ;;  %v7718_v48 = vld [vmem:[%s8741_s13 + $0x41] ss:$8 sps:$4 sm:$0xff]   ;;  %v7719_v49 = vld [vmem:[%s8741_s13 + $0x31] ss:$8 sps:$4 sm:$0xff]  }
 0x12c   : >> { %7356 = vmatpush3.msra.mxu0 %v1116_v35  ;;  %v7720_v50 = vld [vmem:[%s8741_s13 + $0x42] ss:$8 sps:$4 sm:$0xff]   ;;  %v7721_v51 = vld [vmem:[%s8741_s13 + $0x32] ss:$8 sps:$4 sm:$0xff]  }
 0x12d   : >> { %v7722_v52 = vld [vmem:[%s8741_s13 + $0x49] ss:$8 sps:$4 sm:$0xff]   ;;  %v7723_v53 = vld [vmem:[%s8741_s13 + $0x39] ss:$8 sps:$4 sm:$0xff]   ;;  %7357 = vmatprep.subr.mxu0 %v1115_v2 }
 0x12e   : >> { %1039 = vrot.lane.b32.xlu1 %v7704_v33, %s7909_s9  ;;  %v7724_v54 = vld [vmem:[%s8741_s13 + $0x4a] ss:$8 sps:$4 sm:$0xff]   ;;  %v7725_v55 = vld [vmem:[%s8741_s13 + $0x3a] ss:$8 sps:$4 sm:$0xff]   ;;  %7358 = vmatpush3.msra.mxu0 %v1115_v2 }
 0x12f   : >> { %1037 = vrot.lane.b32.xlu0 %v7705_v34, %s7909_s9  ;;  %v7726_v56 = vld [vmem:[%s8741_s13 + $0x19] ss:$8 sps:$4 sm:$0xff]   ;;  %v7727_v57 = vld [vmem:[%s8741_s13 + $0x9] ss:$8 sps:$4 sm:$0xff]   ;;  %7359 = vmatprep.subr.mxu0 %v1114_v3 }
 0x130   : >> { %v7728_v58 = vld [vmem:[%s8741_s13 + $0x20] ss:$8 sps:$4 sm:$0xff]   ;;  %v7729_v59 = vld [vmem:[%s8741_s13 + $0x10] ss:$8 sps:$4 sm:$0xff]   ;;  %7360 = vmatpush3.msra.mxu0 %v1114_v3 }
 0x131   : >> { %v7756_v60 = vld [vmem:[%s8741_s13] ss:$8 sps:$4 sm:$0xff]   ;;  %v7759_v62 = vld [vmem:[%s8741_s13 + $0x10] ss:$8 sps:$4 sm:$0xff]  }
 0x132   : >> { %1058 = vrot.lane.b32.xlu1 %v7706_v36, %s7910_s12  ;;  %v7730_v61 = vld [vmem:[%s8741_s13 + $0x21] ss:$8 sps:$4 sm:$0xff]   ;;  %963 = vst.msk [vmem:[#allocation4] sm:$0xff] %vm341_vm1, %v7756_v60  ;;  %v7731_v63 = vld [vmem:[%s8741_s13 + $0x11] ss:$8 sps:$4 sm:$0xff]   ;;  %964 = vst.msk [vmem:[#allocation4 + $0x8] sm:$0xff] %vm341_vm1, %v7759_v62 }
 0x133   : >> { %1056 = vrot.lane.b32.xlu0 %v7707_v37, %s7910_s12  ;;  %v7732_v0 = vld [vmem:[%s8741_s13 + $0x48] ss:$8 sps:$4 sm:$0xff]   ;;  %v7733_v1 = vld [vmem:[%s8741_s13 + $0x38] ss:$8 sps:$4 sm:$0xff]  }
 0x134   : >> { %v7734_v4 = vld [vmem:[%s8741_s13 + $0x49] ss:$8 sps:$4 sm:$0xff]   ;;  %v7735_v5 = vld [vmem:[%s8741_s13 + $0x39] ss:$8 sps:$4 sm:$0xff]  }
 0x135   : >> { %v1113_v6 = vld [vmem:[%s11009_s2 + $0x30] sm:$0xff]  ;;  %v1112_v7 = vld [vmem:[%s11009_s2 + $0x28] sm:$0xff]  ;;  %v1111_v9 = vld [vmem:[%s11009_s2 + $0x20] sm:$0xff] }
 0x136   : >> { %1079 = vrot.lane.b32.xlu1 %v7708_v38, %s7911_s14  ;;  %v7736_v8 = vld [vmem:[%s8741_s13 + $0x50] ss:$8 sps:$4 sm:$0xff]   ;;  %7361 = vmatprep.subr.mxu0 %v1113_v6  ;;  %v7737_v10 = vld [vmem:[%s8741_s13 + $0x40] ss:$8 sps:$4 sm:$0xff]  }
 0x137   : >> { %1077 = vrot.lane.b32.xlu0 %v7709_v39, %s7911_s14  ;;  %7362 = vmatpush3.msra.mxu0 %v1113_v6  ;;  %v1110_v11 = vld [vmem:[%s11009_s2 + $0x18] sm:$0xff]  ;;  %v1109_v15 = vld [vmem:[%s11009_s2 + $0x10] sm:$0xff]  ;;  %v7739_v17 = vld [vmem:[%s8741_s13 + $0x41] ss:$8 sps:$4 sm:$0xff]  }
 0x138   : >> { %7363 = vmatprep.subr.mxu0 %v1112_v7  ;;  %v7738_v12 = vld [vmem:[%s8741_s13 + $0x51] ss:$8 sps:$4 sm:$0xff]   ;;  %v1108_v19 = vld [vmem:[%s11009_s2 + $0x8] sm:$0xff]  ;;  %v1107_v21 = vld [vmem:[%s11009_s2] sm:$0xff] }
 0x139   : >> { %7364 = vmatpush3.msra.mxu0 %v1112_v7  ;;  %v6625_v16 = vld [vmem:[%s11009_s2 + $0xf8] sm:$0xff]  ;;  %v6624_v20 = vld [vmem:[%s11009_s2 + $0xf0] sm:$0xff]  ;;  %v6623_v23 = vld [vmem:[%s11009_s2 + $0xe8] sm:$0xff] }
 0x13a   : >> { %1098 = vrot.lane.b32.xlu1 %v7710_v40, %s7912_s15  ;;  %7365 = vmatprep.subr.mxu0 %v1111_v9  ;;  %v7740_v18 = vld [vmem:[%s8741_s13 + $0x1a] ss:$8 sps:$4 sm:$0xff]   ;;  %v7741_v22 = vld [vmem:[%s8741_s13 + $0xa] ss:$8 sps:$4 sm:$0xff]  }
 0x13b   : >> { %1096 = vrot.lane.b32.xlu0 %v7711_v41, %s7912_s15  ;;  %7366 = vmatpush3.msra.mxu0 %v1111_v9  ;;  %v7742_v24 = vld [vmem:[%s8741_s13 + $0x21] ss:$8 sps:$4 sm:$0xff]   ;;  %v7743_v26 = vld [vmem:[%s8741_s13 + $0x11] ss:$8 sps:$4 sm:$0xff]  }
 0x13c   : >> { %7367 = vmatprep.subr.mxu0 %v1110_v11  ;;  %7378 = vmatprep.subr.mxu1 %v6625_v16  ;;  %v6622_v25 = vld [vmem:[%s11009_s2 + $0xe0] sm:$0xff]  ;;  %v6621_v27 = vld [vmem:[%s11009_s2 + $0xd8] sm:$0xff]  ;;  %v6620_v29 = vld [vmem:[%s11009_s2 + $0xd0] sm:$0xff] }
 0x13d   : >> { %7368 = vmatpush3.msra.mxu0 %v1110_v11  ;;  %7379 = vmatpush3.msra.mxu1 %v6625_v16  ;;  %v7744_v28 = vld [vmem:[%s8741_s13 + $0x22] ss:$8 sps:$4 sm:$0xff]   ;;  %v7745_v30 = vld [vmem:[%s8741_s13 + $0x12] ss:$8 sps:$4 sm:$0xff]  }
 0x13e   : >> { %1224 = vrot.lane.b32.xlu1 %v7712_v42, %s11018_s16  ;;  %7369 = vmatprep.subr.mxu0 %v1109_v15  ;;  %v6619_v31 = vld [vmem:[%s11009_s2 + $0xc8] sm:$0xff]  ;;  %v6618_v33 = vld [vmem:[%s11009_s2 + $0xc0] sm:$0xff]  ;;  %v6617_v35 = vld [vmem:[%s11009_s2 + $0xb8] sm:$0xff] }
 0x13f   : >> { %1222 = vrot.lane.b32.xlu0 %v7713_v43, %s11018_s16  ;;  %7370 = vmatpush3.msra.mxu0 %v1109_v15  ;;  %v7746_v32 = vld [vmem:[%s8741_s13 + $0x49] ss:$8 sps:$4 sm:$0xff]   ;;  %v7747_v34 = vld [vmem:[%s8741_s13 + $0x39] ss:$8 sps:$4 sm:$0xff]  }
 0x140   : >> { %7371 = vmatprep.subr.mxu0 %v1108_v19  ;;  %7380 = vmatprep.subr.mxu1 %v6624_v20  ;;  %v7748_v36 = vld [vmem:[%s8741_s13 + $0x4a] ss:$8 sps:$4 sm:$0xff]   ;;  %v7749_v38 = vld [vmem:[%s8741_s13 + $0x3a] ss:$8 sps:$4 sm:$0xff]  }
 0x141   : >> { %7372 = vmatpush3.msra.mxu0 %v1108_v19  ;;  %7381 = vmatpush3.msra.mxu1 %v6624_v20  ;;  %v6616_v37 = vld [vmem:[%s11009_s2 + $0xb0] sm:$0xff]  ;;  %v8915_v39 = vld [vmem:[%s11009_s2 + $0x178] sm:$0xff]  ;;  %v6615_v40 = vld [vmem:[%s11009_s2 + $0xa8] sm:$0xff] }
 0x142   : >> { %1242 = vrot.lane.b32.xlu1 %v7714_v44, %s11020_s17  ;;  %7373 = vmatprep.subr.mxu0 %v1107_v21  ;;  %v7750_v41 = vld [vmem:[%s8741_s13 + $0x51] ss:$8 sps:$4 sm:$0xff]   ;;  %v6614_v42 = vld [vmem:[%s11009_s2 + $0xa0] sm:$0xff] }
 0x143   : >> { %1240 = vrot.lane.b32.xlu0 %v7715_v45, %s11020_s17  ;;  %7374 = vmatpush3.msra.mxu0 %v1107_v21  ;;  %v7751_v43 = vld [vmem:[%s8741_s13 + $0x41] ss:$8 sps:$4 sm:$0xff]   ;;  %v6613_v44 = vld [vmem:[%s11009_s2 + $0x98] sm:$0xff] }
 0x144   : >> { %7382 = vmatprep.subr.mxu1 %v6623_v23  ;;  %7413 = vmatprep.subr.mxu0 %v8915_v39  ;;  %v7752_v45 = vld [vmem:[%s8741_s13 + $0x52] ss:$8 sps:$4 sm:$0xff]   ;;  %v7763_v62 = vld [vmem:[%s8741_s13 + $0x60] ss:$8 sps:$4 sm:$0xff]  }
 0x145   : >> { %7383 = vmatpush3.msra.mxu1 %v6623_v23  ;;  %v8961_v60 = vld [vmem:[%s11009_s2 + $0x1f8] sm:$0xff]  ;;  %v7765_v2 = vld [vmem:[%s8741_s13 + $0x61] ss:$8 sps:$4 sm:$0xff]  }
 0x146   : >> { %1260 = vrot.lane.b32.xlu1 %v7716_v46, %s11016_s26  ;;  %7384 = vmatprep.subr.mxu1 %v6622_v25  ;;  %v6612_v46 = vld [vmem:[%s11009_s2 + $0x90] sm:$0xff]  ;;  %v7768_v9 = vld [vmem:[%s8741_s13 + $0x79] ss:$8 sps:$4 sm:$0xff]  }
 0x147   : >> { %1258 = vrot.lane.b32.xlu0 %v7717_v47, %s11016_s26  ;;  %7385 = vmatpush3.msra.mxu1 %v6622_v25  ;;  %v7753_v47 = vld [vmem:[%s8741_s13 + $0x42] ss:$8 sps:$4 sm:$0xff]   ;;  %v7771_v16 = vld [vmem:[%s8741_s13 + $0x32] ss:$8 sps:$4 sm:$0xff]  }
 0x148   : >> { %7386 = vmatprep.subr.mxu1 %v6621_v27  ;;  %v7767_v6 = vld [vmem:[%s8741_s13 + $0x68] ss:$8 sps:$4 sm:$0xff]   ;;  %v7774_v20 = vld [vmem:[%s8741_s13 + $0x39] ss:$8 sps:$4 sm:$0xff]  }
 0x149   : >> { %7387 = vmatpush3.msra.mxu1 %v6621_v27  ;;  %v7770_v15 = vld [vmem:[%s8741_s13 + $0x42] ss:$8 sps:$4 sm:$0xff]  }
 0x14a   : >> { %1278 = vrot.lane.b32.xlu1 %v7718_v48, %s7909_s9  ;;  %7388 = vmatprep.subr.mxu1 %v6620_v29  ;;  %v6611_v48 = vld [vmem:[%s11009_s2 + $0x88] sm:$0xff] }
 0x14b   : >> { %1276 = vrot.lane.b32.xlu0 %v7719_v49, %s7909_s9  ;;  %7389 = vmatpush3.msra.mxu1 %v6620_v29  ;;  %v7754_v49 = vld [vmem:[%s8741_s13 + $0x41] ss:$8 sps:$4 sm:$0xff]  }
 0x14c   : >> { %7390 = vmatprep.subr.mxu1 %v6619_v31  ;;  %v7773_v19 = vld [vmem:[%s8741_s13 + $0x49] ss:$8 sps:$4 sm:$0xff]  }
 0x14d   : >> { %7391 = vmatpush3.msra.mxu1 %v6619_v31  ;;  %v7776_v25 = vld [vmem:[%s8741_s13 + $0x4a] ss:$8 sps:$4 sm:$0xff]  }
 0x14e   : >> { %1296 = vrot.lane.b32.xlu1 %v7720_v50, %s7910_s12  ;;  %7392 = vmatprep.subr.mxu1 %v6618_v33  ;;  %v6610_v50 = vld [vmem:[%s11009_s2 + $0x80] sm:$0xff]  ;;  %v7778_v31 = vld [vmem:[%s8741_s13 + $0x71] ss:$8 sps:$4 sm:$0xff]  }
 0x14f   : >> { %1294 = vrot.lane.b32.xlu0 %v7721_v51, %s7910_s12  ;;  %7393 = vmatpush3.msra.mxu1 %v6618_v33  ;;  %v7755_v51 = vld [vmem:[%s8741_s13 + $0x31] ss:$8 sps:$4 sm:$0xff]   ;;  %v7779_v33 = vld [vmem:[%s8741_s13 + $0x61] ss:$8 sps:$4 sm:$0xff]  }
 0x150   : >> { %7394 = vmatprep.subr.mxu1 %v6617_v35 }
 0x151   : >> { %7395 = vmatpush3.msra.mxu1 %v6617_v35  ;;  %v6671_v35 = vld [vmem:[%s11009_s2 + $0x168] sm:$0xff] }
 0x152   : >> { %1314 = vrot.lane.b32.xlu1 %v7722_v52, %s7911_s14  ;;  %7396 = vmatprep.subr.mxu1 %v6616_v37  ;;  %v7757_v52 = vld [vmem:[%s8741_s13 + $0x48] ss:$8 sps:$4 sm:$0xff]  }
 0x153   : >> { %1312 = vrot.lane.b32.xlu0 %v7723_v53, %s7911_s14  ;;  %7397 = vmatpush3.msra.mxu1 %v6616_v37  ;;  %v7758_v53 = vld [vmem:[%s8741_s13 + $0x38] ss:$8 sps:$4 sm:$0xff]  }
 0x154   : >> { %7398 = vmatprep.subr.mxu1 %v6615_v40  ;;  %v7780_v37 = vld [vmem:[%s8741_s13 + $0x72] ss:$8 sps:$4 sm:$0xff]  }
 0x155   : >> { %7399 = vmatpush3.msra.mxu1 %v6615_v40 }
 0x156   : >> { %1332 = vrot.lane.b32.xlu1 %v7724_v54, %s7912_s15  ;;  %7400 = vmatprep.subr.mxu1 %v6614_v42 }
 0x157   : >> { %1330 = vrot.lane.b32.xlu0 %v7725_v55, %s7912_s15  ;;  %7401 = vmatpush3.msra.mxu1 %v6614_v42 }
 0x158   : >> { %7402 = vmatprep.subr.mxu1 %v6613_v44 }
 0x159   : >> { %7403 = vmatpush3.msra.mxu1 %v6613_v44  ;;  %v6668_v44 = vld [vmem:[%s11009_s2 + $0x150] sm:$0xff] }
 0x15a   : >> { %1991 = vrot.lane.b32.xlu1 %v7726_v56, %s11018_s16  ;;  %7404 = vmatprep.subr.mxu1 %v6612_v46  ;;  %v7760_v56 = vld [vmem:[%s8741_s13 + $0x49] ss:$8 sps:$4 sm:$0xff]  }
 0x15b   : >> { %1989 = vrot.lane.b32.xlu0 %v7727_v57, %s11018_s16  ;;  %7405 = vmatpush3.msra.mxu1 %v6612_v46  ;;  %v7761_v57 = vld [vmem:[%s8741_s13 + $0x39] ss:$8 sps:$4 sm:$0xff]  }
 0x15c   : >> { %7406 = vmatprep.subr.mxu1 %v6611_v48 }
 0x15d   : >> { %7407 = vmatpush3.msra.mxu1 %v6611_v48 }
 0x15e   : >> { %2011 = vrot.lane.b32.xlu1 %v7728_v58, %s11020_s17  ;;  %7408 = vmatprep.subr.mxu1 %v6610_v50 }
 0x15f   : >> { %2009 = vrot.lane.b32.xlu0 %v7729_v59, %s11020_s17  ;;  %7409 = vmatpush3.msra.mxu1 %v6610_v50  ;;  %v6666_v50 = vld [vmem:[%s11009_s2 + $0x140] sm:$0xff] }
 0x160   : >> { %7448 = vmatprep.subr.mxu1 %v8961_v60 }
 0x162   : >> { %2029 = vrot.lane.b32.xlu1 %v7730_v61, %s11016_s26  ;;  %v7762_v61 = vld [vmem:[%s8741_s13 + $0x70] ss:$8 sps:$4 sm:$0xff]  }
 0x163   : >> { %2027 = vrot.lane.b32.xlu0 %v7731_v63, %s11016_s26 }
 0x166   : >> { %2047 = vrot.lane.b32.xlu1 %v7732_v0, %s7909_s9 }
 0x167   : >> { %2045 = vrot.lane.b32.xlu0 %v7733_v1, %s7909_s9  ;;  %v7764_v1 = vld [vmem:[%s8741_s13 + $0x71] ss:$8 sps:$4 sm:$0xff]  }
 0x16a   : >> { %2065 = vrot.lane.b32.xlu1 %v7734_v4, %s7910_s12 }
 0x16b   : >> { %2063 = vrot.lane.b32.xlu0 %v7735_v5, %s7910_s12  ;;  %v7766_v5 = vld [vmem:[%s8741_s13 + $0x78] ss:$8 sps:$4 sm:$0xff]  }
 0x16e   : >> { %2085 = vrot.lane.b32.xlu1 %v7736_v8, %s7911_s14 }
 0x16f   : >> { %2083 = vrot.lane.b32.xlu0 %v7737_v10, %s7911_s14  ;;  %v7769_v10 = vld [vmem:[%s8741_s13 + $0x69] ss:$8 sps:$4 sm:$0xff]  }
 0x172   : >> { %2103 = vrot.lane.b32.xlu1 %v7738_v12, %s7912_s15 }
 0x173   : >> { %2101 = vrot.lane.b32.xlu0 %v7739_v17, %s7912_s15 }
 0x176   : >> { %2229 = vrot.lane.b32.xlu1 %v7740_v18, %s11018_s16 }
 0x177   : >> { %2227 = vrot.lane.b32.xlu0 %v7741_v22, %s11018_s16  ;;  %v7772_v22 = vld [vmem:[%s8741_s13 + $0x11] ss:$8 sps:$4 sm:$0xff]  }
 0x17a   : >> { %2247 = vrot.lane.b32.xlu1 %v7742_v24, %s11020_s17  ;;  %v7775_v24 = vld [vmem:[%s8741_s13 + $0x1] ss:$8 sps:$4 sm:$0xff]  }
 0x17b   : >> { %2245 = vrot.lane.b32.xlu0 %v7743_v26, %s11020_s17  ;;  %v7777_v26 = vld [vmem:[%s8741_s13 + $0x3a] ss:$8 sps:$4 sm:$0xff]  }
 0x17e   : >> { %2265 = vrot.lane.b32.xlu1 %v7744_v28, %s11030_s18 }
 0x17f   : >> { %2263 = vrot.lane.b32.xlu0 %v7745_v30, %s11030_s18 }
 0x182   : >> { %2283 = vrot.lane.b32.xlu1 %v7746_v32, %s7909_s9  ;;  %v6672_v32 = vld [vmem:[%s11009_s2 + $0x170] sm:$0xff] }
 0x183   : >> { %2281 = vrot.lane.b32.xlu0 %v7747_v34, %s7909_s9 }
 0x186   : >> { %2301 = vrot.lane.b32.xlu1 %v7748_v36, %s7910_s12 }
 0x187   : >> { %2299 = vrot.lane.b32.xlu0 %v7749_v38, %s7910_s12  ;;  %v7781_v38 = vld [vmem:[%s8741_s13 + $0x62] ss:$8 sps:$4 sm:$0xff]  }
 0x18a   : >> { %2319 = vrot.lane.b32.xlu1 %v7750_v41, %s7911_s14  ;;  %v6669_v41 = vld [vmem:[%s11009_s2 + $0x158] sm:$0xff] }
 0x18b   : >> { %2317 = vrot.lane.b32.xlu0 %v7751_v43, %s7911_s14  ;;  %v7782_v43 = vld [vmem:[%s8741_s13 + $0x79] ss:$8 sps:$4 sm:$0xff]  }
 0x18e   : >> { %2337 = vrot.lane.b32.xlu1 %v7752_v45, %s7912_s15  ;;  %v7783_v45 = vld [vmem:[%s8741_s13 + $0x69] ss:$8 sps:$4 sm:$0xff]  }
 0x18f   : >> { %2335 = vrot.lane.b32.xlu0 %v7753_v47, %s7912_s15  ;;  %v6667_v47 = vld [vmem:[%s11009_s2 + $0x148] sm:$0xff] }
 0x192   : >> { %2961 = vrot.lane.b32.xlu1 %v7754_v49, %s11031_s10  ;;  %v7784_v49 = vld [vmem:[%s8741_s13 + $0x7a] ss:$8 sps:$4 sm:$0xff]  }
 0x193   : >> { %2959 = vrot.lane.b32.xlu0 %v7755_v51, %s11031_s10  ;;  %v7785_v51 = vld [vmem:[%s8741_s13 + $0x6a] ss:$8 sps:$4 sm:$0xff]  }
 0x194   : >> { %v997_v54 = vpop.permute.xlu1 %996 }
 0x195   : >> { %v976_v55 = vpop.permute.xlu0 %975 }
 0x196   : >> { %982 = vst.msk [vmem:[#allocation4] sm:$0xff] %vm981_vm5, %v976_v55  ;;  %2979 = vrot.lane.b32.xlu1 %v7757_v52, %s11020_s17  ;;  %v7786_v55 = vld [vmem:[%s8741_s13 + $0x49] ss:$8 sps:$4 sm:$0xff]  }
 0x197   : >> { %2977 = vrot.lane.b32.xlu0 %v7758_v53, %s11020_s17  ;;  %1003 = vst.msk [vmem:[#allocation4] sm:$0xff] %vm1002_vm6, %v997_v54  ;;  %v6665_v53 = vld [vmem:[%s11009_s2 + $0x138] sm:$0xff] }
 0x198   : >> { %v999_v58 = vpop.permute.xlu1 %998 }
 0x199   : >> { %v978_v59 = vpop.permute.xlu0 %977 }
 0x19a   : >> { %983 = vst.msk [vmem:[#allocation4 + $0x8] sm:$0xff] %vm981_vm5, %v978_v59  ;;  %2997 = vrot.lane.b32.xlu1 %v7760_v56, %s11030_s18  ;;  %v6664_v56 = vld [vmem:[%s11009_s2 + $0x130] sm:$0xff]  ;;  %v6663_v59 = vld [vmem:[%s11009_s2 + $0x128] sm:$0xff] }
 0x19b   : >> { %2995 = vrot.lane.b32.xlu0 %v7761_v57, %s11030_s18  ;;  %1004 = vst.msk [vmem:[#allocation4 + $0x8] sm:$0xff] %vm1002_vm6, %v999_v58  ;;  %v7787_v57 = vld [vmem:[%s8741_s13 + $0x39] ss:$8 sps:$4 sm:$0xff]  }
 0x19c   : >> { %v1018_v63 = vpop.permute.xlu1 %1017 }
 0x19d   : >> { %1023 = vst.msk [vmem:[#allocation4 + $0x8] sm:$0xff] %vm1021_vm7, %v1018_v63  ;;  %v1016_v0 = vpop.permute.xlu0 %1015  ;;  %v6662_v63 = vld [vmem:[%s11009_s2 + $0x120] sm:$0xff] }
 0x19e   : >> { %1022 = vst.msk [vmem:[#allocation4] sm:$0xff] %vm1021_vm7, %v1016_v0  ;;  %3018 = vrot.lane.b32.xlu1 %v7762_v61, %s7909_s9  ;;  %v7790_v0 = vld [vmem:[%s8741_s13 + $0x40] ss:$8 sps:$4 sm:$0xff]  }
 0x19f   : >> { %3016 = vrot.lane.b32.xlu0 %v7763_v62, %s7909_s9  ;;  %v7789_v62 = vld [vmem:[%s8741_s13 + $0x50] ss:$8 sps:$4 sm:$0xff]  }
 0x1a0   : >> { %v1040_v3 = vpop.permute.xlu1 %1039 }
 0x1a1   : >> { %1045 = vst.msk [vmem:[#allocation4 + $0x8] sm:$0xff] %vm1043_vm8, %v1040_v3  ;;  %v1038_v4 = vpop.permute.xlu0 %1037  ;;  %v7788_v3 = vld [vmem:[%s8741_s13 + $0x18] ss:$8 sps:$4 sm:$0xff]  }
 0x1a2   : >> { %1044 = vst.msk [vmem:[#allocation4] sm:$0xff] %vm1043_vm8, %v1038_v4  ;;  %3036 = vrot.lane.b32.xlu1 %v7764_v1, %s7910_s12 }
 0x1a3   : >> { %3034 = vrot.lane.b32.xlu0 %v7765_v2, %s7910_s12  ;;  %v6661_v2 = vld [vmem:[%s11009_s2 + $0x118] sm:$0xff] }
 0x1a4   : >> { %v1059_v7 = vpop.permute.xlu1 %1058 }
 0x1a5   : >> { %1064 = vst.msk [vmem:[#allocation4 + $0x8] sm:$0xff] %vm1062_vm9, %v1059_v7  ;;  %v1057_v8 = vpop.permute.xlu0 %1056  ;;  %v6660_v7 = vld [vmem:[%s11009_s2 + $0x110] sm:$0xff] }
 0x1a6   : >> { %1063 = vst.msk [vmem:[#allocation4] sm:$0xff] %vm1062_vm9, %v1057_v8  ;;  %3056 = vrot.lane.b32.xlu1 %v7766_v5, %s7911_s14  ;;  %v7791_v5 = vld [vmem:[%s8741_s13 + $0x8] ss:$8 sps:$4 sm:$0xff]  }
 0x1a7   : >> { %3054 = vrot.lane.b32.xlu0 %v7767_v6, %s7911_s14  ;;  %v7792_v6 = vld [vmem:[%s8741_s13 + $0x51] ss:$8 sps:$4 sm:$0xff]   ;;  %v7793_v8 = vld [vmem:[%s8741_s13 + $0x41] ss:$8 sps:$4 sm:$0xff]  }
 0x1a8   : >> { %v1080_v11 = vpop.permute.xlu1 %1079 }
 0x1a9   : >> { %1085 = vst.msk [vmem:[#allocation4 + $0x8] sm:$0xff] %vm1083_vm10, %v1080_v11  ;;  %v1078_v12 = vpop.permute.xlu0 %1077 }
 0x1aa   : >> { %1084 = vst.msk [vmem:[#allocation4] sm:$0xff] %vm1083_vm10, %v1078_v12  ;;  %3074 = vrot.lane.b32.xlu1 %v7768_v9, %s7912_s15 }
 0x1ab   : >> { %3072 = vrot.lane.b32.xlu0 %v7769_v10, %s7912_s15 }
 0x1ac   : >> { %v1099_v17 = vpop.permute.xlu1 %1098 }
 0x1ad   : >> { %1104 = vst.msk [vmem:[#allocation4 + $0x8] sm:$0xff] %vm1102_vm11, %v1099_v17  ;;  %v1097_v18 = vpop.permute.xlu0 %1096  ;;  %v6720_v17 = vld [vmem:[%s11009_s2 + $0x1f0] sm:$0xff] }
 0x1ae   : >> { %1103 = vst.msk [vmem:[#allocation4] sm:$0xff] %vm1102_vm11, %v1097_v18  ;;  %3200 = vrot.lane.b32.xlu1 %v7770_v15, %s11031_s10  ;;  %v7794_v15 = vld [vmem:[%s8741_s13 + $0x78] ss:$8 sps:$4 sm:$0xff]   ;;  %v7795_v18 = vld [vmem:[%s8741_s13 + $0x68] ss:$8 sps:$4 sm:$0xff]  }
 0x1af   : >> { %3198 = vrot.lane.b32.xlu0 %v7771_v16, %s11031_s10  ;;  %v6659_v16 = vld [vmem:[%s11009_s2 + $0x108] sm:$0xff] }
 0x1b0   : >> { %v1225_v21 = vpop.permute.xlu1 %1224 }
 0x1b1   : >> { %v1223_v23 = vpop.permute.xlu0 %1222 }
 0x1b2   : >> { %3218 = vrot.lane.b32.xlu1 %v7773_v19, %s11020_s17 }
 0x1b3   : >> { %3216 = vrot.lane.b32.xlu0 %v7774_v20, %s11020_s17  ;;  %v6658_v20 = vld [vmem:[%s11009_s2 + $0x100] sm:$0xff] }
 0x1b4   : >> { %v1106_v27 = vld [vmem:[#allocation4 + $0x8] sm:$0xff]  ;;  %v1243_v28 = vpop.permute.xlu1 %1242 }
 0x1b5   : >> { %1211 = vst.msk [vmem:[#allocation4 + $0x8] sm:$0xff] %vm341_vm1, %v7772_v22  ;;  %v1241_v29 = vpop.permute.xlu0 %1240  ;;  %v1105_v30 = vld [vmem:[#allocation4] sm:$0xff] }
 0x1b6   : >> { %1229 = vst.msk [vmem:[#allocation4 + $0x8] sm:$0xff] %vm981_vm5, %v1225_v21  ;;  %7375 = vmatprep.mubr.f32.mxu0 %v1105_v30  ;;  %3236 = vrot.lane.b32.xlu1 %v7776_v25, %s11030_s18  ;;  %v7796_v22 = vld [vmem:[%s8741_s13 + $0x79] ss:$8 sps:$4 sm:$0xff]  }
 0x1b7   : >> { %1210 = vst.msk [vmem:[#allocation4] sm:$0xff] %vm341_vm1, %v7775_v24  ;;  %3234 = vrot.lane.b32.xlu0 %v7777_v26, %s11030_s18  ;;  %7376 = vmatmul.mubr.f32.vlgmr.msra.gmra.mxu0 %v1106_v27  ;;  %v7797_v24 = vld [vmem:[%s8741_s13 + $0x69] ss:$8 sps:$4 sm:$0xff]   ;;  %v6718_v26 = vld [vmem:[%s11009_s2 + $0x1e0] sm:$0xff] }
 0x1b8   : >> { %1247 = vst.msk [vmem:[#allocation4 + $0x8] sm:$0xff] %vm1002_vm6, %v1243_v28  ;;  %v1261_v34 = vpop.permute.xlu1 %1260  ;;  %7414 = vmatpush3.msra.mxu0 %v8915_v39  ;;  %v6670_v39 = vld [vmem:[%s11009_s2 + $0x160] sm:$0xff]  ;;  %v7799_v30 = vld [vmem:[%s8741_s13 + $0x70] ss:$8 sps:$4 sm:$0xff]  }
 0x1b9   : >> { %1228 = vst.msk [vmem:[#allocation4] sm:$0xff] %vm981_vm5, %v1223_v23  ;;  %v1259_v36 = vpop.permute.xlu0 %1258  ;;  %7415 = vmatprep.subr.mxu0 %v6672_v32  ;;  %v9122_v23 = vld [vmem:[%s11009_s2 + $0x278] sm:$0xff]  ;;  %v7798_v28 = vld [vmem:[%s8741_s13 + $0x80] ss:$8 sps:$4 sm:$0xff]  }
 0x1ba   : >> { %1246 = vst.msk [vmem:[#allocation4] sm:$0xff] %vm1002_vm6, %v1241_v29  ;;  %3254 = vrot.lane.b32.xlu1 %v7778_v31, %s7909_s9  ;;  %7416 = vmatpush3.msra.mxu0 %v6672_v32  ;;  %v6717_v29 = vld [vmem:[%s11009_s2 + $0x1d8] sm:$0xff]  ;;  %v6716_v32 = vld [vmem:[%s11009_s2 + $0x1d0] sm:$0xff] }
 0x1bb   : >> { %1265 = vst.msk [vmem:[#allocation4 + $0x8] sm:$0xff] %vm1021_vm7, %v1261_v34  ;;  %1264 = vst.msk [vmem:[#allocation4] sm:$0xff] %vm1021_vm7, %v1259_v36  ;;  %3252 = vrot.lane.b32.xlu0 %v7779_v33, %s7909_s9  ;;  %7417 = vmatprep.subr.mxu0 %v6671_v35  ;;  %v7800_v34 = vld [vmem:[%s8741_s13 + $0x81] ss:$8 sps:$4 sm:$0xff]   ;;  %v7801_v36 = vld [vmem:[%s8741_s13 + $0x71] ss:$8 sps:$4 sm:$0xff]  }
 0x1bc   : >> { %v1279_v40 = vpop.permute.xlu1 %1278  ;;  %7418 = vmatpush3.msra.mxu0 %v6671_v35  ;;  %v6715_v35 = vld [vmem:[%s11009_s2 + $0x1c8] sm:$0xff] }
 0x1bd   : >> { %1283 = vst.msk [vmem:[#allocation4 + $0x8] sm:$0xff] %vm1043_vm8, %v1279_v40  ;;  %v1277_v42 = vpop.permute.xlu0 %1276  ;;  %7419 = vmatprep.subr.mxu0 %v6670_v39  ;;  %v7803_v40 = vld [vmem:[%s8741_s13 + $0x4a] ss:$8 sps:$4 sm:$0xff]  }
 0x1be   : >> { %1282 = vst.msk [vmem:[#allocation4] sm:$0xff] %vm1043_vm8, %v1277_v42  ;;  %3272 = vrot.lane.b32.xlu1 %v7780_v37, %s7910_s12  ;;  %7420 = vmatpush3.msra.mxu0 %v6670_v39  ;;  %v7802_v42 = vld [vmem:[%s8741_s13 + $0x3a] ss:$8 sps:$4 sm:$0xff]  }
 0x1bf   : >> { %3270 = vrot.lane.b32.xlu0 %v7781_v38, %s7910_s12  ;;  %7421 = vmatprep.subr.mxu0 %v6669_v41  ;;  %v6714_v38 = vld [vmem:[%s11009_s2 + $0x1c0] sm:$0xff] }
 0x1c0   : >> { %v1297_v46 = vpop.permute.xlu1 %1296  ;;  %7422 = vmatpush3.msra.mxu0 %v6669_v41  ;;  %v6713_v41 = vld [vmem:[%s11009_s2 + $0x1b8] sm:$0xff] }
 0x1c1   : >> { %1301 = vst.msk [vmem:[#allocation4 + $0x8] sm:$0xff] %vm1062_vm9, %v1297_v46  ;;  %v1295_v48 = vpop.permute.xlu0 %1294  ;;  %7423 = vmatprep.subr.mxu0 %v6668_v44  ;;  %v7807_v46 = vld [vmem:[%s8741_s13 + $0x51] ss:$8 sps:$4 sm:$0xff]  }
 0x1c2   : >> { %1300 = vst.msk [vmem:[#allocation4] sm:$0xff] %vm1062_vm9, %v1295_v48  ;;  %3290 = vrot.lane.b32.xlu1 %v7782_v43, %s7911_s14  ;;  %7424 = vmatpush3.msra.mxu0 %v6668_v44  ;;  %v6712_v44 = vld [vmem:[%s11009_s2 + $0x1b0] sm:$0xff]  ;;  %v7806_v48 = vld [vmem:[%s8741_s13 + $0x41] ss:$8 sps:$4 sm:$0xff]  }
 0x1c3   : >> { %3288 = vrot.lane.b32.xlu0 %v7783_v45, %s7911_s14  ;;  %7425 = vmatprep.subr.mxu0 %v6667_v47 }
 0x1c4   : >> { %v1315_v52 = vpop.permute.xlu1 %1314  ;;  %7426 = vmatpush3.msra.mxu0 %v6667_v47  ;;  %v6711_v47 = vld [vmem:[%s11009_s2 + $0x1a8] sm:$0xff] }
 0x1c5   : >> { %1319 = vst.msk [vmem:[#allocation4 + $0x8] sm:$0xff] %vm1083_vm10, %v1315_v52  ;;  %v1313_v54 = vpop.permute.xlu0 %1312  ;;  %7427 = vmatprep.subr.mxu0 %v6666_v50 }
 0x1c6   : >> { %1318 = vst.msk [vmem:[#allocation4] sm:$0xff] %vm1083_vm10, %v1313_v54  ;;  %3308 = vrot.lane.b32.xlu1 %v7784_v49, %s7912_s15  ;;  %7428 = vmatpush3.msra.mxu0 %v6666_v50  ;;  %v6710_v50 = vld [vmem:[%s11009_s2 + $0x1a0] sm:$0xff]  ;;  %v7809_v54 = vld [vmem:[%s8741_s13 + $0x52] ss:$8 sps:$4 sm:$0xff]  }
 0x1c7   : >> { %3306 = vrot.lane.b32.xlu0 %v7785_v51, %s7912_s15  ;;  %7429 = vmatprep.subr.mxu0 %v6665_v53  ;;  %v7804_v51 = vld [vmem:[%s8741_s13 + $0x19] ss:$8 sps:$4 sm:$0xff]  }
 0x1c8   : >> { %v1333_v58 = vpop.permute.xlu1 %1332  ;;  %7430 = vmatpush3.msra.mxu0 %v6665_v53  ;;  %v7805_v53 = vld [vmem:[%s8741_s13 + $0x9] ss:$8 sps:$4 sm:$0xff]  }
 0x1c9   : >> { %1337 = vst.msk [vmem:[#allocation4 + $0x8] sm:$0xff] %vm1102_vm11, %v1333_v58  ;;  %v1331_v61 = vpop.permute.xlu0 %1330  ;;  %7431 = vmatprep.subr.mxu0 %v6664_v56 }
 0x1ca   : >> { %1336 = vst.msk [vmem:[#allocation4] sm:$0xff] %vm1102_vm11, %v1331_v61  ;;  %3910 = vrot.lane.b32.xlu1 %v7786_v55, %s11031_s10  ;;  %7432 = vmatpush3.msra.mxu0 %v6664_v56  ;;  %v6709_v55 = vld [vmem:[%s11009_s2 + $0x198] sm:$0xff]  ;;  %v7808_v56 = vld [vmem:[%s8741_s13 + $0x42] ss:$8 sps:$4 sm:$0xff]  }
 0x1cb   : >> { %3908 = vrot.lane.b32.xlu0 %v7787_v57, %s11031_s10  ;;  %7433 = vmatprep.subr.mxu0 %v6663_v59 }
 0x1cc   : >> { %v1992_v1 = vpop.permute.xlu1 %1991  ;;  %7434 = vmatpush3.msra.mxu0 %v6663_v59 }
 0x1cd   : >> { %v1990_v4 = vpop.permute.xlu0 %1989  ;;  %7435 = vmatprep.subr.mxu0 %v6662_v63 }
 0x1ce   : >> { %3928 = vrot.lane.b32.xlu1 %v7789_v62, %s11020_s17  ;;  %7436 = vmatpush3.msra.mxu0 %v6662_v63  ;;  %v7811_v62 = vld [vmem:[%s8741_s13 + $0x79] ss:$8 sps:$4 sm:$0xff]   ;;  %v6708_v63 = vld [vmem:[%s11009_s2 + $0x190] sm:$0xff] }
 0x1cf   : >> { %3926 = vrot.lane.b32.xlu0 %v7790_v0, %s11020_s17  ;;  %7437 = vmatprep.subr.mxu0 %v6661_v2  ;;  %v6778_v0 = vld [vmem:[%s11009_s2 + $0x270] sm:$0xff] }
 0x1d0   : >> { %v1339_v9 = vld [vmem:[#allocation4 + $0x8] sm:$0xff]  ;;  %v2012_v10 = vpop.permute.xlu1 %2011  ;;  %7438 = vmatpush3.msra.mxu0 %v6661_v2 }
 0x1d1   : >> { %1978 = vst.msk [vmem:[#allocation4 + $0x8] sm:$0xff] %vm341_vm1, %v7788_v3  ;;  %v2010_v11 = vpop.permute.xlu0 %2009  ;;  %v1338_v12 = vld [vmem:[#allocation4] sm:$0xff]  ;;  %7439 = vmatprep.subr.mxu0 %v6660_v7  ;;  %v6707_v3 = vld [vmem:[%s11009_s2 + $0x188] sm:$0xff] }
 0x1d2   : >> { %1996 = vst.msk [vmem:[#allocation4 + $0x8] sm:$0xff] %vm981_vm5, %v1992_v1  ;;  %7410 = vmatprep.mubr.f32.mxu1 %v1338_v12  ;;  %3946 = vrot.lane.b32.xlu1 %v7792_v6, %s11030_s18  ;;  %v7810_v1 = vld [vmem:[%s8741_s13 + $0x69] ss:$8 sps:$4 sm:$0xff]   ;;  %v6706_v6 = vld [vmem:[%s11009_s2 + $0x180] sm:$0xff]  ;;  %v9226_v12 = vld [vmem:[%s11009_s2 + $0x2f8] sm:$0xff] }
 0x1d3   : >> { %1977 = vst.msk [vmem:[#allocation4] sm:$0xff] %vm341_vm1, %v7791_v5  ;;  %3944 = vrot.lane.b32.xlu0 %v7793_v8, %s11030_s18  ;;  %7411 = vmatmul.mubr.f32.vlgmr.msra.gmra.mxu1 %v1339_v9  ;;  %v7813_v5 = vld [vmem:[%s8741_s13 + $0x7a] ss:$8 sps:$4 sm:$0xff]   ;;  %v7812_v8 = vld [vmem:[%s8741_s13 + $0x6a] ss:$8 sps:$4 sm:$0xff]  }
 0x1d4   : >> { %2016 = vst.msk [vmem:[#allocation4 + $0x8] sm:$0xff] %vm1002_vm6, %v2012_v10  ;;  %v2030_v19 = vpop.permute.xlu1 %2029  ;;  %7440 = vmatpush3.msra.mxu0 %v6660_v7  ;;  %7449 = vmatpush3.msra.mxu1 %v8961_v60  ;;  %v6719_v60 = vld [vmem:[%s11009_s2 + $0x1e8] sm:$0xff] }
 0x1d5   : >> { %1995 = vst.msk [vmem:[#allocation4] sm:$0xff] %vm981_vm5, %v1990_v4  ;;  %v2028_v21 = vpop.permute.xlu0 %2027  ;;  %7441 = vmatprep.subr.mxu0 %v6659_v16  ;;  %7450 = vmatprep.subr.mxu1 %v6720_v17  ;;  %v6777_v7 = vld [vmem:[%s11009_s2 + $0x268] sm:$0xff] }
 0x1d6   : >> { %2015 = vst.msk [vmem:[#allocation4] sm:$0xff] %vm1002_vm6, %v2010_v11  ;;  %3964 = vrot.lane.b32.xlu1 %v7794_v15, %s7909_s9  ;;  %7442 = vmatpush3.msra.mxu0 %v6659_v16  ;;  %v6776_v11 = vld [vmem:[%s11009_s2 + $0x260] sm:$0xff]  ;;  %v7814_v16 = vld [vmem:[%s8741_s13 + $0x71] ss:$8 sps:$4 sm:$0xff]  }
 0x1d7   : >> { %2034 = vst.msk [vmem:[#allocation4 + $0x8] sm:$0xff] %vm1021_vm7, %v2030_v19  ;;  %2033 = vst.msk [vmem:[#allocation4] sm:$0xff] %vm1021_vm7, %v2028_v21  ;;  %3962 = vrot.lane.b32.xlu0 %v7795_v18, %s7909_s9  ;;  %7443 = vmatprep.subr.mxu0 %v6658_v20  ;;  %v7815_v15 = vld [vmem:[%s8741_s13 + $0x81] ss:$8 sps:$4 sm:$0xff]  }
 0x1d8   : >> { %v2048_v25 = vpop.permute.xlu1 %2047  ;;  %7444 = vmatpush3.msra.mxu0 %v6658_v20  ;;  %7451 = vmatpush3.msra.mxu1 %v6720_v17  ;;  %v6775_v17 = vld [vmem:[%s11009_s2 + $0x258] sm:$0xff]  ;;  %v6774_v20 = vld [vmem:[%s11009_s2 + $0x250] sm:$0xff]  ;;  %v7817_v21 = vld [vmem:[%s8741_s13 + $0x82] ss:$8 sps:$4 sm:$0xff]  }
 0x1d9   : >> { %2052 = vst.msk [vmem:[#allocation4 + $0x8] sm:$0xff] %vm1043_vm8, %v2048_v25  ;;  %v2046_v27 = vpop.permute.xlu0 %2045  ;;  %7452 = vmatprep.subr.mxu1 %v6719_v60  ;;  %7483 = vmatprep.subr.mxu0 %v9122_v23  ;;  %v6772_v25 = vld [vmem:[%s11009_s2 + $0x240] sm:$0xff] }
 0x1da   : >> { %2051 = vst.msk [vmem:[#allocation4] sm:$0xff] %vm1043_vm8, %v2046_v27  ;;  %3982 = vrot.lane.b32.xlu1 %v7796_v22, %s7910_s12  ;;  %7453 = vmatpush3.msra.mxu1 %v6719_v60  ;;  %v7816_v22 = vld [vmem:[%s8741_s13 + $0x72] ss:$8 sps:$4 sm:$0xff]   ;;  %v6773_v60 = vld [vmem:[%s11009_s2 + $0x248] sm:$0xff] }
 0x1db   : >> { %3980 = vrot.lane.b32.xlu0 %v7797_v24, %s7910_s12  ;;  %7454 = vmatprep.subr.mxu1 %v6718_v26 }
 0x1dc   : >> { %v2066_v31 = vpop.permute.xlu1 %2065  ;;  %7455 = vmatpush3.msra.mxu1 %v6718_v26  ;;  %v6771_v26 = vld [vmem:[%s11009_s2 + $0x238] sm:$0xff] }
 0x1dd   : >> { %2070 = vst.msk [vmem:[#allocation4 + $0x8] sm:$0xff] %vm1062_vm9, %v2066_v31  ;;  %v2064_v33 = vpop.permute.xlu0 %2063  ;;  %7456 = vmatprep.subr.mxu1 %v6717_v29 }
 0x1de   : >> { %2069 = vst.msk [vmem:[#allocation4] sm:$0xff] %vm1062_vm9, %v2064_v33  ;;  %4002 = vrot.lane.b32.xlu1 %v7798_v28, %s7911_s14  ;;  %7457 = vmatpush3.msra.mxu1 %v6717_v29  ;;  %v6770_v29 = vld [vmem:[%s11009_s2 + $0x230] sm:$0xff] }
 0x1df   : >> { %4000 = vrot.lane.b32.xlu0 %v7799_v30, %s7911_s14  ;;  %7458 = vmatprep.subr.mxu1 %v6716_v32  ;;  %v6769_v30 = vld [vmem:[%s11009_s2 + $0x228] sm:$0xff] }
 0x1e0   : >> { %v2086_v37 = vpop.permute.xlu1 %2085  ;;  %7459 = vmatpush3.msra.mxu1 %v6716_v32  ;;  %v7818_v32 = vld [vmem:[%s8741_s13 + $0x40] ss:$8 sps:$4 sm:$0xff]  }
 0x1e1   : >> { %2090 = vst.msk [vmem:[#allocation4 + $0x8] sm:$0xff] %vm1083_vm10, %v2086_v37  ;;  %v2084_v39 = vpop.permute.xlu0 %2083  ;;  %7460 = vmatprep.subr.mxu1 %v6715_v35 }
 0x1e2   : >> { %2089 = vst.msk [vmem:[#allocation4] sm:$0xff] %vm1083_vm10, %v2084_v39  ;;  %4020 = vrot.lane.b32.xlu1 %v7800_v34, %s7912_s15  ;;  %7461 = vmatpush3.msra.mxu1 %v6715_v35  ;;  %v6768_v34 = vld [vmem:[%s11009_s2 + $0x220] sm:$0xff]  ;;  %v7819_v35 = vld [vmem:[%s8741_s13 + $0x30] ss:$8 sps:$4 sm:$0xff]  }
 0x1e3   : >> { %4018 = vrot.lane.b32.xlu0 %v7801_v36, %s7912_s15  ;;  %7462 = vmatprep.subr.mxu1 %v6714_v38  ;;  %v6767_v36 = vld [vmem:[%s11009_s2 + $0x218] sm:$0xff] }
 0x1e4   : >> { %v2104_v43 = vpop.permute.xlu1 %2103  ;;  %7463 = vmatpush3.msra.mxu1 %v6714_v38 }
 0x1e5   : >> { %2108 = vst.msk [vmem:[#allocation4 + $0x8] sm:$0xff] %vm1102_vm11, %v2104_v43  ;;  %v2102_v45 = vpop.permute.xlu0 %2101  ;;  %7464 = vmatprep.subr.mxu1 %v6713_v41  ;;  %v6765_v43 = vld [vmem:[%s11009_s2 + $0x208] sm:$0xff] }
 0x1e6   : >> { %2107 = vst.msk [vmem:[#allocation4] sm:$0xff] %vm1102_vm11, %v2102_v45  ;;  %4146 = vrot.lane.b32.xlu1 %v7803_v40, %s11031_s10  ;;  %7465 = vmatpush3.msra.mxu1 %v6713_v41  ;;  %v6766_v41 = vld [vmem:[%s11009_s2 + $0x210] sm:$0xff]  ;;  %v6825_v45 = vld [vmem:[%s11009_s2 + $0x2e8] sm:$0xff] }
 0x1e7   : >> { %4144 = vrot.lane.b32.xlu0 %v7802_v42, %s11031_s10  ;;  %7466 = vmatprep.subr.mxu1 %v6712_v44  ;;  %v6826_v42 = vld [vmem:[%s11009_s2 + $0x2f0] sm:$0xff] }
 0x1e8   : >> { %v2230_v49 = vpop.permute.xlu1 %2229  ;;  %7467 = vmatpush3.msra.mxu1 %v6712_v44 }
 0x1e9   : >> { %v2228_v52 = vpop.permute.xlu0 %2227  ;;  %7468 = vmatprep.subr.mxu1 %v6711_v47 }
 0x1ea   : >> { %4164 = vrot.lane.b32.xlu1 %v7807_v46, %s11032_s29  ;;  %7469 = vmatpush3.msra.mxu1 %v6711_v47  ;;  %v6764_v47 = vld [vmem:[%s11009_s2 + $0x200] sm:$0xff] }
 0x1eb   : >> { %4162 = vrot.lane.b32.xlu0 %v7806_v48, %s11032_s29  ;;  %7470 = vmatprep.subr.mxu1 %v6710_v50  ;;  %v6824_v48 = vld [vmem:[%s11009_s2 + $0x2e0] sm:$0xff]  ;;  %s6723_s29 = smul.u32 320, %s7898_s11  ;;  %s948_s11 = sadd.s32 1, %s7898_s11  }
 0x1ec   : >> { %v2110_v57 = vld [vmem:[#allocation4 + $0x8] sm:$0xff]  ;;  %v2248_v58 = vpop.permute.xlu1 %2247  ;;  %7471 = vmatpush3.msra.mxu1 %v6710_v50  ;;  %p945_p11 = scmp.ge.s32.totalorder %s948_s11, 4  }
 0x1ed   : >> { %2216 = vst.msk [vmem:[#allocation4 + $0x8] sm:$0xff] %vm341_vm1, %v7804_v51  ;;  %v2109_v59 = vld [vmem:[#allocation4] sm:$0xff]  ;;  %v2246_v61 = vpop.permute.xlu0 %2245  ;;  %7472 = vmatprep.subr.mxu1 %v6709_v55  ;;  %v6823_v51 = vld [vmem:[%s11009_s2 + $0x2d8] sm:$0xff]  ;;  %s9626_s16 = scalar_lea.vmem [#allocation3], %s6723_s29 }
 0x1ee   : >> { %2234 = vst.msk [vmem:[#allocation4 + $0x8] sm:$0xff] %vm981_vm5, %v2230_v49  ;;  %7445 = vmatprep.mubr.f32.mxu0 %v2109_v59  ;;  %4182 = vrot.lane.b32.xlu1 %v7809_v54, %s11030_s18  ;;  %v9305_v49 = vld [vmem:[%s11009_s2 + $0x378] sm:$0xff] }
 0x1ef   : >> { %2215 = vst.msk [vmem:[#allocation4] sm:$0xff] %vm341_vm1, %v7805_v53  ;;  %4180 = vrot.lane.b32.xlu0 %v7808_v56, %s11030_s18  ;;  %7446 = vmatmul.mubr.f32.vlgmr.msra.gmra.mxu0 %v2110_v57  ;;  %v6822_v53 = vld [vmem:[%s11009_s2 + $0x2d0] sm:$0xff]  ;;  %v6820_v57 = vld [vmem:[%s11009_s2 + $0x2c0] sm:$0xff]  ;;  %v6819_v59 = vld [vmem:[%s11009_s2 + $0x2b8] sm:$0xff] }
 0x1f0   : >> { %2233 = vst.msk [vmem:[#allocation4] sm:$0xff] %vm981_vm5, %v2228_v52  ;;  %v2266_v2 = vpop.permute.xlu1 %2265  ;;  %7473 = vmatpush3.msra.mxu1 %v6709_v55  ;;  %7484 = vmatpush3.msra.mxu0 %v9122_v23  ;;  %v6821_v55 = vld [vmem:[%s11009_s2 + $0x2c8] sm:$0xff] }
 0x1f1   : >> { %2252 = vst.msk [vmem:[#allocation4 + $0x8] sm:$0xff] %vm1002_vm6, %v2248_v58  ;;  %2251 = vst.msk [vmem:[#allocation4] sm:$0xff] %vm1002_vm6, %v2246_v61  ;;  %v2264_v4 = vpop.permute.xlu0 %2263  ;;  %7474 = vmatprep.subr.mxu1 %v6708_v63  ;;  %7485 = vmatprep.subr.mxu0 %v6778_v0 }
 0x1f2   : >> { %2270 = vst.msk [vmem:[#allocation4 + $0x8] sm:$0xff] %vm1021_vm7, %v2266_v2  ;;  %2269 = vst.msk [vmem:[#allocation4] sm:$0xff] %vm1021_vm7, %v2264_v4  ;;  %4200 = vrot.lane.b32.xlu1 %v7811_v62, %s7909_s9  ;;  %7475 = vmatpush3.msra.mxu1 %v6708_v63  ;;  %v6818_v62 = vld [vmem:[%s11009_s2 + $0x2b0] sm:$0xff]  ;;  %v6816_v2 = vld [vmem:[%s11009_s2 + $0x2a0] sm:$0xff] }
 0x1f3   : >> { %4198 = vrot.lane.b32.xlu0 %v7810_v1, %s7909_s9  ;;  %7476 = vmatprep.subr.mxu1 %v6707_v3  ;;  %v6815_v4 = vld [vmem:[%s11009_s2 + $0x298] sm:$0xff]  ;;  %s10003_s9 = smov (%p945_p11), 0  }
 0x1f4   : >> { %v2284_v9 = vpop.permute.xlu1 %2283  ;;  %7477 = vmatpush3.msra.mxu1 %v6707_v3  ;;  %7486 = vmatpush3.msra.mxu0 %v6778_v0  ;;  %v6817_v0 = vld [vmem:[%s11009_s2 + $0x2a8] sm:$0xff] }
 0x1f5   : >> { %2288 = vst.msk [vmem:[#allocation4 + $0x8] sm:$0xff] %vm1043_vm8, %v2284_v9  ;;  %v2282_v10 = vpop.permute.xlu0 %2281  ;;  %7478 = vmatprep.subr.mxu1 %v6706_v6  ;;  %7487 = vmatprep.subr.mxu0 %v6777_v7 }
 0x1f6   : >> { %2287 = vst.msk [vmem:[#allocation4] sm:$0xff] %vm1043_vm8, %v2282_v10  ;;  %4218 = vrot.lane.b32.xlu1 %v7813_v5, %s7910_s12  ;;  %7479 = vmatpush3.msra.mxu1 %v6706_v6  ;;  %v7820_v5 = vld [vmem:[%s8741_s13 + $0x41] ss:$8 sps:$4 sm:$0xff]  }
 0x1f7   : >> { %4216 = vrot.lane.b32.xlu0 %v7812_v8, %s7910_s12  ;;  %7488 = vmatpush3.msra.mxu0 %v6777_v7  ;;  %v7821_v7 = vld [vmem:[%s8741_s13 + $0x31] ss:$8 sps:$4 sm:$0xff]  }
 0x1f8   : >> { %v2302_v18 = vpop.permute.xlu1 %2301  ;;  %7489 = vmatprep.subr.mxu0 %v6776_v11  ;;  %7518 = vmatprep.subr.mxu1 %v9226_v12  ;;  %v6814_v8 = vld [vmem:[%s11009_s2 + $0x290] sm:$0xff] }
 0x1f9   : >> { %2306 = vst.msk [vmem:[#allocation4 + $0x8] sm:$0xff] %vm1062_vm9, %v2302_v18  ;;  %v2300_v19 = vpop.permute.xlu0 %2299  ;;  %7490 = vmatpush3.msra.mxu0 %v6776_v11  ;;  %v6813_v11 = vld [vmem:[%s11009_s2 + $0x288] sm:$0xff] }
 0x1fa   : >> { %2305 = vst.msk [vmem:[#allocation4] sm:$0xff] %vm1062_vm9, %v2300_v19  ;;  %4236 = vrot.lane.b32.xlu1 %v7815_v15, %s7911_s14  ;;  %7491 = vmatprep.subr.mxu0 %v6775_v17  ;;  %v6873_v19 = vld [vmem:[%s11009_s2 + $0x368] sm:$0xff] }
 0x1fb   : >> { %4234 = vrot.lane.b32.xlu0 %v7814_v16, %s7911_s14  ;;  %7492 = vmatpush3.msra.mxu0 %v6775_v17  ;;  %v6812_v16 = vld [vmem:[%s11009_s2 + $0x280] sm:$0xff]  ;;  %v6874_v17 = vld [vmem:[%s11009_s2 + $0x370] sm:$0xff] }
 0x1fc   : >> { %v2320_v23 = vpop.permute.xlu1 %2319  ;;  %7493 = vmatprep.subr.mxu0 %v6774_v20 }
 0x1fd   : >> { %2324 = vst.msk [vmem:[#allocation4 + $0x8] sm:$0xff] %vm1083_vm10, %v2320_v23  ;;  %v2318_v24 = vpop.permute.xlu0 %2317  ;;  %7494 = vmatpush3.msra.mxu0 %v6774_v20  ;;  %v9370_v20 = vld [vmem:[%s11009_s2 + $0x3f8] sm:$0xff] }
 0x1fe   : >> { %2323 = vst.msk [vmem:[#allocation4] sm:$0xff] %vm1083_vm10, %v2318_v24  ;;  %4254 = vrot.lane.b32.xlu1 %v7817_v21, %s7912_s15  ;;  %7495 = vmatprep.subr.mxu0 %v6773_v60  ;;  %v6871_v23 = vld [vmem:[%s11009_s2 + $0x358] sm:$0xff] }
 0x1ff   : >> { %4252 = vrot.lane.b32.xlu0 %v7816_v22, %s7912_s15  ;;  %7496 = vmatpush3.msra.mxu0 %v6773_v60  ;;  %v6872_v22 = vld [vmem:[%s11009_s2 + $0x360] sm:$0xff] }
 0x200   : >> { %v2338_v27 = vpop.permute.xlu1 %2337  ;;  %7497 = vmatprep.subr.mxu0 %v6772_v25 }
 0x201   : >> { %2342 = vst.msk [vmem:[#allocation4 + $0x8] sm:$0xff] %vm1102_vm11, %v2338_v27  ;;  %v2336_v28 = vpop.permute.xlu0 %2335  ;;  %7498 = vmatpush3.msra.mxu0 %v6772_v25  ;;  %v6870_v25 = vld [vmem:[%s11009_s2 + $0x350] sm:$0xff]  ;;  %v6869_v27 = vld [vmem:[%s11009_s2 + $0x348] sm:$0xff] }
 0x202   : >> { %2341 = vst.msk [vmem:[#allocation4] sm:$0xff] %vm1102_vm11, %v2336_v28  ;;  %7499 = vmatprep.subr.mxu0 %v6771_v26 }
 0x203   : >> { %7500 = vmatpush3.msra.mxu0 %v6771_v26 }
 0x204   : >> { %v2962_v31 = vpop.permute.xlu1 %2961  ;;  %7501 = vmatprep.subr.mxu0 %v6770_v29 }
 0x205   : >> { %v2960_v33 = vpop.permute.xlu0 %2959  ;;  %7502 = vmatpush3.msra.mxu0 %v6770_v29  ;;  %v6868_v29 = vld [vmem:[%s11009_s2 + $0x340] sm:$0xff] }
 0x206   : >> { %7503 = vmatprep.subr.mxu0 %v6769_v30 }
 0x207   : >> { %7504 = vmatpush3.msra.mxu0 %v6769_v30 }
 0x208   : >> { %v2344_v37 = vld [vmem:[#allocation4 + $0x8] sm:$0xff]  ;;  %v2980_v38 = vpop.permute.xlu1 %2979  ;;  %7505 = vmatprep.subr.mxu0 %v6768_v34 }
 0x209   : >> { %2948 = vst.msk [vmem:[#allocation4 + $0x8] sm:$0xff] %vm341_vm1, %v7818_v32  ;;  %v2343_v39 = vld [vmem:[#allocation4] sm:$0xff]  ;;  %v2978_v40 = vpop.permute.xlu0 %2977  ;;  %7506 = vmatpush3.msra.mxu0 %v6768_v34 }
 0x20a   : >> { %2966 = vst.msk [vmem:[#allocation4 + $0x8] sm:$0xff] %vm981_vm5, %v2962_v31  ;;  %7480 = vmatprep.mubr.f32.mxu1 %v2343_v39  ;;  %7507 = vmatprep.subr.mxu0 %v6767_v36  ;;  %v6867_v31 = vld [vmem:[%s11009_s2 + $0x338] sm:$0xff] }
 0x20b   : >> { %2947 = vst.msk [vmem:[#allocation4] sm:$0xff] %vm341_vm1, %v7819_v35  ;;  %7481 = vmatmul.mubr.f32.vlgmr.msra.gmra.mxu1 %v2344_v37  ;;  %7508 = vmatpush3.msra.mxu0 %v6767_v36  ;;  %v6865_v35 = vld [vmem:[%s11009_s2 + $0x328] sm:$0xff]  ;;  %v6864_v37 = vld [vmem:[%s11009_s2 + $0x320] sm:$0xff]  ;;  %v6863_v39 = vld [vmem:[%s11009_s2 + $0x318] sm:$0xff] }
 0x20c   : >> { %2965 = vst.msk [vmem:[#allocation4] sm:$0xff] %vm981_vm5, %v2960_v33  ;;  %v2998_v44 = vpop.permute.xlu1 %2997  ;;  %7509 = vmatprep.subr.mxu0 %v6766_v41  ;;  %7519 = vmatpush3.msra.mxu1 %v9226_v12  ;;  %v6866_v33 = vld [vmem:[%s11009_s2 + $0x330] sm:$0xff] }
 0x20d   : >> { %2984 = vst.msk [vmem:[#allocation4 + $0x8] sm:$0xff] %vm1002_vm6, %v2980_v38  ;;  %2983 = vst.msk [vmem:[#allocation4] sm:$0xff] %vm1002_vm6, %v2978_v40  ;;  %v2996_v46 = vpop.permute.xlu0 %2995  ;;  %7510 = vmatpush3.msra.mxu0 %v6766_v41  ;;  %7520 = vmatprep.subr.mxu1 %v6826_v42  ;;  %v7822_v40 = vld [vmem:[%s8741_s13 + $0x48] ss:$8 sps:$4 sm:$0xff]  }
 0x20e   : >> { %3002 = vst.msk [vmem:[#allocation4 + $0x8] sm:$0xff] %vm1021_vm7, %v2998_v44  ;;  %3001 = vst.msk [vmem:[#allocation4] sm:$0xff] %vm1021_vm7, %v2996_v46  ;;  %7511 = vmatprep.subr.mxu0 %v6765_v43  ;;  %7521 = vmatpush3.msra.mxu1 %v6826_v42  ;;  %v7823_v42 = vld [vmem:[%s8741_s13 + $0x38] ss:$8 sps:$4 sm:$0xff]   ;;  %v6861_v46 = vld [vmem:[%s11009_s2 + $0x308] sm:$0xff] }
 0x20f   : >> { %7512 = vmatpush3.msra.mxu0 %v6765_v43  ;;  %7522 = vmatprep.subr.mxu1 %v6825_v45  ;;  %v6862_v43 = vld [vmem:[%s11009_s2 + $0x310] sm:$0xff] }
 0x210   : >> { %v3019_v50 = vpop.permute.xlu1 %3018  ;;  %7513 = vmatprep.subr.mxu0 %v6764_v47  ;;  %7523 = vmatpush3.msra.mxu1 %v6825_v45 }
 0x211   : >> { %3023 = vst.msk [vmem:[#allocation4 + $0x8] sm:$0xff] %vm1043_vm8, %v3019_v50  ;;  %v3017_v52 = vpop.permute.xlu0 %3016  ;;  %7514 = vmatpush3.msra.mxu0 %v6764_v47  ;;  %7524 = vmatprep.subr.mxu1 %v6824_v48  ;;  %v6922_v50 = vld [vmem:[%s11009_s2 + $0x3f0] sm:$0xff] }
 0x212   : >> { %3022 = vst.msk [vmem:[#allocation4] sm:$0xff] %vm1043_vm8, %v3017_v52  ;;  %7525 = vmatpush3.msra.mxu1 %v6824_v48  ;;  %7553 = vmatprep.subr.mxu0 %v9305_v49  ;;  %v6921_v52 = vld [vmem:[%s11009_s2 + $0x3e8] sm:$0xff] }
 0x213   : >> { %7526 = vmatprep.subr.mxu1 %v6823_v51 }
 0x214   : >> { %v3037_v54 = vpop.permute.xlu1 %3036  ;;  %7527 = vmatpush3.msra.mxu1 %v6823_v51 }
 0x215   : >> { %3041 = vst.msk [vmem:[#allocation4 + $0x8] sm:$0xff] %vm1062_vm9, %v3037_v54  ;;  %v3035_v56 = vpop.permute.xlu0 %3034  ;;  %7528 = vmatprep.subr.mxu1 %v6822_v53  ;;  %v6920_v54 = vld [vmem:[%s11009_s2 + $0x3e0] sm:$0xff] }
 0x216   : >> { %3040 = vst.msk [vmem:[#allocation4] sm:$0xff] %vm1062_vm9, %v3035_v56  ;;  %7529 = vmatpush3.msra.mxu1 %v6822_v53  ;;  %v6919_v56 = vld [vmem:[%s11009_s2 + $0x3d8] sm:$0xff] }
 0x217   : >> { %7530 = vmatprep.subr.mxu1 %v6821_v55 }
 0x218   : >> { %v3057_v58 = vpop.permute.xlu1 %3056  ;;  %7531 = vmatpush3.msra.mxu1 %v6821_v55 }
 0x219   : >> { %3061 = vst.msk [vmem:[#allocation4 + $0x8] sm:$0xff] %vm1083_vm10, %v3057_v58  ;;  %v3055_v61 = vpop.permute.xlu0 %3054  ;;  %7532 = vmatprep.subr.mxu1 %v6820_v57  ;;  %v6918_v58 = vld [vmem:[%s11009_s2 + $0x3d0] sm:$0xff] }
 0x21a   : >> { %3060 = vst.msk [vmem:[#allocation4] sm:$0xff] %vm1083_vm10, %v3055_v61  ;;  %7533 = vmatpush3.msra.mxu1 %v6820_v57  ;;  %v6917_v61 = vld [vmem:[%s11009_s2 + $0x3c8] sm:$0xff] }
 0x21b   : >> { %7534 = vmatprep.subr.mxu1 %v6819_v59 }
 0x21c   : >> { %v3075_v63 = vpop.permute.xlu1 %3074  ;;  %7535 = vmatpush3.msra.mxu1 %v6819_v59 }
 0x21d   : >> { %3079 = vst.msk [vmem:[#allocation4 + $0x8] sm:$0xff] %vm1102_vm11, %v3075_v63  ;;  %v3073_v1 = vpop.permute.xlu0 %3072  ;;  %7536 = vmatprep.subr.mxu1 %v6818_v62  ;;  %v6916_v63 = vld [vmem:[%s11009_s2 + $0x3c0] sm:$0xff] }
 0x21e   : >> { %3078 = vst.msk [vmem:[#allocation4] sm:$0xff] %vm1102_vm11, %v3073_v1  ;;  %7537 = vmatpush3.msra.mxu1 %v6818_v62  ;;  %v6915_v1 = vld [vmem:[%s11009_s2 + $0x3b8] sm:$0xff] }
 0x21f   : >> { %7538 = vmatprep.subr.mxu1 %v6817_v0 }
 0x220   : >> { %v3201_v3 = vpop.permute.xlu1 %3200  ;;  %7539 = vmatpush3.msra.mxu1 %v6817_v0 }
 0x221   : >> { %v3199_v6 = vpop.permute.xlu0 %3198  ;;  %7540 = vmatprep.subr.mxu1 %v6816_v2 }
 0x222   : >> { %7541 = vmatpush3.msra.mxu1 %v6816_v2 }
 0x223   : >> { %7542 = vmatprep.subr.mxu1 %v6815_v4 }
 0x224   : >> { %v3081_v9 = vld [vmem:[#allocation4 + $0x8] sm:$0xff]  ;;  %v3219_v10 = vpop.permute.xlu1 %3218  ;;  %7543 = vmatpush3.msra.mxu1 %v6815_v4 }
 0x225   : >> { %3187 = vst.msk [vmem:[#allocation4 + $0x8] sm:$0xff] %vm341_vm1, %v7820_v5  ;;  %v3080_v12 = vld [vmem:[#allocation4] sm:$0xff]  ;;  %v3217_v15 = vpop.permute.xlu0 %3216  ;;  %7544 = vmatprep.subr.mxu1 %v6814_v8  ;;  %v6913_v5 = vld [vmem:[%s11009_s2 + $0x3a8] sm:$0xff] }
 0x226   : >> { %3205 = vst.msk [vmem:[#allocation4 + $0x8] sm:$0xff] %vm981_vm5, %v3201_v3  ;;  %7515 = vmatprep.mubr.f32.mxu0 %v3080_v12  ;;  %7545 = vmatpush3.msra.mxu1 %v6814_v8  ;;  %v6914_v3 = vld [vmem:[%s11009_s2 + $0x3b0] sm:$0xff]  ;;  %v7824_v12 = vld [vmem:[%s8741_s13 + $0x39] ss:$8 sps:$4 sm:$0xff]  }
 0x227   : >> { %3186 = vst.msk [vmem:[#allocation4] sm:$0xff] %vm341_vm1, %v7821_v7  ;;  %7516 = vmatmul.mubr.f32.vlgmr.msra.gmra.mxu0 %v3081_v9  ;;  %7546 = vmatprep.subr.mxu1 %v6813_v11  ;;  %v6912_v7 = vld [vmem:[%s11009_s2 + $0x3a0] sm:$0xff]  ;;  %v6911_v9 = vld [vmem:[%s11009_s2 + $0x398] sm:$0xff] }
 0x228   : >> { %3204 = vst.msk [vmem:[#allocation4] sm:$0xff] %vm981_vm5, %v3199_v6  ;;  %v3237_v18 = vpop.permute.xlu1 %3236  ;;  %7547 = vmatpush3.msra.mxu1 %v6813_v11  ;;  %7554 = vmatpush3.msra.mxu0 %v9305_v49  ;;  %v6860_v49 = vld [vmem:[%s11009_s2 + $0x300] sm:$0xff]  ;;  %v7825_v11 = vld [vmem:[%s8741_s13 + $0x49] ss:$8 sps:$4 sm:$0xff]  }
 0x229   : >> { %3223 = vst.msk [vmem:[#allocation4 + $0x8] sm:$0xff] %vm1002_vm6, %v3219_v10  ;;  %3222 = vst.msk [vmem:[#allocation4] sm:$0xff] %vm1002_vm6, %v3217_v15  ;;  %v3235_v21 = vpop.permute.xlu0 %3234  ;;  %7548 = vmatprep.subr.mxu1 %v6812_v16  ;;  %7555 = vmatprep.subr.mxu0 %v6874_v17  ;;  %v6910_v15 = vld [vmem:[%s11009_s2 + $0x390] sm:$0xff] }
 0x22a   : >> { %3241 = vst.msk [vmem:[#allocation4 + $0x8] sm:$0xff] %vm1021_vm7, %v3237_v18  ;;  %3240 = vst.msk [vmem:[#allocation4] sm:$0xff] %vm1021_vm7, %v3235_v21  ;;  %7549 = vmatpush3.msra.mxu1 %v6812_v16  ;;  %7556 = vmatpush3.msra.mxu0 %v6874_v17  ;;  %v6909_v18 = vld [vmem:[%s11009_s2 + $0x388] sm:$0xff]  ;;  %v6908_v21 = vld [vmem:[%s11009_s2 + $0x380] sm:$0xff] }
 0x22b   : >> { %7557 = vmatprep.subr.mxu0 %v6873_v19  ;;  %7588 = vmatprep.subr.mxu1 %v9370_v20 }
 0x22c   : >> { %v3255_v60 = vpop.permute.xlu1 %3254  ;;  %7558 = vmatpush3.msra.mxu0 %v6873_v19 }
 0x22d   : >> { %3259 = vst.msk [vmem:[#allocation4 + $0x8] sm:$0xff] %vm1043_vm8, %v3255_v60  ;;  %v3253_v24 = vpop.permute.xlu0 %3252  ;;  %7559 = vmatprep.subr.mxu0 %v6872_v22 }
 0x22e   : >> { %3258 = vst.msk [vmem:[#allocation4] sm:$0xff] %vm1043_vm8, %v3253_v24  ;;  %7560 = vmatpush3.msra.mxu0 %v6872_v22 }
 0x22f   : >> { %7561 = vmatprep.subr.mxu0 %v6871_v23 }
 0x230   : >> { %v3273_v26 = vpop.permute.xlu1 %3272  ;;  %7562 = vmatpush3.msra.mxu0 %v6871_v23 }
 0x231   : >> { %3277 = vst.msk [vmem:[#allocation4 + $0x8] sm:$0xff] %vm1062_vm9, %v3273_v26  ;;  %v3271_v28 = vpop.permute.xlu0 %3270  ;;  %7563 = vmatprep.subr.mxu0 %v6870_v25 }
 0x232   : >> { %3276 = vst.msk [vmem:[#allocation4] sm:$0xff] %vm1062_vm9, %v3271_v28  ;;  %7564 = vmatpush3.msra.mxu0 %v6870_v25 }
 0x233   : >> { %7565 = vmatprep.subr.mxu0 %v6869_v27 }
 0x234   : >> { %v3291_v30 = vpop.permute.xlu1 %3290  ;;  %7566 = vmatpush3.msra.mxu0 %v6869_v27 }
 0x235   : >> { %3295 = vst.msk [vmem:[#allocation4 + $0x8] sm:$0xff] %vm1083_vm10, %v3291_v30  ;;  %v3289_v32 = vpop.permute.xlu0 %3288  ;;  %7567 = vmatprep.subr.mxu0 %v6868_v29 }
 0x236   : >> { %3294 = vst.msk [vmem:[#allocation4] sm:$0xff] %vm1083_vm10, %v3289_v32  ;;  %7568 = vmatpush3.msra.mxu0 %v6868_v29  ;;  %v7913_v29 = vmov 1966171168  }
 0x237   : >> { %7569 = vmatprep.subr.mxu0 %v6867_v31  ;;  %v1436_v30 = vunpack.c.l.s4 %v7913_v29 }
 0x238   : >> { %v3309_v34 = vpop.permute.xlu1 %3308  ;;  %7570 = vmatpush3.msra.mxu0 %v6867_v31  ;;  %v1438_v31 = vlaneseq }
 0x239   : >> { %3313 = vst.msk [vmem:[#allocation4 + $0x8] sm:$0xff] %vm1102_vm11, %v3309_v34  ;;  %v3307_v36 = vpop.permute.xlu0 %3306  ;;  %7571 = vmatprep.subr.mxu0 %v6866_v33  ;;  %v1437_v34 = vunpack.c.0.s8 %v1436_v30 }
 0x23a   : >> { %3312 = vst.msk [vmem:[#allocation4] sm:$0xff] %vm1102_vm11, %v3307_v36  ;;  %7572 = vmatpush3.msra.mxu0 %v6866_v33 }
 0x23b   : >> { %7573 = vmatprep.subr.mxu0 %v6865_v35 }
 0x23c   : >> { %v3911_v38 = vpop.permute.xlu1 %3910  ;;  %7574 = vmatpush3.msra.mxu0 %v6865_v35  ;;  %v9504_v35 = vshrl.u32 %v1438_v31, 7 }
 0x23d   : >> { %v3909_v41 = vpop.permute.xlu0 %3908  ;;  %7575 = vmatprep.subr.mxu0 %v6864_v37 }
 0x23e   : >> { %7576 = vmatpush3.msra.mxu0 %v6864_v37  ;;  %v9507_v37 = vsub.s32 %v1437_v34, %v9504_v35 }
 0x23f   : >> { %7577 = vmatprep.subr.mxu0 %v6863_v39 }
 0x240   : >> { %v3315_v44 = vld [vmem:[#allocation4 + $0x8] sm:$0xff]  ;;  %v3929_v45 = vpop.permute.xlu1 %3928  ;;  %7578 = vmatpush3.msra.mxu0 %v6863_v39 }
 0x241   : >> { %3897 = vst.msk [vmem:[#allocation4 + $0x8] sm:$0xff] %vm341_vm1, %v7822_v40  ;;  %v3314_v47 = vld [vmem:[#allocation4] sm:$0xff]  ;;  %v3927_v48 = vpop.permute.xlu0 %3926  ;;  %7579 = vmatprep.subr.mxu0 %v6862_v43 }
 0x242   : >> { %3915 = vst.msk [vmem:[#allocation4 + $0x8] sm:$0xff] %vm981_vm5, %v3911_v38  ;;  %7550 = vmatprep.mubr.f32.mxu1 %v3314_v47  ;;  %7580 = vmatpush3.msra.mxu0 %v6862_v43 }
 0x243   : >> { %3896 = vst.msk [vmem:[#allocation4] sm:$0xff] %vm341_vm1, %v7823_v42  ;;  %7551 = vmatmul.mubr.f32.vlgmr.msra.gmra.mxu1 %v3315_v44  ;;  %7581 = vmatprep.subr.mxu0 %v6861_v46 }
 0x244   : >> { %3914 = vst.msk [vmem:[#allocation4] sm:$0xff] %vm981_vm5, %v3909_v41  ;;  %v3947_v51 = vpop.permute.xlu1 %3946  ;;  %7582 = vmatpush3.msra.mxu0 %v6861_v46  ;;  %7589 = vmatpush3.msra.mxu1 %v9370_v20 }
 0x245   : >> { %3933 = vst.msk [vmem:[#allocation4 + $0x8] sm:$0xff] %vm1002_vm6, %v3929_v45  ;;  %3932 = vst.msk [vmem:[#allocation4] sm:$0xff] %vm1002_vm6, %v3927_v48  ;;  %v3945_v53 = vpop.permute.xlu0 %3944  ;;  %7583 = vmatprep.subr.mxu0 %v6860_v49  ;;  %7590 = vmatprep.subr.mxu1 %v6922_v50 }
 0x246   : >> { %3951 = vst.msk [vmem:[#allocation4 + $0x8] sm:$0xff] %vm1021_vm7, %v3947_v51  ;;  %3950 = vst.msk [vmem:[#allocation4] sm:$0xff] %vm1021_vm7, %v3945_v53  ;;  %7584 = vmatpush3.msra.mxu0 %v6860_v49  ;;  %7591 = vmatpush3.msra.mxu1 %v6922_v50 }
 0x247   : >> { %7592 = vmatprep.subr.mxu1 %v6921_v52 }
 0x248   : >> { %v3965_v55 = vpop.permute.xlu1 %3964  ;;  %7593 = vmatpush3.msra.mxu1 %v6921_v52 }
 0x249   : >> { %3969 = vst.msk [vmem:[#allocation4 + $0x8] sm:$0xff] %vm1043_vm8, %v3965_v55  ;;  %v3963_v57 = vpop.permute.xlu0 %3962  ;;  %7594 = vmatprep.subr.mxu1 %v6920_v54 }
 0x24a   : >> { %3968 = vst.msk [vmem:[#allocation4] sm:$0xff] %vm1043_vm8, %v3963_v57  ;;  %7595 = vmatpush3.msra.mxu1 %v6920_v54  ;;  %v7914_v57 = vmov 1983009808  }
 0x24b   : >> { %7596 = vmatprep.subr.mxu1 %v6919_v56 }
 0x24c   : >> { %v3983_v59 = vpop.permute.xlu1 %3982  ;;  %7597 = vmatpush3.msra.mxu1 %v6919_v56 }
 0x24d   : >> { %3987 = vst.msk [vmem:[#allocation4 + $0x8] sm:$0xff] %vm1062_vm9, %v3983_v59  ;;  %v3981_v62 = vpop.permute.xlu0 %3980  ;;  %7598 = vmatprep.subr.mxu1 %v6918_v58 }
 0x24e   : >> { %3986 = vst.msk [vmem:[#allocation4] sm:$0xff] %vm1062_vm9, %v3981_v62  ;;  %7599 = vmatpush3.msra.mxu1 %v6918_v58  ;;  %v1820_v58 = vunpack.c.l.s4 %v7914_v57  ;;  %v9520_v62 = vsub.s32 0, %v9504_v35 }
 0x24f   : >> { %7600 = vmatprep.subr.mxu1 %v6917_v61 }
 0x250   : >> { %v4003_v0 = vpop.permute.xlu1 %4002  ;;  %7601 = vmatpush3.msra.mxu1 %v6917_v61 }
 0x251   : >> { %4007 = vst.msk [vmem:[#allocation4 + $0x8] sm:$0xff] %vm1083_vm10, %v4003_v0  ;;  %v4001_v2 = vpop.permute.xlu0 %4000  ;;  %7602 = vmatprep.subr.mxu1 %v6916_v63 }
 0x252   : >> { %4006 = vst.msk [vmem:[#allocation4] sm:$0xff] %vm1083_vm10, %v4001_v2  ;;  %7603 = vmatpush3.msra.mxu1 %v6916_v63 }
 0x253   : >> { %7604 = vmatprep.subr.mxu1 %v6915_v1 }
 0x254   : >> { %v4021_v4 = vpop.permute.xlu1 %4020  ;;  %7605 = vmatpush3.msra.mxu1 %v6915_v1 }
 0x255   : >> { %4025 = vst.msk [vmem:[#allocation4 + $0x8] sm:$0xff] %vm1102_vm11, %v4021_v4  ;;  %v4019_v6 = vpop.permute.xlu0 %4018  ;;  %7606 = vmatprep.subr.mxu1 %v6914_v3 }
 0x256   : >> { %4024 = vst.msk [vmem:[#allocation4] sm:$0xff] %vm1102_vm11, %v4019_v6  ;;  %7607 = vmatpush3.msra.mxu1 %v6914_v3  ;;  %v1763_v6 = vadd.s32 16, %v9504_v35 }
 0x257   : >> { %7608 = vmatprep.subr.mxu1 %v6913_v5 }
 0x258   : >> { %v4147_v8 = vpop.permute.xlu1 %4146  ;;  %7609 = vmatpush3.msra.mxu1 %v6913_v5  ;;  %v1821_v5 = vunpack.c.0.s8 %v1820_v58 }
 0x259   : >> { %v4145_v10 = vpop.permute.xlu0 %4144  ;;  %7610 = vmatprep.subr.mxu1 %v6912_v7 }
 0x25a   : >> { %7611 = vmatpush3.msra.mxu1 %v6912_v7 }
 0x25b   : >> { %7612 = vmatprep.subr.mxu1 %v6911_v9 }
 0x25c   : >> { %v4027_v16 = vld [vmem:[#allocation4 + $0x8] sm:$0xff]  ;;  %v4165_v17 = vpop.permute.xlu1 %4164  ;;  %7613 = vmatpush3.msra.mxu1 %v6911_v9 }
 0x25d   : >> { %v4026_v19 = vld [vmem:[#allocation4] sm:$0xff]  ;;  %4133 = vst.msk [vmem:[#allocation4 + $0x8] sm:$0xff] %vm341_vm1, %v7825_v11  ;;  %v4163_v20 = vpop.permute.xlu0 %4162  ;;  %7614 = vmatprep.subr.mxu1 %v6910_v15 }
 0x25e   : >> { %4132 = vst.msk [vmem:[#allocation4] sm:$0xff] %vm341_vm1, %v7824_v12  ;;  %7585 = vmatprep.mubr.f32.mxu0 %v4026_v19  ;;  %7615 = vmatpush3.msra.mxu1 %v6910_v15  ;;  %v1764_v15 = vadd.s32 24, %v9504_v35 }
 0x25f   : >> { %4151 = vst.msk [vmem:[#allocation4 + $0x8] sm:$0xff] %vm981_vm5, %v4147_v8  ;;  %4150 = vst.msk [vmem:[#allocation4] sm:$0xff] %vm981_vm5, %v4145_v10  ;;  %7586 = vmatmul.mubr.f32.vlgmr.msra.gmra.mxu0 %v4027_v16  ;;  %7616 = vmatprep.subr.mxu1 %v6909_v18  ;;  %v9535_v16 = vadd.s32 8, %v9504_v35 }
 0x260   : >> { %4169 = vst.msk [vmem:[#allocation4 + $0x8] sm:$0xff] %vm1002_vm6, %v4165_v17  ;;  %4168 = vst.msk [vmem:[#allocation4] sm:$0xff] %vm1002_vm6, %v4163_v20  ;;  %v4183_v22 = vpop.permute.xlu1 %4182  ;;  %7617 = vmatpush3.msra.mxu1 %v6909_v18 }
 0x261   : >> { %v4181_v60 = vpop.permute.xlu0 %4180  ;;  %4187 = vst.msk [vmem:[#allocation4 + $0x8] sm:$0xff] %vm1021_vm7, %v4183_v22  ;;  %7618 = vmatprep.subr.mxu1 %v6908_v21  ;;  %v1776_v29 = vand.u32 1, %v9535_v16 }
 0x262   : >> { %4186 = vst.msk [vmem:[#allocation4] sm:$0xff] %vm1021_vm7, %v4181_v60  ;;  %7619 = vmatpush3.msra.mxu1 %v6908_v21  ;;  %v9540_v21 = vsub.s32 %v1821_v5, %v9504_v35 }
 0x263   : >> { %vm9649_vm0 = vcmp.eq.s32.totalorder %v1776_v29, 0 }
 0x264   : >> { %v4201_v23 = vpop.permute.xlu1 %4200 }
 0x265   : >> { %v4199_v24 = vpop.permute.xlu0 %4198  ;;  %4205 = vst.msk [vmem:[#allocation4 + $0x8] sm:$0xff] %vm1043_vm8, %v4201_v23 }
 0x266   : >> { %4204 = vst.msk [vmem:[#allocation4] sm:$0xff] %vm1043_vm8, %v4199_v24 }
 0x268   : >> { %v4219_v25 = vpop.permute.xlu1 %4218 }
 0x269   : >> { %v4217_v26 = vpop.permute.xlu0 %4216  ;;  %4223 = vst.msk [vmem:[#allocation4 + $0x8] sm:$0xff] %vm1062_vm9, %v4219_v25 }
 0x26a   : >> { %4222 = vst.msk [vmem:[#allocation4] sm:$0xff] %vm1062_vm9, %v4217_v26  ;;  %v1783_v26 = vand.u32 1, %v1763_v6 }
 0x26c   : >> { %v4237_v27 = vpop.permute.xlu1 %4236  ;;  %vm9585_vm12 = vcmp.eq.s32.totalorder %v1783_v26, 0 }
 0x26d   : >> { %v4235_v28 = vpop.permute.xlu0 %4234  ;;  %4241 = vst.msk [vmem:[#allocation4 + $0x8] sm:$0xff] %vm1083_vm10, %v4237_v27  ;;  %v1790_v27 = vand.u32 1, %v1764_v15 }
 0x26e   : >> { %4240 = vst.msk [vmem:[#allocation4] sm:$0xff] %vm1083_vm10, %v4235_v28  ;;  %v1769_v28 = vand.u32 1, %v9504_v35 }
 0x26f   : >> { %vm9595_vm14 = vcmp.eq.s32.totalorder %v1790_v27, 0 }
 0x270   : >> { %v4255_v32 = vpop.permute.xlu1 %4254  ;;  %vm9632_vm15 = vcmp.eq.s32.totalorder %v1769_v28, 0 }
 0x271   : >> { %v4253_v33 = vpop.permute.xlu0 %4252  ;;  %4259 = vst.msk [vmem:[#allocation4 + $0x8] sm:$0xff] %vm1102_vm11, %v4255_v32 }
 0x272   : >> { %4258 = vst.msk [vmem:[#allocation4] sm:$0xff] %vm1102_vm11, %v4253_v33 }
 0x277   : >> { %v7377_v36 = vpop.f32.mrf.mxu0 }
 0x278   : >> { %v1195_v38 = vadd.f32 %v7377_v36, %v8637_v13  ;;  %v4261_v39 = vld [vmem:[#allocation4 + $0x8] sm:$0xff] }
 0x279   : >> { %v4260_v40 = vld [vmem:[#allocation4] sm:$0xff]  ;;  %v1189_v42 = vpop.f32.mrf.mxu0 }
 0x27a   : >> { %v1483_v41 = vcombine.high %v1195_v38, %v1195_v38  ;;  %7620 = vmatprep.mubr.f32.mxu1 %v4260_v40  ;;  %v1490_v43 = vrot.slane %v1195_v38, %v9507_v37  ;;  %v1190_v45 = vadd.f32 %v8637_v13, %v1189_v42 }
 0x27b   : >> { %7621 = vmatmul.mubr.f32.vlgmr.msra.gmra.mxu1 %v4261_v39 }
 0x27c   : >> { %v1497_v44 = vrot.slane %v1483_v41, %v9507_v37  ;;  %v1498_v46 = vcombine.high %v1490_v43, %v1490_v43  ;;  %v1434_v48 = vcombine.high %v1190_v45, %v1190_v45  ;;  %v1441_v50 = vrot.slane %v1190_v45, %v9507_v37 }
 0x27d   : >> { %v1506_v51 = vrot.slane %v1490_v43, %v9507_v37 }
 0x27e   : >> { %v1499_v47 = vcombine.high %v1497_v44, %v1497_v44  ;;  %v1520_v49 = vrot.slane %v1498_v46, %v9507_v37  ;;  %v1448_v53 = vrot.slane %v1434_v48, %v9507_v37  ;;  %v1513_v54 = vrot.slane %v1497_v44, %v9507_v37 }
 0x27f   : >> { %v1449_v56 = vcombine.high %v1441_v50, %v1441_v50  ;;  %v1528_v59 = vcombine.high %v1506_v51, %v1506_v51  ;;  %v1457_v9 = vrot.slane %v1441_v50, %v9507_v37  ;;  %v1567_v11 = vrot.slane %v1506_v51, %v9520_v62 }
 0x280   : >> { %v1527_v52 = vrot.slane %v1499_v47, %v9507_v37  ;;  %v1530_v55 = vcombine.high %v1520_v49, %v1520_v49  ;;  %v1450_v63 = vcombine.high %v1448_v53, %v1448_v53  ;;  %v1529_v0 = vcombine.high %v1513_v54, %v1513_v54 }
 0x281   : >> { %v1471_v2 = vrot.slane %v1449_v56, %v9507_v37  ;;  %v1571_v3 = vrot.slane %v1520_v49, %v9520_v62  ;;  %v1575_v7 = vrot.slane %v1528_v59, %v9520_v62  ;;  %v1583_v12 = vrot.slane %v1513_v54, %v9520_v62 }
 0x282   : >> { %v1531_v61 = vcombine.high %v1527_v52, %v1527_v52  ;;  %v1579_v1 = vrot.slane %v1530_v55, %v9520_v62  ;;  %v1587_v4 = vrot.slane %v1527_v52, %v9520_v62  ;;  %v1478_v10 = vrot.slane %v1450_v63, %v9507_v37 }
 0x283   : >> { %v1591_v17 = vrot.slane %v1529_v0, %v9520_v62  ;;  %v1464_v19 = vrot.slane %v1448_v53, %v9507_v37  ;;  %v1481_v20 = vcombine.high %v1471_v2, %v1471_v2  ;;  %v1851_v22 = vcombine.low %v1567_v11, %v1571_v3 }
 0x284   : >> { %v1595_v8 = vrot.slane %v1531_v61, %v9520_v62  ;;  %v1852_v18 = vcombine.low %v1575_v7, %v1579_v1  ;;  %v1868_v60 = vcombine.low %v1583_v12, %v1587_v4  ;;  %v1479_v24 = vcombine.high %v1457_v9, %v1457_v9 }
 0x285   : >> { %v1482_v25 = vcombine.high %v1478_v10, %v1478_v10  ;;  %v1480_v31 = vcombine.high %v1464_v19, %v1464_v19  ;;  %v1539_v32 = vrot.slane %v1471_v2, %v9520_v62  ;;  %v9547_v33 = vrot.slane %v1481_v20, %v9520_v62 }
 0x286   : >> { %v1869_v23 = vcombine.low %v1591_v17, %v1595_v8  ;;  %v1866_v30 = vrot.slane %v1852_v18, %v9540_v21  ;;  %v1859_v36 = vrot.slane %v1851_v22, %v9540_v21  ;;  %v1876_v38 = vrot.slane %v1868_v60, %v9540_v21 }
 0x287   : >> { %v1535_v39 = vrot.slane %v1457_v9, %v9520_v62  ;;  %v9555_v42 = vrot.slane %v1479_v24, %v9520_v62  ;;  %v1555_v43 = vrot.slane %v1478_v10, %v9520_v62  ;;  %v9559_v44 = vrot.slane %v1482_v25, %v9520_v62 }
 0x288   : >> { %v1883_v41 = vrot.slane %v1869_v23, %v9540_v21  ;;  %v1551_v46 = vrot.slane %v1464_v19, %v9520_v62  ;;  %v9564_v50 = vcombine.low %v1859_v36, %v1866_v30  ;;  %v9567_v51 = vrot.slane %v1480_v31, %v9520_v62 }
 0x289   : >> { %v9569_v52 = vcombine.low %v1535_v39, %v1539_v32  ;;  %v1818_v53 = vcombine.low %v9555_v42, %v9547_v33 }
 0x28a   : >> { %v9575_v58 = vcombine.low %v1876_v38, %v1883_v41  ;;  %v9577_v59 = vcombine.low %v1551_v46, %v1555_v43  ;;  %v1835_v61 = vcombine.low %v9567_v51, %v9559_v44 }
 0x293   : >> { %v7412_v34 = vpop.f32.mrf.mxu1 }
 0x294   : >> { %v1429_v40 = vadd.f32 %v7412_v34, %v8637_v13 }
 0x295   : >> { %v1423_v45 = vpop.f32.mrf.mxu1 }
 0x296   : >> { %v1647_v47 = vcombine.high %v1429_v40, %v1429_v40  ;;  %v1654_v48 = vrot.slane %v1429_v40, %v9507_v37  ;;  %v1424_v49 = vadd.f32 %v8637_v13, %v1423_v45 }
 0x298   : >> { %v1661_v54 = vrot.slane %v1647_v47, %v9507_v37  ;;  %v1662_v55 = vcombine.high %v1654_v48, %v1654_v48  ;;  %v1670_v56 = vrot.slane %v1654_v48, %v9507_v37  ;;  %v1598_v57 = vcombine.high %v1424_v49, %v1424_v49 }
 0x299   : >> { %v1605_v63 = vrot.slane %v1424_v49, %v9507_v37 }
 0x29a   : >> { %v1663_v0 = vcombine.high %v1661_v54, %v1661_v54  ;;  %v1677_v1 = vrot.slane %v1661_v54, %v9507_v37  ;;  %v1684_v2 = vrot.slane %v1662_v55, %v9507_v37  ;;  %v1692_v3 = vcombine.high %v1670_v56, %v1670_v56 }
 0x29b   : >> { %v1731_v4 = vrot.slane %v1670_v56, %v9520_v62  ;;  %v1612_v6 = vrot.slane %v1598_v57, %v9507_v37  ;;  %v1613_v7 = vcombine.high %v1605_v63, %v1605_v63  ;;  %v1621_v8 = vrot.slane %v1605_v63, %v9507_v37 }
 0x29c   : >> { %v1691_v9 = vrot.slane %v1663_v0, %v9507_v37  ;;  %v1693_v10 = vcombine.high %v1677_v1, %v1677_v1  ;;  %v1694_v11 = vcombine.high %v1684_v2, %v1684_v2  ;;  %v1735_v12 = vrot.slane %v1684_v2, %v9520_v62 }
 0x29d   : >> { %v1739_v15 = vrot.slane %v1692_v3, %v9520_v62  ;;  %v1747_v17 = vrot.slane %v1677_v1, %v9520_v62  ;;  %v1614_v19 = vcombine.high %v1612_v6, %v1612_v6  ;;  %v1628_v20 = vrot.slane %v1612_v6, %v9507_v37 }
 0x29e   : >> { %v1695_v22 = vcombine.high %v1691_v9, %v1691_v9  ;;  %v1743_v60 = vrot.slane %v1694_v11, %v9520_v62  ;;  %v1751_v23 = vrot.slane %v1691_v9, %v9520_v62  ;;  %v1755_v24 = vrot.slane %v1693_v10, %v9520_v62 }
 0x29f   : >> { %v1923_v25 = vcombine.low %v1731_v4, %v1735_v12  ;;  %v1635_v26 = vrot.slane %v1613_v7, %v9507_v37  ;;  %v1642_v30 = vrot.slane %v1614_v19, %v9507_v37  ;;  %v1643_v31 = vcombine.high %v1621_v8, %v1621_v8 }
 0x2a0   : >> { %v1759_v27 = vrot.slane %v1695_v22, %v9520_v62  ;;  %v1924_v32 = vcombine.low %v1739_v15, %v1743_v60  ;;  %v1940_v33 = vcombine.low %v1747_v17, %v1751_v23  ;;  %v1644_v34 = vcombine.high %v1628_v20, %v1628_v20 }
 0x2a1   : >> { %v1931_v36 = vrot.slane %v1923_v25, %v9540_v21  ;;  %v1645_v38 = vcombine.high %v1635_v26, %v1635_v26  ;;  %v1646_v39 = vcombine.high %v1642_v30, %v1642_v30  ;;  %v1699_v40 = vrot.slane %v1621_v8, %v9520_v62 }
 0x2a2   : >> { %v1938_v41 = vrot.slane %v1924_v32, %v9540_v21  ;;  %v1941_v42 = vcombine.low %v1755_v24, %v1759_v27  ;;  %v1948_v43 = vrot.slane %v1940_v33, %v9540_v21  ;;  %v1703_v44 = vrot.slane %v1635_v26, %v9520_v62 }
 0x2a3   : >> { %v1707_v45 = vrot.slane %v1643_v31, %v9520_v62  ;;  %v1711_v46 = vrot.slane %v1645_v38, %v9520_v62  ;;  %v1715_v47 = vrot.slane %v1628_v20, %v9520_v62  ;;  %v1719_v48 = vrot.slane %v1642_v30, %v9520_v62 }
 0x2a4   : >> { %v1939_v49 = vcombine.low %v1931_v36, %v1938_v41  ;;  %v1955_v51 = vrot.slane %v1941_v42, %v9540_v21  ;;  %v1723_v54 = vrot.slane %v1644_v34, %v9520_v62  ;;  %v1727_v55 = vrot.slane %v1646_v39, %v9520_v62 }
 0x2a5   : >> { %v1832_v56 = vrot.slane %v1818_v53, %v9540_v21  ;;  %v1889_v57 = vcombine.low %v1699_v40, %v1703_v44  ;;  %v1890_v63 = vcombine.low %v1707_v45, %v1711_v46  ;;  %v1906_v0 = vcombine.low %v1715_v47, %v1719_v48 }
 0x2a6   : >> { %v1849_v1 = vrot.slane %v1835_v61, %v9540_v21  ;;  %v1956_v2 = vcombine.low %v1948_v43, %v1955_v51  ;;  %v1963_v3 = vsel %vm9585_vm12, %v9564_v50, %v1939_v49  ;;  %v1907_v4 = vcombine.low %v1723_v54, %v1727_v55 }
 0x2a7   : >> { %v1825_v6 = vrot.slane %v9569_v52, %v9540_v21  ;;  %6728 = vst.msk [vmem:[%s9626_s16 + $0xf1] sm:$0xff] %vm2926_vm13, %v1963_v3  ;;  %v1897_v50 = vrot.slane %v1889_v57, %v9540_v21  ;;  %v1904_v61 = vrot.slane %v1890_v63, %v9540_v21  ;;  %v1842_v52 = vrot.slane %v9577_v59, %v9540_v21 }
 0x2a8   : >> { %v1964_v7 = vsel %vm9595_vm14, %v9575_v58, %v1956_v2  ;;  %v1914_v8 = vrot.slane %v1906_v0, %v9540_v21  ;;  %v1921_v35 = vrot.slane %v1907_v4, %v9540_v21 }
 0x2a9   : >> { %v1833_v28 = vcombine.low %v1825_v6, %v1832_v56  ;;  %6730 = vst.msk [vmem:[%s9626_s16 + $0x111] sm:$0xff] %vm2926_vm13, %v1964_v7  ;;  %v1905_v10 = vcombine.low %v1897_v50, %v1904_v61  ;;  %v1850_v11 = vcombine.low %v1842_v52, %v1849_v1 }
 0x2aa   : >> { %v1922_v59 = vcombine.low %v1914_v8, %v1921_v35 }
 0x2ab   : >> { %v1961_v12 = vsel %vm9632_vm15, %v1833_v28, %v1905_v10 }
 0x2ac   : >> { %v1962_v58 = vsel %vm9649_vm0, %v1850_v11, %v1922_v59  ;;  %6724 = vst.msk [vmem:[%s9626_s16 + $0xb1] sm:$0xff] %vm2926_vm13, %v1961_v12 }
 0x2ad   : >> { %6726 = vst.msk [vmem:[%s9626_s16 + $0xd1] sm:$0xff] %vm2926_vm13, %v1962_v58 }
 0x2af   : >> { %v7447_v15 = vpop.f32.mrf.mxu0 }
 0x2b0   : >> { %v2200_v16 = vadd.f32 %v7447_v15, %v8637_v13 }
 0x2b1   : >> { %v2194_v17 = vpop.f32.mrf.mxu0 }
 0x2b2   : >> { %v2488_v29 = vcombine.high %v2200_v16, %v2200_v16  ;;  %v2495_v19 = vrot.slane %v2200_v16, %v9507_v37  ;;  %v2195_v22 = vadd.f32 %v8637_v13, %v2194_v17 }
 0x2b4   : >> { %v2502_v20 = vrot.slane %v2488_v29, %v9507_v37  ;;  %v2503_v60 = vcombine.high %v2495_v19, %v2495_v19  ;;  %v2439_v24 = vcombine.high %v2195_v22, %v2195_v22  ;;  %v2446_v26 = vrot.slane %v2195_v22, %v9507_v37 }
 0x2b5   : >> { %v2511_v30 = vrot.slane %v2495_v19, %v9507_v37 }
 0x2b6   : >> { %v2504_v23 = vcombine.high %v2502_v20, %v2502_v20  ;;  %v2525_v25 = vrot.slane %v2503_v60, %v9507_v37  ;;  %v2453_v27 = vrot.slane %v2439_v24, %v9507_v37  ;;  %v2518_v32 = vrot.slane %v2502_v20, %v9507_v37 }
 0x2b7   : >> { %v2454_v34 = vcombine.high %v2446_v26, %v2446_v26  ;;  %v2533_v36 = vcombine.high %v2511_v30, %v2511_v30  ;;  %v2462_v47 = vrot.slane %v2446_v26, %v9507_v37  ;;  %v2572_v49 = vrot.slane %v2511_v30, %v9520_v62 }
 0x2b8   : >> { %v2532_v31 = vrot.slane %v2504_v23, %v9507_v37  ;;  %v2535_v33 = vcombine.high %v2525_v25, %v2525_v25  ;;  %v2455_v39 = vcombine.high %v2453_v27, %v2453_v27  ;;  %v2534_v40 = vcombine.high %v2518_v32, %v2518_v32 }
 0x2b9   : >> { %v2476_v42 = vrot.slane %v2454_v34, %v9507_v37  ;;  %v2576_v43 = vrot.slane %v2525_v25, %v9520_v62  ;;  %v2580_v45 = vrot.slane %v2533_v36, %v9520_v62  ;;  %v2588_v51 = vrot.slane %v2518_v32, %v9520_v62 }
 0x2ba   : >> { %v2536_v38 = vcombine.high %v2532_v31, %v2532_v31  ;;  %v2584_v41 = vrot.slane %v2535_v33, %v9520_v62  ;;  %v2592_v44 = vrot.slane %v2532_v31, %v9520_v62  ;;  %v2483_v48 = vrot.slane %v2455_v39, %v9507_v37 }
 0x2bb   : >> { %v2596_v54 = vrot.slane %v2534_v40, %v9520_v62  ;;  %v2469_v56 = vrot.slane %v2453_v27, %v9507_v37  ;;  %v2486_v57 = vcombine.high %v2476_v42, %v2476_v42  ;;  %v2799_v63 = vcombine.low %v2572_v49, %v2576_v43 }
 0x2bc   : >> { %v2600_v46 = vrot.slane %v2536_v38, %v9520_v62  ;;  %v2800_v55 = vcombine.low %v2580_v45, %v2584_v41  ;;  %v2816_v0 = vcombine.low %v2588_v51, %v2592_v44  ;;  %v2484_v2 = vcombine.high %v2462_v47, %v2462_v47 }
 0x2bd   : >> { %v2487_v3 = vcombine.high %v2483_v48, %v2483_v48  ;;  %v2485_v6 = vcombine.high %v2469_v56, %v2469_v56  ;;  %v2544_v50 = vrot.slane %v2476_v42, %v9520_v62  ;;  %v9686_v61 = vrot.slane %v2486_v57, %v9520_v62 }
 0x2be   : >> { %v2817_v1 = vcombine.low %v2596_v54, %v2600_v46  ;;  %v2814_v4 = vrot.slane %v2800_v55, %v9540_v21  ;;  %v2807_v7 = vrot.slane %v2799_v63, %v9540_v21  ;;  %v2824_v8 = vrot.slane %v2816_v0, %v9540_v21 }
 0x2bf   : >> { %v2540_v35 = vrot.slane %v2462_v47, %v9520_v62  ;;  %v9694_v11 = vrot.slane %v2484_v2, %v9520_v62  ;;  %v2560_v59 = vrot.slane %v2483_v48, %v9520_v62  ;;  %v9698_v12 = vrot.slane %v2487_v3, %v9520_v62 }
 0x2c0   : >> { %v2831_v10 = vrot.slane %v2817_v1, %v9540_v21  ;;  %v2556_v15 = vrot.slane %v2469_v56, %v9520_v62  ;;  %v9703_v19 = vcombine.low %v2807_v7, %v2814_v4  ;;  %v2564_v20 = vrot.slane %v2485_v6, %v9520_v62 }
 0x2c1   : >> { %v9706_v22 = vcombine.low %v2540_v35, %v2544_v50  ;;  %v2766_v60 = vcombine.low %v9694_v11, %v9686_v61 }
 0x2c2   : >> { %v9712_v30 = vcombine.low %v2824_v8, %v2831_v10  ;;  %v9714_v31 = vcombine.low %v2556_v15, %v2560_v59  ;;  %v2783_v27 = vcombine.low %v2564_v20, %v9698_v12 }
 0x2cb   : >> { %v7482_v52 = vpop.f32.mrf.mxu1 }
 0x2cc   : >> { %v2434_v28 = vadd.f32 %v7482_v52, %v8637_v13 }
 0x2cd   : >> { %v2428_v58 = vpop.f32.mrf.mxu1 }
 0x2ce   : >> { %v2652_v16 = vcombine.high %v2434_v28, %v2434_v28  ;;  %v2659_v29 = vrot.slane %v2434_v28, %v9507_v37  ;;  %v2429_v17 = vadd.f32 %v8637_v13, %v2428_v58 }
 0x2d0   : >> { %v2666_v23 = vrot.slane %v2652_v16, %v9507_v37  ;;  %v2667_v24 = vcombine.high %v2659_v29, %v2659_v29  ;;  %v2675_v25 = vrot.slane %v2659_v29, %v9507_v37  ;;  %v2603_v26 = vcombine.high %v2429_v17, %v2429_v17 }
 0x2d1   : >> { %v2610_v32 = vrot.slane %v2429_v17, %v9507_v37 }
 0x2d2   : >> { %v2668_v33 = vcombine.high %v2666_v23, %v2666_v23  ;;  %v2682_v34 = vrot.slane %v2666_v23, %v9507_v37  ;;  %v2689_v36 = vrot.slane %v2667_v24, %v9507_v37  ;;  %v2697_v38 = vcombine.high %v2675_v25, %v2675_v25 }
 0x2d3   : >> { %v2736_v39 = vrot.slane %v2675_v25, %v9520_v62  ;;  %v2617_v40 = vrot.slane %v2603_v26, %v9507_v37  ;;  %v2618_v41 = vcombine.high %v2610_v32, %v2610_v32  ;;  %v2626_v42 = vrot.slane %v2610_v32, %v9507_v37 }
 0x2d4   : >> { %v2696_v43 = vrot.slane %v2668_v33, %v9507_v37  ;;  %v2698_v44 = vcombine.high %v2682_v34, %v2682_v34  ;;  %v2699_v45 = vcombine.high %v2689_v36, %v2689_v36  ;;  %v2740_v46 = vrot.slane %v2689_v36, %v9520_v62 }
 0x2d5   : >> { %v2744_v47 = vrot.slane %v2697_v38, %v9520_v62  ;;  %v2752_v48 = vrot.slane %v2682_v34, %v9520_v62  ;;  %v2619_v49 = vcombine.high %v2617_v40, %v2617_v40  ;;  %v2633_v51 = vrot.slane %v2617_v40, %v9507_v37 }
 0x2d6   : >> { %v2700_v54 = vcombine.high %v2696_v43, %v2696_v43  ;;  %v2748_v55 = vrot.slane %v2699_v45, %v9520_v62  ;;  %v2756_v56 = vrot.slane %v2696_v43, %v9520_v62  ;;  %v2760_v57 = vrot.slane %v2698_v44, %v9520_v62 }
 0x2d7   : >> { %v2871_v63 = vcombine.low %v2736_v39, %v2740_v46  ;;  %v2640_v0 = vrot.slane %v2618_v41, %v9507_v37  ;;  %v2647_v1 = vrot.slane %v2619_v49, %v9507_v37  ;;  %v2648_v2 = vcombine.high %v2626_v42, %v2626_v42 }
 0x2d8   : >> { %v2764_v3 = vrot.slane %v2700_v54, %v9520_v62  ;;  %v2872_v4 = vcombine.low %v2744_v47, %v2748_v55  ;;  %v2888_v6 = vcombine.low %v2752_v48, %v2756_v56  ;;  %v2649_v50 = vcombine.high %v2633_v51, %v2633_v51 }
 0x2d9   : >> { %v2879_v61 = vrot.slane %v2871_v63, %v9540_v21  ;;  %v2650_v52 = vcombine.high %v2640_v0, %v2640_v0  ;;  %v2651_v7 = vcombine.high %v2647_v1, %v2647_v1  ;;  %v2704_v8 = vrot.slane %v2626_v42, %v9520_v62 }
 0x2da   : >> { %v2886_v35 = vrot.slane %v2872_v4, %v9540_v21  ;;  %v2889_v28 = vcombine.low %v2760_v57, %v2764_v3  ;;  %v2896_v10 = vrot.slane %v2888_v6, %v9540_v21  ;;  %v2708_v11 = vrot.slane %v2640_v0, %v9520_v62 }
 0x2db   : >> { %v2712_v59 = vrot.slane %v2648_v2, %v9520_v62  ;;  %v2716_v12 = vrot.slane %v2650_v52, %v9520_v62  ;;  %v2720_v58 = vrot.slane %v2633_v51, %v9520_v62  ;;  %v2724_v15 = vrot.slane %v2647_v1, %v9520_v62 }
 0x2dc   : >> { %v2887_v16 = vcombine.low %v2879_v61, %v2886_v35  ;;  %v2903_v29 = vrot.slane %v2889_v28, %v9540_v21  ;;  %v2728_v17 = vrot.slane %v2649_v50, %v9520_v62  ;;  %v2732_v20 = vrot.slane %v2651_v7, %v9520_v62 }
 0x2dd   : >> { %v2780_v23 = vrot.slane %v2766_v60, %v9540_v21  ;;  %v2837_v24 = vcombine.low %v2704_v8, %v2708_v11  ;;  %v2838_v25 = vcombine.low %v2712_v59, %v2716_v12  ;;  %v2854_v26 = vcombine.low %v2720_v58, %v2724_v15 }
 0x2de   : >> { %v2797_v32 = vrot.slane %v2783_v27, %v9540_v21  ;;  %v2904_v33 = vcombine.low %v2896_v10, %v2903_v29  ;;  %v2911_v34 = vsel %vm9585_vm12, %v9703_v19, %v2887_v16  ;;  %v2855_v36 = vcombine.low %v2728_v17, %v2732_v20 }
 0x2df   : >> { %v2773_v38 = vrot.slane %v9706_v22, %v9540_v21  ;;  %6729 = vst.msk [vmem:[%s9626_s16 + $0x101] sm:$0xff] %vm2926_vm13, %v2911_v34  ;;  %v2845_v60 = vrot.slane %v2837_v24, %v9540_v21  ;;  %v2852_v39 = vrot.slane %v2838_v25, %v9540_v21  ;;  %v2790_v27 = vrot.slane %v9714_v31, %v9540_v21 }
 0x2e0   : >> { %v2912_v40 = vsel %vm9595_vm14, %v9712_v30, %v2904_v33  ;;  %v2862_v19 = vrot.slane %v2854_v26, %v9540_v21  ;;  %v2869_v41 = vrot.slane %v2855_v36, %v9540_v21 }
 0x2e1   : >> { %v2781_v42 = vcombine.low %v2773_v38, %v2780_v23  ;;  %6731 = vst.msk [vmem:[%s9626_s16 + $0x121] sm:$0xff] %vm2926_vm13, %v2912_v40  ;;  %v2853_v22 = vcombine.low %v2845_v60, %v2852_v39  ;;  %v2798_v43 = vcombine.low %v2790_v27, %v2797_v32 }
 0x2e2   : >> { %v2870_v44 = vcombine.low %v2862_v19, %v2869_v41 }
 0x2e3   : >> { %v2909_v45 = vsel %vm9632_vm15, %v2781_v42, %v2853_v22 }
 0x2e4   : >> { %v2910_v31 = vsel %vm9649_vm0, %v2798_v43, %v2870_v44  ;;  %6725 = vst.msk [vmem:[%s9626_s16 + $0xc1] sm:$0xff] %vm2926_vm13, %v2909_v45 }
 0x2e5   : >> { %6727 = vst.msk [vmem:[%s9626_s16 + $0xe1] sm:$0xff] %vm2926_vm13, %v2910_v31 }
 0x2e7   : >> { %v7517_v30 = vpop.f32.mrf.mxu0 }
 0x2e8   : >> { %v3171_v46 = vadd.f32 %v7517_v30, %v8637_v13 }
 0x2e9   : >> { %v3165_v48 = vpop.f32.mrf.mxu0 }
 0x2ea   : >> { %v3459_v47 = vcombine.high %v3171_v46, %v3171_v46  ;;  %v3466_v49 = vrot.slane %v3171_v46, %v9507_v37  ;;  %v3166_v54 = vadd.f32 %v8637_v13, %v3165_v48 }
 0x2ec   : >> { %v3473_v51 = vrot.slane %v3459_v47, %v9507_v37  ;;  %v3474_v55 = vcombine.high %v3466_v49, %v3466_v49  ;;  %v3410_v57 = vcombine.high %v3166_v54, %v3166_v54  ;;  %v3417_v0 = vrot.slane %v3166_v54, %v9507_v37 }
 0x2ed   : >> { %v3482_v1 = vrot.slane %v3466_v49, %v9507_v37 }
 0x2ee   : >> { %v3475_v56 = vcombine.high %v3473_v51, %v3473_v51  ;;  %v3496_v63 = vrot.slane %v3474_v55, %v9507_v37  ;;  %v3424_v3 = vrot.slane %v3410_v57, %v9507_v37  ;;  %v3489_v4 = vrot.slane %v3473_v51, %v9507_v37 }
 0x2ef   : >> { %v3425_v50 = vcombine.high %v3417_v0, %v3417_v0  ;;  %v3504_v61 = vcombine.high %v3482_v1, %v3482_v1  ;;  %v3433_v58 = vrot.slane %v3417_v0, %v9507_v37  ;;  %v3543_v16 = vrot.slane %v3482_v1, %v9520_v62 }
 0x2f0   : >> { %v3503_v2 = vrot.slane %v3475_v56, %v9507_v37  ;;  %v3506_v6 = vcombine.high %v3496_v63, %v3496_v63  ;;  %v3426_v7 = vcombine.high %v3424_v3, %v3424_v3  ;;  %v3505_v8 = vcombine.high %v3489_v4, %v3489_v4 }
 0x2f1   : >> { %v3447_v28 = vrot.slane %v3425_v50, %v9507_v37  ;;  %v3547_v10 = vrot.slane %v3496_v63, %v9520_v62  ;;  %v3551_v59 = vrot.slane %v3504_v61, %v9520_v62  ;;  %v3559_v29 = vrot.slane %v3489_v4, %v9520_v62 }
 0x2f2   : >> { %v3507_v52 = vcombine.high %v3503_v2, %v3503_v2  ;;  %v3555_v35 = vrot.slane %v3506_v6, %v9520_v62  ;;  %v3563_v11 = vrot.slane %v3503_v2, %v9520_v62  ;;  %v3454_v15 = vrot.slane %v3426_v7, %v9507_v37 }
 0x2f3   : >> { %v3567_v17 = vrot.slane %v3505_v8, %v9520_v62  ;;  %v3440_v23 = vrot.slane %v3424_v3, %v9507_v37  ;;  %v3457_v24 = vcombine.high %v3447_v28, %v3447_v28  ;;  %v3770_v25 = vcombine.low %v3543_v16, %v3547_v10 }
 0x2f4   : >> { %v3571_v12 = vrot.slane %v3507_v52, %v9520_v62  ;;  %v3771_v20 = vcombine.low %v3551_v59, %v3555_v35  ;;  %v3787_v26 = vcombine.low %v3559_v29, %v3563_v11  ;;  %v3455_v33 = vcombine.high %v3433_v58, %v3433_v58 }
 0x2f5   : >> { %v3458_v34 = vcombine.high %v3454_v15, %v3454_v15  ;;  %v3456_v38 = vcombine.high %v3440_v23, %v3440_v23  ;;  %v3515_v60 = vrot.slane %v3447_v28, %v9520_v62  ;;  %v9799_v39 = vrot.slane %v3457_v24, %v9520_v62 }
 0x2f6   : >> { %v3788_v32 = vcombine.low %v3567_v17, %v3571_v12  ;;  %v3785_v36 = vrot.slane %v3771_v20, %v9540_v21  ;;  %v3778_v40 = vrot.slane %v3770_v25, %v9540_v21  ;;  %v3795_v19 = vrot.slane %v3787_v26, %v9540_v21 }
 0x2f7   : >> { %v3511_v41 = vrot.slane %v3433_v58, %v9520_v62  ;;  %v9807_v43 = vrot.slane %v3455_v33, %v9520_v62  ;;  %v3531_v44 = vrot.slane %v3454_v15, %v9520_v62  ;;  %v9811_v45 = vrot.slane %v3458_v34, %v9520_v62 }
 0x2f8   : >> { %v3802_v22 = vrot.slane %v3788_v32, %v9540_v21  ;;  %v3527_v30 = vrot.slane %v3440_v23, %v9520_v62  ;;  %v9816_v49 = vcombine.low %v3778_v40, %v3785_v36  ;;  %v3535_v51 = vrot.slane %v3456_v38, %v9520_v62 }
 0x2f9   : >> { %v9819_v54 = vcombine.low %v3511_v41, %v3515_v60  ;;  %v3737_v55 = vcombine.low %v9807_v43, %v9799_v39 }
 0x2fa   : >> { %v9825_v1 = vcombine.low %v3795_v19, %v3802_v22  ;;  %v9827_v2 = vcombine.low %v3527_v30, %v3531_v44  ;;  %v3754_v3 = vcombine.low %v3535_v51, %v9811_v45 }
 0x303   : >> { %v7552_v27 = vpop.f32.mrf.mxu1 }
 0x304   : >> { %v3405_v42 = vadd.f32 %v7552_v27, %v8637_v13 }
 0x305   : >> { %v3399_v31 = vpop.f32.mrf.mxu1 }
 0x306   : >> { %v3623_v46 = vcombine.high %v3405_v42, %v3405_v42  ;;  %v3630_v47 = vrot.slane %v3405_v42, %v9507_v37  ;;  %v3400_v48 = vadd.f32 %v8637_v13, %v3399_v31 }
 0x308   : >> { %v3637_v56 = vrot.slane %v3623_v46, %v9507_v37  ;;  %v3638_v57 = vcombine.high %v3630_v47, %v3630_v47  ;;  %v3646_v63 = vrot.slane %v3630_v47, %v9507_v37  ;;  %v3574_v0 = vcombine.high %v3400_v48, %v3400_v48 }
 0x309   : >> { %v3581_v4 = vrot.slane %v3400_v48, %v9507_v37 }
 0x30a   : >> { %v3639_v6 = vcombine.high %v3637_v56, %v3637_v56  ;;  %v3653_v50 = vrot.slane %v3637_v56, %v9507_v37  ;;  %v3660_v61 = vrot.slane %v3638_v57, %v9507_v37  ;;  %v3668_v52 = vcombine.high %v3646_v63, %v3646_v63 }
 0x30b   : >> { %v3707_v7 = vrot.slane %v3646_v63, %v9520_v62  ;;  %v3588_v8 = vrot.slane %v3574_v0, %v9507_v37  ;;  %v3589_v35 = vcombine.high %v3581_v4, %v3581_v4  ;;  %v3597_v28 = vrot.slane %v3581_v4, %v9507_v37 }
 0x30c   : >> { %v3667_v10 = vrot.slane %v3639_v6, %v9507_v37  ;;  %v3669_v11 = vcombine.high %v3653_v50, %v3653_v50  ;;  %v3670_v59 = vcombine.high %v3660_v61, %v3660_v61  ;;  %v3711_v12 = vrot.slane %v3660_v61, %v9520_v62 }
 0x30d   : >> { %v3715_v58 = vrot.slane %v3668_v52, %v9520_v62  ;;  %v3723_v15 = vrot.slane %v3653_v50, %v9520_v62  ;;  %v3590_v16 = vcombine.high %v3588_v8, %v3588_v8  ;;  %v3604_v29 = vrot.slane %v3588_v8, %v9507_v37 }
 0x30e   : >> { %v3671_v17 = vcombine.high %v3667_v10, %v3667_v10  ;;  %v3719_v20 = vrot.slane %v3670_v59, %v9520_v62  ;;  %v3727_v23 = vrot.slane %v3667_v10, %v9520_v62  ;;  %v3731_v24 = vrot.slane %v3669_v11, %v9520_v62 }
 0x30f   : >> { %v3842_v25 = vcombine.low %v3707_v7, %v3711_v12  ;;  %v3611_v26 = vrot.slane %v3589_v35, %v9507_v37  ;;  %v3618_v32 = vrot.slane %v3590_v16, %v9507_v37  ;;  %v3619_v33 = vcombine.high %v3597_v28, %v3597_v28 }
 0x310   : >> { %v3735_v34 = vrot.slane %v3671_v17, %v9520_v62  ;;  %v3843_v36 = vcombine.low %v3715_v58, %v3719_v20  ;;  %v3859_v38 = vcombine.low %v3723_v15, %v3727_v23  ;;  %v3620_v60 = vcombine.high %v3604_v29, %v3604_v29 }
 0x311   : >> { %v3850_v39 = vrot.slane %v3842_v25, %v9540_v21  ;;  %v3621_v27 = vcombine.high %v3611_v26, %v3611_v26  ;;  %v3622_v40 = vcombine.high %v3618_v32, %v3618_v32  ;;  %v3675_v19 = vrot.slane %v3597_v28, %v9520_v62 }
 0x312   : >> { %v3857_v41 = vrot.slane %v3843_v36, %v9540_v21  ;;  %v3860_v42 = vcombine.low %v3731_v24, %v3735_v34  ;;  %v3867_v22 = vrot.slane %v3859_v38, %v9540_v21  ;;  %v3679_v43 = vrot.slane %v3611_v26, %v9520_v62 }
 0x313   : >> { %v3683_v44 = vrot.slane %v3619_v33, %v9520_v62  ;;  %v3687_v45 = vrot.slane %v3621_v27, %v9520_v62  ;;  %v3691_v31 = vrot.slane %v3604_v29, %v9520_v62  ;;  %v3695_v30 = vrot.slane %v3618_v32, %v9520_v62 }
 0x314   : >> { %v3858_v46 = vcombine.low %v3850_v39, %v3857_v41  ;;  %v3874_v47 = vrot.slane %v3860_v42, %v9540_v21  ;;  %v3699_v48 = vrot.slane %v3620_v60, %v9520_v62  ;;  %v3703_v51 = vrot.slane %v3622_v40, %v9520_v62 }
 0x315   : >> { %v3751_v56 = vrot.slane %v3737_v55, %v9540_v21  ;;  %v3808_v57 = vcombine.low %v3675_v19, %v3679_v43  ;;  %v3809_v63 = vcombine.low %v3683_v44, %v3687_v45  ;;  %v3825_v0 = vcombine.low %v3691_v31, %v3695_v30 }
 0x316   : >> { %v3768_v4 = vrot.slane %v3754_v3, %v9540_v21  ;;  %v3875_v6 = vcombine.low %v3867_v22, %v3874_v47  ;;  %v3882_v50 = vsel %vm9585_vm12, %v9816_v49, %v3858_v46  ;;  %v3826_v61 = vcombine.low %v3699_v48, %v3703_v51 }
 0x317   : >> { %v3744_v52 = vrot.slane %v9819_v54, %v9540_v21  ;;  %6930 = vst.msk [vmem:[%s9626_s16 + $0x191] sm:$0xff] %vm2926_vm13, %v3882_v50  ;;  %v3816_v55 = vrot.slane %v3808_v57, %v9540_v21  ;;  %v3823_v7 = vrot.slane %v3809_v63, %v9540_v21  ;;  %v3761_v3 = vrot.slane %v9827_v2, %v9540_v21 }
 0x318   : >> { %v3883_v8 = vsel %vm9595_vm14, %v9825_v1, %v3875_v6  ;;  %v3833_v49 = vrot.slane %v3825_v0, %v9540_v21  ;;  %v3840_v35 = vrot.slane %v3826_v61, %v9540_v21 }
 0x319   : >> { %v3752_v28 = vcombine.low %v3744_v52, %v3751_v56  ;;  %6932 = vst.msk [vmem:[%s9626_s16 + $0x1b1] sm:$0xff] %vm2926_vm13, %v3883_v8  ;;  %v3824_v54 = vcombine.low %v3816_v55, %v3823_v7  ;;  %v3769_v10 = vcombine.low %v3761_v3, %v3768_v4 }
 0x31a   : >> { %v3841_v11 = vcombine.low %v3833_v49, %v3840_v35 }
 0x31b   : >> { %v3880_v59 = vsel %vm9632_vm15, %v3752_v28, %v3824_v54 }
 0x31c   : >> { %v3881_v2 = vsel %vm9649_vm0, %v3769_v10, %v3841_v11  ;;  %6926 = vst.msk [vmem:[%s9626_s16 + $0x151] sm:$0xff] %vm2926_vm13, %v3880_v59 }
 0x31d   : >> { %6928 = vst.msk [vmem:[%s9626_s16 + $0x171] sm:$0xff] %vm2926_vm13, %v3881_v2 }
 0x31f   : >> { %v7587_v1 = vpop.f32.mrf.mxu0 }
 0x320   : >> { %v4117_v12 = vadd.f32 %v7587_v1, %v8637_v13 }
 0x321   : >> { %v4111_v15 = vpop.f32.mrf.mxu0 }
 0x322   : >> { %v4405_v58 = vcombine.high %v4117_v12, %v4117_v12  ;;  %v4412_v16 = vrot.slane %v4117_v12, %v9507_v37  ;;  %v4112_v17 = vadd.f32 %v8637_v13, %v4111_v15 }
 0x324   : >> { %v4419_v29 = vrot.slane %v4405_v58, %v9507_v37  ;;  %v4420_v20 = vcombine.high %v4412_v16, %v4412_v16  ;;  %v4356_v24 = vcombine.high %v4112_v17, %v4112_v17  ;;  %v4363_v26 = vrot.slane %v4112_v17, %v9507_v37 }
 0x325   : >> { %v4428_v32 = vrot.slane %v4412_v16, %v9507_v37 }
 0x326   : >> { %v4421_v23 = vcombine.high %v4419_v29, %v4419_v29  ;;  %v4442_v25 = vrot.slane %v4420_v20, %v9507_v37  ;;  %v4370_v34 = vrot.slane %v4356_v24, %v9507_v37  ;;  %v4435_v36 = vrot.slane %v4419_v29, %v9507_v37 }
 0x327   : >> { %v4371_v60 = vcombine.high %v4363_v26, %v4363_v26  ;;  %v4450_v39 = vcombine.high %v4428_v32, %v4428_v32  ;;  %v4379_v31 = vrot.slane %v4363_v26, %v9507_v37  ;;  %v4489_v46 = vrot.slane %v4428_v32, %v9520_v62 }
 0x328   : >> { %v4449_v33 = vrot.slane %v4421_v23, %v9507_v37  ;;  %v4452_v38 = vcombine.high %v4442_v25, %v4442_v25  ;;  %v4372_v40 = vcombine.high %v4370_v34, %v4370_v34  ;;  %v4451_v19 = vcombine.high %v4435_v36, %v4435_v36 }
 0x329   : >> { %v4393_v42 = vrot.slane %v4371_v60, %v9507_v37  ;;  %v4493_v22 = vrot.slane %v4442_v25, %v9520_v62  ;;  %v4497_v44 = vrot.slane %v4450_v39, %v9520_v62  ;;  %v4505_v47 = vrot.slane %v4435_v36, %v9520_v62 }
 0x32a   : >> { %v4453_v27 = vcombine.high %v4449_v33, %v4449_v33  ;;  %v4501_v41 = vrot.slane %v4452_v38, %v9520_v62  ;;  %v4509_v43 = vrot.slane %v4449_v33, %v9520_v62  ;;  %v4400_v30 = vrot.slane %v4372_v40, %v9507_v37 }
 0x32b   : >> { %v4513_v48 = vrot.slane %v4451_v19, %v9520_v62  ;;  %v4386_v56 = vrot.slane %v4370_v34, %v9507_v37  ;;  %v4403_v57 = vcombine.high %v4393_v42, %v4393_v42  ;;  %v4716_v63 = vcombine.low %v4489_v46, %v4493_v22 }
 0x32c   : >> { %v4517_v45 = vrot.slane %v4453_v27, %v9520_v62  ;;  %v4717_v51 = vcombine.low %v4497_v44, %v4501_v41  ;;  %v4733_v0 = vcombine.low %v4505_v47, %v4509_v43  ;;  %v4401_v6 = vcombine.high %v4379_v31, %v4379_v31 }
 0x32d   : >> { %v4404_v50 = vcombine.high %v4400_v30, %v4400_v30  ;;  %v4402_v52 = vcombine.high %v4386_v56, %v4386_v56  ;;  %v4461_v55 = vrot.slane %v4393_v42, %v9520_v62  ;;  %v9912_v7 = vrot.slane %v4403_v57, %v9520_v62 }
 0x32e   : >> { %v4734_v4 = vcombine.low %v4513_v48, %v4517_v45  ;;  %v4731_v61 = vrot.slane %v4717_v51, %v9540_v21  ;;  %v4724_v8 = vrot.slane %v4716_v63, %v9540_v21  ;;  %v4741_v49 = vrot.slane %v4733_v0, %v9540_v21 }
 0x32f   : >> { %v4457_v35 = vrot.slane %v4379_v31, %v9520_v62  ;;  %v9920_v10 = vrot.slane %v4401_v6, %v9520_v62  ;;  %v4477_v11 = vrot.slane %v4400_v30, %v9520_v62  ;;  %v9924_v59 = vrot.slane %v4404_v50, %v9520_v62 }
 0x330   : >> { %v4748_v54 = vrot.slane %v4734_v4, %v9540_v21  ;;  %v4473_v1 = vrot.slane %v4386_v56, %v9520_v62  ;;  %v9929_v16 = vcombine.low %v4724_v8, %v4731_v61  ;;  %v4481_v29 = vrot.slane %v4402_v52, %v9520_v62 }
 0x331   : >> { %v9932_v17 = vcombine.low %v4457_v35, %v4461_v55  ;;  %v4683_v20 = vcombine.low %v9920_v10, %v9912_v7 }
 0x332   : >> { %v9938_v32 = vcombine.low %v4741_v49, %v4748_v54  ;;  %v9940_v33 = vcombine.low %v4473_v1, %v4477_v11  ;;  %v4700_v34 = vcombine.low %v4481_v29, %v9924_v59 }
 0x333   : >> { %v4697_v29 = vrot.slane %v4683_v20, %v9540_v21 }
 0x33b   : >> { %v7622_v3 = vpop.f32.mrf.mxu1 }
 0x33c   : >> { %v4351_v28 = vadd.f32 %v7622_v3, %v8637_v13 }
 0x33d   : >> { %v4345_v2 = vpop.f32.mrf.mxu1 }
 0x33e   : >> { %v4569_v12 = vcombine.high %v4351_v28, %v4351_v28  ;;  %v4576_v58 = vrot.slane %v4351_v28, %v9507_v37  ;;  %v4346_v15 = vadd.f32 %v8637_v13, %v4345_v2 }
 0x340   : >> { %v4583_v23 = vrot.slane %v4569_v12, %v9507_v37  ;;  %v4584_v24 = vcombine.high %v4576_v58, %v4576_v58  ;;  %v4592_v25 = vrot.slane %v4576_v58, %v9507_v37  ;;  %v4520_v26 = vcombine.high %v4346_v15, %v4346_v15 }
 0x341   : >> { %v4527_v36 = vrot.slane %v4346_v15, %v9507_v37 }
 0x342   : >> { %v4585_v38 = vcombine.high %v4583_v23, %v4583_v23  ;;  %v4599_v60 = vrot.slane %v4583_v23, %v9507_v37  ;;  %v4606_v39 = vrot.slane %v4584_v24, %v9507_v37  ;;  %v4614_v27 = vcombine.high %v4592_v25, %v4592_v25 }
 0x343   : >> { %v4653_v40 = vrot.slane %v4592_v25, %v9520_v62  ;;  %v4534_v19 = vrot.slane %v4520_v26, %v9507_v37  ;;  %v4535_v41 = vcombine.high %v4527_v36, %v4527_v36  ;;  %v4543_v42 = vrot.slane %v4527_v36, %v9507_v37 }
 0x344   : >> { %v4613_v22 = vrot.slane %v4585_v38, %v9507_v37  ;;  %v4615_v43 = vcombine.high %v4599_v60, %v4599_v60  ;;  %v4616_v44 = vcombine.high %v4606_v39, %v4606_v39  ;;  %v4657_v45 = vrot.slane %v4606_v39, %v9520_v62 }
 0x345   : >> { %v4661_v31 = vrot.slane %v4614_v27, %v9520_v62  ;;  %v4669_v30 = vrot.slane %v4599_v60, %v9520_v62  ;;  %v4536_v46 = vcombine.high %v4534_v19, %v4534_v19  ;;  %v4550_v47 = vrot.slane %v4534_v19, %v9507_v37 }
 0x346   : >> { %v4617_v48 = vcombine.high %v4613_v22, %v4613_v22  ;;  %v4665_v51 = vrot.slane %v4616_v44, %v9520_v62  ;;  %v4673_v56 = vrot.slane %v4613_v22, %v9520_v62  ;;  %v4677_v57 = vrot.slane %v4615_v43, %v9520_v62 }
 0x347   : >> { %v4788_v63 = vcombine.low %v4653_v40, %v4657_v45  ;;  %v4557_v0 = vrot.slane %v4535_v41, %v9507_v37  ;;  %v4564_v4 = vrot.slane %v4536_v46, %v9507_v37  ;;  %v4565_v6 = vcombine.high %v4543_v42, %v4543_v42 }
 0x348   : >> { %v4681_v50 = vrot.slane %v4617_v48, %v9520_v62  ;;  %v4789_v61 = vcombine.low %v4661_v31, %v4665_v51  ;;  %v4805_v52 = vcombine.low %v4669_v30, %v4673_v56  ;;  %v4566_v55 = vcombine.high %v4550_v47, %v4550_v47 }
 0x349   : >> { %v4796_v7 = vrot.slane %v4788_v63, %v9540_v21  ;;  %v4567_v3 = vcombine.high %v4557_v0, %v4557_v0  ;;  %v4568_v8 = vcombine.high %v4564_v4, %v4564_v4  ;;  %v4621_v49 = vrot.slane %v4543_v42, %v9520_v62 }
 0x34a   : >> { %v4803_v35 = vrot.slane %v4789_v61, %v9540_v21  ;;  %v4806_v28 = vcombine.low %v4677_v57, %v4681_v50  ;;  %v4813_v54 = vrot.slane %v4805_v52, %v9540_v21  ;;  %v4625_v10 = vrot.slane %v4557_v0, %v9520_v62 }
 0x34b   : >> { %v4629_v37 = vrot.slane %v4565_v6, %v9520_v62  ;;  %v4633_v11 = vrot.slane %v4567_v3, %v9520_v62  ;;  %v4637_v59 = vrot.slane %v4550_v47, %v9520_v62  ;;  %v4641_v2 = vrot.slane %v4564_v4, %v9520_v62 }
 0x34c   : >> { %v4804_v1 = vcombine.low %v4796_v7, %v4803_v35  ;;  %v4820_v12 = vrot.slane %v4806_v28, %v9540_v21  ;;  %v4645_v58 = vrot.slane %v4566_v55, %v9520_v62  ;;  %v4649_v15 = vrot.slane %v4568_v8, %v9520_v62 }
 0x34d   : >> { %v4754_v23 = vcombine.low %v4621_v49, %v4625_v10  ;;  %v4755_v24 = vcombine.low %v4629_v37, %v4633_v11  ;;  %v4771_v25 = vcombine.low %v4637_v59, %v4641_v2  ;;  %v4714_v26 = vrot.slane %v4700_v34, %v9540_v21 }
 0x34e   : >> { %v4821_v36 = vcombine.low %v4813_v54, %v4820_v12  ;;  %v4828_v38 = vsel %vm9585_vm12, %v9929_v16, %v4804_v1  ;;  %v4772_v60 = vcombine.low %v4645_v58, %v4649_v15  ;;  %v4690_v39 = vrot.slane %v9932_v17, %v9540_v21 }
 0x34f   : >> { %6931 = vst.msk [vmem:[%s9626_s16 + $0x1a1] sm:$0xff] %vm2926_vm13, %v4828_v38  ;;  %v4762_v62 = vrot.slane %v4754_v23, %v9540_v21  ;;  %v4769_v20 = vrot.slane %v4755_v24, %v9540_v21  ;;  %v4707_v34 = vrot.slane %v9940_v33, %v9540_v21  ;;  %v4779_v16 = vrot.slane %v4771_v25, %v9540_v21 }
 0x350   : >> { %v4829_v5 = vsel %vm9595_vm14, %v9938_v32, %v4821_v36  ;;  %v4786_v27 = vrot.slane %v4772_v60, %v9540_v21  ;;  %v4698_v40 = vcombine.low %v4690_v39, %v4697_v29 }
 0x351   : >> { %6933 = vst.msk [vmem:[%s9626_s16 + $0x1c1] sm:$0xff] %vm2926_vm13, %v4829_v5  ;;  %v4770_v17 = vcombine.low %v4762_v62, %v4769_v20  ;;  %v4715_v19 = vcombine.low %v4707_v34, %v4714_v26  ;;  %947 = sbr.rel (!%p945_p11) target bundleno = 286 (0x11e), region = 126 }
 0x352   : >> { %v4787_v41 = vcombine.low %v4779_v16, %v4786_v27 }
 0x353   : >> { %v4826_v42 = vsel %vm9632_vm15, %v4698_v40, %v4770_v17 }
 0x354   : >> { %v4827_v33 = vsel %vm9649_vm0, %v4715_v19, %v4787_v41  ;;  %6927 = vst.msk [vmem:[%s9626_s16 + $0x161] sm:$0xff] %vm2926_vm13, %v4826_v42 }
 0x355   : >> { %6929 = vst.msk [vmem:[%s9626_s16 + $0x181] sm:$0xff] %vm2926_vm13, %v4827_v33 }
 0x356 LB: >> { %s4856_s15 = smul.u32 160, %s7902_s9  ;;  %s7915_s11 = smov 16   ;;  %v6114_v49 = vld [vmem:[%s11011_s4 + $0xf8] sm:$0xff]  ;;  %v6113_v28 = vld [vmem:[%s11011_s4 + $0xf0] sm:$0xff]  ;;  %v6112_v10 = vld [vmem:[%s11011_s4 + $0xe8] sm:$0xff]  ;;  %vm6137_vm2 = vcmask 392192   ;;  %s7902_s9 = sphi %s10003_s9, %s4855_s9  }
 0x357   : >> { %s11026_s17 = smov 32   ;;  %s7917_s10 = smov 48   ;;  %7287 = vmatprep.subr.mxu0 %v6114_v49  ;;  %v6098_v35 = vld [vmem:[%s11011_s4 + $0x78] sm:$0xff]  ;;  %v6097_v54 = vld [vmem:[%s11011_s4 + $0x70] sm:$0xff]  ;;  %v6096_v37 = vld [vmem:[%s11011_s4 + $0x68] sm:$0xff] }
 0x358   : >> { %s10009_s18 = scalar_lea.vmem [#allocation3], %s4856_s15  ;;  %s7918_s12 = smov 64   ;;  %7288 = vmatpush3.msra.mxu0 %v6098_v35  ;;  %v6111_v11 = vld [vmem:[%s11011_s4 + $0xe0] sm:$0xff]  ;;  %v6110_v1 = vld [vmem:[%s11011_s4 + $0xd8] sm:$0xff]  ;;  %v6109_v29 = vld [vmem:[%s11011_s4 + $0xd0] sm:$0xff] }
 0x359   : >> { %7289 = vmatprep.subr.mxu0 %v6113_v28  ;;  %v6095_v2 = vld [vmem:[%s11011_s4 + $0x60] sm:$0xff]  ;;  %v6094_v12 = vld [vmem:[%s11011_s4 + $0x58] sm:$0xff]  ;;  %v6093_v23 = vld [vmem:[%s11011_s4 + $0x50] sm:$0xff]  ;;  %s11022_s14 = smov 80   ;;  %s11024_s28 = smov 96  }
 0x35a   : >> { %7290 = vmatpush3.msra.mxu0 %v6097_v54  ;;  %v6108_v24 = vld [vmem:[%s11011_s4 + $0xc8] sm:$0xff]  ;;  %v6107_v38 = vld [vmem:[%s11011_s4 + $0xc0] sm:$0xff]  ;;  %v6106_v20 = vld [vmem:[%s11011_s4 + $0xb8] sm:$0xff]  ;;  %s11041_s19 = smov 80   ;;  %s11042_s26 = smov 96  }
 0x35b   : >> { %7291 = vmatprep.subr.mxu0 %v6112_v10  ;;  %v6092_v36 = vld [vmem:[%s11011_s4 + $0x48] sm:$0xff]  ;;  %v6091_v39 = vld [vmem:[%s11011_s4 + $0x40] sm:$0xff]  ;;  %v6090_v34 = vld [vmem:[%s11011_s4 + $0x38] sm:$0xff] }
 0x35c   : >> { %v10012_v13 = vld [vmem:[%s10009_s18 + $0x21] sm:$0xff]  ;;  %v10019_v18 = vld [vmem:[%s10009_s18 + $0x31] sm:$0xff]  ;;  %7292 = vmatpush3.msra.mxu0 %v6096_v37 }
 0x35d   : >> { %v4874_v21 = vld [vmem:[%s10009_s18 + $0x1] sm:$0xff]  ;;  %4894 = vrot.lane.b32.xlu1 %v10012_v13, %s7915_s11  ;;  %v10022_v53 = vld [vmem:[%s10009_s18 + $0x11] sm:$0xff]  ;;  %7293 = vmatprep.subr.mxu0 %v6111_v11 }
 0x35e   : >> { %4890 = vrot.lane.b32.xlu0 %v4874_v21, %s7915_s11  ;;  %v10025_v9 = vld [vmem:[%s10009_s18 + $0x32] sm:$0xff]  ;;  %v10028_v32 = vld [vmem:[%s10009_s18 + $0x22] sm:$0xff]  ;;  %7294 = vmatpush3.msra.mxu0 %v6095_v2 }
 0x35f   : >> { %v10031_v22 = vld [vmem:[%s10009_s18 + $0x52] sm:$0xff]  ;;  %v10034_v43 = vld [vmem:[%s10009_s18 + $0x42] sm:$0xff]  ;;  %5230 = vst.msk [vmem:[#allocation5 + $0x28] sm:$0xff] %vm341_vm1, %v10025_v9  ;;  %5229 = vst.msk [vmem:[#allocation5 + $0x8] sm:$0xff] %vm341_vm1, %v10028_v32  ;;  %7295 = vmatprep.subr.mxu0 %v6110_v1 }
 0x360   : >> { %v10043_v44 = vld [vmem:[%s10009_s18 + $0x51] sm:$0xff]  ;;  %v10046_v45 = vld [vmem:[%s10009_s18 + $0x41] sm:$0xff]  ;;  %5231 = vst.msk [vmem:[#allocation5 + $0x48] sm:$0xff] %vm341_vm1, %v10034_v43  ;;  %5232 = vst.msk [vmem:[#allocation5 + $0x68] sm:$0xff] %vm341_vm1, %v10031_v22  ;;  %7296 = vmatpush3.msra.mxu0 %v6094_v12 }
 0x361   : >> { %4896 = vrot.lane.b32.xlu1 %v10019_v18, %s7915_s11  ;;  %v10055_v31 = vld [vmem:[%s10009_s18 + $0x20] sm:$0xff]  ;;  %v6934_v30 = vld [vmem:[%s10009_s18 + $0x10] sm:$0xff]  ;;  %7297 = vmatprep.subr.mxu0 %v6109_v29  ;;  %v6104_v27 = vld [vmem:[%s11011_s4 + $0xa8] sm:$0xff] }
 0x362   : >> { %4892 = vrot.lane.b32.xlu0 %v10022_v53, %s7915_s11  ;;  %v10059_v46 = vld [vmem:[%s10009_s18 + $0x40] sm:$0xff]  ;;  %v10062_v47 = vld [vmem:[%s10009_s18 + $0x30] sm:$0xff]  ;;  %4868 = vst.msk [vmem:[#allocation5 + $0x40] sm:$0xff] %vm341_vm1, %v10055_v31  ;;  %4867 = vst.msk [vmem:[#allocation5 + $0x20] sm:$0xff] %vm341_vm1, %v6934_v30  ;;  %7298 = vmatpush3.msra.mxu0 %v6093_v23 }
 0x363   : >> { %v10065_v48 = vld [vmem:[%s10009_s18 + $0x60] sm:$0xff]  ;;  %v10068_v51 = vld [vmem:[%s10009_s18 + $0x50] sm:$0xff]  ;;  %4870 = vst.msk [vmem:[#allocation5 + $0x80] sm:$0xff] %vm341_vm1, %v10059_v46  ;;  %4869 = vst.msk [vmem:[#allocation5 + $0x60] sm:$0xff] %vm341_vm1, %v10062_v47  ;;  %7299 = vmatprep.subr.mxu0 %v6108_v24 }
 0x364   : >> { %v6940_v56 = vld [vmem:[%s10009_s18 + $0x70] sm:$0xff]  ;;  %4871 = vst.msk [vmem:[#allocation5 + $0xa0] sm:$0xff] %vm341_vm1, %v10068_v51  ;;  %4872 = vst.msk [vmem:[#allocation5 + $0xc0] sm:$0xff] %vm341_vm1, %v10065_v48  ;;  %v10089_v63 = vld [vmem:[%s10009_s18 + $0x61] sm:$0xff]  ;;  %7300 = vmatpush3.msra.mxu0 %v6092_v36 }
 0x365   : >> { %4900 = vrot.lane.b32.xlu1 %v10043_v44, %s7915_s11  ;;  %4873 = vst.msk [vmem:[#allocation5 + $0xe0] sm:$0xff] %vm341_vm1, %v6940_v56  ;;  %v4881_v57 = vld [vmem:[%s10009_s18 + $0x71] sm:$0xff]  ;;  %v10092_v0 = vld [vmem:[%s10009_s18 + $0xc1] sm:$0xff]  ;;  %7301 = vmatprep.subr.mxu0 %v6107_v38 }
 0x366   : >> { %4898 = vrot.lane.b32.xlu0 %v10046_v45, %s7915_s11  ;;  %5588 = vst.msk [vmem:[#allocation5 + $0x10] sm:$0xff] %vm341_vm1, %v10092_v0  ;;  %v10100_v4 = vld [vmem:[%s10009_s18 + $0x12] sm:$0xff]  ;;  %v4923_v6 = vld [vmem:[%s10009_s18 + $0x2] sm:$0xff]  ;;  %7302 = vmatpush3.msra.mxu0 %v6091_v39 }
 0x367   : >> { %v4858_v50 = vld [vmem:[%s10009_s18] sm:$0xff]  ;;  %v10106_v61 = vld [vmem:[%s10009_s18 + $0xd1] sm:$0xff]  ;;  %7303 = vmatprep.subr.mxu0 %v6106_v20  ;;  %v6088_v17 = vld [vmem:[%s11011_s4 + $0x28] sm:$0xff] }
 0x368   : >> { %4866 = vst.msk [vmem:[#allocation5] sm:$0xff] %vm341_vm1, %v4858_v50  ;;  %5589 = vst.msk [vmem:[#allocation5 + $0x30] sm:$0xff] %vm341_vm1, %v10106_v61  ;;  %v4930_v52 = vld [vmem:[%s10009_s18 + $0x72] sm:$0xff]  ;;  %v10123_v55 = vld [vmem:[%s10009_s18 + $0x62] sm:$0xff]  ;;  %7304 = vmatpush3.msra.mxu0 %v6090_v34 }
 0x369   : >> { %4904 = vrot.lane.b32.xlu1 %v4881_v57, %s7915_s11  ;;  %v10129_v7 = vld [vmem:[%s10009_s18 + $0x160] sm:$0xff]  ;;  %v7006_v25 = vld [vmem:[%s10009_s18 + $0xb0] sm:$0xff]  ;;  %v6102_v33 = vld [vmem:[%s11011_s4 + $0x98] sm:$0xff] }
 0x36a   : >> { %4902 = vrot.lane.b32.xlu0 %v10089_v63, %s7915_s11  ;;  %5947 = vst.msk [vmem:[#allocation5 + $0x18] sm:$0xff] %vm341_vm1, %v10129_v7  ;;  %v10137_v3 = vld [vmem:[%s10009_s18 + $0xe1] sm:$0xff]  ;;  %v10219_v60 = vld [vmem:[%s10009_s18 + $0x170] sm:$0xff]  ;;  %v6118_v34 = vld [vmem:[%s11011_s4 + $0x118] sm:$0xff] }
 0x36b   : >> { %5590 = vst.msk [vmem:[#allocation5 + $0x50] sm:$0xff] %vm341_vm1, %v10137_v3  ;;  %v6941_v8 = vld [vmem:[%s10009_s18 + $0x80] sm:$0xff]  ;;  %5948 = vst.msk [vmem:[#allocation5 + $0x38] sm:$0xff] %vm341_vm1, %v10219_v60  ;;  %v7014_v62 = vld [vmem:[%s10009_s18 + $0xb1] sm:$0xff] }
 0x36c   : >> { %v6949_v59 = vld [vmem:[%s10009_s18 + $0x81] sm:$0xff]  ;;  %v6105_v5 = vld [vmem:[%s11011_s4 + $0xb0] sm:$0xff] }
 0x36d   : >> { %4941 = vrot.lane.b32.xlu1 %v10100_v4, %s11026_s17  ;;  %v6990_v58 = vld [vmem:[%s10009_s18 + $0xa1] sm:$0xff]  ;;  %v6089_v16 = vld [vmem:[%s11011_s4 + $0x30] sm:$0xff]  ;;  %7305 = vmatprep.subr.mxu0 %v6105_v5 }
 0x36e   : >> { %4939 = vrot.lane.b32.xlu0 %v4923_v6, %s11026_s17  ;;  %v6982_v15 = vld [vmem:[%s10009_s18 + $0xa0] sm:$0xff]  ;;  %v10247_v40 = vld [vmem:[%s10009_s18 + $0xf1] sm:$0xff]  ;;  %7306 = vmatpush3.msra.mxu0 %v6089_v16  ;;  %v6128_v35 = vld [vmem:[%s11011_s4 + $0x168] sm:$0xff] }
 0x36f   : >> { %v6998_v26 = vld [vmem:[%s10009_s18 + $0xa2] sm:$0xff]  ;;  %5591 = vst.msk [vmem:[#allocation5 + $0x70] sm:$0xff] %vm341_vm1, %v10247_v40  ;;  %v7022_v19 = vld [vmem:[%s10009_s18 + $0xb2] sm:$0xff]  ;;  %7307 = vmatprep.subr.mxu0 %v6104_v27 }
 0x370   : >> { %v6103_v41 = vld [vmem:[%s11011_s4 + $0xa0] sm:$0xff]  ;;  %7308 = vmatpush3.msra.mxu0 %v6088_v17  ;;  %v6129_v49 = vld [vmem:[%s11011_s4 + $0x170] sm:$0xff] }
 0x371   : >> { %4945 = vrot.lane.b32.xlu1 %v10025_v9, %s11026_s17  ;;  %v6087_v42 = vld [vmem:[%s11011_s4 + $0x20] sm:$0xff]  ;;  %7309 = vmatprep.subr.mxu0 %v6103_v41  ;;  %v7031_v11 = vld [vmem:[%s10009_s18 + $0xd0] sm:$0xff]  ;;  %v6116_v41 = vld [vmem:[%s11011_s4 + $0x108] sm:$0xff] }
 0x372   : >> { %4943 = vrot.lane.b32.xlu0 %v10028_v32, %s11026_s17  ;;  %v7030_v21 = vld [vmem:[%s10009_s18 + $0xc0] sm:$0xff]  ;;  %7310 = vmatpush3.msra.mxu0 %v6087_v42  ;;  %v10370_v29 = vld [vmem:[%s10009_s18 + $0xd2] sm:$0xff] }
 0x373   : >> { %7311 = vmatprep.subr.mxu0 %v6102_v33  ;;  %v7046_v6 = vld [vmem:[%s10009_s18 + $0xc2] sm:$0xff]  ;;  %v6117_v5 = vld [vmem:[%s11011_s4 + $0x110] sm:$0xff] }
 0x374   : >> { %v6083_v50 = vld [vmem:[%s11011_s4] sm:$0xff]  ;;  %v7086_v27 = vld [vmem:[%s10009_s18 + $0x151] sm:$0xff] }
 0x375   : >> { %4949 = vrot.lane.b32.xlu1 %v10031_v22, %s11026_s17  ;;  %v7062_v28 = vld [vmem:[%s10009_s18 + $0x141] sm:$0xff] }
 0x376   : >> { %4947 = vrot.lane.b32.xlu0 %v10034_v43, %s11026_s17  ;;  %v6127_v54 = vld [vmem:[%s11011_s4 + $0x160] sm:$0xff] }
 0x377   : >> { %v10335_v10 = vld [vmem:[%s10009_s18 + $0x180] sm:$0xff] }
 0x378   : >> { %5949 = vst.msk [vmem:[#allocation5 + $0x58] sm:$0xff] %vm341_vm1, %v10335_v10  ;;  %v7070_v37 = vld [vmem:[%s10009_s18 + $0x142] sm:$0xff] }
 0x379   : >> { %4953 = vrot.lane.b32.xlu1 %v4930_v52, %s11026_s17  ;;  %v7054_v52 = vld [vmem:[%s10009_s18 + $0x140] sm:$0xff] }
 0x37a   : >> { %4951 = vrot.lane.b32.xlu0 %v10123_v55, %s11026_s17  ;;  %v10350_v2 = vld [vmem:[%s10009_s18 + $0x101] sm:$0xff] }
 0x37b   : >> { %5592 = vst.msk [vmem:[#allocation5 + $0x90] sm:$0xff] %vm341_vm1, %v10350_v2  ;;  %v6119_v39 = vld [vmem:[%s11011_s4 + $0x120] sm:$0xff] }
 0x37c   : >> { %v10411_v16 = vld [vmem:[%s10009_s18 + $0x162] sm:$0xff] }
 0x37d   : >> { %4992 = vrot.lane.b32.xlu1 %v10055_v31, %s7917_s10 }
 0x37e   : >> { %4990 = vrot.lane.b32.xlu0 %v6934_v30, %s7917_s10  ;;  %v6101_v30 = vld [vmem:[%s11011_s4 + $0x90] sm:$0xff] }
 0x381   : >> { %4996 = vrot.lane.b32.xlu1 %v10059_v46, %s7917_s10 }
 0x382   : >> { %4994 = vrot.lane.b32.xlu0 %v10062_v47, %s7917_s10 }
 0x385   : >> { %5000 = vrot.lane.b32.xlu1 %v10065_v48, %s7917_s10 }
 0x386   : >> { %4998 = vrot.lane.b32.xlu0 %v10068_v51, %s7917_s10 }
 0x389   : >> { %5004 = vrot.lane.b32.xlu1 %v6941_v8, %s7917_s10  ;;  %v6130_v8 = vld [vmem:[%s11011_s4 + $0x178] sm:$0xff] }
 0x38a   : >> { %5002 = vrot.lane.b32.xlu0 %v6940_v56, %s7917_s10  ;;  %v6100_v56 = vld [vmem:[%s11011_s4 + $0x88] sm:$0xff] }
 0x38d   : >> { %5041 = vrot.lane.b32.xlu1 %v10012_v13, %s7918_s12 }
 0x38e   : >> { %5039 = vrot.lane.b32.xlu0 %v10022_v53, %s7918_s12  ;;  %v6086_v53 = vld [vmem:[%s11011_s4 + $0x18] sm:$0xff] }
 0x38f   : >> { %7312 = vmatpush3.msra.mxu0 %v6086_v53  ;;  %v6136_v53 = vld [vmem:[%s11011_s4 + $0x1a8] sm:$0xff] }
 0x390   : >> { %7313 = vmatprep.subr.mxu0 %v6101_v30 }
 0x391   : >> { %5045 = vrot.lane.b32.xlu1 %v10046_v45, %s7918_s12 }
 0x392   : >> { %5043 = vrot.lane.b32.xlu0 %v10019_v18, %s7918_s12 }
 0x395   : >> { %5049 = vrot.lane.b32.xlu1 %v10089_v63, %s7918_s12 }
 0x396   : >> { %5047 = vrot.lane.b32.xlu0 %v10043_v44, %s7918_s12 }
 0x399   : >> { %5053 = vrot.lane.b32.xlu1 %v6949_v59, %s7918_s12  ;;  %v6124_v59 = vld [vmem:[%s11011_s4 + $0x148] sm:$0xff] }
 0x39a   : >> { %5051 = vrot.lane.b32.xlu0 %v4881_v57, %s7918_s12  ;;  %v6084_v57 = vld [vmem:[%s11011_s4 + $0x8] sm:$0xff] }
 0x39d   : >> { %5304 = vrot.lane.b32.xlu1 %v6990_v58, %s11026_s17  ;;  %v6122_v58 = vld [vmem:[%s11011_s4 + $0x138] sm:$0xff] }
 0x39e   : >> { %5256 = vrot.lane.b32.xlu0 %v6982_v15, %s7915_s11  ;;  %v7078_v15 = vld [vmem:[%s10009_s18 + $0x150] sm:$0xff] }
 0x3a1   : >> { %5402 = vrot.lane.b32.xlu1 %v7006_v25, %s7918_s12 }
 0x3a2   : >> { %5352 = vrot.lane.b32.xlu0 %v6998_v26, %s7917_s10  ;;  %v10386_v26 = vld [vmem:[%s10009_s18 + $0x161] sm:$0xff] }
 0x3a5   : >> { %5450 = vrot.lane.b32.xlu1 %v7014_v62, %s11022_s14 }
 0x3a6   : >> { %5258 = vrot.lane.b32.xlu0 %v7006_v25, %s7915_s11  ;;  %v6121_v25 = vld [vmem:[%s11011_s4 + $0x130] sm:$0xff] }
 0x3a9   : >> { %5306 = vrot.lane.b32.xlu1 %v7014_v62, %s11026_s17 }
 0x3aa   : >> { %5088 = vrot.lane.b32.xlu0 %v10100_v4, %s11022_s14  ;;  %s7921_s14 = smov 112   ;;  %v6099_v4 = vld [vmem:[%s11011_s4 + $0x80] sm:$0xff] }
 0x3ad   : >> { %5139 = vrot.lane.b32.xlu1 %v10055_v31, %s11024_s28  ;;  %v6085_v31 = vld [vmem:[%s11011_s4 + $0x10] sm:$0xff] }
 0x3ae   : >> { %5498 = vrot.lane.b32.xlu0 %v7022_v19, %s11024_s28  ;;  %7314 = vmatpush3.msra.mxu0 %v6085_v31 }
 0x3af   : >> { %7315 = vmatprep.subr.mxu0 %v6100_v56 }
 0x3b0   : >> { %7316 = vmatpush3.msra.mxu0 %v6084_v57 }
 0x3b1   : >> { %5548 = vrot.lane.b32.xlu1 %v7030_v21, %s7921_s14  ;;  %7317 = vmatprep.subr.mxu0 %v6099_v4  ;;  %v6134_v4 = vld [vmem:[%s11011_s4 + $0x198] sm:$0xff] }
 0x3b2   : >> { %5354 = vrot.lane.b32.xlu0 %v7022_v19, %s7917_s10  ;;  %7318 = vmatpush3.msra.mxu0 %v6083_v50  ;;  %v6133_v50 = vld [vmem:[%s11011_s4 + $0x190] sm:$0xff] }
 0x3b5   : >> { %5404 = vrot.lane.b32.xlu1 %v7030_v21, %s7918_s12 }
 0x3b6   : >> { %5188 = vrot.lane.b32.xlu0 %v10012_v13, %s7921_s14  ;;  %v7922_v13 = vmov 0.0  }
 0x3b7   : >> { %6267 = vmatprep.subr.mxu1 %v7922_v13 }
 0x3b8   : >> { %6268 = vmatpush1.msra.mxu1 %v6130_v8 }
 0x3b9   : >> { %5260 = vrot.lane.b32.xlu1 %v7030_v21, %s7915_s11  ;;  %6269 = vmatprep.subr.mxu1 %v7922_v13  ;;  %v6115_v21 = vld [vmem:[%s11011_s4 + $0x100] sm:$0xff] }
 0x3ba   : >> { %5612 = vrot.lane.b32.xlu0 %v7046_v6, %s7915_s11  ;;  %6270 = vmatpush1.msra.mxu1 %v6129_v49 }
 0x3bb   : >> { %6271 = vmatprep.subr.mxu1 %v7922_v13 }
 0x3bc   : >> { %6272 = vmatpush1.msra.mxu1 %v6128_v35  ;;  %v6978_v35 = vld [vmem:[%s10009_s18 + $0x62] sm:$0xff] }
 0x3bd   : >> { %5663 = vrot.lane.b32.xlu1 %v7054_v52, %s11026_s17  ;;  %6273 = vmatprep.subr.mxu1 %v7922_v13  ;;  %v7032_v52 = vld [vmem:[%s10009_s18 + $0xe0] sm:$0xff]  ;;  %5233 = vst.msk [vmem:[#allocation5 + $0x88] sm:$0xff] %vm341_vm1, %v6978_v35 }
 0x3be   : >> { %5452 = vrot.lane.b32.xlu0 %v10092_v0, %s11041_s19  ;;  %6274 = vmatpush1.msra.mxu1 %v6127_v54 }
 0x3bf   : >> { %6275 = vmatprep.subr.mxu1 %v7922_v13 }
 0x3c1   : >> { %5308 = vrot.lane.b32.xlu1 %v10092_v0, %s11026_s17  ;;  %v6125_v0 = vld [vmem:[%s11011_s4 + $0x150] sm:$0xff]  ;;  %s11043_s17 = smov 32  }
 0x3c2   : >> { %5090 = vrot.lane.b32.xlu0 %v10028_v32, %s11041_s19  ;;  %v6126_v32 = vld [vmem:[%s11011_s4 + $0x158] sm:$0xff] }
 0x3c3   : >> { %6276 = vmatpush1.msra.mxu1 %v6126_v32  ;;  %v6131_v32 = vld [vmem:[%s11011_s4 + $0x180] sm:$0xff] }
 0x3c4   : >> { %6277 = vmatprep.subr.mxu1 %v7922_v13 }
 0x3c5   : >> { %5711 = vrot.lane.b32.xlu1 %v7062_v28, %s7917_s10  ;;  %6278 = vmatpush1.msra.mxu1 %v6125_v0  ;;  %v10485_v0 = vld [vmem:[%s10009_s18 + $0x111] sm:$0xff] }
 0x3c6   : >> { %5500 = vrot.lane.b32.xlu0 %v7046_v6, %s11042_s26  ;;  %6279 = vmatprep.subr.mxu1 %v7922_v13  ;;  %5593 = vst.msk [vmem:[#allocation5 + $0xb0] sm:$0xff] %vm341_vm1, %v10485_v0 }
 0x3c7   : >> { %6280 = vmatpush1.msra.mxu1 %v6124_v59 }
 0x3c8   : >> { %6281 = vmatprep.subr.mxu1 %v7922_v13 }
 0x3c9   : >> { %5356 = vrot.lane.b32.xlu1 %v7046_v6, %s7917_s10  ;;  %v10455_v6 = vld [vmem:[%s10009_s18 + $0x190] sm:$0xff] }
 0x3ca   : >> { %5141 = vrot.lane.b32.xlu0 %v10062_v47, %s11042_s26  ;;  %v6123_v47 = vld [vmem:[%s11011_s4 + $0x140] sm:$0xff]  ;;  %5950 = vst.msk [vmem:[#allocation5 + $0x78] sm:$0xff] %vm341_vm1, %v10455_v6 }
 0x3cb   : >> { %6282 = vmatpush1.msra.mxu1 %v6123_v47 }
 0x3cc   : >> { %6283 = vmatprep.subr.mxu1 %v7922_v13 }
 0x3cd   : >> { %5759 = vrot.lane.b32.xlu1 %v7070_v37, %s7918_s12  ;;  %6284 = vmatpush1.msra.mxu1 %v6122_v58  ;;  %v7048_v37 = vld [vmem:[%s10009_s18 + $0xe2] sm:$0xff] }
 0x3ce   : >> { %5550 = vrot.lane.b32.xlu0 %v7031_v11, %s7921_s14  ;;  %6285 = vmatprep.subr.mxu1 %v7922_v13 }
 0x3cf   : >> { %v4895_v1 = vpop.permute.xlu1 %4894  ;;  %6286 = vmatpush1.msra.mxu1 %v6121_v25 }
 0x3d0   : >> { %v4891_v12 = vpop.permute.xlu0 %4890  ;;  %4917 = vst.msk [vmem:[#allocation5 + $0x40] sm:$0xff] %vm981_vm5, %v4895_v1  ;;  %6287 = vmatprep.subr.mxu1 %v7922_v13  ;;  %v10503_v1 = vld [vmem:[%s10009_s18 + $0x72] sm:$0xff] }
 0x3d1   : >> { %4915 = vst.msk [vmem:[#allocation5] sm:$0xff] %vm981_vm5, %v4891_v12  ;;  %5406 = vrot.lane.b32.xlu1 %v7031_v11, %s7918_s12 }
 0x3d2   : >> { %5190 = vrot.lane.b32.xlu0 %v10019_v18, %s7921_s14  ;;  %v6120_v18 = vld [vmem:[%s11011_s4 + $0x128] sm:$0xff]  ;;  %5234 = vst.msk [vmem:[#allocation5 + $0xa8] sm:$0xff] %vm341_vm1, %v10503_v1 }
 0x3d3   : >> { %v4897_v23 = vpop.permute.xlu1 %4896  ;;  %6288 = vmatpush1.msra.mxu1 %v6120_v18 }
 0x3d4   : >> { %v4893_v24 = vpop.permute.xlu0 %4892  ;;  %4918 = vst.msk [vmem:[#allocation5 + $0x60] sm:$0xff] %vm981_vm5, %v4897_v23  ;;  %6289 = vmatprep.subr.mxu1 %v7922_v13  ;;  %v10523_v23 = vld [vmem:[%s10009_s18 + $0x172] sm:$0xff] }
 0x3d5   : >> { %4916 = vst.msk [vmem:[#allocation5 + $0x20] sm:$0xff] %vm981_vm5, %v4893_v24  ;;  %5809 = vrot.lane.b32.xlu1 %v7078_v15, %s11041_s19  ;;  %6290 = vmatpush1.msra.mxu1 %v6119_v39 }
 0x3d6   : >> { %5614 = vrot.lane.b32.xlu0 %v10370_v29, %s7915_s11  ;;  %6291 = vmatprep.subr.mxu1 %v7922_v13 }
 0x3d7   : >> { %v4901_v36 = vpop.permute.xlu1 %4900  ;;  %6292 = vmatpush1.msra.mxu1 %v6118_v34  ;;  %v10556_v34 = vld [vmem:[%s10009_s18 + $0x121] sm:$0xff] }
 0x3d8   : >> { %v4899_v38 = vpop.permute.xlu0 %4898  ;;  %4920 = vst.msk [vmem:[#allocation5 + $0xa0] sm:$0xff] %vm981_vm5, %v4901_v36  ;;  %6293 = vmatprep.subr.mxu1 %v7922_v13 }
 0x3d9   : >> { %4919 = vst.msk [vmem:[#allocation5 + $0x80] sm:$0xff] %vm981_vm5, %v4899_v38  ;;  %5262 = vrot.lane.b32.xlu1 %v7031_v11, %s7915_s11  ;;  %6294 = vmatpush1.msra.mxu1 %v6117_v5 }
 0x3da   : >> { %5971 = vrot.lane.b32.xlu0 %v10386_v26, %s7915_s11  ;;  %6295 = vmatprep.subr.mxu1 %v7922_v13  ;;  %5594 = vst.msk [vmem:[#allocation5 + $0xd0] sm:$0xff] %vm341_vm1, %v10556_v34 }
 0x3db   : >> { %v4905_v62 = vpop.permute.xlu1 %4904  ;;  %6296 = vmatpush1.msra.mxu1 %v6116_v41  ;;  %v10580_v41 = vld [vmem:[%s10009_s18 + $0x181] sm:$0xff] }
 0x3dc   : >> { %v4903_v20 = vpop.permute.xlu0 %4902  ;;  %4922 = vst.msk [vmem:[#allocation5 + $0xe0] sm:$0xff] %vm981_vm5, %v4905_v62  ;;  %6297 = vmatprep.subr.mxu1 %v7922_v13  ;;  %v10544_v62 = vld [vmem:[%s10009_s18 + $0x1a0] sm:$0xff] }
 0x3dd   : >> { %4921 = vst.msk [vmem:[#allocation5 + $0xc0] sm:$0xff] %vm981_vm5, %v4903_v20  ;;  %5665 = vrot.lane.b32.xlu1 %v7078_v15, %s11043_s17  ;;  %6298 = vmatpush1.msra.mxu1 %v6115_v21 }
 0x3de   : >> { %5454 = vrot.lane.b32.xlu0 %v10106_v61, %s11041_s19  ;;  %6319 = vmatprep.subr.mxu1 %v7922_v13  ;;  %5951 = vst.msk [vmem:[#allocation5 + $0x98] sm:$0xff] %vm341_vm1, %v10544_v62 }
 0x3df   : >> { %v4942_v17 = vpop.permute.xlu1 %4941  ;;  %6320 = vmatpush2.msra.mxu1 %v6136_v53  ;;  %v10594_v53 = vld [vmem:[%s10009_s18 + $0x182] sm:$0xff] }
 0x3e0   : >> { %v4940_v19 = vpop.permute.xlu0 %4939  ;;  %4965 = vst.msk [vmem:[#allocation5 + $0x20] sm:$0xff] %vm1002_vm6, %v4942_v17  ;;  %6321 = vmatprep.subr.mxu1 %v7922_v13 }
 0x3e1   : >> { %4964 = vst.msk [vmem:[#allocation5] sm:$0xff] %vm1002_vm6, %v4940_v19  ;;  %6019 = vrot.lane.b32.xlu1 %v10411_v16, %s11043_s17  ;;  %v10572_v19 = vld [vmem:[%s10009_s18 + $0x82] sm:$0xff] }
 0x3e2   : >> { %5857 = vrot.lane.b32.xlu0 %v7086_v27, %s11042_s26  ;;  %5235 = vst.msk [vmem:[#allocation5 + $0xc8] sm:$0xff] %vm341_vm1, %v10572_v19 }
 0x3e3   : >> { %v4946_v42 = vpop.permute.xlu1 %4945 }
 0x3e4   : >> { %v4944_v33 = vpop.permute.xlu0 %4943  ;;  %4967 = vst.msk [vmem:[#allocation5 + $0x60] sm:$0xff] %vm1002_vm6, %v4946_v42 }
 0x3e5   : >> { %4966 = vst.msk [vmem:[#allocation5 + $0x40] sm:$0xff] %vm1002_vm6, %v4944_v33  ;;  %5310 = vrot.lane.b32.xlu1 %v10106_v61, %s11043_s17  ;;  %v6135_v61 = vld [vmem:[%s11011_s4 + $0x1a0] sm:$0xff] }
 0x3e6   : >> { %5092 = vrot.lane.b32.xlu0 %v10025_v9, %s11041_s19  ;;  %v7094_v9 = vld [vmem:[%s10009_s18 + $0x152] sm:$0xff]  ;;  %6322 = vmatpush2.msra.mxu1 %v6135_v61 }
 0x3e7   : >> { %v4950_v30 = vpop.permute.xlu1 %4949  ;;  %6323 = vmatprep.subr.mxu1 %v7922_v13 }
 0x3e8   : >> { %v4948_v31 = vpop.permute.xlu0 %4947  ;;  %4969 = vst.msk [vmem:[#allocation5 + $0xa0] sm:$0xff] %vm1002_vm6, %v4950_v30  ;;  %6324 = vmatpush2.msra.mxu1 %v6134_v4 }
 0x3e9   : >> { %4968 = vst.msk [vmem:[#allocation5 + $0x80] sm:$0xff] %vm1002_vm6, %v4948_v31  ;;  %5713 = vrot.lane.b32.xlu1 %v7086_v27, %s7917_s10  ;;  %6325 = vmatprep.subr.mxu1 %v7922_v13  ;;  %v7049_v27 = vld [vmem:[%s10009_s18 + $0xf2] sm:$0xff] }
 0x3ea   : >> { %5502 = vrot.lane.b32.xlu0 %v10370_v29, %s11042_s26  ;;  %6326 = vmatpush2.msra.mxu1 %v6133_v50 }
 0x3eb   : >> { %v4954_v56 = vpop.permute.xlu1 %4953  ;;  %6327 = vmatprep.subr.mxu1 %v7922_v13 }
 0x3ec   : >> { %v4952_v57 = vpop.permute.xlu0 %4951  ;;  %4971 = vst.msk [vmem:[#allocation5 + $0xe0] sm:$0xff] %vm1002_vm6, %v4954_v56 }
 0x3ed   : >> { %4970 = vst.msk [vmem:[#allocation5 + $0xc0] sm:$0xff] %vm1002_vm6, %v4952_v57  ;;  %5143 = vrot.lane.b32.xlu1 %v10059_v46, %s11042_s26  ;;  %v6132_v46 = vld [vmem:[%s11011_s4 + $0x188] sm:$0xff]  ;;  %v10605_v57 = vld [vmem:[%s10009_s18 + $0x1b0] sm:$0xff] }
 0x3ee   : >> { %5905 = vrot.lane.b32.xlu0 %v7094_v9, %s7921_s14  ;;  %6328 = vmatpush2.msra.mxu1 %v6132_v46  ;;  %5952 = vst.msk [vmem:[#allocation5 + $0xb8] sm:$0xff] %vm341_vm1, %v10605_v57 }
 0x3ef   : >> { %v4993_v8 = vpop.permute.xlu1 %4992  ;;  %6329 = vmatprep.subr.mxu1 %v7922_v13  ;;  %v10498_v13 = vld [vmem:[%s10009_s18 + $0x171] sm:$0xff] }
 0x3f0   : >> { %v4991_v49 = vpop.permute.xlu0 %4990  ;;  %5016 = vst.msk [vmem:[#allocation5 + $0x20] sm:$0xff] %vm1021_vm7, %v4993_v8  ;;  %6330 = vmatpush2.msra.mxu1 %v6131_v32 }
 0x3f1   : >> { %5015 = vst.msk [vmem:[#allocation5] sm:$0xff] %vm1021_vm7, %v4991_v49  ;;  %5552 = vrot.lane.b32.xlu1 %v7032_v52, %s7921_s14 }
 0x3f2   : >> { %5358 = vrot.lane.b32.xlu0 %v10370_v29, %s7917_s10 }
 0x3f3   : >> { %v4997_v28 = vpop.permute.xlu1 %4996 }
 0x3f4   : >> { %v4995_v54 = vpop.permute.xlu0 %4994  ;;  %5018 = vst.msk [vmem:[#allocation5 + $0x60] sm:$0xff] %vm1021_vm7, %v4997_v28  ;;  %v7050_v28 = vld [vmem:[%s10009_s18 + $0x102] sm:$0xff] }
 0x3f5   : >> { %5017 = vst.msk [vmem:[#allocation5 + $0x40] sm:$0xff] %vm1021_vm7, %v4995_v54  ;;  %5192 = vrot.lane.b32.xlu1 %v10046_v45, %s7921_s14 }
 0x3f6   : >> { %5761 = vrot.lane.b32.xlu0 %v7094_v9, %s7918_s12 }
 0x3f7   : >> { %v5001_v11 = vpop.permute.xlu1 %5000 }
 0x3f8   : >> { %v4999_v59 = vpop.permute.xlu0 %4998  ;;  %5020 = vst.msk [vmem:[#allocation5 + $0xa0] sm:$0xff] %vm1021_vm7, %v5001_v11 }
 0x3f9   : >> { %5019 = vst.msk [vmem:[#allocation5 + $0x80] sm:$0xff] %vm1021_vm7, %v4999_v59  ;;  %5616 = vrot.lane.b32.xlu1 %v7048_v37, %s7915_s11 }
 0x3fa   : >> { %5408 = vrot.lane.b32.xlu0 %v7032_v52, %s7918_s12 }
 0x3fb   : >> { %v5005_v45 = vpop.permute.xlu1 %5004 }
 0x3fc   : >> { %v5003_v47 = vpop.permute.xlu0 %5002  ;;  %5022 = vst.msk [vmem:[#allocation5 + $0xe0] sm:$0xff] %vm1021_vm7, %v5005_v45 }
 0x3fd   : >> { %5021 = vst.msk [vmem:[#allocation5 + $0xc0] sm:$0xff] %vm1021_vm7, %v5003_v47  ;;  %5973 = vrot.lane.b32.xlu1 %v10498_v13, %s7915_s11 }
 0x3fe   : >> { %5811 = vrot.lane.b32.xlu0 %v10129_v7, %s11041_s19 }
 0x3ff   : >> { %v5042_v12 = vpop.permute.xlu1 %5041 }
 0x400   : >> { %v5040_v58 = vpop.permute.xlu0 %5039  ;;  %5065 = vst.msk [vmem:[#allocation5 + $0x20] sm:$0xff] %vm1043_vm8, %v5042_v12 }
 0x401   : >> { %5064 = vst.msk [vmem:[#allocation5] sm:$0xff] %vm1043_vm8, %v5040_v58  ;;  %5456 = vrot.lane.b32.xlu1 %v10137_v3, %s11041_s19 }
 0x402   : >> { %5264 = vrot.lane.b32.xlu0 %v7032_v52, %s7915_s11 }
 0x403   : >> { %v5046_v15 = vpop.permute.xlu1 %5045 }
 0x404   : >> { %v5044_v29 = vpop.permute.xlu0 %5043  ;;  %5067 = vst.msk [vmem:[#allocation5 + $0x60] sm:$0xff] %vm1043_vm8, %v5046_v15  ;;  %v10666_v15 = vld [vmem:[%s10009_s18 + $0x192] sm:$0xff] }
 0x405   : >> { %5066 = vst.msk [vmem:[#allocation5 + $0x40] sm:$0xff] %vm1043_vm8, %v5044_v29  ;;  %5859 = vrot.lane.b32.xlu1 %v10386_v26, %s11042_s26 }
 0x406   : >> { %5667 = vrot.lane.b32.xlu0 %v10129_v7, %s11043_s17 }
 0x407   : >> { %v5050_v24 = vpop.permute.xlu1 %5049 }
 0x408   : >> { %v5048_v25 = vpop.permute.xlu0 %5047  ;;  %5069 = vst.msk [vmem:[#allocation5 + $0xa0] sm:$0xff] %vm1043_vm8, %v5050_v24 }
 0x409   : >> { %5068 = vst.msk [vmem:[#allocation5 + $0x80] sm:$0xff] %vm1043_vm8, %v5048_v25  ;;  %5094 = vrot.lane.b32.xlu1 %v10034_v43, %s11041_s19 }
 0x40a   : >> { %6021 = vrot.lane.b32.xlu0 %v10523_v23, %s11043_s17 }
 0x40b   : >> { %v5054_v18 = vpop.permute.xlu1 %5053 }
 0x40c   : >> { %v5052_v36 = vpop.permute.xlu0 %5051  ;;  %5071 = vst.msk [vmem:[#allocation5 + $0xe0] sm:$0xff] %vm1043_vm8, %v5054_v18 }
 0x40d   : >> { %5070 = vst.msk [vmem:[#allocation5 + $0xc0] sm:$0xff] %vm1043_vm8, %v5052_v36  ;;  %5504 = vrot.lane.b32.xlu1 %v7048_v37, %s11042_s26  ;;  %v6963_v36 = vld [vmem:[%s10009_s18 + $0x70] sm:$0xff] }
 0x40e   : >> { %5312 = vrot.lane.b32.xlu0 %v10137_v3, %s11043_s17  ;;  %v7033_v3 = vld [vmem:[%s10009_s18 + $0xf0] sm:$0xff] }
 0x40f   : >> { %v5305_v7 = vpop.permute.xlu1 %5304 }
 0x410   : >> { %v5257_v38 = vpop.permute.xlu0 %5256 }
 0x411   : >> { %5280 = vst.msk [vmem:[#allocation5 + $0x8] sm:$0xff] %vm981_vm5, %v5257_v38  ;;  %5907 = vrot.lane.b32.xlu1 %v10411_v16, %s7921_s14  ;;  %v6981_v38 = vld [vmem:[%s10009_s18 + $0x92] sm:$0xff] }
 0x412   : >> { %5328 = vst.msk [vmem:[#allocation5 + $0x8] sm:$0xff] %vm1002_vm6, %v5305_v7  ;;  %5715 = vrot.lane.b32.xlu0 %v10386_v26, %s7917_s10 }
 0x413   : >> { %v5403_v43 = vpop.permute.xlu1 %5402  ;;  %5236 = vst.msk [vmem:[#allocation5 + $0xe8] sm:$0xff] %vm341_vm1, %v6981_v38 }
 0x414   : >> { %v5353_v39 = vpop.permute.xlu0 %5352 }
 0x415   : >> { %5376 = vst.msk [vmem:[#allocation5 + $0x8] sm:$0xff] %vm1021_vm7, %v5353_v39  ;;  %5360 = vrot.lane.b32.xlu1 %v7048_v37, %s7917_s10 }
 0x416   : >> { %5426 = vst.msk [vmem:[#allocation5 + $0x8] sm:$0xff] %vm1043_vm8, %v5403_v43  ;;  %5145 = vrot.lane.b32.xlu0 %v10068_v51, %s11042_s26  ;;  %v7035_v43 = vld [vmem:[%s10009_s18 + $0x110] sm:$0xff] }
 0x417   : >> { %v5451_v20 = vpop.permute.xlu1 %5450 }
 0x418   : >> { %v5259_v26 = vpop.permute.xlu0 %5258  ;;  %5474 = vst.msk [vmem:[#allocation5 + $0x8] sm:$0xff] %vm1062_vm9, %v5451_v20  ;;  %v6971_v20 = vld [vmem:[%s10009_s18 + $0x71] sm:$0xff] }
 0x419   : >> { %5281 = vst.msk [vmem:[#allocation5 + $0x28] sm:$0xff] %vm981_vm5, %v5259_v26  ;;  %5763 = vrot.lane.b32.xlu1 %v10411_v16, %s7918_s12 }
 0x41a   : >> { %5554 = vrot.lane.b32.xlu0 %v7033_v3, %s7921_s14 }
 0x41b   : >> { %v5307_v51 = vpop.permute.xlu1 %5306 }
 0x41c   : >> { %v5089_v5 = vpop.permute.xlu0 %5088  ;;  %5329 = vst.msk [vmem:[#allocation5 + $0x28] sm:$0xff] %vm1002_vm6, %v5307_v51 }
 0x41d   : >> { %5113 = vst.msk [vmem:[#allocation5] sm:$0xff] %vm1062_vm9, %v5089_v5  ;;  %5410 = vrot.lane.b32.xlu1 %v7033_v3, %s7918_s12 }
 0x41e   : >> { %5194 = vrot.lane.b32.xlu0 %v10043_v44, %s7921_s14 }
 0x41f   : >> { %v5140_v17 = vpop.permute.xlu1 %5139 }
 0x420   : >> { %v5499_v16 = vpop.permute.xlu0 %5498  ;;  %5164 = vst.msk [vmem:[#allocation5] sm:$0xff] %vm1083_vm10, %v5140_v17 }
 0x421   : >> { %5522 = vst.msk [vmem:[#allocation5 + $0x8] sm:$0xff] %vm1083_vm10, %v5499_v16  ;;  %5813 = vrot.lane.b32.xlu1 %v10219_v60, %s11041_s19 }
 0x422   : >> { %5618 = vrot.lane.b32.xlu0 %v7049_v27, %s7915_s11 }
 0x423   : >> { %v5549_v44 = vpop.permute.xlu1 %5548 }
 0x424   : >> { %v5355_v42 = vpop.permute.xlu0 %5354  ;;  %5572 = vst.msk [vmem:[#allocation5 + $0x8] sm:$0xff] %vm1102_vm11, %v5549_v44  ;;  %v10711_v44 = vld [vmem:[%s10009_s18 + $0x1a1] sm:$0xff] }
 0x425   : >> { %5377 = vst.msk [vmem:[#allocation5 + $0x28] sm:$0xff] %vm1021_vm7, %v5355_v42  ;;  %5266 = vrot.lane.b32.xlu1 %v7033_v3, %s7915_s11 }
 0x426   : >> { %5975 = vrot.lane.b32.xlu0 %v10580_v41, %s7915_s11 }
 0x427   : >> { %v5405_v33 = vpop.permute.xlu1 %5404 }
 0x428   : >> { %v5189_v21 = vpop.permute.xlu0 %5188  ;;  %5427 = vst.msk [vmem:[#allocation5 + $0x28] sm:$0xff] %vm1043_vm8, %v5405_v33 }
 0x429   : >> { %5213 = vst.msk [vmem:[#allocation5] sm:$0xff] %vm1102_vm11, %v5189_v21  ;;  %5669 = vrot.lane.b32.xlu1 %v10219_v60, %s11043_s17 }
 0x42a   : >> { %5458 = vrot.lane.b32.xlu0 %v10247_v40, %s11041_s19 }
 0x42b   : >> { %v5261_v30 = vpop.permute.xlu1 %5260  ;;  %v6052_v61 = vld [vmem:[#allocation5 + $0x8] sm:$0xff] }
 0x42c   : >> { %v5613_v31 = vpop.permute.xlu0 %5612  ;;  %5282 = vst.msk [vmem:[#allocation5 + $0x48] sm:$0xff] %vm981_vm5, %v5261_v30  ;;  %6226 = vmatprep.mubr.f32.mxu0 %v6052_v61 }
 0x42d   : >> { %5636 = vst.msk [vmem:[#allocation5 + $0x10] sm:$0xff] %vm981_vm5, %v5613_v31  ;;  %6023 = vrot.lane.b32.xlu1 %v10594_v53, %s11043_s17  ;;  %v10725_v31 = vld [vmem:[%s10009_s18 + $0x1a2] sm:$0xff] }
 0x42e   : >> { %5861 = vrot.lane.b32.xlu0 %v10498_v13, %s11042_s26 }
 0x42f   : >> { %v5664_v60 = vpop.permute.xlu1 %5663 }
 0x430   : >> { %v5453_v9 = vpop.permute.xlu0 %5452  ;;  %v6051_v56 = vld [vmem:[#allocation5] sm:$0xff]  ;;  %5687 = vst.msk [vmem:[#allocation5 + $0x10] sm:$0xff] %vm1002_vm6, %v5664_v60 }
 0x431   : >> { %5475 = vst.msk [vmem:[#allocation5 + $0x28] sm:$0xff] %vm1062_vm9, %v5453_v9  ;;  %6227 = vmatmul.mubr.f32.vlgmr.msra.gmra.mxu0 %v6051_v56  ;;  %5314 = vrot.lane.b32.xlu1 %v10247_v40, %s11043_s17 }
 0x432   : >> { %5096 = vrot.lane.b32.xlu0 %v10031_v22, %s11041_s19  ;;  %v7034_v22 = vld [vmem:[%s10009_s18 + $0x100] sm:$0xff] }
 0x433   : >> { %v5309_v4 = vpop.permute.xlu1 %5308 }
 0x434   : >> { %v5091_v50 = vpop.permute.xlu0 %5090  ;;  %5330 = vst.msk [vmem:[#allocation5 + $0x48] sm:$0xff] %vm1002_vm6, %v5309_v4 }
 0x435   : >> { %5114 = vst.msk [vmem:[#allocation5 + $0x20] sm:$0xff] %vm1062_vm9, %v5091_v50  ;;  %5717 = vrot.lane.b32.xlu1 %v10498_v13, %s7917_s10  ;;  %v6964_v50 = vld [vmem:[%s10009_s18 + $0x80] sm:$0xff] }
 0x436   : >> { %5506 = vrot.lane.b32.xlu0 %v7049_v27, %s11042_s26 }
 0x437   : >> { %v5712_v52 = vpop.permute.xlu1 %5711 }
 0x438   : >> { %v5501_v8 = vpop.permute.xlu0 %5500  ;;  %5735 = vst.msk [vmem:[#allocation5 + $0x10] sm:$0xff] %vm1021_vm7, %v5712_v52 }
 0x439   : >> { %5523 = vst.msk [vmem:[#allocation5 + $0x28] sm:$0xff] %vm1083_vm10, %v5501_v8  ;;  %5147 = vrot.lane.b32.xlu1 %v10065_v48, %s11042_s26  ;;  %v10636_v48 = vld [vmem:[%s10009_s18 + $0x1c0] sm:$0xff] }
 0x43a   : >> { %5909 = vrot.lane.b32.xlu0 %v10523_v23, %s7921_s14  ;;  %5953 = vst.msk [vmem:[#allocation5 + $0xd8] sm:$0xff] %vm341_vm1, %v10636_v48 }
 0x43b   : >> { %v5357_v40 = vpop.permute.xlu1 %5356 }
 0x43c   : >> { %v5142_v49 = vpop.permute.xlu0 %5141  ;;  %5378 = vst.msk [vmem:[#allocation5 + $0x48] sm:$0xff] %vm1021_vm7, %v5357_v40 }
 0x43d   : >> { %5165 = vst.msk [vmem:[#allocation5 + $0x20] sm:$0xff] %vm1083_vm10, %v5142_v49  ;;  %5556 = vrot.lane.b32.xlu1 %v7034_v22, %s7921_s14  ;;  %v6972_v49 = vld [vmem:[%s10009_s18 + $0x81] sm:$0xff] }
 0x43e   : >> { %5362 = vrot.lane.b32.xlu0 %v7049_v27, %s7917_s10  ;;  %v7051_v27 = vld [vmem:[%s10009_s18 + $0x112] sm:$0xff] }
 0x43f   : >> { %v5760_v46 = vpop.permute.xlu1 %5759 }
 0x440   : >> { %v5551_v35 = vpop.permute.xlu0 %5550  ;;  %5783 = vst.msk [vmem:[#allocation5 + $0x10] sm:$0xff] %vm1043_vm8, %v5760_v46 }
 0x441   : >> { %5573 = vst.msk [vmem:[#allocation5 + $0x28] sm:$0xff] %vm1102_vm11, %v5551_v35  ;;  %5196 = vrot.lane.b32.xlu1 %v10089_v63, %s7921_s14  ;;  %v10646_v63 = vld [vmem:[%s10009_s18 + $0x191] sm:$0xff] }
 0x442   : >> { %5765 = vrot.lane.b32.xlu0 %v10523_v23, %s7918_s12 }
 0x443   : >> { %v5407_v54 = vpop.permute.xlu1 %5406 }
 0x444   : >> { %v5191_v32 = vpop.permute.xlu0 %5190  ;;  %5428 = vst.msk [vmem:[#allocation5 + $0x48] sm:$0xff] %vm1043_vm8, %v5407_v54  ;;  %v7052_v54 = vld [vmem:[%s10009_s18 + $0x122] sm:$0xff] }
 0x445   : >> { %5214 = vst.msk [vmem:[#allocation5 + $0x20] sm:$0xff] %vm1102_vm11, %v5191_v32  ;;  %5620 = vrot.lane.b32.xlu1 %v7050_v28, %s7915_s11 }
 0x446   : >> { %5412 = vrot.lane.b32.xlu0 %v7034_v22, %s7918_s12 }
 0x447   : >> { %v5810_v37 = vpop.permute.xlu1 %5809 }
 0x448   : >> { %v5615_v11 = vpop.permute.xlu0 %5614  ;;  %v6056_v59 = vld [vmem:[#allocation5 + $0x28] sm:$0xff]  ;;  %5833 = vst.msk [vmem:[#allocation5 + $0x10] sm:$0xff] %vm1062_vm9, %v5810_v37 }
 0x449   : >> { %5637 = vst.msk [vmem:[#allocation5 + $0x30] sm:$0xff] %vm981_vm5, %v5615_v11  ;;  %6231 = vmatprep.mubr.f32.mxu0 %v6056_v59  ;;  %5977 = vrot.lane.b32.xlu1 %v10646_v63, %s7915_s11  ;;  %v10768_v37 = vld [vmem:[%s10009_s18 + $0x1b1] sm:$0xff] }
 0x44a   : >> { %5815 = vrot.lane.b32.xlu0 %v10335_v10, %s11041_s19 }
 0x44b   : >> { %v5263_v13 = vpop.permute.xlu1 %5262 }
 0x44c   : >> { %v5972_v45 = vpop.permute.xlu0 %5971  ;;  %v6055_v47 = vld [vmem:[#allocation5 + $0x20] sm:$0xff]  ;;  %5283 = vst.msk [vmem:[#allocation5 + $0x68] sm:$0xff] %vm981_vm5, %v5263_v13 }
 0x44d   : >> { %5995 = vst.msk [vmem:[#allocation5 + $0x18] sm:$0xff] %vm981_vm5, %v5972_v45  ;;  %6232 = vmatmul.mubr.f32.gmra.mxu0 %v6055_v47  ;;  %5460 = vrot.lane.b32.xlu1 %v10350_v2, %s11041_s19 }
 0x44e   : >> { %5268 = vrot.lane.b32.xlu0 %v7034_v22, %s7915_s11 }
 0x44f   : >> { %v5666_v12 = vpop.permute.xlu1 %5665 }
 0x450   : >> { %v5455_v58 = vpop.permute.xlu0 %5454  ;;  %5688 = vst.msk [vmem:[#allocation5 + $0x30] sm:$0xff] %vm1002_vm6, %v5666_v12 }
 0x451   : >> { %5476 = vst.msk [vmem:[#allocation5 + $0x48] sm:$0xff] %vm1062_vm9, %v5455_v58  ;;  %5863 = vrot.lane.b32.xlu1 %v10580_v41, %s11042_s26  ;;  %v10783_v58 = vld [vmem:[%s10009_s18 + $0x1b2] sm:$0xff] }
 0x452   : >> { %5671 = vrot.lane.b32.xlu0 %v10335_v10, %s11043_s17 }
 0x453   : >> { %v6020_v29 = vpop.permute.xlu1 %6019 }
 0x454   : >> { %v5858_v23 = vpop.permute.xlu0 %5857  ;;  %6043 = vst.msk [vmem:[#allocation5 + $0x18] sm:$0xff] %vm1002_vm6, %v6020_v29 }
 0x455   : >> { %5881 = vst.msk [vmem:[#allocation5 + $0x10] sm:$0xff] %vm1083_vm10, %v5858_v23  ;;  %5098 = vrot.lane.b32.xlu1 %v10123_v55, %s11041_s19 }
 0x456   : >> { %6025 = vrot.lane.b32.xlu0 %v10666_v15, %s11043_s17 }
 0x457   : >> { %v5311_v24 = vpop.permute.xlu1 %5310 }
 0x458   : >> { %v5093_v25 = vpop.permute.xlu0 %5092  ;;  %5331 = vst.msk [vmem:[#allocation5 + $0x68] sm:$0xff] %vm1002_vm6, %v5311_v24 }
 0x459   : >> { %5115 = vst.msk [vmem:[#allocation5 + $0x40] sm:$0xff] %vm1062_vm9, %v5093_v25  ;;  %5508 = vrot.lane.b32.xlu1 %v7050_v28, %s11042_s26 }
 0x45a   : >> { %5316 = vrot.lane.b32.xlu0 %v10350_v2, %s11043_s17 }
 0x45b   : >> { %v5714_v10 = vpop.permute.xlu1 %5713  ;;  %v6054_v55 = vld [vmem:[#allocation5 + $0x18] sm:$0xff] }
 0x45c   : >> { %v5503_v18 = vpop.permute.xlu0 %5502  ;;  %5736 = vst.msk [vmem:[#allocation5 + $0x30] sm:$0xff] %vm1021_vm7, %v5714_v10  ;;  %7126 = vmatprep.mubr.msk.f32.mxu1 %vm6137_vm2, %v6054_v55  ;;  %v7037_v10 = vld [vmem:[%s10009_s18 + $0x130] sm:$0xff] }
 0x45d   : >> { %5524 = vst.msk [vmem:[#allocation5 + $0x48] sm:$0xff] %vm1083_vm10, %v5503_v18  ;;  %5911 = vrot.lane.b32.xlu1 %v10594_v53, %s7921_s14  ;;  %v6965_v18 = vld [vmem:[%s10009_s18 + $0x90] sm:$0xff] }
 0x45e   : >> { %5719 = vrot.lane.b32.xlu0 %v10580_v41, %s7917_s10 }
 0x45f   : >> { %v5144_v2 = vpop.permute.xlu1 %5143 }
 0x460   : >> { %v5906_v7 = vpop.permute.xlu0 %5905  ;;  %5166 = vst.msk [vmem:[#allocation5 + $0x40] sm:$0xff] %vm1083_vm10, %v5144_v2  ;;  %v6973_v2 = vld [vmem:[%s10009_s18 + $0x91] sm:$0xff] }
 0x461   : >> { %5929 = vst.msk [vmem:[#allocation5 + $0x10] sm:$0xff] %vm1102_vm11, %v5906_v7  ;;  %5364 = vrot.lane.b32.xlu1 %v7050_v28, %s7917_s10 }
 0x462   : >> { %5149 = vrot.lane.b32.xlu0 %v6963_v36, %s11042_s26 }
 0x463   : >> { %v5553_v39 = vpop.permute.xlu1 %5552 }
 0x464   : >> { %v5359_v3 = vpop.permute.xlu0 %5358  ;;  %5574 = vst.msk [vmem:[#allocation5 + $0x48] sm:$0xff] %vm1102_vm11, %v5553_v39 }
 0x465   : >> { %5379 = vst.msk [vmem:[#allocation5 + $0x68] sm:$0xff] %vm1021_vm7, %v5359_v3  ;;  %5767 = vrot.lane.b32.xlu1 %v10594_v53, %s7918_s12 }
 0x466   : >> { %5558 = vrot.lane.b32.xlu0 %v7035_v43, %s7921_s14 }
 0x467   : >> { %v5193_v26 = vpop.permute.xlu1 %5192 }
 0x468   : >> { %v5762_v51 = vpop.permute.xlu0 %5761  ;;  %v6053_v5 = vld [vmem:[#allocation5 + $0x10] sm:$0xff]  ;;  %5215 = vst.msk [vmem:[#allocation5 + $0x40] sm:$0xff] %vm1102_vm11, %v5193_v26 }
 0x469   : >> { %5784 = vst.msk [vmem:[#allocation5 + $0x30] sm:$0xff] %vm1043_vm8, %v5762_v51  ;;  %6332 = vmatmul.mubr.f32.vlgmr.msra.gmra.mxu1 %v6053_v5  ;;  %5414 = vrot.lane.b32.xlu1 %v7035_v43, %s7918_s12 }
 0x46a   : >> { %5198 = vrot.lane.b32.xlu0 %v6971_v20, %s7921_s14  ;;  %v7116_v20 = vld [vmem:[%s10009_s18 + $0x1c1] sm:$0xff] }
 0x46b   : >> { %v5617_v17 = vpop.permute.xlu1 %5616  ;;  %v6060_v41 = vld [vmem:[#allocation5 + $0x48] sm:$0xff] }
 0x46c   : >> { %v5409_v16 = vpop.permute.xlu0 %5408  ;;  %5638 = vst.msk [vmem:[#allocation5 + $0x50] sm:$0xff] %vm981_vm5, %v5617_v17  ;;  %6236 = vmatprep.mubr.f32.mxu0 %v6060_v41  ;;  %v7124_v17 = vld [vmem:[%s10009_s18 + $0x1c2] sm:$0xff] }
 0x46d   : >> { %5429 = vst.msk [vmem:[#allocation5 + $0x68] sm:$0xff] %vm1043_vm8, %v5409_v16  ;;  %5817 = vrot.lane.b32.xlu1 %v10455_v6, %s11041_s19 }
 0x46e   : >> { %5622 = vrot.lane.b32.xlu0 %v7051_v27, %s7915_s11 }
 0x46f   : >> { %v5974_v42 = vpop.permute.xlu1 %5973  ;;  %v6059_v21 = vld [vmem:[#allocation5 + $0x40] sm:$0xff] }
 0x470   : >> { %v5812_v33 = vpop.permute.xlu0 %5811  ;;  %6237 = vmatmul.mubr.f32.gmra.mxu0 %v6059_v21  ;;  %5996 = vst.msk [vmem:[#allocation5 + $0x38] sm:$0xff] %vm981_vm5, %v5974_v42 }
 0x471   : >> { %5834 = vst.msk [vmem:[#allocation5 + $0x30] sm:$0xff] %vm1062_vm9, %v5812_v33  ;;  %5270 = vrot.lane.b32.xlu1 %v7035_v43, %s7915_s11  ;;  %v7053_v43 = vld [vmem:[%s10009_s18 + $0x132] sm:$0xff] }
 0x472   : >> { %5979 = vrot.lane.b32.xlu0 %v10711_v44, %s7915_s11 }
 0x473   : >> { %v5457_v53 = vpop.permute.xlu1 %5456 }
 0x474   : >> { %v5265_v30 = vpop.permute.xlu0 %5264  ;;  %5477 = vst.msk [vmem:[#allocation5 + $0x68] sm:$0xff] %vm1062_vm9, %v5457_v53 }
 0x475   : >> { %5284 = vst.msk [vmem:[#allocation5 + $0x88] sm:$0xff] %vm981_vm5, %v5265_v30  ;;  %5673 = vrot.lane.b32.xlu1 %v10455_v6, %s11043_s17  ;;  %v7117_v30 = vld [vmem:[%s10009_s18 + $0x1d1] sm:$0xff] }
 0x476   : >> { %5462 = vrot.lane.b32.xlu0 %v10485_v0, %s11041_s19 }
 0x477   : >> { %v5860_v61 = vpop.permute.xlu1 %5859 }
 0x478   : >> { %v5668_v60 = vpop.permute.xlu0 %5667  ;;  %5882 = vst.msk [vmem:[#allocation5 + $0x30] sm:$0xff] %vm1083_vm10, %v5860_v61 }
 0x479   : >> { %5689 = vst.msk [vmem:[#allocation5 + $0x50] sm:$0xff] %vm1002_vm6, %v5668_v60  ;;  %6027 = vrot.lane.b32.xlu1 %v10725_v31, %s11043_s17  ;;  %v7125_v60 = vld [vmem:[%s10009_s18 + $0x1d2] sm:$0xff] }
 0x47a   : >> { %5865 = vrot.lane.b32.xlu0 %v10646_v63, %s11042_s26 }
 0x47b   : >> { %v5095_v9 = vpop.permute.xlu1 %5094 }
 0x47c   : >> { %v6022_v6 = vpop.permute.xlu0 %6021  ;;  %5116 = vst.msk [vmem:[#allocation5 + $0x60] sm:$0xff] %vm1062_vm9, %v5095_v9 }
 0x47d   : >> { %6044 = vst.msk [vmem:[#allocation5 + $0x38] sm:$0xff] %vm1002_vm6, %v6022_v6  ;;  %5318 = vrot.lane.b32.xlu1 %v10485_v0, %s11043_s17 }
 0x47e   : >> { %5100 = vrot.lane.b32.xlu0 %v10503_v1, %s11041_s19  ;;  %v7036_v1 = vld [vmem:[%s10009_s18 + $0x120] sm:$0xff] }
 0x47f   : >> { %v5505_v56 = vpop.permute.xlu1 %5504 }
 0x480   : >> { %v5313_v4 = vpop.permute.xlu0 %5312  ;;  %5525 = vst.msk [vmem:[#allocation5 + $0x68] sm:$0xff] %vm1083_vm10, %v5505_v56 }
 0x481   : >> { %5332 = vst.msk [vmem:[#allocation5 + $0x88] sm:$0xff] %vm1002_vm6, %v5313_v4  ;;  %5721 = vrot.lane.b32.xlu1 %v10646_v63, %s7917_s10 }
 0x482   : >> { %5510 = vrot.lane.b32.xlu0 %v7051_v27, %s11042_s26 }
 0x483   : >> { %v5908_v52 = vpop.permute.xlu1 %5907 }
 0x484   : >> { %v5716_v8 = vpop.permute.xlu0 %5715  ;;  %v6058_v0 = vld [vmem:[#allocation5 + $0x38] sm:$0xff]  ;;  %5930 = vst.msk [vmem:[#allocation5 + $0x30] sm:$0xff] %vm1102_vm11, %v5908_v52 }
 0x485   : >> { %5737 = vst.msk [vmem:[#allocation5 + $0x50] sm:$0xff] %vm1021_vm7, %v5716_v8  ;;  %7127 = vmatprep.mubr.msk.f32.mxu1 %vm6137_vm2, %v6058_v0  ;;  %5151 = vrot.lane.b32.xlu1 %v6964_v50, %s11042_s26 }
 0x486   : >> { %5913 = vrot.lane.b32.xlu0 %v10666_v15, %s7921_s14 }
 0x487   : >> { %v5361_v22 = vpop.permute.xlu1 %5360 }
 0x488   : >> { %v5146_v40 = vpop.permute.xlu0 %5145  ;;  %5380 = vst.msk [vmem:[#allocation5 + $0x88] sm:$0xff] %vm1021_vm7, %v5361_v22 }
 0x489   : >> { %5167 = vst.msk [vmem:[#allocation5 + $0x60] sm:$0xff] %vm1083_vm10, %v5146_v40  ;;  %5560 = vrot.lane.b32.xlu1 %v7036_v1, %s7921_s14 }
 0x48a   : >> { %5366 = vrot.lane.b32.xlu0 %v7051_v27, %s7917_s10  ;;  %v7109_v27 = vld [vmem:[%s10009_s18 + $0x1d0] sm:$0xff] }
 0x48b   : >> { %v5764_v46 = vpop.permute.xlu1 %5763  ;;  %v6057_v28 = vld [vmem:[#allocation5 + $0x30] sm:$0xff]  ;;  %5954 = vst.msk [vmem:[#allocation5 + $0xf8] sm:$0xff] %vm341_vm1, %v7109_v27 }
 0x48c   : >> { %v5555_v35 = vpop.permute.xlu0 %5554  ;;  %5785 = vst.msk [vmem:[#allocation5 + $0x50] sm:$0xff] %vm1043_vm8, %v5764_v46  ;;  %6337 = vmatmul.mubr.f32.gmra.mxu1 %v6057_v28 }
 0x48d   : >> { %5575 = vst.msk [vmem:[#allocation5 + $0x68] sm:$0xff] %vm1102_vm11, %v5555_v35  ;;  %5200 = vrot.lane.b32.xlu1 %v6972_v49, %s7921_s14 }
 0x48e   : >> { %5769 = vrot.lane.b32.xlu0 %v10666_v15, %s7918_s12 }
 0x48f   : >> { %v5411_v32 = vpop.permute.xlu1 %5410 }
 0x490   : >> { %v5195_v63 = vpop.permute.xlu0 %5194  ;;  %5430 = vst.msk [vmem:[#allocation5 + $0x88] sm:$0xff] %vm1043_vm8, %v5411_v32 }
 0x491   : >> { %5216 = vst.msk [vmem:[#allocation5 + $0x60] sm:$0xff] %vm1102_vm11, %v5195_v63  ;;  %5624 = vrot.lane.b32.xlu1 %v7052_v54, %s7915_s11 }
 0x492   : >> { %5416 = vrot.lane.b32.xlu0 %v7036_v1, %s7918_s12 }
 0x493   : >> { %v5814_v11 = vpop.permute.xlu1 %5813 }
 0x494   : >> { %v5619_v59 = vpop.permute.xlu0 %5618  ;;  %v6064_v13 = vld [vmem:[#allocation5 + $0x68] sm:$0xff]  ;;  %5835 = vst.msk [vmem:[#allocation5 + $0x50] sm:$0xff] %vm1062_vm9, %v5814_v11 }
 0x495   : >> { %5639 = vst.msk [vmem:[#allocation5 + $0x70] sm:$0xff] %vm981_vm5, %v5619_v59  ;;  %6241 = vmatprep.mubr.f32.mxu0 %v6064_v13  ;;  %5981 = vrot.lane.b32.xlu1 %v10768_v37, %s7915_s11 }
 0x496   : >> { %5819 = vrot.lane.b32.xlu0 %v10544_v62, %s11041_s19 }
 0x497   : >> { %v5267_v45 = vpop.permute.xlu1 %5266 }
 0x498   : >> { %v5976_v47 = vpop.permute.xlu0 %5975  ;;  %v6063_v12 = vld [vmem:[#allocation5 + $0x60] sm:$0xff]  ;;  %5285 = vst.msk [vmem:[#allocation5 + $0xa8] sm:$0xff] %vm981_vm5, %v5267_v45 }
 0x499   : >> { %5997 = vst.msk [vmem:[#allocation5 + $0x58] sm:$0xff] %vm981_vm5, %v5976_v47  ;;  %6242 = vmatmul.mubr.f32.gmra.mxu0 %v6063_v12  ;;  %5675 = vrot.lane.b32.xlu1 %v10544_v62, %s11043_s17 }
 0x49a   : >> { %5464 = vrot.lane.b32.xlu0 %v10556_v34, %s11041_s19  ;;  %v7045_v34 = vld [vmem:[%s10009_s18 + $0x131] sm:$0xff]  ;;  %s7134_s18 = sshll.u32 %s7902_s9, 6  ;;  %s4855_s9 = sadd.s32 1, %s7902_s9  }
 0x49b   : >> { %v5670_v15 = vpop.permute.xlu1 %5669  ;;  %5595 = vst.msk [vmem:[#allocation5 + $0xf0] sm:$0xff] %vm341_vm1, %v7045_v34  ;;  %p4852_p12 = scmp.ge.s32.totalorder %s4855_s9, 8  }
 0x49c   : >> { %v5459_v29 = vpop.permute.xlu0 %5458  ;;  %5690 = vst.msk [vmem:[#allocation5 + $0x70] sm:$0xff] %vm1002_vm6, %v5670_v15  ;;  %s11046_s15 = sand.u32 (%p4852_p12), 1, %s7886_s22  }
 0x49d   : >> { %5478 = vst.msk [vmem:[#allocation5 + $0x88] sm:$0xff] %vm1062_vm9, %v5459_v29  ;;  %6029 = vrot.lane.b32.xlu1 %v10783_v58, %s11043_s17  ;;  %s10966_s9 = scalar_lea.sflag (%p4852_p12), [#allocation7], %s11046_s15 }
 0x49e   : >> { %5867 = vrot.lane.b32.xlu0 %v10711_v44, %s11042_s26 }
 0x49f   : >> { %v6024_v62 = vpop.permute.xlu1 %6023 }
 0x4a0   : >> { %v5862_v23 = vpop.permute.xlu0 %5861  ;;  %6045 = vst.msk [vmem:[#allocation5 + $0x58] sm:$0xff] %vm1002_vm6, %v6024_v62 }
 0x4a1   : >> { %5883 = vst.msk [vmem:[#allocation5 + $0x50] sm:$0xff] %vm1083_vm10, %v5862_v23  ;;  %5512 = vrot.lane.b32.xlu1 %v7052_v54, %s11042_s26 }
 0x4a2   : >> { %5102 = vrot.lane.b32.xlu0 %v10572_v19, %s11041_s19 }
 0x4a3   : >> { %v5315_v24 = vpop.permute.xlu1 %5314 }
 0x4a4   : >> { %v5097_v25 = vpop.permute.xlu0 %5096  ;;  %5333 = vst.msk [vmem:[#allocation5 + $0xa8] sm:$0xff] %vm1002_vm6, %v5315_v24 }
 0x4a5   : >> { %5117 = vst.msk [vmem:[#allocation5 + $0x80] sm:$0xff] %vm1062_vm9, %v5097_v25  ;;  %5915 = vrot.lane.b32.xlu1 %v10725_v31, %s7921_s14 }
 0x4a6   : >> { %5723 = vrot.lane.b32.xlu0 %v10711_v44, %s7917_s10 }
 0x4a7   : >> { %v5718_v19 = vpop.permute.xlu1 %5717  ;;  %v6062_v36 = vld [vmem:[#allocation5 + $0x58] sm:$0xff] }
 0x4a8   : >> { %v5507_v55 = vpop.permute.xlu0 %5506  ;;  %5738 = vst.msk [vmem:[#allocation5 + $0x70] sm:$0xff] %vm1021_vm7, %v5718_v19  ;;  %7128 = vmatprep.mubr.msk.f32.mxu1 %vm6137_vm2, %v6062_v36 }
 0x4a9   : >> { %5526 = vst.msk [vmem:[#allocation5 + $0x88] sm:$0xff] %vm1083_vm10, %v5507_v55  ;;  %5562 = vrot.lane.b32.xlu1 %v7037_v10, %s7921_s14 }
 0x4aa   : >> { %5153 = vrot.lane.b32.xlu0 %v6965_v18, %s11042_s26 }
 0x4ab   : >> { %v5148_v7 = vpop.permute.xlu1 %5147 }
 0x4ac   : >> { %v5910_v38 = vpop.permute.xlu0 %5909  ;;  %5168 = vst.msk [vmem:[#allocation5 + $0x80] sm:$0xff] %vm1083_vm10, %v5148_v7 }
 0x4ad   : >> { %5931 = vst.msk [vmem:[#allocation5 + $0x50] sm:$0xff] %vm1102_vm11, %v5910_v38  ;;  %5202 = vrot.lane.b32.xlu1 %v6973_v2, %s7921_s14 }
 0x4ae   : >> { %5771 = vrot.lane.b32.xlu0 %v10725_v31, %s7918_s12 }
 0x4af   : >> { %v5557_v39 = vpop.permute.xlu1 %5556 }
 0x4b0   : >> { %v5363_v3 = vpop.permute.xlu0 %5362  ;;  %5576 = vst.msk [vmem:[#allocation5 + $0x88] sm:$0xff] %vm1102_vm11, %v5557_v39 }
 0x4b1   : >> { %5381 = vst.msk [vmem:[#allocation5 + $0xa8] sm:$0xff] %vm1021_vm7, %v5363_v3  ;;  %5821 = vrot.lane.b32.xlu1 %v10605_v57, %s11041_s19 }
 0x4b2   : >> { %5626 = vrot.lane.b32.xlu0 %v7053_v43, %s7915_s11 }
 0x4b3   : >> { %v5197_v26 = vpop.permute.xlu1 %5196 }
 0x4b4   : >> { %v5766_v51 = vpop.permute.xlu0 %5765  ;;  %v6061_v5 = vld [vmem:[#allocation5 + $0x50] sm:$0xff]  ;;  %5217 = vst.msk [vmem:[#allocation5 + $0x80] sm:$0xff] %vm1102_vm11, %v5197_v26 }
 0x4b5   : >> { %5786 = vst.msk [vmem:[#allocation5 + $0x70] sm:$0xff] %vm1043_vm8, %v5766_v51  ;;  %6342 = vmatmul.mubr.f32.gmra.mxu1 %v6061_v5  ;;  %5677 = vrot.lane.b32.xlu1 %v10605_v57, %s11043_s17 }
 0x4b6   : >> { %5983 = vrot.lane.b32.xlu0 %v7116_v20, %s7915_s11 }
 0x4b7   : >> { %v5621_v16 = vpop.permute.xlu1 %5620  ;;  %v6068_v44 = vld [vmem:[#allocation5 + $0x88] sm:$0xff] }
 0x4b8   : >> { %v5413_v41 = vpop.permute.xlu0 %5412  ;;  %5640 = vst.msk [vmem:[#allocation5 + $0x90] sm:$0xff] %vm981_vm5, %v5621_v16  ;;  %6246 = vmatprep.mubr.f32.mxu0 %v6068_v44 }
 0x4b9   : >> { %5431 = vst.msk [vmem:[#allocation5 + $0xa8] sm:$0xff] %vm1043_vm8, %v5413_v41  ;;  %6031 = vrot.lane.b32.xlu1 %v7124_v17, %s11043_s17 }
 0x4ba   : >> { %5869 = vrot.lane.b32.xlu0 %v10768_v37, %s11042_s26 }
 0x4bb   : >> { %v5978_v57 = vpop.permute.xlu1 %5977  ;;  %v6067_v33 = vld [vmem:[#allocation5 + $0x80] sm:$0xff] }
 0x4bc   : >> { %v5816_v42 = vpop.permute.xlu0 %5815  ;;  %5998 = vst.msk [vmem:[#allocation5 + $0x78] sm:$0xff] %vm981_vm5, %v5978_v57  ;;  %6247 = vmatmul.mubr.f32.gmra.mxu0 %v6067_v33 }
 0x4bd   : >> { %5836 = vst.msk [vmem:[#allocation5 + $0x70] sm:$0xff] %vm1062_vm9, %v5816_v42  ;;  %5917 = vrot.lane.b32.xlu1 %v10783_v58, %s7921_s14 }
 0x4be   : >> { %5725 = vrot.lane.b32.xlu0 %v10768_v37, %s7917_s10 }
 0x4bf   : >> { %v5461_v21 = vpop.permute.xlu1 %5460 }
 0x4c0   : >> { %v5269_v53 = vpop.permute.xlu0 %5268  ;;  %5479 = vst.msk [vmem:[#allocation5 + $0xa8] sm:$0xff] %vm1062_vm9, %v5461_v21 }
 0x4c1   : >> { %5286 = vst.msk [vmem:[#allocation5 + $0xc8] sm:$0xff] %vm981_vm5, %v5269_v53  ;;  %5823 = vrot.lane.b32.xlu1 %v10636_v48, %s11041_s19 }
 0x4c2   : >> { %5773 = vrot.lane.b32.xlu0 %v10783_v58, %s7918_s12  ;;  %s7142_s12 = sshll.u32 (%p4852_p12), %s7981_s25, 13  ;;  %s7923_s25 = smov (%p4852_p12), [#allocation6]  }
 0x4c3   : >> { %v5864_v31 = vpop.permute.xlu1 %5863  ;;  %s7830_s29 = sshll.u32 (%p4852_p12), %s7923_s25, 4  ;;  %s7831_s29 = int_to_ptr.vmem [resolvable:$false] %s7830_s29 }
 0x4c4   : >> { %v5672_v61 = vpop.permute.xlu0 %5671  ;;  %5884 = vst.msk [vmem:[#allocation5 + $0x70] sm:$0xff] %vm1083_vm10, %v5864_v31  ;;  %s7832_s16 = scalar_lea.vmem (%p4852_p12), %s7831_s29, 16384 }
 0x4c5   : >> { %5691 = vst.msk [vmem:[#allocation5 + $0x90] sm:$0xff] %vm1002_vm6, %v5672_v61  ;;  %5871 = vrot.lane.b32.xlu1 %v7116_v20, %s11042_s26  ;;  %s10958_s26 = scalar_lea.hbm (%p4852_p12), %s11013_s6, %s7142_s12 }
 0x4c6   : >> { %5985 = vrot.lane.b32.xlu0 %v7117_v30, %s7915_s11  ;;  %s11044_s11 = scalar_lea.vmem [#allocation6], %s8632_s20 }
 0x4c7   : >> { %v5099_v9 = vpop.permute.xlu1 %5098  ;;  %s10914_s10 = scalar_lea.vmem %s11044_s11, %s7134_s18 [#allocation6] }
 0x4c8   : >> { %v6026_v6 = vpop.permute.xlu0 %6025  ;;  %5118 = vst.msk [vmem:[#allocation5 + $0xa0] sm:$0xff] %vm1062_vm9, %v5099_v9 }
 0x4c9   : >> { %6046 = vst.msk [vmem:[#allocation5 + $0x78] sm:$0xff] %vm1002_vm6, %v6026_v6  ;;  %5919 = vrot.lane.b32.xlu1 %v7124_v17, %s7921_s14 }
 0x4ca   : >> { %6033 = vrot.lane.b32.xlu0 %v7125_v60, %s11043_s17  ;;  %s11045_s17 = scalar_lea.vmem (%p4852_p12), [#allocation6], %s8632_s20 }
 0x4cb   : >> { %v5509_v48 = vpop.permute.xlu1 %5508  ;;  %s6405_s28 = sshll.u32 (%p4852_p12), %s11045_s17, 4  ;;  %s10962_s28 = int_to_ptr.vmem [resolvable:$true] %s6405_s28 }
 0x4cc   : >> { %v5317_v56 = vpop.permute.xlu0 %5316  ;;  %5527 = vst.msk [vmem:[#allocation5 + $0xa8] sm:$0xff] %vm1083_vm10, %v5509_v48  ;;  %s7826_s13 = scalar_lea.vmem (%p4852_p12), %s10962_s28, 8192  ;;  %p7833_p2 = scmp.lt.s32.totalorder (%p4852_p12), %s10962_s28, %s7831_s29 }
 0x4cd   : >> { %5334 = vst.msk [vmem:[#allocation5 + $0xc8] sm:$0xff] %vm1002_vm6, %v5317_v56  ;;  %p7827_p13 = scmp.ne.s32.totalorder (%p4852_p12), %s10962_s28, %s7826_s13  ;;  %p7834_p3 = scmp.lt.s32.totalorder (%p4852_p12), %s7832_s16, %s7826_s13 }
 0x4cf   : >> { %v5912_v4 = vpop.permute.xlu1 %5911  ;;  %p7828_p0 = pnand (%p4852_p12), %p7827_p13, %p7998_p5  ;;  %p7835_p4 = por (%p4852_p12), %p7834_p3, %p7833_p2 }
 0x4d0   : >> { %v5720_v50 = vpop.permute.xlu0 %5719  ;;  %v6066_v52 = vld [vmem:[#allocation5 + $0x78] sm:$0xff]  ;;  %5932 = vst.msk [vmem:[#allocation5 + $0x70] sm:$0xff] %vm1102_vm11, %v5912_v4 }
 0x4d1   : >> { %5739 = vst.msk [vmem:[#allocation5 + $0x90] sm:$0xff] %vm1021_vm7, %v5720_v50  ;;  %7129 = vmatprep.mubr.msk.f32.mxu1 %vm6137_vm2, %v6066_v52  ;;  %p7829_p1 = pneg (%p4852_p12), %p7828_p0 }
 0x4d3   : >> { %v5365_v8 = vpop.permute.xlu1 %5364  ;;  %p7836_p7 = pnand (%p4852_p12), %p7835_p4, %p7829_p1 }
 0x4d4   : >> { %v5150_v0 = vpop.permute.xlu0 %5149  ;;  %5382 = vst.msk [vmem:[#allocation5 + $0xc8] sm:$0xff] %vm1021_vm7, %v5365_v8 }
 0x4d5   : >> { %5169 = vst.msk [vmem:[#allocation5 + $0xa0] sm:$0xff] %vm1083_vm10, %v5150_v0 }
 0x4d7   : >> { %v5768_v1 = vpop.permute.xlu1 %5767  ;;  %v6065_v40 = vld [vmem:[#allocation5 + $0x70] sm:$0xff] }
 0x4d8   : >> { %v5559_v22 = vpop.permute.xlu0 %5558  ;;  %5787 = vst.msk [vmem:[#allocation5 + $0x90] sm:$0xff] %vm1043_vm8, %v5768_v1  ;;  %6347 = vmatmul.mubr.f32.gmra.mxu1 %v6065_v40 }
 0x4d9   : >> { %5577 = vst.msk [vmem:[#allocation5 + $0xa8] sm:$0xff] %vm1102_vm11, %v5559_v22 }
 0x4db   : >> { %v5415_v49 = vpop.permute.xlu1 %5414 }
 0x4dc   : >> { %v5199_v46 = vpop.permute.xlu0 %5198  ;;  %5432 = vst.msk [vmem:[#allocation5 + $0xc8] sm:$0xff] %vm1043_vm8, %v5415_v49 }
 0x4dd   : >> { %5218 = vst.msk [vmem:[#allocation5 + $0xa0] sm:$0xff] %vm1102_vm11, %v5199_v46 }
 0x4df   : >> { %v5818_v35 = vpop.permute.xlu1 %5817 }
 0x4e0   : >> { %v5623_v28 = vpop.permute.xlu0 %5622  ;;  %v6072_v54 = vld [vmem:[#allocation5 + $0xa8] sm:$0xff]  ;;  %5837 = vst.msk [vmem:[#allocation5 + $0x90] sm:$0xff] %vm1062_vm9, %v5818_v35 }
 0x4e1   : >> { %5641 = vst.msk [vmem:[#allocation5 + $0xb0] sm:$0xff] %vm981_vm5, %v5623_v28  ;;  %6251 = vmatprep.mubr.f32.mxu0 %v6072_v54 }
 0x4e3   : >> { %v5271_v32 = vpop.permute.xlu1 %5270 }
 0x4e4   : >> { %v5980_v63 = vpop.permute.xlu0 %5979  ;;  %v6071_v37 = vld [vmem:[#allocation5 + $0xa0] sm:$0xff]  ;;  %5287 = vst.msk [vmem:[#allocation5 + $0xe8] sm:$0xff] %vm981_vm5, %v5271_v32 }
 0x4e5   : >> { %5999 = vst.msk [vmem:[#allocation5 + $0x98] sm:$0xff] %vm981_vm5, %v5980_v63  ;;  %6252 = vmatmul.mubr.f32.gmra.mxu0 %v6071_v37 }
 0x4e7   : >> { %v5674_v11 = vpop.permute.xlu1 %5673 }
 0x4e8   : >> { %v5463_v59 = vpop.permute.xlu0 %5462  ;;  %5692 = vst.msk [vmem:[#allocation5 + $0xb0] sm:$0xff] %vm1002_vm6, %v5674_v11 }
 0x4e9   : >> { %5480 = vst.msk [vmem:[#allocation5 + $0xc8] sm:$0xff] %vm1062_vm9, %v5463_v59 }
 0x4eb   : >> { %v6028_v13 = vpop.permute.xlu1 %6027 }
 0x4ec   : >> { %v5866_v45 = vpop.permute.xlu0 %5865  ;;  %6047 = vst.msk [vmem:[#allocation5 + $0x98] sm:$0xff] %vm1002_vm6, %v6028_v13 }
 0x4ed   : >> { %5885 = vst.msk [vmem:[#allocation5 + $0x90] sm:$0xff] %vm1083_vm10, %v5866_v45 }
 0x4ef   : >> { %v5319_v47 = vpop.permute.xlu1 %5318 }
 0x4f0   : >> { %v5101_v12 = vpop.permute.xlu0 %5100  ;;  %5335 = vst.msk [vmem:[#allocation5 + $0xe8] sm:$0xff] %vm1002_vm6, %v5319_v47 }
 0x4f1   : >> { %5119 = vst.msk [vmem:[#allocation5 + $0xc0] sm:$0xff] %vm1062_vm9, %v5101_v12  ;;  %v7319_v44 = vpop.f32.mrf.mxu0 }
 0x4f3   : >> { %v5722_v58 = vpop.permute.xlu1 %5721  ;;  %v6070_v29 = vld [vmem:[#allocation5 + $0x98] sm:$0xff]  ;;  %v7320_v21 = vpop.f32.mrf.mxu0 }
 0x4f4   : >> { %v5511_v15 = vpop.permute.xlu0 %5510  ;;  %5740 = vst.msk [vmem:[#allocation5 + $0xb0] sm:$0xff] %vm1021_vm7, %v5722_v58  ;;  %7130 = vmatprep.mubr.msk.f32.mxu1 %vm6137_vm2, %v6070_v29  ;;  %v7321_v53 = vadd.f32 %v7320_v21, %v7319_v44 }
 0x4f5   : >> { %5528 = vst.msk [vmem:[#allocation5 + $0xc8] sm:$0xff] %vm1083_vm10, %v5511_v15 }
 0x4f6   : >> { %v6229_v60 = vadd.f32 %v7321_v53, %v8642_v14 }
 0x4f7   : >> { %v5152_v62 = vpop.permute.xlu1 %5151 }
 0x4f8   : >> { %v5914_v23 = vpop.permute.xlu0 %5913  ;;  %5170 = vst.msk [vmem:[#allocation5 + $0xc0] sm:$0xff] %vm1083_vm10, %v5152_v62 }
 0x4f9   : >> { %5933 = vst.msk [vmem:[#allocation5 + $0x90] sm:$0xff] %vm1102_vm11, %v5914_v23 }
 0x4fb   : >> { %v5561_v34 = vpop.permute.xlu1 %5560 }
 0x4fc   : >> { %v5367_v24 = vpop.permute.xlu0 %5366  ;;  %5578 = vst.msk [vmem:[#allocation5 + $0xc8] sm:$0xff] %vm1102_vm11, %v5561_v34 }
 0x4fd   : >> { %5383 = vst.msk [vmem:[#allocation5 + $0xe8] sm:$0xff] %vm1021_vm7, %v5367_v24 }
 0x4ff   : >> { %v5201_v25 = vpop.permute.xlu1 %5200 }
 0x500   : >> { %v5770_v10 = vpop.permute.xlu0 %5769  ;;  %v6069_v18 = vld [vmem:[#allocation5 + $0x90] sm:$0xff]  ;;  %5219 = vst.msk [vmem:[#allocation5 + $0xc0] sm:$0xff] %vm1102_vm11, %v5201_v25 }
 0x501   : >> { %5788 = vst.msk [vmem:[#allocation5 + $0xb0] sm:$0xff] %vm1043_vm8, %v5770_v10  ;;  %6352 = vmatmul.mubr.f32.gmra.mxu1 %v6069_v18 }
 0x503   : >> { %v5625_v19 = vpop.permute.xlu1 %5624  ;;  %v6076_v36 = vld [vmem:[#allocation5 + $0xc8] sm:$0xff] }
 0x504   : >> { %v5417_v55 = vpop.permute.xlu0 %5416  ;;  %5642 = vst.msk [vmem:[#allocation5 + $0xd0] sm:$0xff] %vm981_vm5, %v5625_v19  ;;  %6256 = vmatprep.mubr.f32.mxu0 %v6076_v36 }
 0x505   : >> { %5433 = vst.msk [vmem:[#allocation5 + $0xe8] sm:$0xff] %vm1043_vm8, %v5417_v55 }
 0x507   : >> { %v5982_v2 = vpop.permute.xlu1 %5981  ;;  %v6075_v38 = vld [vmem:[#allocation5 + $0xc0] sm:$0xff] }
 0x508   : >> { %v5820_v7 = vpop.permute.xlu0 %5819  ;;  %6000 = vst.msk [vmem:[#allocation5 + $0xb8] sm:$0xff] %vm981_vm5, %v5982_v2  ;;  %6257 = vmatmul.mubr.f32.gmra.mxu0 %v6075_v38 }
 0x509   : >> { %5838 = vst.msk [vmem:[#allocation5 + $0xb0] sm:$0xff] %vm1062_vm9, %v5820_v7 }
 0x50b   : >> { %v5676_v43 = vpop.permute.xlu1 %5675 }
 0x50c   : >> { %v5465_v39 = vpop.permute.xlu0 %5464  ;;  %5693 = vst.msk [vmem:[#allocation5 + $0xd0] sm:$0xff] %vm1002_vm6, %v5676_v43 }
 0x50d   : >> { %5481 = vst.msk [vmem:[#allocation5 + $0xe8] sm:$0xff] %vm1062_vm9, %v5465_v39  ;;  %v7322_v37 = vpop.f32.mrf.mxu0 }
 0x50f   : >> { %v6030_v3 = vpop.permute.xlu1 %6029  ;;  %v7323_v13 = vpop.f32.mrf.mxu0 }
 0x510   : >> { %v5868_v20 = vpop.permute.xlu0 %5867  ;;  %6048 = vst.msk [vmem:[#allocation5 + $0xb8] sm:$0xff] %vm1002_vm6, %v6030_v3  ;;  %v7324_v45 = vadd.f32 %v7323_v13, %v7322_v37 }
 0x511   : >> { %5886 = vst.msk [vmem:[#allocation5 + $0xb0] sm:$0xff] %vm1083_vm10, %v5868_v20 }
 0x512   : >> { %v6234_v47 = vadd.f32 %v7324_v45, %v8642_v14 }
 0x513   : >> { %v5513_v26 = vpop.permute.xlu1 %5512 }
 0x514   : >> { %v5103_v51 = vpop.permute.xlu0 %5102  ;;  %5529 = vst.msk [vmem:[#allocation5 + $0xe8] sm:$0xff] %vm1083_vm10, %v5513_v26 }
 0x515   : >> { %5120 = vst.msk [vmem:[#allocation5 + $0xe0] sm:$0xff] %vm1062_vm9, %v5103_v51 }
 0x517   : >> { %v5916_v5 = vpop.permute.xlu1 %5915  ;;  %v6074_v17 = vld [vmem:[#allocation5 + $0xb8] sm:$0xff] }
 0x518   : >> { %v5724_v27 = vpop.permute.xlu0 %5723  ;;  %5934 = vst.msk [vmem:[#allocation5 + $0xb0] sm:$0xff] %vm1102_vm11, %v5916_v5  ;;  %7131 = vmatprep.mubr.msk.f32.mxu1 %vm6137_vm2, %v6074_v17 }
 0x519   : >> { %5741 = vst.msk [vmem:[#allocation5 + $0xd0] sm:$0xff] %vm1021_vm7, %v5724_v27 }
 0x51b   : >> { %v5563_v16 = vpop.permute.xlu1 %5562 }
 0x51c   : >> { %v5154_v41 = vpop.permute.xlu0 %5153  ;;  %5579 = vst.msk [vmem:[#allocation5 + $0xe8] sm:$0xff] %vm1102_vm11, %v5563_v16 }
 0x51d   : >> { %5171 = vst.msk [vmem:[#allocation5 + $0xe0] sm:$0xff] %vm1083_vm10, %v5154_v41 }
 0x51f   : >> { %v5203_v57 = vpop.permute.xlu1 %5202  ;;  %v6073_v33 = vld [vmem:[#allocation5 + $0xb0] sm:$0xff] }
 0x520   : >> { %v5772_v42 = vpop.permute.xlu0 %5771  ;;  %5220 = vst.msk [vmem:[#allocation5 + $0xe0] sm:$0xff] %vm1102_vm11, %v5203_v57  ;;  %6357 = vmatmul.mubr.f32.gmra.mxu1 %v6073_v33 }
 0x521   : >> { %5789 = vst.msk [vmem:[#allocation5 + $0xd0] sm:$0xff] %vm1043_vm8, %v5772_v42 }
 0x523   : >> { %v5822_v30 = vpop.permute.xlu1 %5821  ;;  %v6080_v61 = vld [vmem:[#allocation5 + $0xe8] sm:$0xff] }
 0x524   : >> { %v5627_v31 = vpop.permute.xlu0 %5626  ;;  %5839 = vst.msk [vmem:[#allocation5 + $0xd0] sm:$0xff] %vm1062_vm9, %v5822_v30  ;;  %6261 = vmatprep.mubr.f32.mxu0 %v6080_v61 }
 0x525   : >> { %5643 = vst.msk [vmem:[#allocation5 + $0xf0] sm:$0xff] %vm981_vm5, %v5627_v31 }
 0x527   : >> { %v5678_v9 = vpop.permute.xlu1 %5677  ;;  %v6079_v48 = vld [vmem:[#allocation5 + $0xe0] sm:$0xff] }
 0x528   : >> { %v5984_v6 = vpop.permute.xlu0 %5983  ;;  %5694 = vst.msk [vmem:[#allocation5 + $0xf0] sm:$0xff] %vm1002_vm6, %v5678_v9  ;;  %6262 = vmatmul.mubr.f32.gmra.mxu0 %v6079_v48 }
 0x529   : >> { %6001 = vst.msk [vmem:[#allocation5 + $0xd8] sm:$0xff] %vm981_vm5, %v5984_v6  ;;  %v6333_v56 = vpop.f32.mrf.mxu1 }
 0x52a   : >> { %v6334_v4 = vadd.f32 %v6333_v56, %v6229_v60 }
 0x52b   : >> { %v6335_v50 = vpop.f32.mrf.mxu1  ;;  %v6032_v8 = vpop.permute.xlu1 %6031 }
 0x52c   : >> { %v6372_v52 = vmax.f32 %v6334_v4, 0.0  ;;  %v5870_v0 = vpop.permute.xlu0 %5869  ;;  %6049 = vst.msk [vmem:[#allocation5 + $0xd8] sm:$0xff] %vm1002_vm6, %v6032_v8 }
 0x52d   : >> { %5887 = vst.msk [vmem:[#allocation5 + $0xd0] sm:$0xff] %vm1083_vm10, %v5870_v0 }
 0x52e   : >> { %6383 = vst.msk [vmem:[%s10914_s10] sm:$0xff] %vm2926_vm13, %v6372_v52 }
 0x52f   : >> { %v5918_v1 = vpop.permute.xlu1 %5917 }
 0x530   : >> { %v5726_v22 = vpop.permute.xlu0 %5725  ;;  %5935 = vst.msk [vmem:[#allocation5 + $0xd0] sm:$0xff] %vm1102_vm11, %v5918_v1  ;;  %v7325_v62 = vpop.f32.mrf.mxu0 }
 0x531   : >> { %5742 = vst.msk [vmem:[#allocation5 + $0xf0] sm:$0xff] %vm1021_vm7, %v5726_v22 }
 0x532   : >> { %v7326_v23 = vpop.f32.mrf.mxu0 }
 0x533   : >> { %v5824_v49 = vpop.permute.xlu1 %5823  ;;  %v6078_v46 = vld [vmem:[#allocation5 + $0xd8] sm:$0xff]  ;;  %v7327_v34 = vadd.f32 %v7326_v23, %v7325_v62 }
 0x534   : >> { %v5774_v40 = vpop.permute.xlu0 %5773  ;;  %7132 = vmatprep.mubr.msk.f32.mxu1 %vm6137_vm2, %v6078_v46 }
 0x535   : >> { %5790 = vst.msk [vmem:[#allocation5 + $0xf0] sm:$0xff] %vm1043_vm8, %v5774_v40  ;;  %v6239_v24 = vadd.f32 %v7327_v34, %v8642_v14 }
 0x536   : >> { %5840 = vst.msk [vmem:[#allocation5 + $0xf0] sm:$0xff] %vm1062_vm9, %v5824_v49 }
 0x537   : >> { %v5872_v28 = vpop.permute.xlu1 %5871  ;;  %v6077_v54 = vld [vmem:[#allocation5 + $0xd0] sm:$0xff] }
 0x538   : >> { %v5986_v35 = vpop.permute.xlu0 %5985  ;;  %5888 = vst.msk [vmem:[#allocation5 + $0xf0] sm:$0xff] %vm1083_vm10, %v5872_v28  ;;  %6362 = vmatmul.mubr.f32.gmra.mxu1 %v6077_v54 }
 0x539   : >> { %6002 = vst.msk [vmem:[#allocation5 + $0xf8] sm:$0xff] %vm981_vm5, %v5986_v35 }
 0x53b   : >> { %v5920_v63 = vpop.permute.xlu1 %5919 }
 0x53c   : >> { %v6034_v32 = vpop.permute.xlu0 %6033  ;;  %5936 = vst.msk [vmem:[#allocation5 + $0xf0] sm:$0xff] %vm1102_vm11, %v5920_v63 }
 0x53d   : >> { %6050 = vst.msk [vmem:[#allocation5 + $0xf8] sm:$0xff] %vm1002_vm6, %v6034_v32 }
 0x543   : >> { %v6081_v59 = vld [vmem:[#allocation5 + $0xf0] sm:$0xff] }
 0x544   : >> { %v6082_v11 = vld [vmem:[#allocation5 + $0xf8] sm:$0xff] }
 0x545   : >> { %7133 = vmatprep.mubr.msk.f32.mxu1 %vm6137_vm2, %v6082_v11 }
 0x546   : >> { %6367 = vmatmul.mubr.f32.gmra.mxu1 %v6081_v59 }
 0x54c   : >> { %v6338_v12 = vpop.f32.mrf.mxu1 }
 0x54d   : >> { %v6339_v58 = vadd.f32 %v6338_v12, %v6234_v47 }
 0x54e   : >> { %v6340_v15 = vpop.f32.mrf.mxu1 }
 0x54f   : >> { %v6373_v29 = vmax.f32 %v6339_v58, 0.0 }
 0x551   : >> { %6384 = vst.msk [vmem:[%s10914_s10 + $0x8] sm:$0xff] %vm2926_vm13, %v6373_v29 }
 0x559   : >> { %v7328_v55 = vpop.f32.mrf.mxu0 }
 0x55b   : >> { %v7329_v36 = vpop.f32.mrf.mxu0 }
 0x55c   : >> { %v7330_v2 = vadd.f32 %v7329_v36, %v7328_v55 }
 0x55e   : >> { %v6244_v7 = vadd.f32 %v7330_v2, %v8642_v14 }
 0x575   : >> { %v6343_v25 = vpop.f32.mrf.mxu1 }
 0x576   : >> { %v6344_v10 = vadd.f32 %v6343_v25, %v6239_v24 }
 0x577   : >> { %v6345_v18 = vpop.f32.mrf.mxu1 }
 0x578   : >> { %v6374_v19 = vmax.f32 %v6344_v10, 0.0 }
 0x57a   : >> { %6385 = vst.msk [vmem:[%s10914_s10 + $0x10] sm:$0xff] %vm2926_vm13, %v6374_v19 }
 0x57c   : >> { %v7331_v20 = vpop.f32.mrf.mxu0 }
 0x57e   : >> { %v7332_v26 = vpop.f32.mrf.mxu0 }
 0x57f   : >> { %v7333_v51 = vadd.f32 %v7332_v26, %v7331_v20 }
 0x581   : >> { %v6249_v5 = vadd.f32 %v7333_v51, %v8642_v14 }
 0x598   : >> { %v6348_v38 = vpop.f32.mrf.mxu1 }
 0x599   : >> { %v6349_v43 = vadd.f32 %v6348_v38, %v6244_v7 }
 0x59a   : >> { %v6350_v39 = vpop.f32.mrf.mxu1 }
 0x59b   : >> { %v6375_v3 = vmax.f32 %v6349_v43, 0.0 }
 0x59d   : >> { %6386 = vst.msk [vmem:[%s10914_s10 + $0x18] sm:$0xff] %vm2926_vm13, %v6375_v3 }
 0x5a5   : >> { %v7334_v44 = vpop.f32.mrf.mxu0 }
 0x5a7   : >> { %v7335_v57 = vpop.f32.mrf.mxu0 }
 0x5a8   : >> { %v7336_v42 = vadd.f32 %v7335_v57, %v7334_v44 }
 0x5aa   : >> { %v6254_v33 = vadd.f32 %v7336_v42, %v8642_v14 }
 0x5c1   : >> { %v6353_v27 = vpop.f32.mrf.mxu1 }
 0x5c2   : >> { %v6354_v17 = vadd.f32 %v6353_v27, %v6249_v5 }
 0x5c3   : >> { %v6355_v16 = vpop.f32.mrf.mxu1 }
 0x5c4   : >> { %v6376_v41 = vmax.f32 %v6354_v17, 0.0 }
 0x5c6   : >> { %6387 = vst.msk [vmem:[%s10914_s10 + $0x20] sm:$0xff] %vm2926_vm13, %v6376_v41 }
 0x5c8   : >> { %v7337_v61 = vpop.f32.mrf.mxu0 }
 0x5ca   : >> { %v7338_v60 = vpop.f32.mrf.mxu0 }
 0x5cb   : >> { %v7339_v9 = vadd.f32 %v7338_v60, %v7337_v61 }
 0x5cd   : >> { %v6259_v6 = vadd.f32 %v7339_v9, %v8642_v14 }
 0x5e0   : >> { %v6358_v21 = vpop.f32.mrf.mxu1 }
 0x5e1   : >> { %v6359_v53 = vadd.f32 %v6358_v21, %v6254_v33 }
 0x5e2   : >> { %v6360_v30 = vpop.f32.mrf.mxu1 }
 0x5e3   : >> { %v6377_v31 = vmax.f32 %v6359_v53, 0.0 }
 0x5e5   : >> { %6388 = vst.msk [vmem:[%s10914_s10 + $0x28] sm:$0xff] %vm2926_vm13, %v6377_v31 }
 0x5e8   : >> { %v7340_v56 = vpop.f32.mrf.mxu0 }
 0x5ea   : >> { %v7341_v8 = vpop.f32.mrf.mxu0 }
 0x5eb   : >> { %v7342_v0 = vadd.f32 %v7341_v8, %v7340_v56 }
 0x5ed   : >> { %v6264_v1 = vadd.f32 %v7342_v0, %v8642_v14 }
 0x5f8   : >> { %v6363_v48 = vpop.f32.mrf.mxu1 }
 0x5f9   : >> { %v6364_v4 = vadd.f32 %v6363_v48, %v6259_v6 }
 0x5fa   : >> { %v6365_v50 = vpop.f32.mrf.mxu1 }
 0x5fb   : >> { %v6378_v52 = vmax.f32 %v6364_v4, 0.0 }
 0x5fd   : >> { %6389 = vst.msk [vmem:[%s10914_s10 + $0x30] sm:$0xff] %vm2926_vm13, %v6378_v52 }
 0x606   : >> { %v6368_v22 = vpop.f32.mrf.mxu1 }
 0x607   : >> { %v6369_v40 = vadd.f32 %v6368_v22, %v6264_v1  ;;  %4854 = sbr.rel (!%p4852_p12) target bundleno = 854 (0x356), region = 137 }
 0x608   : >> { %v6370_v49 = vpop.f32.mrf.mxu1 }
 0x609   : >> { %v6379_v46 = vmax.f32 %v6369_v40, 0.0 }
 0x60b   : >> { %6390 = vst.msk [vmem:[%s10914_s10 + $0x38] sm:$0xff] %vm2926_vm13, %v6379_v46 }
 0x60c   : > { %7839 = shalt.err (!%p7836_p7)
}
 0x60d   : > { %s7840_s20 = scalar_lea.hbm %s10958_s26, 8192  ;;  %s7844_s10 = scalar_lea.hbm %s11013_s6, 16384 }
 0x60e   : > { %p7841_p8 = scmp.ne.s32.totalorder %s10958_s26, %s7840_s20  ;;  %p7845_p11 = scmp.lt.s32.totalorder %s10958_s26, %s11013_s6 }
 0x60f   : > { %p7846_p12 = scmp.lt.s32.totalorder %s7844_s10, %s7840_s20 }
 0x610   : > { %p7842_p9 = pnand %p7841_p8, %p7998_p5 }
 0x611   : > { %p7847_p13 = por %p7846_p12, %p7845_p11 }
 0x612   : > { %p7843_p10 = pneg %p7842_p9 }
 0x614   : > { %p7848_p0 = pnand %p7847_p13, %p7843_p10 }
 0x616   : > { %7851 = shalt.err (!%p7848_p0)
}
 0x617   : > { %s7924_s19 = smov 128   ;;  %s11047_s17 = smov 8  }
 0x618   : > { %7623 = dma.vmem_to_hbm [thread:$0]  (%p7998_p5), %s10962_s28, 8192, %s10958_s26, %s10966_s9, %s7924_s19, %s7924_s19, %s11047_s17  }
 0x619 PF: > { %p7629_p1 = scmp.ge.s32.totalorder %s7894_s24, 2  ;;  %s6420_s15 = sand.u32 1, %s7882_s21  }
 0x61a   : > { %s6421_s13 = scalar_lea.sflag [#allocation7], %s6420_s15 }
 0x61b   : > { %p7626_p2 = pnand %p7629_p1, %p8002_p6 }
 0x61d   : > { %p7627_p3 = pneg %p7626_p2 }
 0x61f   : > { %7877 = dma.done.wait (%p7627_p3), %s6421_s13, 8192  }
 0x620   : > { %7879 = vsyncadd (%p7627_p3), %s6421_s13, 4294959104  ;;  %p16_p4 = scmp.ge.s32.totalorder %s7985_s27, 4   ;;  %s11048_s21 = smov %s7886_s22 }
 0x621   : > { %s11049_s22 = smov %s7890_s23  ;;  %s11050_s23 = smov %s7996_s30 }
 0x622   : > { %s11051_s24 = smov %s7985_s27  ;;  %18 = sbr.rel (!%p16_p4) target bundleno = 3 (0x3), region = 148 }
 0x627   :  { %6426 = vsyncpa [#allocation7], 1 }
 0x628   :  { %6428 = vsyncpa [#allocation7 + $0x1], 1 }

</bundles_post_ra>
